<compile_context>
chip_gen: v6e
topology: v6e:2x2x1
jax: 0.10.0
libtpu: 0.0.40
codegen_flags: <defaults>
</compile_context>

<pallas_src>
import functools

import jax
import jax.numpy as jnp
from jax.experimental import pallas as pl
from jax.experimental.pallas import tpu as pltpu


PARAM_ORDER = (
    "w_vlin0", "b_vlin0", "w_qlin0", "b_qlin0",
    "w_iv", "b_iv", "w_iq", "b_iq",
    "w_ivo_x", "w_ivo_u", "b_ivo",
    "w_iqo_x", "w_iqo_u", "b_iqo",
    "w_gv4q", "b_gv4q", "w_gq4v", "b_gq4v",
    "w_dv", "b_dv", "w_dq", "b_dq",
    "w_dvo", "b_dvo", "w_dqo", "b_dqo",
)
_NUM_PARAMS = len(PARAM_ORDER)


# ----------------------------------------------------------------------------
# Fused kernel: one batch element per grid step, everything in VMEM.
# ----------------------------------------------------------------------------
def _singleblock_kernel(v_ref, q_ref, vmc_ref, vmr_ref, qmc_ref, qmr_ref,
                        *rest, output_size, num_block,
                        num_inter_head, num_intra_head):
    O = output_size
    f32 = jnp.float32

    w = dict(zip(PARAM_ORDER, (r[...] for r in rest[:_NUM_PARAMS])))
    out_v_ref, out_q_ref = rest[_NUM_PARAMS], rest[_NUM_PARAMS + 1]

    v = v_ref[0].astype(f32)                        # [No, Vs]
    q = q_ref[0].astype(f32)                        # [Nl, Qs]
    vm_col = vmc_ref[0].astype(f32)                 # [No, 1]
    qm_col = qmc_ref[0].astype(f32)                 # [Nl, 1]
    # additive key-mask bias: 0 where valid, -1e9 where padded
    v_bias = (vmr_ref[0].astype(f32) - 1.0) * 1e9   # [1, No]
    q_bias = (qmr_ref[0].astype(f32) - 1.0) * 1e9   # [1, Nl]

    def dot(a, b):
        return jnp.dot(a, b, preferred_element_type=f32)

    def relu(x):
        return jnp.maximum(x, 0.0)

    def sigmoid(x):
        return 1.0 / (1.0 + jnp.exp(-x))

    def softmax_rows(s):
        s = s - jnp.max(s, axis=-1, keepdims=True)
        e = jnp.exp(s)
        return e * pl.reciprocal(jnp.sum(e, axis=-1, keepdims=True), approx=True)

    def mha_into(acc, qf, kf, vf, key_bias, num_head, w_rows):
        """acc + MultiHeadAttn(qf, kf, vf) @ w_rows; no per-head concat."""
        dh = O // num_head
        inv_scale = 1.0 / (float(dh) ** 0.5)
        for h in range(num_head):
            sl = slice(h * dh, (h + 1) * dh)
            s = (dot(qf[:, sl], kf[:, sl].T) + key_bias) * inv_scale
            p = softmax_rows(s)
            o_h = dot(p, vf[:, sl])                    # [Nq, dh]
            acc = acc + dot(o_h, w_rows[sl, :])        # fold head into out proj
        return acc

    def inter_block(v, q):
        v_t = (dot(relu(v), w["w_iv"]) + w["b_iv"]) * vm_col      # [No, 3O]
        q_t = (dot(relu(q), w["w_iq"]) + w["b_iq"]) * qm_col      # [Nl, 3O]
        v_k, v_q, v_v = v_t[:, :O], v_t[:, O:2 * O], v_t[:, 2 * O:]
        q_k, q_q, q_v = q_t[:, :O], q_t[:, O:2 * O], q_t[:, 2 * O:]
        # updated_v = cat(v, attn(v_q, q_k, q_v)) @ W_vo + b  (W_vo split host-side)
        new_v = dot(v, w["w_ivo_x"]) + w["b_ivo"]
        new_v = mha_into(new_v, v_q, q_k, q_v, q_bias, num_inter_head, w["w_ivo_u"])
        new_q = dot(q, w["w_iqo_x"]) + w["b_iqo"]
        new_q = mha_into(new_q, q_q, v_k, v_v, v_bias, num_inter_head, w["w_iqo_u"])
        return new_v, new_q

    def intra_block(v, q):
        v_cnt = jnp.sum(vm_col, axis=0, keepdims=True)                 # [1, 1]
        q_cnt = jnp.sum(qm_col, axis=0, keepdims=True)
        v_mean = jnp.sum(v * vm_col, axis=0, keepdims=True) / v_cnt    # [1, O]
        q_mean = jnp.sum(q * qm_col, axis=0, keepdims=True) / q_cnt
        v4q_gate = sigmoid(dot(relu(v_mean), w["w_gv4q"]) + w["b_gv4q"])   # [1, O]
        q4v_gate = sigmoid(dot(relu(q_mean), w["w_gq4v"]) + w["b_gq4v"])
        v_t = (dot(relu(v), w["w_dv"]) + w["b_dv"]) * vm_col
        q_t = (dot(relu(q), w["w_dq"]) + w["b_dq"]) * qm_col
        v_k, v_q, v_v = v_t[:, :O], v_t[:, O:2 * O], v_t[:, 2 * O:]
        q_k, q_q, q_v = q_t[:, :O], q_t[:, O:2 * O], q_t[:, 2 * O:]
        gv = 1.0 + q4v_gate
        gq = 1.0 + v4q_gate
        # updated_v = (v + v_update) @ W_dvo + b  (same weight for both halves)
        new_v = dot(v, w["w_dvo"]) + w["b_dvo"]
        new_v = mha_into(new_v, gv * v_q, gv * v_k, v_v, v_bias,
                         num_intra_head, w["w_dvo"])
        new_q = dot(q, w["w_dqo"]) + w["b_dqo"]
        new_q = mha_into(new_q, gq * q_q, gq * q_k, q_v, q_bias,
                         num_intra_head, w["w_dqo"])
        return new_v, new_q

    # SingleBlock initial projections (dropout p=0 -> identity, no relu)
    v = dot(v, w["w_vlin0"]) + w["b_vlin0"]
    q = dot(q, w["w_qlin0"]) + w["b_qlin0"]

    for _ in range(num_block):           # weights shared across iterations
        v, q = inter_block(v, q)
        v, q = intra_block(v, q)

    out_v_ref[0] = v.astype(out_v_ref.dtype)
    out_q_ref[0] = q.astype(out_q_ref.dtype)


# ----------------------------------------------------------------------------
# Wrapper
# ----------------------------------------------------------------------------
def single_block_forward(params, v, q, v_mask, q_mask, *, output_size,
                         num_block, num_inter_head, num_intra_head):
    B, No, _ = v.shape
    _, Nl, _ = q.shape
    O = output_size

    vm_col = v_mask.reshape(B, No, 1).astype(v.dtype)
    vm_row = v_mask.reshape(B, 1, No).astype(v.dtype)
    qm_col = q_mask.reshape(B, Nl, 1).astype(q.dtype)
    qm_row = q_mask.reshape(B, 1, Nl).astype(q.dtype)
    weights = [params[name] for name in PARAM_ORDER]

    def batch_spec(shape):
        nd = len(shape)
        return pl.BlockSpec((1,) + tuple(shape[1:]),
                            lambda b: (b,) + (0,) * (nd - 1))

    data_specs = [batch_spec(v.shape), batch_spec(q.shape),
                  batch_spec(vm_col.shape), batch_spec(vm_row.shape),
                  batch_spec(qm_col.shape), batch_spec(qm_row.shape)]
    weight_specs = [pl.BlockSpec(wt.shape, lambda b: (0, 0)) for wt in weights]

    kernel = functools.partial(
        _singleblock_kernel, output_size=O, num_block=num_block,
        num_inter_head=num_inter_head, num_intra_head=num_intra_head)

    return pl.pallas_call(
        kernel,
        out_shape=(jax.ShapeDtypeStruct((B, No, O), v.dtype),
                   jax.ShapeDtypeStruct((B, Nl, O), q.dtype)),
        grid=(B,),
        in_specs=data_specs + weight_specs,
        out_specs=(batch_spec((B, No, O)), batch_spec((B, Nl, O))),
        # v7x: two TensorCores take one batch element each; no-op on v5e/v6e.
        compiler_params=pltpu.CompilerParams(dimension_semantics=("parallel",)),
    )(v, q, vm_col, vm_row, qm_col, qm_row, *weights)


# ----------------------------------------------------------------------------
# Parameter construction (deterministic, synthetic)
# ----------------------------------------------------------------------------
def init_singleblock_params(key, v_size, q_size, output_size, scale=0.05):
    O = output_size
    shapes = {
        "w_vlin0": (v_size, O), "b_vlin0": (1, O),
        "w_qlin0": (q_size, O), "b_qlin0": (1, O),
        "w_iv": (O, 3 * O), "b_iv": (1, 3 * O),
        "w_iq": (O, 3 * O), "b_iq": (1, 3 * O),
        "w_ivo_x": (O, O), "w_ivo_u": (O, O), "b_ivo": (1, O),
        "w_iqo_x": (O, O), "w_iqo_u": (O, O), "b_iqo": (1, O),
        "w_gv4q": (O, O), "b_gv4q": (1, O),
        "w_gq4v": (O, O), "b_gq4v": (1, O),
        "w_dv": (O, 3 * O), "b_dv": (1, 3 * O),
        "w_dq": (O, 3 * O), "b_dq": (1, 3 * O),
        "w_dvo": (O, O), "b_dvo": (1, O),
        "w_dqo": (O, O), "b_dqo": (1, O),
    }
    keys = jax.random.split(key, _NUM_PARAMS)
    return {name: scale * jax.random.normal(k, shapes[name], jnp.float32)
            for name, k in zip(PARAM_ORDER, keys)}


# ----------------------------------------------------------------------------
if __name__ == "__main__":
    B = 2            # batch
    NUM_OBJ = 8      # num visual objects
    MAX_LEN = 8      # question length
    V_SIZE = 64
    Q_SIZE = 48
    OUTPUT_SIZE = 32
    NUM_INTER_HEAD = 4
    NUM_INTRA_HEAD = 4
    NUM_BLOCK = 2

    key = jax.random.PRNGKey(0)
    kv, kq = jax.random.split(key)
    v = jax.random.normal(kv, (B, NUM_OBJ, V_SIZE), jnp.float32)
    q = jax.random.normal(kq, (B, MAX_LEN, Q_SIZE), jnp.float32)
    v_mask = jnp.array([[1, 1, 1, 1, 1, 1, 0, 0],
                        [1, 1, 1, 1, 0, 0, 0, 0]], jnp.float32)
    q_mask = jnp.array([[1, 1, 1, 1, 1, 0, 0, 0],
                        [1, 1, 1, 0, 0, 0, 0, 0]], jnp.float32)

    params = init_singleblock_params(jax.random.PRNGKey(42),
                                     V_SIZE, Q_SIZE, OUTPUT_SIZE)

    fwd = jax.jit(functools.partial(
        single_block_forward,
        output_size=OUTPUT_SIZE, num_block=NUM_BLOCK,
        num_inter_head=NUM_INTER_HEAD, num_intra_head=NUM_INTRA_HEAD))

    out_v, out_q = fwd(params, v, q, v_mask, q_mask)
    jax.block_until_ready((out_v, out_q))
    assert out_v.shape == (B, NUM_OBJ, OUTPUT_SIZE)
    assert out_q.shape == (B, MAX_LEN, OUTPUT_SIZE)
    assert bool(jnp.all(jnp.isfinite(out_v))) and bool(jnp.all(jnp.isfinite(out_q)))
    print("KERNEL_OK")
</pallas_src>

<mosaic_0001>
module attributes {stable_mosaic.version = 11 : i64} {
  func.func @_singleblock_kernel(%arg0: i32, %arg1: memref<1x8x64xf32, #tpu.memory_space<vmem>>, %arg2: memref<1x8x48xf32, #tpu.memory_space<vmem>>, %arg3: memref<1x8x1xf32, #tpu.memory_space<vmem>>, %arg4: memref<1x1x8xf32, #tpu.memory_space<vmem>>, %arg5: memref<1x8x1xf32, #tpu.memory_space<vmem>>, %arg6: memref<1x1x8xf32, #tpu.memory_space<vmem>>, %arg7: memref<64x32xf32, #tpu.memory_space<vmem>>, %arg8: memref<1x32xf32, #tpu.memory_space<vmem>>, %arg9: memref<48x32xf32, #tpu.memory_space<vmem>>, %arg10: memref<1x32xf32, #tpu.memory_space<vmem>>, %arg11: memref<32x96xf32, #tpu.memory_space<vmem>>, %arg12: memref<1x96xf32, #tpu.memory_space<vmem>>, %arg13: memref<32x96xf32, #tpu.memory_space<vmem>>, %arg14: memref<1x96xf32, #tpu.memory_space<vmem>>, %arg15: memref<32x32xf32, #tpu.memory_space<vmem>>, %arg16: memref<32x32xf32, #tpu.memory_space<vmem>>, %arg17: memref<1x32xf32, #tpu.memory_space<vmem>>, %arg18: memref<32x32xf32, #tpu.memory_space<vmem>>, %arg19: memref<32x32xf32, #tpu.memory_space<vmem>>, %arg20: memref<1x32xf32, #tpu.memory_space<vmem>>, %arg21: memref<32x32xf32, #tpu.memory_space<vmem>>, %arg22: memref<1x32xf32, #tpu.memory_space<vmem>>, %arg23: memref<32x32xf32, #tpu.memory_space<vmem>>, %arg24: memref<1x32xf32, #tpu.memory_space<vmem>>, %arg25: memref<32x96xf32, #tpu.memory_space<vmem>>, %arg26: memref<1x96xf32, #tpu.memory_space<vmem>>, %arg27: memref<32x96xf32, #tpu.memory_space<vmem>>, %arg28: memref<1x96xf32, #tpu.memory_space<vmem>>, %arg29: memref<32x32xf32, #tpu.memory_space<vmem>>, %arg30: memref<1x32xf32, #tpu.memory_space<vmem>>, %arg31: memref<32x32xf32, #tpu.memory_space<vmem>>, %arg32: memref<1x32xf32, #tpu.memory_space<vmem>>, %arg33: memref<1x8x32xf32, #tpu.memory_space<vmem>>, %arg34: memref<1x8x32xf32, #tpu.memory_space<vmem>>) attributes {dimension_semantics = [#tpu.dimension_semantics<parallel>], iteration_bounds = array<i64: 2>, scalar_prefetch = 0 : i64, scratch_operands = 0 : i64, tpu.core_type = #tpu.core_type<tc>, window_params = [{transform_indices = @transform_0, window_bounds = array<i64: 1, 8, 64>}, {transform_indices = @transform_1, window_bounds = array<i64: 1, 8, 48>}, {transform_indices = @transform_2, window_bounds = array<i64: 1, 8, 1>}, {transform_indices = @transform_3, window_bounds = array<i64: 1, 1, 8>}, {transform_indices = @transform_4, window_bounds = array<i64: 1, 8, 1>}, {transform_indices = @transform_5, window_bounds = array<i64: 1, 1, 8>}, {pipeline_mode = #tpu.pipeline_mode<synchronous>, transform_indices = @transform_6, window_bounds = array<i64: 64, 32>}, {pipeline_mode = #tpu.pipeline_mode<synchronous>, transform_indices = @transform_7, window_bounds = array<i64: 1, 32>}, {pipeline_mode = #tpu.pipeline_mode<synchronous>, transform_indices = @transform_8, window_bounds = array<i64: 48, 32>}, {pipeline_mode = #tpu.pipeline_mode<synchronous>, transform_indices = @transform_9, window_bounds = array<i64: 1, 32>}, {pipeline_mode = #tpu.pipeline_mode<synchronous>, transform_indices = @transform_10, window_bounds = array<i64: 32, 96>}, {pipeline_mode = #tpu.pipeline_mode<synchronous>, transform_indices = @transform_11, window_bounds = array<i64: 1, 96>}, {pipeline_mode = #tpu.pipeline_mode<synchronous>, transform_indices = @transform_12, window_bounds = array<i64: 32, 96>}, {pipeline_mode = #tpu.pipeline_mode<synchronous>, transform_indices = @transform_13, window_bounds = array<i64: 1, 96>}, {pipeline_mode = #tpu.pipeline_mode<synchronous>, transform_indices = @transform_14, window_bounds = array<i64: 32, 32>}, {pipeline_mode = #tpu.pipeline_mode<synchronous>, transform_indices = @transform_15, window_bounds = array<i64: 32, 32>}, {pipeline_mode = #tpu.pipeline_mode<synchronous>, transform_indices = @transform_16, window_bounds = array<i64: 1, 32>}, {pipeline_mode = #tpu.pipeline_mode<synchronous>, transform_indices = @transform_17, window_bounds = array<i64: 32, 32>}, {pipeline_mode = #tpu.pipeline_mode<synchronous>, transform_indices = @transform_18, window_bounds = array<i64: 32, 32>}, {pipeline_mode = #tpu.pipeline_mode<synchronous>, transform_indices = @transform_19, window_bounds = array<i64: 1, 32>}, {pipeline_mode = #tpu.pipeline_mode<synchronous>, transform_indices = @transform_20, window_bounds = array<i64: 32, 32>}, {pipeline_mode = #tpu.pipeline_mode<synchronous>, transform_indices = @transform_21, window_bounds = array<i64: 1, 32>}, {pipeline_mode = #tpu.pipeline_mode<synchronous>, transform_indices = @transform_22, window_bounds = array<i64: 32, 32>}, {pipeline_mode = #tpu.pipeline_mode<synchronous>, transform_indices = @transform_23, window_bounds = array<i64: 1, 32>}, {pipeline_mode = #tpu.pipeline_mode<synchronous>, transform_indices = @transform_24, window_bounds = array<i64: 32, 96>}, {pipeline_mode = #tpu.pipeline_mode<synchronous>, transform_indices = @transform_25, window_bounds = array<i64: 1, 96>}, {pipeline_mode = #tpu.pipeline_mode<synchronous>, transform_indices = @transform_26, window_bounds = array<i64: 32, 96>}, {pipeline_mode = #tpu.pipeline_mode<synchronous>, transform_indices = @transform_27, window_bounds = array<i64: 1, 96>}, {pipeline_mode = #tpu.pipeline_mode<synchronous>, transform_indices = @transform_28, window_bounds = array<i64: 32, 32>}, {pipeline_mode = #tpu.pipeline_mode<synchronous>, transform_indices = @transform_29, window_bounds = array<i64: 1, 32>}, {pipeline_mode = #tpu.pipeline_mode<synchronous>, transform_indices = @transform_30, window_bounds = array<i64: 32, 32>}, {pipeline_mode = #tpu.pipeline_mode<synchronous>, transform_indices = @transform_31, window_bounds = array<i64: 1, 32>}, {transform_indices = @transform_32, window_bounds = array<i64: 1, 8, 32>}, {transform_indices = @transform_33, window_bounds = array<i64: 1, 8, 32>}]} {
    %c0 = arith.constant 0 : index
    %c0_0 = arith.constant 0 : index
    %0 = vector.load %arg7[%c0, %c0_0] : memref<64x32xf32, #tpu.memory_space<vmem>>, vector<64x32xf32>
    %c0_1 = arith.constant 0 : index
    %c0_2 = arith.constant 0 : index
    %1 = vector.load %arg8[%c0_1, %c0_2] : memref<1x32xf32, #tpu.memory_space<vmem>>, vector<1x32xf32>
    %c0_3 = arith.constant 0 : index
    %c0_4 = arith.constant 0 : index
    %2 = vector.load %arg9[%c0_3, %c0_4] : memref<48x32xf32, #tpu.memory_space<vmem>>, vector<48x32xf32>
    %c0_5 = arith.constant 0 : index
    %c0_6 = arith.constant 0 : index
    %3 = vector.load %arg10[%c0_5, %c0_6] : memref<1x32xf32, #tpu.memory_space<vmem>>, vector<1x32xf32>
    %c0_7 = arith.constant 0 : index
    %c0_8 = arith.constant 0 : index
    %4 = vector.load %arg11[%c0_7, %c0_8] : memref<32x96xf32, #tpu.memory_space<vmem>>, vector<32x96xf32>
    %c0_9 = arith.constant 0 : index
    %c0_10 = arith.constant 0 : index
    %5 = vector.load %arg12[%c0_9, %c0_10] : memref<1x96xf32, #tpu.memory_space<vmem>>, vector<1x96xf32>
    %c0_11 = arith.constant 0 : index
    %c0_12 = arith.constant 0 : index
    %6 = vector.load %arg13[%c0_11, %c0_12] : memref<32x96xf32, #tpu.memory_space<vmem>>, vector<32x96xf32>
    %c0_13 = arith.constant 0 : index
    %c0_14 = arith.constant 0 : index
    %7 = vector.load %arg14[%c0_13, %c0_14] : memref<1x96xf32, #tpu.memory_space<vmem>>, vector<1x96xf32>
    %c0_15 = arith.constant 0 : index
    %c0_16 = arith.constant 0 : index
    %8 = vector.load %arg15[%c0_15, %c0_16] : memref<32x32xf32, #tpu.memory_space<vmem>>, vector<32x32xf32>
    %c0_17 = arith.constant 0 : index
    %c0_18 = arith.constant 0 : index
    %9 = vector.load %arg16[%c0_17, %c0_18] : memref<32x32xf32, #tpu.memory_space<vmem>>, vector<32x32xf32>
    %c0_19 = arith.constant 0 : index
    %c0_20 = arith.constant 0 : index
    %10 = vector.load %arg17[%c0_19, %c0_20] : memref<1x32xf32, #tpu.memory_space<vmem>>, vector<1x32xf32>
    %c0_21 = arith.constant 0 : index
    %c0_22 = arith.constant 0 : index
    %11 = vector.load %arg18[%c0_21, %c0_22] : memref<32x32xf32, #tpu.memory_space<vmem>>, vector<32x32xf32>
    %c0_23 = arith.constant 0 : index
    %c0_24 = arith.constant 0 : index
    %12 = vector.load %arg19[%c0_23, %c0_24] : memref<32x32xf32, #tpu.memory_space<vmem>>, vector<32x32xf32>
    %c0_25 = arith.constant 0 : index
    %c0_26 = arith.constant 0 : index
    %13 = vector.load %arg20[%c0_25, %c0_26] : memref<1x32xf32, #tpu.memory_space<vmem>>, vector<1x32xf32>
    %c0_27 = arith.constant 0 : index
    %c0_28 = arith.constant 0 : index
    %14 = vector.load %arg21[%c0_27, %c0_28] : memref<32x32xf32, #tpu.memory_space<vmem>>, vector<32x32xf32>
    %c0_29 = arith.constant 0 : index
    %c0_30 = arith.constant 0 : index
    %15 = vector.load %arg22[%c0_29, %c0_30] : memref<1x32xf32, #tpu.memory_space<vmem>>, vector<1x32xf32>
    %c0_31 = arith.constant 0 : index
    %c0_32 = arith.constant 0 : index
    %16 = vector.load %arg23[%c0_31, %c0_32] : memref<32x32xf32, #tpu.memory_space<vmem>>, vector<32x32xf32>
    %c0_33 = arith.constant 0 : index
    %c0_34 = arith.constant 0 : index
    %17 = vector.load %arg24[%c0_33, %c0_34] : memref<1x32xf32, #tpu.memory_space<vmem>>, vector<1x32xf32>
    %c0_35 = arith.constant 0 : index
    %c0_36 = arith.constant 0 : index
    %18 = vector.load %arg25[%c0_35, %c0_36] : memref<32x96xf32, #tpu.memory_space<vmem>>, vector<32x96xf32>
    %c0_37 = arith.constant 0 : index
    %c0_38 = arith.constant 0 : index
    %19 = vector.load %arg26[%c0_37, %c0_38] : memref<1x96xf32, #tpu.memory_space<vmem>>, vector<1x96xf32>
    %c0_39 = arith.constant 0 : index
    %c0_40 = arith.constant 0 : index
    %20 = vector.load %arg27[%c0_39, %c0_40] : memref<32x96xf32, #tpu.memory_space<vmem>>, vector<32x96xf32>
    %c0_41 = arith.constant 0 : index
    %c0_42 = arith.constant 0 : index
    %21 = vector.load %arg28[%c0_41, %c0_42] : memref<1x96xf32, #tpu.memory_space<vmem>>, vector<1x96xf32>
    %c0_43 = arith.constant 0 : index
    %c0_44 = arith.constant 0 : index
    %22 = vector.load %arg29[%c0_43, %c0_44] : memref<32x32xf32, #tpu.memory_space<vmem>>, vector<32x32xf32>
    %c0_45 = arith.constant 0 : index
    %c0_46 = arith.constant 0 : index
    %23 = vector.load %arg30[%c0_45, %c0_46] : memref<1x32xf32, #tpu.memory_space<vmem>>, vector<1x32xf32>
    %c0_47 = arith.constant 0 : index
    %c0_48 = arith.constant 0 : index
    %24 = vector.load %arg31[%c0_47, %c0_48] : memref<32x32xf32, #tpu.memory_space<vmem>>, vector<32x32xf32>
    %c0_49 = arith.constant 0 : index
    %c0_50 = arith.constant 0 : index
    %25 = vector.load %arg32[%c0_49, %c0_50] : memref<1x32xf32, #tpu.memory_space<vmem>>, vector<1x32xf32>
    %c0_51 = arith.constant 0 : index
    %c0_52 = arith.constant 0 : index
    %c0_53 = arith.constant 0 : index
    %26 = vector.load %arg1[%c0_51, %c0_52, %c0_53] : memref<1x8x64xf32, #tpu.memory_space<vmem>>, vector<1x8x64xf32>
    %27 = vector.shape_cast %26 : vector<1x8x64xf32> to vector<8x64xf32>
    %c0_54 = arith.constant 0 : index
    %c0_55 = arith.constant 0 : index
    %c0_56 = arith.constant 0 : index
    %28 = vector.load %arg2[%c0_54, %c0_55, %c0_56] : memref<1x8x48xf32, #tpu.memory_space<vmem>>, vector<1x8x48xf32>
    %29 = vector.shape_cast %28 : vector<1x8x48xf32> to vector<8x48xf32>
    %c0_57 = arith.constant 0 : index
    %c0_58 = arith.constant 0 : index
    %c0_59 = arith.constant 0 : index
    %30 = vector.load %arg3[%c0_57, %c0_58, %c0_59] : memref<1x8x1xf32, #tpu.memory_space<vmem>>, vector<1x8x1xf32>
    %31 = vector.shape_cast %30 : vector<1x8x1xf32> to vector<8x1xf32>
    %c0_60 = arith.constant 0 : index
    %c0_61 = arith.constant 0 : index
    %c0_62 = arith.constant 0 : index
    %32 = vector.load %arg5[%c0_60, %c0_61, %c0_62] : memref<1x8x1xf32, #tpu.memory_space<vmem>>, vector<1x8x1xf32>
    %33 = vector.shape_cast %32 : vector<1x8x1xf32> to vector<8x1xf32>
    %c0_63 = arith.constant 0 : index
    %c0_64 = arith.constant 0 : index
    %c0_65 = arith.constant 0 : index
    %34 = vector.load %arg4[%c0_63, %c0_64, %c0_65] : memref<1x1x8xf32, #tpu.memory_space<vmem>>, vector<1x1x8xf32>
    %35 = vector.shape_cast %34 : vector<1x1x8xf32> to vector<1x8xf32>
    %cst = arith.constant 1.000000e+00 : f32
    %36 = vector.broadcast %cst : f32 to vector<1x8xf32>
    %37 = arith.subf %35, %36 : vector<1x8xf32>
    %cst_66 = arith.constant 1.000000e+09 : f32
    %38 = vector.broadcast %cst_66 : f32 to vector<1x8xf32>
    %39 = arith.mulf %37, %38 : vector<1x8xf32>
    %c0_67 = arith.constant 0 : index
    %c0_68 = arith.constant 0 : index
    %c0_69 = arith.constant 0 : index
    %40 = vector.load %arg6[%c0_67, %c0_68, %c0_69] : memref<1x1x8xf32, #tpu.memory_space<vmem>>, vector<1x1x8xf32>
    %41 = vector.shape_cast %40 : vector<1x1x8xf32> to vector<1x8xf32>
    %cst_70 = arith.constant 1.000000e+00 : f32
    %42 = vector.broadcast %cst_70 : f32 to vector<1x8xf32>
    %43 = arith.subf %41, %42 : vector<1x8xf32>
    %cst_71 = arith.constant 1.000000e+09 : f32
    %44 = vector.broadcast %cst_71 : f32 to vector<1x8xf32>
    %45 = arith.mulf %43, %44 : vector<1x8xf32>
    %cst_72 = arith.constant dense<0.000000e+00> : vector<8x32xf32>
    %46 = tpu.matmul %27, %0, %cst_72 {dimension_numbers = #tpu.dot_dimension_numbers<[1], [0], [0], [1], [0, 0, 1, 1], [], []>} : vector<8x64xf32>, vector<64x32xf32>, vector<8x32xf32> -> vector<8x32xf32>
    %47 = vector.broadcast %1 : vector<1x32xf32> to vector<8x32xf32>
    %48 = arith.addf %46, %47 : vector<8x32xf32>
    %cst_73 = arith.constant dense<0.000000e+00> : vector<8x32xf32>
    %49 = tpu.matmul %29, %2, %cst_73 {dimension_numbers = #tpu.dot_dimension_numbers<[1], [0], [0], [1], [0, 0, 1, 1], [], []>} : vector<8x48xf32>, vector<48x32xf32>, vector<8x32xf32> -> vector<8x32xf32>
    %50 = vector.broadcast %3 : vector<1x32xf32> to vector<8x32xf32>
    %51 = arith.addf %49, %50 : vector<8x32xf32>
    %cst_74 = arith.constant 0.000000e+00 : f32
    %52 = vector.broadcast %cst_74 : f32 to vector<8x32xf32>
    %53 = arith.maximumf %48, %52 : vector<8x32xf32>
    %cst_75 = arith.constant dense<0.000000e+00> : vector<8x96xf32>
    %54 = tpu.matmul %53, %4, %cst_75 {dimension_numbers = #tpu.dot_dimension_numbers<[1], [0], [0], [1], [0, 0, 1, 1], [], []>} : vector<8x32xf32>, vector<32x96xf32>, vector<8x96xf32> -> vector<8x96xf32>
    %55 = vector.broadcast %5 : vector<1x96xf32> to vector<8x96xf32>
    %56 = arith.addf %54, %55 : vector<8x96xf32>
    %57 = vector.broadcast %31 : vector<8x1xf32> to vector<8x96xf32>
    %58 = arith.mulf %56, %57 : vector<8x96xf32>
    %cst_76 = arith.constant 0.000000e+00 : f32
    %59 = vector.broadcast %cst_76 : f32 to vector<8x32xf32>
    %60 = arith.maximumf %51, %59 : vector<8x32xf32>
    %cst_77 = arith.constant dense<0.000000e+00> : vector<8x96xf32>
    %61 = tpu.matmul %60, %6, %cst_77 {dimension_numbers = #tpu.dot_dimension_numbers<[1], [0], [0], [1], [0, 0, 1, 1], [], []>} : vector<8x32xf32>, vector<32x96xf32>, vector<8x96xf32> -> vector<8x96xf32>
    %62 = vector.broadcast %7 : vector<1x96xf32> to vector<8x96xf32>
    %63 = arith.addf %61, %62 : vector<8x96xf32>
    %64 = vector.broadcast %33 : vector<8x1xf32> to vector<8x96xf32>
    %65 = arith.mulf %63, %64 : vector<8x96xf32>
    %66 = vector.extract_strided_slice %58 {offsets = [0, 0], sizes = [8, 32], strides = [1, 1]} : vector<8x96xf32> to vector<8x32xf32>
    %67 = vector.extract_strided_slice %58 {offsets = [0, 32], sizes = [8, 32], strides = [1, 1]} : vector<8x96xf32> to vector<8x32xf32>
    %68 = vector.extract_strided_slice %58 {offsets = [0, 64], sizes = [8, 32], strides = [1, 1]} : vector<8x96xf32> to vector<8x32xf32>
    %69 = vector.extract_strided_slice %65 {offsets = [0, 0], sizes = [8, 32], strides = [1, 1]} : vector<8x96xf32> to vector<8x32xf32>
    %70 = vector.extract_strided_slice %65 {offsets = [0, 32], sizes = [8, 32], strides = [1, 1]} : vector<8x96xf32> to vector<8x32xf32>
    %71 = vector.extract_strided_slice %65 {offsets = [0, 64], sizes = [8, 32], strides = [1, 1]} : vector<8x96xf32> to vector<8x32xf32>
    %cst_78 = arith.constant dense<0.000000e+00> : vector<8x32xf32>
    %72 = tpu.matmul %48, %8, %cst_78 {dimension_numbers = #tpu.dot_dimension_numbers<[1], [0], [0], [1], [0, 0, 1, 1], [], []>} : vector<8x32xf32>, vector<32x32xf32>, vector<8x32xf32> -> vector<8x32xf32>
    %73 = vector.broadcast %10 : vector<1x32xf32> to vector<8x32xf32>
    %74 = arith.addf %72, %73 : vector<8x32xf32>
    %75 = vector.extract_strided_slice %67 {offsets = [0, 0], sizes = [8, 8], strides = [1, 1]} : vector<8x32xf32> to vector<8x8xf32>
    %76 = vector.extract_strided_slice %69 {offsets = [0, 0], sizes = [8, 8], strides = [1, 1]} : vector<8x32xf32> to vector<8x8xf32>
    %77 = tpu.transpose %76, [1, 0] : vector<8x8xf32> -> vector<8x8xf32>
    %cst_79 = arith.constant dense<0.000000e+00> : vector<8x8xf32>
    %78 = tpu.matmul %75, %77, %cst_79 {dimension_numbers = #tpu.dot_dimension_numbers<[1], [0], [0], [1], [0, 0, 1, 1], [], []>} : vector<8x8xf32>, vector<8x8xf32>, vector<8x8xf32> -> vector<8x8xf32>
    %79 = vector.broadcast %45 : vector<1x8xf32> to vector<8x8xf32>
    %80 = arith.addf %78, %79 : vector<8x8xf32>
    %cst_80 = arith.constant 0.353553385 : f32
    %81 = vector.broadcast %cst_80 : f32 to vector<8x8xf32>
    %82 = arith.mulf %80, %81 : vector<8x8xf32>
    %cst_81 = arith.constant dense<0xFF800000> : vector<8xf32>
    %83 = vector.multi_reduction <maximumf>, %82, %cst_81 [1] : vector<8x8xf32> to vector<8xf32>
    %84 = vector.shape_cast %83 : vector<8xf32> to vector<8x1xf32>
    %85 = vector.broadcast %84 : vector<8x1xf32> to vector<8x8xf32>
    %86 = arith.subf %82, %85 : vector<8x8xf32>
    %87 = math.exp %86 : vector<8x8xf32>
    %cst_82 = arith.constant dense<0.000000e+00> : vector<8xf32>
    %88 = vector.multi_reduction <add>, %87, %cst_82 [1] : vector<8x8xf32> to vector<8xf32>
    %89 = vector.shape_cast %88 : vector<8xf32> to vector<8x1xf32>
    %90 = tpu.reciprocal %89 {approx = true} : vector<8x1xf32> -> vector<8x1xf32>
    %91 = vector.broadcast %90 : vector<8x1xf32> to vector<8x8xf32>
    %92 = arith.mulf %87, %91 : vector<8x8xf32>
    %93 = vector.extract_strided_slice %71 {offsets = [0, 0], sizes = [8, 8], strides = [1, 1]} : vector<8x32xf32> to vector<8x8xf32>
    %cst_83 = arith.constant dense<0.000000e+00> : vector<8x8xf32>
    %94 = tpu.matmul %92, %93, %cst_83 {dimension_numbers = #tpu.dot_dimension_numbers<[1], [0], [0], [1], [0, 0, 1, 1], [], []>} : vector<8x8xf32>, vector<8x8xf32>, vector<8x8xf32> -> vector<8x8xf32>
    %95 = vector.extract_strided_slice %9 {offsets = [0, 0], sizes = [8, 32], strides = [1, 1]} : vector<32x32xf32> to vector<8x32xf32>
    %cst_84 = arith.constant dense<0.000000e+00> : vector<8x32xf32>
    %96 = tpu.matmul %94, %95, %cst_84 {dimension_numbers = #tpu.dot_dimension_numbers<[1], [0], [0], [1], [0, 0, 1, 1], [], []>} : vector<8x8xf32>, vector<8x32xf32>, vector<8x32xf32> -> vector<8x32xf32>
    %97 = arith.addf %74, %96 : vector<8x32xf32>
    %98 = vector.extract_strided_slice %67 {offsets = [0, 8], sizes = [8, 8], strides = [1, 1]} : vector<8x32xf32> to vector<8x8xf32>
    %99 = vector.extract_strided_slice %69 {offsets = [0, 8], sizes = [8, 8], strides = [1, 1]} : vector<8x32xf32> to vector<8x8xf32>
    %100 = tpu.transpose %99, [1, 0] : vector<8x8xf32> -> vector<8x8xf32>
    %cst_85 = arith.constant dense<0.000000e+00> : vector<8x8xf32>
    %101 = tpu.matmul %98, %100, %cst_85 {dimension_numbers = #tpu.dot_dimension_numbers<[1], [0], [0], [1], [0, 0, 1, 1], [], []>} : vector<8x8xf32>, vector<8x8xf32>, vector<8x8xf32> -> vector<8x8xf32>
    %102 = vector.broadcast %45 : vector<1x8xf32> to vector<8x8xf32>
    %103 = arith.addf %101, %102 : vector<8x8xf32>
    %cst_86 = arith.constant 0.353553385 : f32
    %104 = vector.broadcast %cst_86 : f32 to vector<8x8xf32>
    %105 = arith.mulf %103, %104 : vector<8x8xf32>
    %cst_87 = arith.constant dense<0xFF800000> : vector<8xf32>
    %106 = vector.multi_reduction <maximumf>, %105, %cst_87 [1] : vector<8x8xf32> to vector<8xf32>
    %107 = vector.shape_cast %106 : vector<8xf32> to vector<8x1xf32>
    %108 = vector.broadcast %107 : vector<8x1xf32> to vector<8x8xf32>
    %109 = arith.subf %105, %108 : vector<8x8xf32>
    %110 = math.exp %109 : vector<8x8xf32>
    %cst_88 = arith.constant dense<0.000000e+00> : vector<8xf32>
    %111 = vector.multi_reduction <add>, %110, %cst_88 [1] : vector<8x8xf32> to vector<8xf32>
    %112 = vector.shape_cast %111 : vector<8xf32> to vector<8x1xf32>
    %113 = tpu.reciprocal %112 {approx = true} : vector<8x1xf32> -> vector<8x1xf32>
    %114 = vector.broadcast %113 : vector<8x1xf32> to vector<8x8xf32>
    %115 = arith.mulf %110, %114 : vector<8x8xf32>
    %116 = vector.extract_strided_slice %71 {offsets = [0, 8], sizes = [8, 8], strides = [1, 1]} : vector<8x32xf32> to vector<8x8xf32>
    %cst_89 = arith.constant dense<0.000000e+00> : vector<8x8xf32>
    %117 = tpu.matmul %115, %116, %cst_89 {dimension_numbers = #tpu.dot_dimension_numbers<[1], [0], [0], [1], [0, 0, 1, 1], [], []>} : vector<8x8xf32>, vector<8x8xf32>, vector<8x8xf32> -> vector<8x8xf32>
    %118 = vector.extract_strided_slice %9 {offsets = [8, 0], sizes = [8, 32], strides = [1, 1]} : vector<32x32xf32> to vector<8x32xf32>
    %cst_90 = arith.constant dense<0.000000e+00> : vector<8x32xf32>
    %119 = tpu.matmul %117, %118, %cst_90 {dimension_numbers = #tpu.dot_dimension_numbers<[1], [0], [0], [1], [0, 0, 1, 1], [], []>} : vector<8x8xf32>, vector<8x32xf32>, vector<8x32xf32> -> vector<8x32xf32>
    %120 = arith.addf %97, %119 : vector<8x32xf32>
    %121 = vector.extract_strided_slice %67 {offsets = [0, 16], sizes = [8, 8], strides = [1, 1]} : vector<8x32xf32> to vector<8x8xf32>
    %122 = vector.extract_strided_slice %69 {offsets = [0, 16], sizes = [8, 8], strides = [1, 1]} : vector<8x32xf32> to vector<8x8xf32>
    %123 = tpu.transpose %122, [1, 0] : vector<8x8xf32> -> vector<8x8xf32>
    %cst_91 = arith.constant dense<0.000000e+00> : vector<8x8xf32>
    %124 = tpu.matmul %121, %123, %cst_91 {dimension_numbers = #tpu.dot_dimension_numbers<[1], [0], [0], [1], [0, 0, 1, 1], [], []>} : vector<8x8xf32>, vector<8x8xf32>, vector<8x8xf32> -> vector<8x8xf32>
    %125 = vector.broadcast %45 : vector<1x8xf32> to vector<8x8xf32>
    %126 = arith.addf %124, %125 : vector<8x8xf32>
    %cst_92 = arith.constant 0.353553385 : f32
    %127 = vector.broadcast %cst_92 : f32 to vector<8x8xf32>
    %128 = arith.mulf %126, %127 : vector<8x8xf32>
    %cst_93 = arith.constant dense<0xFF800000> : vector<8xf32>
    %129 = vector.multi_reduction <maximumf>, %128, %cst_93 [1] : vector<8x8xf32> to vector<8xf32>
    %130 = vector.shape_cast %129 : vector<8xf32> to vector<8x1xf32>
    %131 = vector.broadcast %130 : vector<8x1xf32> to vector<8x8xf32>
    %132 = arith.subf %128, %131 : vector<8x8xf32>
    %133 = math.exp %132 : vector<8x8xf32>
    %cst_94 = arith.constant dense<0.000000e+00> : vector<8xf32>
    %134 = vector.multi_reduction <add>, %133, %cst_94 [1] : vector<8x8xf32> to vector<8xf32>
    %135 = vector.shape_cast %134 : vector<8xf32> to vector<8x1xf32>
    %136 = tpu.reciprocal %135 {approx = true} : vector<8x1xf32> -> vector<8x1xf32>
    %137 = vector.broadcast %136 : vector<8x1xf32> to vector<8x8xf32>
    %138 = arith.mulf %133, %137 : vector<8x8xf32>
    %139 = vector.extract_strided_slice %71 {offsets = [0, 16], sizes = [8, 8], strides = [1, 1]} : vector<8x32xf32> to vector<8x8xf32>
    %cst_95 = arith.constant dense<0.000000e+00> : vector<8x8xf32>
    %140 = tpu.matmul %138, %139, %cst_95 {dimension_numbers = #tpu.dot_dimension_numbers<[1], [0], [0], [1], [0, 0, 1, 1], [], []>} : vector<8x8xf32>, vector<8x8xf32>, vector<8x8xf32> -> vector<8x8xf32>
    %141 = vector.extract_strided_slice %9 {offsets = [16, 0], sizes = [8, 32], strides = [1, 1]} : vector<32x32xf32> to vector<8x32xf32>
    %cst_96 = arith.constant dense<0.000000e+00> : vector<8x32xf32>
    %142 = tpu.matmul %140, %141, %cst_96 {dimension_numbers = #tpu.dot_dimension_numbers<[1], [0], [0], [1], [0, 0, 1, 1], [], []>} : vector<8x8xf32>, vector<8x32xf32>, vector<8x32xf32> -> vector<8x32xf32>
    %143 = arith.addf %120, %142 : vector<8x32xf32>
    %144 = vector.extract_strided_slice %67 {offsets = [0, 24], sizes = [8, 8], strides = [1, 1]} : vector<8x32xf32> to vector<8x8xf32>
    %145 = vector.extract_strided_slice %69 {offsets = [0, 24], sizes = [8, 8], strides = [1, 1]} : vector<8x32xf32> to vector<8x8xf32>
    %146 = tpu.transpose %145, [1, 0] : vector<8x8xf32> -> vector<8x8xf32>
    %cst_97 = arith.constant dense<0.000000e+00> : vector<8x8xf32>
    %147 = tpu.matmul %144, %146, %cst_97 {dimension_numbers = #tpu.dot_dimension_numbers<[1], [0], [0], [1], [0, 0, 1, 1], [], []>} : vector<8x8xf32>, vector<8x8xf32>, vector<8x8xf32> -> vector<8x8xf32>
    %148 = vector.broadcast %45 : vector<1x8xf32> to vector<8x8xf32>
    %149 = arith.addf %147, %148 : vector<8x8xf32>
    %cst_98 = arith.constant 0.353553385 : f32
    %150 = vector.broadcast %cst_98 : f32 to vector<8x8xf32>
    %151 = arith.mulf %149, %150 : vector<8x8xf32>
    %cst_99 = arith.constant dense<0xFF800000> : vector<8xf32>
    %152 = vector.multi_reduction <maximumf>, %151, %cst_99 [1] : vector<8x8xf32> to vector<8xf32>
    %153 = vector.shape_cast %152 : vector<8xf32> to vector<8x1xf32>
    %154 = vector.broadcast %153 : vector<8x1xf32> to vector<8x8xf32>
    %155 = arith.subf %151, %154 : vector<8x8xf32>
    %156 = math.exp %155 : vector<8x8xf32>
    %cst_100 = arith.constant dense<0.000000e+00> : vector<8xf32>
    %157 = vector.multi_reduction <add>, %156, %cst_100 [1] : vector<8x8xf32> to vector<8xf32>
    %158 = vector.shape_cast %157 : vector<8xf32> to vector<8x1xf32>
    %159 = tpu.reciprocal %158 {approx = true} : vector<8x1xf32> -> vector<8x1xf32>
    %160 = vector.broadcast %159 : vector<8x1xf32> to vector<8x8xf32>
    %161 = arith.mulf %156, %160 : vector<8x8xf32>
    %162 = vector.extract_strided_slice %71 {offsets = [0, 24], sizes = [8, 8], strides = [1, 1]} : vector<8x32xf32> to vector<8x8xf32>
    %cst_101 = arith.constant dense<0.000000e+00> : vector<8x8xf32>
    %163 = tpu.matmul %161, %162, %cst_101 {dimension_numbers = #tpu.dot_dimension_numbers<[1], [0], [0], [1], [0, 0, 1, 1], [], []>} : vector<8x8xf32>, vector<8x8xf32>, vector<8x8xf32> -> vector<8x8xf32>
    %164 = vector.extract_strided_slice %9 {offsets = [24, 0], sizes = [8, 32], strides = [1, 1]} : vector<32x32xf32> to vector<8x32xf32>
    %cst_102 = arith.constant dense<0.000000e+00> : vector<8x32xf32>
    %165 = tpu.matmul %163, %164, %cst_102 {dimension_numbers = #tpu.dot_dimension_numbers<[1], [0], [0], [1], [0, 0, 1, 1], [], []>} : vector<8x8xf32>, vector<8x32xf32>, vector<8x32xf32> -> vector<8x32xf32>
    %166 = arith.addf %143, %165 : vector<8x32xf32>
    %cst_103 = arith.constant dense<0.000000e+00> : vector<8x32xf32>
    %167 = tpu.matmul %51, %11, %cst_103 {dimension_numbers = #tpu.dot_dimension_numbers<[1], [0], [0], [1], [0, 0, 1, 1], [], []>} : vector<8x32xf32>, vector<32x32xf32>, vector<8x32xf32> -> vector<8x32xf32>
    %168 = vector.broadcast %13 : vector<1x32xf32> to vector<8x32xf32>
    %169 = arith.addf %167, %168 : vector<8x32xf32>
    %170 = vector.extract_strided_slice %70 {offsets = [0, 0], sizes = [8, 8], strides = [1, 1]} : vector<8x32xf32> to vector<8x8xf32>
    %171 = vector.extract_strided_slice %66 {offsets = [0, 0], sizes = [8, 8], strides = [1, 1]} : vector<8x32xf32> to vector<8x8xf32>
    %172 = tpu.transpose %171, [1, 0] : vector<8x8xf32> -> vector<8x8xf32>
    %cst_104 = arith.constant dense<0.000000e+00> : vector<8x8xf32>
    %173 = tpu.matmul %170, %172, %cst_104 {dimension_numbers = #tpu.dot_dimension_numbers<[1], [0], [0], [1], [0, 0, 1, 1], [], []>} : vector<8x8xf32>, vector<8x8xf32>, vector<8x8xf32> -> vector<8x8xf32>
    %174 = vector.broadcast %39 : vector<1x8xf32> to vector<8x8xf32>
    %175 = arith.addf %173, %174 : vector<8x8xf32>
    %cst_105 = arith.constant 0.353553385 : f32
    %176 = vector.broadcast %cst_105 : f32 to vector<8x8xf32>
    %177 = arith.mulf %175, %176 : vector<8x8xf32>
    %cst_106 = arith.constant dense<0xFF800000> : vector<8xf32>
    %178 = vector.multi_reduction <maximumf>, %177, %cst_106 [1] : vector<8x8xf32> to vector<8xf32>
    %179 = vector.shape_cast %178 : vector<8xf32> to vector<8x1xf32>
    %180 = vector.broadcast %179 : vector<8x1xf32> to vector<8x8xf32>
    %181 = arith.subf %177, %180 : vector<8x8xf32>
    %182 = math.exp %181 : vector<8x8xf32>
    %cst_107 = arith.constant dense<0.000000e+00> : vector<8xf32>
    %183 = vector.multi_reduction <add>, %182, %cst_107 [1] : vector<8x8xf32> to vector<8xf32>
    %184 = vector.shape_cast %183 : vector<8xf32> to vector<8x1xf32>
    %185 = tpu.reciprocal %184 {approx = true} : vector<8x1xf32> -> vector<8x1xf32>
    %186 = vector.broadcast %185 : vector<8x1xf32> to vector<8x8xf32>
    %187 = arith.mulf %182, %186 : vector<8x8xf32>
    %188 = vector.extract_strided_slice %68 {offsets = [0, 0], sizes = [8, 8], strides = [1, 1]} : vector<8x32xf32> to vector<8x8xf32>
    %cst_108 = arith.constant dense<0.000000e+00> : vector<8x8xf32>
    %189 = tpu.matmul %187, %188, %cst_108 {dimension_numbers = #tpu.dot_dimension_numbers<[1], [0], [0], [1], [0, 0, 1, 1], [], []>} : vector<8x8xf32>, vector<8x8xf32>, vector<8x8xf32> -> vector<8x8xf32>
    %190 = vector.extract_strided_slice %12 {offsets = [0, 0], sizes = [8, 32], strides = [1, 1]} : vector<32x32xf32> to vector<8x32xf32>
    %cst_109 = arith.constant dense<0.000000e+00> : vector<8x32xf32>
    %191 = tpu.matmul %189, %190, %cst_109 {dimension_numbers = #tpu.dot_dimension_numbers<[1], [0], [0], [1], [0, 0, 1, 1], [], []>} : vector<8x8xf32>, vector<8x32xf32>, vector<8x32xf32> -> vector<8x32xf32>
    %192 = arith.addf %169, %191 : vector<8x32xf32>
    %193 = vector.extract_strided_slice %70 {offsets = [0, 8], sizes = [8, 8], strides = [1, 1]} : vector<8x32xf32> to vector<8x8xf32>
    %194 = vector.extract_strided_slice %66 {offsets = [0, 8], sizes = [8, 8], strides = [1, 1]} : vector<8x32xf32> to vector<8x8xf32>
    %195 = tpu.transpose %194, [1, 0] : vector<8x8xf32> -> vector<8x8xf32>
    %cst_110 = arith.constant dense<0.000000e+00> : vector<8x8xf32>
    %196 = tpu.matmul %193, %195, %cst_110 {dimension_numbers = #tpu.dot_dimension_numbers<[1], [0], [0], [1], [0, 0, 1, 1], [], []>} : vector<8x8xf32>, vector<8x8xf32>, vector<8x8xf32> -> vector<8x8xf32>
    %197 = vector.broadcast %39 : vector<1x8xf32> to vector<8x8xf32>
    %198 = arith.addf %196, %197 : vector<8x8xf32>
    %cst_111 = arith.constant 0.353553385 : f32
    %199 = vector.broadcast %cst_111 : f32 to vector<8x8xf32>
    %200 = arith.mulf %198, %199 : vector<8x8xf32>
    %cst_112 = arith.constant dense<0xFF800000> : vector<8xf32>
    %201 = vector.multi_reduction <maximumf>, %200, %cst_112 [1] : vector<8x8xf32> to vector<8xf32>
    %202 = vector.shape_cast %201 : vector<8xf32> to vector<8x1xf32>
    %203 = vector.broadcast %202 : vector<8x1xf32> to vector<8x8xf32>
    %204 = arith.subf %200, %203 : vector<8x8xf32>
    %205 = math.exp %204 : vector<8x8xf32>
    %cst_113 = arith.constant dense<0.000000e+00> : vector<8xf32>
    %206 = vector.multi_reduction <add>, %205, %cst_113 [1] : vector<8x8xf32> to vector<8xf32>
    %207 = vector.shape_cast %206 : vector<8xf32> to vector<8x1xf32>
    %208 = tpu.reciprocal %207 {approx = true} : vector<8x1xf32> -> vector<8x1xf32>
    %209 = vector.broadcast %208 : vector<8x1xf32> to vector<8x8xf32>
    %210 = arith.mulf %205, %209 : vector<8x8xf32>
    %211 = vector.extract_strided_slice %68 {offsets = [0, 8], sizes = [8, 8], strides = [1, 1]} : vector<8x32xf32> to vector<8x8xf32>
    %cst_114 = arith.constant dense<0.000000e+00> : vector<8x8xf32>
    %212 = tpu.matmul %210, %211, %cst_114 {dimension_numbers = #tpu.dot_dimension_numbers<[1], [0], [0], [1], [0, 0, 1, 1], [], []>} : vector<8x8xf32>, vector<8x8xf32>, vector<8x8xf32> -> vector<8x8xf32>
    %213 = vector.extract_strided_slice %12 {offsets = [8, 0], sizes = [8, 32], strides = [1, 1]} : vector<32x32xf32> to vector<8x32xf32>
    %cst_115 = arith.constant dense<0.000000e+00> : vector<8x32xf32>
    %214 = tpu.matmul %212, %213, %cst_115 {dimension_numbers = #tpu.dot_dimension_numbers<[1], [0], [0], [1], [0, 0, 1, 1], [], []>} : vector<8x8xf32>, vector<8x32xf32>, vector<8x32xf32> -> vector<8x32xf32>
    %215 = arith.addf %192, %214 : vector<8x32xf32>
    %216 = vector.extract_strided_slice %70 {offsets = [0, 16], sizes = [8, 8], strides = [1, 1]} : vector<8x32xf32> to vector<8x8xf32>
    %217 = vector.extract_strided_slice %66 {offsets = [0, 16], sizes = [8, 8], strides = [1, 1]} : vector<8x32xf32> to vector<8x8xf32>
    %218 = tpu.transpose %217, [1, 0] : vector<8x8xf32> -> vector<8x8xf32>
    %cst_116 = arith.constant dense<0.000000e+00> : vector<8x8xf32>
    %219 = tpu.matmul %216, %218, %cst_116 {dimension_numbers = #tpu.dot_dimension_numbers<[1], [0], [0], [1], [0, 0, 1, 1], [], []>} : vector<8x8xf32>, vector<8x8xf32>, vector<8x8xf32> -> vector<8x8xf32>
    %220 = vector.broadcast %39 : vector<1x8xf32> to vector<8x8xf32>
    %221 = arith.addf %219, %220 : vector<8x8xf32>
    %cst_117 = arith.constant 0.353553385 : f32
    %222 = vector.broadcast %cst_117 : f32 to vector<8x8xf32>
    %223 = arith.mulf %221, %222 : vector<8x8xf32>
    %cst_118 = arith.constant dense<0xFF800000> : vector<8xf32>
    %224 = vector.multi_reduction <maximumf>, %223, %cst_118 [1] : vector<8x8xf32> to vector<8xf32>
    %225 = vector.shape_cast %224 : vector<8xf32> to vector<8x1xf32>
    %226 = vector.broadcast %225 : vector<8x1xf32> to vector<8x8xf32>
    %227 = arith.subf %223, %226 : vector<8x8xf32>
    %228 = math.exp %227 : vector<8x8xf32>
    %cst_119 = arith.constant dense<0.000000e+00> : vector<8xf32>
    %229 = vector.multi_reduction <add>, %228, %cst_119 [1] : vector<8x8xf32> to vector<8xf32>
    %230 = vector.shape_cast %229 : vector<8xf32> to vector<8x1xf32>
    %231 = tpu.reciprocal %230 {approx = true} : vector<8x1xf32> -> vector<8x1xf32>
    %232 = vector.broadcast %231 : vector<8x1xf32> to vector<8x8xf32>
    %233 = arith.mulf %228, %232 : vector<8x8xf32>
    %234 = vector.extract_strided_slice %68 {offsets = [0, 16], sizes = [8, 8], strides = [1, 1]} : vector<8x32xf32> to vector<8x8xf32>
    %cst_120 = arith.constant dense<0.000000e+00> : vector<8x8xf32>
    %235 = tpu.matmul %233, %234, %cst_120 {dimension_numbers = #tpu.dot_dimension_numbers<[1], [0], [0], [1], [0, 0, 1, 1], [], []>} : vector<8x8xf32>, vector<8x8xf32>, vector<8x8xf32> -> vector<8x8xf32>
    %236 = vector.extract_strided_slice %12 {offsets = [16, 0], sizes = [8, 32], strides = [1, 1]} : vector<32x32xf32> to vector<8x32xf32>
    %cst_121 = arith.constant dense<0.000000e+00> : vector<8x32xf32>
    %237 = tpu.matmul %235, %236, %cst_121 {dimension_numbers = #tpu.dot_dimension_numbers<[1], [0], [0], [1], [0, 0, 1, 1], [], []>} : vector<8x8xf32>, vector<8x32xf32>, vector<8x32xf32> -> vector<8x32xf32>
    %238 = arith.addf %215, %237 : vector<8x32xf32>
    %239 = vector.extract_strided_slice %70 {offsets = [0, 24], sizes = [8, 8], strides = [1, 1]} : vector<8x32xf32> to vector<8x8xf32>
    %240 = vector.extract_strided_slice %66 {offsets = [0, 24], sizes = [8, 8], strides = [1, 1]} : vector<8x32xf32> to vector<8x8xf32>
    %241 = tpu.transpose %240, [1, 0] : vector<8x8xf32> -> vector<8x8xf32>
    %cst_122 = arith.constant dense<0.000000e+00> : vector<8x8xf32>
    %242 = tpu.matmul %239, %241, %cst_122 {dimension_numbers = #tpu.dot_dimension_numbers<[1], [0], [0], [1], [0, 0, 1, 1], [], []>} : vector<8x8xf32>, vector<8x8xf32>, vector<8x8xf32> -> vector<8x8xf32>
    %243 = vector.broadcast %39 : vector<1x8xf32> to vector<8x8xf32>
    %244 = arith.addf %242, %243 : vector<8x8xf32>
    %cst_123 = arith.constant 0.353553385 : f32
    %245 = vector.broadcast %cst_123 : f32 to vector<8x8xf32>
    %246 = arith.mulf %244, %245 : vector<8x8xf32>
    %cst_124 = arith.constant dense<0xFF800000> : vector<8xf32>
    %247 = vector.multi_reduction <maximumf>, %246, %cst_124 [1] : vector<8x8xf32> to vector<8xf32>
    %248 = vector.shape_cast %247 : vector<8xf32> to vector<8x1xf32>
    %249 = vector.broadcast %248 : vector<8x1xf32> to vector<8x8xf32>
    %250 = arith.subf %246, %249 : vector<8x8xf32>
    %251 = math.exp %250 : vector<8x8xf32>
    %cst_125 = arith.constant dense<0.000000e+00> : vector<8xf32>
    %252 = vector.multi_reduction <add>, %251, %cst_125 [1] : vector<8x8xf32> to vector<8xf32>
    %253 = vector.shape_cast %252 : vector<8xf32> to vector<8x1xf32>
    %254 = tpu.reciprocal %253 {approx = true} : vector<8x1xf32> -> vector<8x1xf32>
    %255 = vector.broadcast %254 : vector<8x1xf32> to vector<8x8xf32>
    %256 = arith.mulf %251, %255 : vector<8x8xf32>
    %257 = vector.extract_strided_slice %68 {offsets = [0, 24], sizes = [8, 8], strides = [1, 1]} : vector<8x32xf32> to vector<8x8xf32>
    %cst_126 = arith.constant dense<0.000000e+00> : vector<8x8xf32>
    %258 = tpu.matmul %256, %257, %cst_126 {dimension_numbers = #tpu.dot_dimension_numbers<[1], [0], [0], [1], [0, 0, 1, 1], [], []>} : vector<8x8xf32>, vector<8x8xf32>, vector<8x8xf32> -> vector<8x8xf32>
    %259 = vector.extract_strided_slice %12 {offsets = [24, 0], sizes = [8, 32], strides = [1, 1]} : vector<32x32xf32> to vector<8x32xf32>
    %cst_127 = arith.constant dense<0.000000e+00> : vector<8x32xf32>
    %260 = tpu.matmul %258, %259, %cst_127 {dimension_numbers = #tpu.dot_dimension_numbers<[1], [0], [0], [1], [0, 0, 1, 1], [], []>} : vector<8x8xf32>, vector<8x32xf32>, vector<8x32xf32> -> vector<8x32xf32>
    %261 = arith.addf %238, %260 : vector<8x32xf32>
    %cst_128 = arith.constant dense<0.000000e+00> : vector<1xf32>
    %262 = vector.multi_reduction <add>, %31, %cst_128 [0] : vector<8x1xf32> to vector<1xf32>
    %263 = vector.shape_cast %262 : vector<1xf32> to vector<1x1xf32>
    %cst_129 = arith.constant dense<0.000000e+00> : vector<1xf32>
    %264 = vector.multi_reduction <add>, %33, %cst_129 [0] : vector<8x1xf32> to vector<1xf32>
    %265 = vector.shape_cast %264 : vector<1xf32> to vector<1x1xf32>
    %266 = vector.broadcast %31 : vector<8x1xf32> to vector<8x32xf32>
    %267 = arith.mulf %166, %266 : vector<8x32xf32>
    %cst_130 = arith.constant dense<0.000000e+00> : vector<32xf32>
    %268 = vector.multi_reduction <add>, %267, %cst_130 [0] : vector<8x32xf32> to vector<32xf32>
    %269 = vector.shape_cast %268 : vector<32xf32> to vector<1x32xf32>
    %270 = vector.broadcast %263 : vector<1x1xf32> to vector<1x32xf32>
    %271 = arith.divf %269, %270 : vector<1x32xf32>
    %272 = vector.broadcast %33 : vector<8x1xf32> to vector<8x32xf32>
    %273 = arith.mulf %261, %272 : vector<8x32xf32>
    %cst_131 = arith.constant dense<0.000000e+00> : vector<32xf32>
    %274 = vector.multi_reduction <add>, %273, %cst_131 [0] : vector<8x32xf32> to vector<32xf32>
    %275 = vector.shape_cast %274 : vector<32xf32> to vector<1x32xf32>
    %276 = vector.broadcast %265 : vector<1x1xf32> to vector<1x32xf32>
    %277 = arith.divf %275, %276 : vector<1x32xf32>
    %cst_132 = arith.constant 0.000000e+00 : f32
    %278 = vector.broadcast %cst_132 : f32 to vector<1x32xf32>
    %279 = arith.maximumf %271, %278 : vector<1x32xf32>
    %cst_133 = arith.constant dense<0.000000e+00> : vector<1x32xf32>
    %280 = tpu.matmul %279, %14, %cst_133 {dimension_numbers = #tpu.dot_dimension_numbers<[1], [0], [0], [1], [0, 0, 1, 1], [], []>} : vector<1x32xf32>, vector<32x32xf32>, vector<1x32xf32> -> vector<1x32xf32>
    %281 = arith.addf %280, %15 : vector<1x32xf32>
    %cst_134 = arith.constant 0.000000e+00 : f32
    %282 = vector.broadcast %cst_134 : f32 to vector<1x32xf32>
    %283 = arith.subf %282, %281 : vector<1x32xf32>
    %284 = math.exp %283 : vector<1x32xf32>
    %cst_135 = arith.constant 1.000000e+00 : f32
    %285 = vector.broadcast %cst_135 : f32 to vector<1x32xf32>
    %286 = arith.addf %285, %284 : vector<1x32xf32>
    %cst_136 = arith.constant 1.000000e+00 : f32
    %287 = vector.broadcast %cst_136 : f32 to vector<1x32xf32>
    %288 = arith.divf %287, %286 : vector<1x32xf32>
    %cst_137 = arith.constant 0.000000e+00 : f32
    %289 = vector.broadcast %cst_137 : f32 to vector<1x32xf32>
    %290 = arith.maximumf %277, %289 : vector<1x32xf32>
    %cst_138 = arith.constant dense<0.000000e+00> : vector<1x32xf32>
    %291 = tpu.matmul %290, %16, %cst_138 {dimension_numbers = #tpu.dot_dimension_numbers<[1], [0], [0], [1], [0, 0, 1, 1], [], []>} : vector<1x32xf32>, vector<32x32xf32>, vector<1x32xf32> -> vector<1x32xf32>
    %292 = arith.addf %291, %17 : vector<1x32xf32>
    %cst_139 = arith.constant 0.000000e+00 : f32
    %293 = vector.broadcast %cst_139 : f32 to vector<1x32xf32>
    %294 = arith.subf %293, %292 : vector<1x32xf32>
    %295 = math.exp %294 : vector<1x32xf32>
    %cst_140 = arith.constant 1.000000e+00 : f32
    %296 = vector.broadcast %cst_140 : f32 to vector<1x32xf32>
    %297 = arith.addf %296, %295 : vector<1x32xf32>
    %cst_141 = arith.constant 1.000000e+00 : f32
    %298 = vector.broadcast %cst_141 : f32 to vector<1x32xf32>
    %299 = arith.divf %298, %297 : vector<1x32xf32>
    %cst_142 = arith.constant 0.000000e+00 : f32
    %300 = vector.broadcast %cst_142 : f32 to vector<8x32xf32>
    %301 = arith.maximumf %166, %300 : vector<8x32xf32>
    %cst_143 = arith.constant dense<0.000000e+00> : vector<8x96xf32>
    %302 = tpu.matmul %301, %18, %cst_143 {dimension_numbers = #tpu.dot_dimension_numbers<[1], [0], [0], [1], [0, 0, 1, 1], [], []>} : vector<8x32xf32>, vector<32x96xf32>, vector<8x96xf32> -> vector<8x96xf32>
    %303 = vector.broadcast %19 : vector<1x96xf32> to vector<8x96xf32>
    %304 = arith.addf %302, %303 : vector<8x96xf32>
    %305 = vector.broadcast %31 : vector<8x1xf32> to vector<8x96xf32>
    %306 = arith.mulf %304, %305 : vector<8x96xf32>
    %cst_144 = arith.constant 0.000000e+00 : f32
    %307 = vector.broadcast %cst_144 : f32 to vector<8x32xf32>
    %308 = arith.maximumf %261, %307 : vector<8x32xf32>
    %cst_145 = arith.constant dense<0.000000e+00> : vector<8x96xf32>
    %309 = tpu.matmul %308, %20, %cst_145 {dimension_numbers = #tpu.dot_dimension_numbers<[1], [0], [0], [1], [0, 0, 1, 1], [], []>} : vector<8x32xf32>, vector<32x96xf32>, vector<8x96xf32> -> vector<8x96xf32>
    %310 = vector.broadcast %21 : vector<1x96xf32> to vector<8x96xf32>
    %311 = arith.addf %309, %310 : vector<8x96xf32>
    %312 = vector.broadcast %33 : vector<8x1xf32> to vector<8x96xf32>
    %313 = arith.mulf %311, %312 : vector<8x96xf32>
    %314 = vector.extract_strided_slice %306 {offsets = [0, 0], sizes = [8, 32], strides = [1, 1]} : vector<8x96xf32> to vector<8x32xf32>
    %315 = vector.extract_strided_slice %306 {offsets = [0, 32], sizes = [8, 32], strides = [1, 1]} : vector<8x96xf32> to vector<8x32xf32>
    %316 = vector.extract_strided_slice %306 {offsets = [0, 64], sizes = [8, 32], strides = [1, 1]} : vector<8x96xf32> to vector<8x32xf32>
    %317 = vector.extract_strided_slice %313 {offsets = [0, 0], sizes = [8, 32], strides = [1, 1]} : vector<8x96xf32> to vector<8x32xf32>
    %318 = vector.extract_strided_slice %313 {offsets = [0, 32], sizes = [8, 32], strides = [1, 1]} : vector<8x96xf32> to vector<8x32xf32>
    %319 = vector.extract_strided_slice %313 {offsets = [0, 64], sizes = [8, 32], strides = [1, 1]} : vector<8x96xf32> to vector<8x32xf32>
    %cst_146 = arith.constant 1.000000e+00 : f32
    %320 = vector.broadcast %cst_146 : f32 to vector<1x32xf32>
    %321 = arith.addf %320, %299 : vector<1x32xf32>
    %cst_147 = arith.constant 1.000000e+00 : f32
    %322 = vector.broadcast %cst_147 : f32 to vector<1x32xf32>
    %323 = arith.addf %322, %288 : vector<1x32xf32>
    %cst_148 = arith.constant dense<0.000000e+00> : vector<8x32xf32>
    %324 = tpu.matmul %166, %22, %cst_148 {dimension_numbers = #tpu.dot_dimension_numbers<[1], [0], [0], [1], [0, 0, 1, 1], [], []>} : vector<8x32xf32>, vector<32x32xf32>, vector<8x32xf32> -> vector<8x32xf32>
    %325 = vector.broadcast %23 : vector<1x32xf32> to vector<8x32xf32>
    %326 = arith.addf %324, %325 : vector<8x32xf32>
    %327 = vector.broadcast %321 : vector<1x32xf32> to vector<8x32xf32>
    %328 = arith.mulf %327, %315 : vector<8x32xf32>
    %329 = vector.broadcast %321 : vector<1x32xf32> to vector<8x32xf32>
    %330 = arith.mulf %329, %314 : vector<8x32xf32>
    %331 = vector.extract_strided_slice %328 {offsets = [0, 0], sizes = [8, 8], strides = [1, 1]} : vector<8x32xf32> to vector<8x8xf32>
    %332 = vector.extract_strided_slice %330 {offsets = [0, 0], sizes = [8, 8], strides = [1, 1]} : vector<8x32xf32> to vector<8x8xf32>
    %333 = tpu.transpose %332, [1, 0] : vector<8x8xf32> -> vector<8x8xf32>
    %cst_149 = arith.constant dense<0.000000e+00> : vector<8x8xf32>
    %334 = tpu.matmul %331, %333, %cst_149 {dimension_numbers = #tpu.dot_dimension_numbers<[1], [0], [0], [1], [0, 0, 1, 1], [], []>} : vector<8x8xf32>, vector<8x8xf32>, vector<8x8xf32> -> vector<8x8xf32>
    %335 = vector.broadcast %39 : vector<1x8xf32> to vector<8x8xf32>
    %336 = arith.addf %334, %335 : vector<8x8xf32>
    %cst_150 = arith.constant 0.353553385 : f32
    %337 = vector.broadcast %cst_150 : f32 to vector<8x8xf32>
    %338 = arith.mulf %336, %337 : vector<8x8xf32>
    %cst_151 = arith.constant dense<0xFF800000> : vector<8xf32>
    %339 = vector.multi_reduction <maximumf>, %338, %cst_151 [1] : vector<8x8xf32> to vector<8xf32>
    %340 = vector.shape_cast %339 : vector<8xf32> to vector<8x1xf32>
    %341 = vector.broadcast %340 : vector<8x1xf32> to vector<8x8xf32>
    %342 = arith.subf %338, %341 : vector<8x8xf32>
    %343 = math.exp %342 : vector<8x8xf32>
    %cst_152 = arith.constant dense<0.000000e+00> : vector<8xf32>
    %344 = vector.multi_reduction <add>, %343, %cst_152 [1] : vector<8x8xf32> to vector<8xf32>
    %345 = vector.shape_cast %344 : vector<8xf32> to vector<8x1xf32>
    %346 = tpu.reciprocal %345 {approx = true} : vector<8x1xf32> -> vector<8x1xf32>
    %347 = vector.broadcast %346 : vector<8x1xf32> to vector<8x8xf32>
    %348 = arith.mulf %343, %347 : vector<8x8xf32>
    %349 = vector.extract_strided_slice %316 {offsets = [0, 0], sizes = [8, 8], strides = [1, 1]} : vector<8x32xf32> to vector<8x8xf32>
    %cst_153 = arith.constant dense<0.000000e+00> : vector<8x8xf32>
    %350 = tpu.matmul %348, %349, %cst_153 {dimension_numbers = #tpu.dot_dimension_numbers<[1], [0], [0], [1], [0, 0, 1, 1], [], []>} : vector<8x8xf32>, vector<8x8xf32>, vector<8x8xf32> -> vector<8x8xf32>
    %351 = vector.extract_strided_slice %22 {offsets = [0, 0], sizes = [8, 32], strides = [1, 1]} : vector<32x32xf32> to vector<8x32xf32>
    %cst_154 = arith.constant dense<0.000000e+00> : vector<8x32xf32>
    %352 = tpu.matmul %350, %351, %cst_154 {dimension_numbers = #tpu.dot_dimension_numbers<[1], [0], [0], [1], [0, 0, 1, 1], [], []>} : vector<8x8xf32>, vector<8x32xf32>, vector<8x32xf32> -> vector<8x32xf32>
    %353 = arith.addf %326, %352 : vector<8x32xf32>
    %354 = vector.extract_strided_slice %328 {offsets = [0, 8], sizes = [8, 8], strides = [1, 1]} : vector<8x32xf32> to vector<8x8xf32>
    %355 = vector.extract_strided_slice %330 {offsets = [0, 8], sizes = [8, 8], strides = [1, 1]} : vector<8x32xf32> to vector<8x8xf32>
    %356 = tpu.transpose %355, [1, 0] : vector<8x8xf32> -> vector<8x8xf32>
    %cst_155 = arith.constant dense<0.000000e+00> : vector<8x8xf32>
    %357 = tpu.matmul %354, %356, %cst_155 {dimension_numbers = #tpu.dot_dimension_numbers<[1], [0], [0], [1], [0, 0, 1, 1], [], []>} : vector<8x8xf32>, vector<8x8xf32>, vector<8x8xf32> -> vector<8x8xf32>
    %358 = vector.broadcast %39 : vector<1x8xf32> to vector<8x8xf32>
    %359 = arith.addf %357, %358 : vector<8x8xf32>
    %cst_156 = arith.constant 0.353553385 : f32
    %360 = vector.broadcast %cst_156 : f32 to vector<8x8xf32>
    %361 = arith.mulf %359, %360 : vector<8x8xf32>
    %cst_157 = arith.constant dense<0xFF800000> : vector<8xf32>
    %362 = vector.multi_reduction <maximumf>, %361, %cst_157 [1] : vector<8x8xf32> to vector<8xf32>
    %363 = vector.shape_cast %362 : vector<8xf32> to vector<8x1xf32>
    %364 = vector.broadcast %363 : vector<8x1xf32> to vector<8x8xf32>
    %365 = arith.subf %361, %364 : vector<8x8xf32>
    %366 = math.exp %365 : vector<8x8xf32>
    %cst_158 = arith.constant dense<0.000000e+00> : vector<8xf32>
    %367 = vector.multi_reduction <add>, %366, %cst_158 [1] : vector<8x8xf32> to vector<8xf32>
    %368 = vector.shape_cast %367 : vector<8xf32> to vector<8x1xf32>
    %369 = tpu.reciprocal %368 {approx = true} : vector<8x1xf32> -> vector<8x1xf32>
    %370 = vector.broadcast %369 : vector<8x1xf32> to vector<8x8xf32>
    %371 = arith.mulf %366, %370 : vector<8x8xf32>
    %372 = vector.extract_strided_slice %316 {offsets = [0, 8], sizes = [8, 8], strides = [1, 1]} : vector<8x32xf32> to vector<8x8xf32>
    %cst_159 = arith.constant dense<0.000000e+00> : vector<8x8xf32>
    %373 = tpu.matmul %371, %372, %cst_159 {dimension_numbers = #tpu.dot_dimension_numbers<[1], [0], [0], [1], [0, 0, 1, 1], [], []>} : vector<8x8xf32>, vector<8x8xf32>, vector<8x8xf32> -> vector<8x8xf32>
    %374 = vector.extract_strided_slice %22 {offsets = [8, 0], sizes = [8, 32], strides = [1, 1]} : vector<32x32xf32> to vector<8x32xf32>
    %cst_160 = arith.constant dense<0.000000e+00> : vector<8x32xf32>
    %375 = tpu.matmul %373, %374, %cst_160 {dimension_numbers = #tpu.dot_dimension_numbers<[1], [0], [0], [1], [0, 0, 1, 1], [], []>} : vector<8x8xf32>, vector<8x32xf32>, vector<8x32xf32> -> vector<8x32xf32>
    %376 = arith.addf %353, %375 : vector<8x32xf32>
    %377 = vector.extract_strided_slice %328 {offsets = [0, 16], sizes = [8, 8], strides = [1, 1]} : vector<8x32xf32> to vector<8x8xf32>
    %378 = vector.extract_strided_slice %330 {offsets = [0, 16], sizes = [8, 8], strides = [1, 1]} : vector<8x32xf32> to vector<8x8xf32>
    %379 = tpu.transpose %378, [1, 0] : vector<8x8xf32> -> vector<8x8xf32>
    %cst_161 = arith.constant dense<0.000000e+00> : vector<8x8xf32>
    %380 = tpu.matmul %377, %379, %cst_161 {dimension_numbers = #tpu.dot_dimension_numbers<[1], [0], [0], [1], [0, 0, 1, 1], [], []>} : vector<8x8xf32>, vector<8x8xf32>, vector<8x8xf32> -> vector<8x8xf32>
    %381 = vector.broadcast %39 : vector<1x8xf32> to vector<8x8xf32>
    %382 = arith.addf %380, %381 : vector<8x8xf32>
    %cst_162 = arith.constant 0.353553385 : f32
    %383 = vector.broadcast %cst_162 : f32 to vector<8x8xf32>
    %384 = arith.mulf %382, %383 : vector<8x8xf32>
    %cst_163 = arith.constant dense<0xFF800000> : vector<8xf32>
    %385 = vector.multi_reduction <maximumf>, %384, %cst_163 [1] : vector<8x8xf32> to vector<8xf32>
    %386 = vector.shape_cast %385 : vector<8xf32> to vector<8x1xf32>
    %387 = vector.broadcast %386 : vector<8x1xf32> to vector<8x8xf32>
    %388 = arith.subf %384, %387 : vector<8x8xf32>
    %389 = math.exp %388 : vector<8x8xf32>
    %cst_164 = arith.constant dense<0.000000e+00> : vector<8xf32>
    %390 = vector.multi_reduction <add>, %389, %cst_164 [1] : vector<8x8xf32> to vector<8xf32>
    %391 = vector.shape_cast %390 : vector<8xf32> to vector<8x1xf32>
    %392 = tpu.reciprocal %391 {approx = true} : vector<8x1xf32> -> vector<8x1xf32>
    %393 = vector.broadcast %392 : vector<8x1xf32> to vector<8x8xf32>
    %394 = arith.mulf %389, %393 : vector<8x8xf32>
    %395 = vector.extract_strided_slice %316 {offsets = [0, 16], sizes = [8, 8], strides = [1, 1]} : vector<8x32xf32> to vector<8x8xf32>
    %cst_165 = arith.constant dense<0.000000e+00> : vector<8x8xf32>
    %396 = tpu.matmul %394, %395, %cst_165 {dimension_numbers = #tpu.dot_dimension_numbers<[1], [0], [0], [1], [0, 0, 1, 1], [], []>} : vector<8x8xf32>, vector<8x8xf32>, vector<8x8xf32> -> vector<8x8xf32>
    %397 = vector.extract_strided_slice %22 {offsets = [16, 0], sizes = [8, 32], strides = [1, 1]} : vector<32x32xf32> to vector<8x32xf32>
    %cst_166 = arith.constant dense<0.000000e+00> : vector<8x32xf32>
    %398 = tpu.matmul %396, %397, %cst_166 {dimension_numbers = #tpu.dot_dimension_numbers<[1], [0], [0], [1], [0, 0, 1, 1], [], []>} : vector<8x8xf32>, vector<8x32xf32>, vector<8x32xf32> -> vector<8x32xf32>
    %399 = arith.addf %376, %398 : vector<8x32xf32>
    %400 = vector.extract_strided_slice %328 {offsets = [0, 24], sizes = [8, 8], strides = [1, 1]} : vector<8x32xf32> to vector<8x8xf32>
    %401 = vector.extract_strided_slice %330 {offsets = [0, 24], sizes = [8, 8], strides = [1, 1]} : vector<8x32xf32> to vector<8x8xf32>
    %402 = tpu.transpose %401, [1, 0] : vector<8x8xf32> -> vector<8x8xf32>
    %cst_167 = arith.constant dense<0.000000e+00> : vector<8x8xf32>
    %403 = tpu.matmul %400, %402, %cst_167 {dimension_numbers = #tpu.dot_dimension_numbers<[1], [0], [0], [1], [0, 0, 1, 1], [], []>} : vector<8x8xf32>, vector<8x8xf32>, vector<8x8xf32> -> vector<8x8xf32>
    %404 = vector.broadcast %39 : vector<1x8xf32> to vector<8x8xf32>
    %405 = arith.addf %403, %404 : vector<8x8xf32>
    %cst_168 = arith.constant 0.353553385 : f32
    %406 = vector.broadcast %cst_168 : f32 to vector<8x8xf32>
    %407 = arith.mulf %405, %406 : vector<8x8xf32>
    %cst_169 = arith.constant dense<0xFF800000> : vector<8xf32>
    %408 = vector.multi_reduction <maximumf>, %407, %cst_169 [1] : vector<8x8xf32> to vector<8xf32>
    %409 = vector.shape_cast %408 : vector<8xf32> to vector<8x1xf32>
    %410 = vector.broadcast %409 : vector<8x1xf32> to vector<8x8xf32>
    %411 = arith.subf %407, %410 : vector<8x8xf32>
    %412 = math.exp %411 : vector<8x8xf32>
    %cst_170 = arith.constant dense<0.000000e+00> : vector<8xf32>
    %413 = vector.multi_reduction <add>, %412, %cst_170 [1] : vector<8x8xf32> to vector<8xf32>
    %414 = vector.shape_cast %413 : vector<8xf32> to vector<8x1xf32>
    %415 = tpu.reciprocal %414 {approx = true} : vector<8x1xf32> -> vector<8x1xf32>
    %416 = vector.broadcast %415 : vector<8x1xf32> to vector<8x8xf32>
    %417 = arith.mulf %412, %416 : vector<8x8xf32>
    %418 = vector.extract_strided_slice %316 {offsets = [0, 24], sizes = [8, 8], strides = [1, 1]} : vector<8x32xf32> to vector<8x8xf32>
    %cst_171 = arith.constant dense<0.000000e+00> : vector<8x8xf32>
    %419 = tpu.matmul %417, %418, %cst_171 {dimension_numbers = #tpu.dot_dimension_numbers<[1], [0], [0], [1], [0, 0, 1, 1], [], []>} : vector<8x8xf32>, vector<8x8xf32>, vector<8x8xf32> -> vector<8x8xf32>
    %420 = vector.extract_strided_slice %22 {offsets = [24, 0], sizes = [8, 32], strides = [1, 1]} : vector<32x32xf32> to vector<8x32xf32>
    %cst_172 = arith.constant dense<0.000000e+00> : vector<8x32xf32>
    %421 = tpu.matmul %419, %420, %cst_172 {dimension_numbers = #tpu.dot_dimension_numbers<[1], [0], [0], [1], [0, 0, 1, 1], [], []>} : vector<8x8xf32>, vector<8x32xf32>, vector<8x32xf32> -> vector<8x32xf32>
    %422 = arith.addf %399, %421 : vector<8x32xf32>
    %cst_173 = arith.constant dense<0.000000e+00> : vector<8x32xf32>
    %423 = tpu.matmul %261, %24, %cst_173 {dimension_numbers = #tpu.dot_dimension_numbers<[1], [0], [0], [1], [0, 0, 1, 1], [], []>} : vector<8x32xf32>, vector<32x32xf32>, vector<8x32xf32> -> vector<8x32xf32>
    %424 = vector.broadcast %25 : vector<1x32xf32> to vector<8x32xf32>
    %425 = arith.addf %423, %424 : vector<8x32xf32>
    %426 = vector.broadcast %323 : vector<1x32xf32> to vector<8x32xf32>
    %427 = arith.mulf %426, %318 : vector<8x32xf32>
    %428 = vector.broadcast %323 : vector<1x32xf32> to vector<8x32xf32>
    %429 = arith.mulf %428, %317 : vector<8x32xf32>
    %430 = vector.extract_strided_slice %427 {offsets = [0, 0], sizes = [8, 8], strides = [1, 1]} : vector<8x32xf32> to vector<8x8xf32>
    %431 = vector.extract_strided_slice %429 {offsets = [0, 0], sizes = [8, 8], strides = [1, 1]} : vector<8x32xf32> to vector<8x8xf32>
    %432 = tpu.transpose %431, [1, 0] : vector<8x8xf32> -> vector<8x8xf32>
    %cst_174 = arith.constant dense<0.000000e+00> : vector<8x8xf32>
    %433 = tpu.matmul %430, %432, %cst_174 {dimension_numbers = #tpu.dot_dimension_numbers<[1], [0], [0], [1], [0, 0, 1, 1], [], []>} : vector<8x8xf32>, vector<8x8xf32>, vector<8x8xf32> -> vector<8x8xf32>
    %434 = vector.broadcast %45 : vector<1x8xf32> to vector<8x8xf32>
    %435 = arith.addf %433, %434 : vector<8x8xf32>
    %cst_175 = arith.constant 0.353553385 : f32
    %436 = vector.broadcast %cst_175 : f32 to vector<8x8xf32>
    %437 = arith.mulf %435, %436 : vector<8x8xf32>
    %cst_176 = arith.constant dense<0xFF800000> : vector<8xf32>
    %438 = vector.multi_reduction <maximumf>, %437, %cst_176 [1] : vector<8x8xf32> to vector<8xf32>
    %439 = vector.shape_cast %438 : vector<8xf32> to vector<8x1xf32>
    %440 = vector.broadcast %439 : vector<8x1xf32> to vector<8x8xf32>
    %441 = arith.subf %437, %440 : vector<8x8xf32>
    %442 = math.exp %441 : vector<8x8xf32>
    %cst_177 = arith.constant dense<0.000000e+00> : vector<8xf32>
    %443 = vector.multi_reduction <add>, %442, %cst_177 [1] : vector<8x8xf32> to vector<8xf32>
    %444 = vector.shape_cast %443 : vector<8xf32> to vector<8x1xf32>
    %445 = tpu.reciprocal %444 {approx = true} : vector<8x1xf32> -> vector<8x1xf32>
    %446 = vector.broadcast %445 : vector<8x1xf32> to vector<8x8xf32>
    %447 = arith.mulf %442, %446 : vector<8x8xf32>
    %448 = vector.extract_strided_slice %319 {offsets = [0, 0], sizes = [8, 8], strides = [1, 1]} : vector<8x32xf32> to vector<8x8xf32>
    %cst_178 = arith.constant dense<0.000000e+00> : vector<8x8xf32>
    %449 = tpu.matmul %447, %448, %cst_178 {dimension_numbers = #tpu.dot_dimension_numbers<[1], [0], [0], [1], [0, 0, 1, 1], [], []>} : vector<8x8xf32>, vector<8x8xf32>, vector<8x8xf32> -> vector<8x8xf32>
    %450 = vector.extract_strided_slice %24 {offsets = [0, 0], sizes = [8, 32], strides = [1, 1]} : vector<32x32xf32> to vector<8x32xf32>
    %cst_179 = arith.constant dense<0.000000e+00> : vector<8x32xf32>
    %451 = tpu.matmul %449, %450, %cst_179 {dimension_numbers = #tpu.dot_dimension_numbers<[1], [0], [0], [1], [0, 0, 1, 1], [], []>} : vector<8x8xf32>, vector<8x32xf32>, vector<8x32xf32> -> vector<8x32xf32>
    %452 = arith.addf %425, %451 : vector<8x32xf32>
    %453 = vector.extract_strided_slice %427 {offsets = [0, 8], sizes = [8, 8], strides = [1, 1]} : vector<8x32xf32> to vector<8x8xf32>
    %454 = vector.extract_strided_slice %429 {offsets = [0, 8], sizes = [8, 8], strides = [1, 1]} : vector<8x32xf32> to vector<8x8xf32>
    %455 = tpu.transpose %454, [1, 0] : vector<8x8xf32> -> vector<8x8xf32>
    %cst_180 = arith.constant dense<0.000000e+00> : vector<8x8xf32>
    %456 = tpu.matmul %453, %455, %cst_180 {dimension_numbers = #tpu.dot_dimension_numbers<[1], [0], [0], [1], [0, 0, 1, 1], [], []>} : vector<8x8xf32>, vector<8x8xf32>, vector<8x8xf32> -> vector<8x8xf32>
    %457 = vector.broadcast %45 : vector<1x8xf32> to vector<8x8xf32>
    %458 = arith.addf %456, %457 : vector<8x8xf32>
    %cst_181 = arith.constant 0.353553385 : f32
    %459 = vector.broadcast %cst_181 : f32 to vector<8x8xf32>
    %460 = arith.mulf %458, %459 : vector<8x8xf32>
    %cst_182 = arith.constant dense<0xFF800000> : vector<8xf32>
    %461 = vector.multi_reduction <maximumf>, %460, %cst_182 [1] : vector<8x8xf32> to vector<8xf32>
    %462 = vector.shape_cast %461 : vector<8xf32> to vector<8x1xf32>
    %463 = vector.broadcast %462 : vector<8x1xf32> to vector<8x8xf32>
    %464 = arith.subf %460, %463 : vector<8x8xf32>
    %465 = math.exp %464 : vector<8x8xf32>
    %cst_183 = arith.constant dense<0.000000e+00> : vector<8xf32>
    %466 = vector.multi_reduction <add>, %465, %cst_183 [1] : vector<8x8xf32> to vector<8xf32>
    %467 = vector.shape_cast %466 : vector<8xf32> to vector<8x1xf32>
    %468 = tpu.reciprocal %467 {approx = true} : vector<8x1xf32> -> vector<8x1xf32>
    %469 = vector.broadcast %468 : vector<8x1xf32> to vector<8x8xf32>
    %470 = arith.mulf %465, %469 : vector<8x8xf32>
    %471 = vector.extract_strided_slice %319 {offsets = [0, 8], sizes = [8, 8], strides = [1, 1]} : vector<8x32xf32> to vector<8x8xf32>
    %cst_184 = arith.constant dense<0.000000e+00> : vector<8x8xf32>
    %472 = tpu.matmul %470, %471, %cst_184 {dimension_numbers = #tpu.dot_dimension_numbers<[1], [0], [0], [1], [0, 0, 1, 1], [], []>} : vector<8x8xf32>, vector<8x8xf32>, vector<8x8xf32> -> vector<8x8xf32>
    %473 = vector.extract_strided_slice %24 {offsets = [8, 0], sizes = [8, 32], strides = [1, 1]} : vector<32x32xf32> to vector<8x32xf32>
    %cst_185 = arith.constant dense<0.000000e+00> : vector<8x32xf32>
    %474 = tpu.matmul %472, %473, %cst_185 {dimension_numbers = #tpu.dot_dimension_numbers<[1], [0], [0], [1], [0, 0, 1, 1], [], []>} : vector<8x8xf32>, vector<8x32xf32>, vector<8x32xf32> -> vector<8x32xf32>
    %475 = arith.addf %452, %474 : vector<8x32xf32>
    %476 = vector.extract_strided_slice %427 {offsets = [0, 16], sizes = [8, 8], strides = [1, 1]} : vector<8x32xf32> to vector<8x8xf32>
    %477 = vector.extract_strided_slice %429 {offsets = [0, 16], sizes = [8, 8], strides = [1, 1]} : vector<8x32xf32> to vector<8x8xf32>
    %478 = tpu.transpose %477, [1, 0] : vector<8x8xf32> -> vector<8x8xf32>
    %cst_186 = arith.constant dense<0.000000e+00> : vector<8x8xf32>
    %479 = tpu.matmul %476, %478, %cst_186 {dimension_numbers = #tpu.dot_dimension_numbers<[1], [0], [0], [1], [0, 0, 1, 1], [], []>} : vector<8x8xf32>, vector<8x8xf32>, vector<8x8xf32> -> vector<8x8xf32>
    %480 = vector.broadcast %45 : vector<1x8xf32> to vector<8x8xf32>
    %481 = arith.addf %479, %480 : vector<8x8xf32>
    %cst_187 = arith.constant 0.353553385 : f32
    %482 = vector.broadcast %cst_187 : f32 to vector<8x8xf32>
    %483 = arith.mulf %481, %482 : vector<8x8xf32>
    %cst_188 = arith.constant dense<0xFF800000> : vector<8xf32>
    %484 = vector.multi_reduction <maximumf>, %483, %cst_188 [1] : vector<8x8xf32> to vector<8xf32>
    %485 = vector.shape_cast %484 : vector<8xf32> to vector<8x1xf32>
    %486 = vector.broadcast %485 : vector<8x1xf32> to vector<8x8xf32>
    %487 = arith.subf %483, %486 : vector<8x8xf32>
    %488 = math.exp %487 : vector<8x8xf32>
    %cst_189 = arith.constant dense<0.000000e+00> : vector<8xf32>
    %489 = vector.multi_reduction <add>, %488, %cst_189 [1] : vector<8x8xf32> to vector<8xf32>
    %490 = vector.shape_cast %489 : vector<8xf32> to vector<8x1xf32>
    %491 = tpu.reciprocal %490 {approx = true} : vector<8x1xf32> -> vector<8x1xf32>
    %492 = vector.broadcast %491 : vector<8x1xf32> to vector<8x8xf32>
    %493 = arith.mulf %488, %492 : vector<8x8xf32>
    %494 = vector.extract_strided_slice %319 {offsets = [0, 16], sizes = [8, 8], strides = [1, 1]} : vector<8x32xf32> to vector<8x8xf32>
    %cst_190 = arith.constant dense<0.000000e+00> : vector<8x8xf32>
    %495 = tpu.matmul %493, %494, %cst_190 {dimension_numbers = #tpu.dot_dimension_numbers<[1], [0], [0], [1], [0, 0, 1, 1], [], []>} : vector<8x8xf32>, vector<8x8xf32>, vector<8x8xf32> -> vector<8x8xf32>
    %496 = vector.extract_strided_slice %24 {offsets = [16, 0], sizes = [8, 32], strides = [1, 1]} : vector<32x32xf32> to vector<8x32xf32>
    %cst_191 = arith.constant dense<0.000000e+00> : vector<8x32xf32>
    %497 = tpu.matmul %495, %496, %cst_191 {dimension_numbers = #tpu.dot_dimension_numbers<[1], [0], [0], [1], [0, 0, 1, 1], [], []>} : vector<8x8xf32>, vector<8x32xf32>, vector<8x32xf32> -> vector<8x32xf32>
    %498 = arith.addf %475, %497 : vector<8x32xf32>
    %499 = vector.extract_strided_slice %427 {offsets = [0, 24], sizes = [8, 8], strides = [1, 1]} : vector<8x32xf32> to vector<8x8xf32>
    %500 = vector.extract_strided_slice %429 {offsets = [0, 24], sizes = [8, 8], strides = [1, 1]} : vector<8x32xf32> to vector<8x8xf32>
    %501 = tpu.transpose %500, [1, 0] : vector<8x8xf32> -> vector<8x8xf32>
    %cst_192 = arith.constant dense<0.000000e+00> : vector<8x8xf32>
    %502 = tpu.matmul %499, %501, %cst_192 {dimension_numbers = #tpu.dot_dimension_numbers<[1], [0], [0], [1], [0, 0, 1, 1], [], []>} : vector<8x8xf32>, vector<8x8xf32>, vector<8x8xf32> -> vector<8x8xf32>
    %503 = vector.broadcast %45 : vector<1x8xf32> to vector<8x8xf32>
    %504 = arith.addf %502, %503 : vector<8x8xf32>
    %cst_193 = arith.constant 0.353553385 : f32
    %505 = vector.broadcast %cst_193 : f32 to vector<8x8xf32>
    %506 = arith.mulf %504, %505 : vector<8x8xf32>
    %cst_194 = arith.constant dense<0xFF800000> : vector<8xf32>
    %507 = vector.multi_reduction <maximumf>, %506, %cst_194 [1] : vector<8x8xf32> to vector<8xf32>
    %508 = vector.shape_cast %507 : vector<8xf32> to vector<8x1xf32>
    %509 = vector.broadcast %508 : vector<8x1xf32> to vector<8x8xf32>
    %510 = arith.subf %506, %509 : vector<8x8xf32>
    %511 = math.exp %510 : vector<8x8xf32>
    %cst_195 = arith.constant dense<0.000000e+00> : vector<8xf32>
    %512 = vector.multi_reduction <add>, %511, %cst_195 [1] : vector<8x8xf32> to vector<8xf32>
    %513 = vector.shape_cast %512 : vector<8xf32> to vector<8x1xf32>
    %514 = tpu.reciprocal %513 {approx = true} : vector<8x1xf32> -> vector<8x1xf32>
    %515 = vector.broadcast %514 : vector<8x1xf32> to vector<8x8xf32>
    %516 = arith.mulf %511, %515 : vector<8x8xf32>
    %517 = vector.extract_strided_slice %319 {offsets = [0, 24], sizes = [8, 8], strides = [1, 1]} : vector<8x32xf32> to vector<8x8xf32>
    %cst_196 = arith.constant dense<0.000000e+00> : vector<8x8xf32>
    %518 = tpu.matmul %516, %517, %cst_196 {dimension_numbers = #tpu.dot_dimension_numbers<[1], [0], [0], [1], [0, 0, 1, 1], [], []>} : vector<8x8xf32>, vector<8x8xf32>, vector<8x8xf32> -> vector<8x8xf32>
    %519 = vector.extract_strided_slice %24 {offsets = [24, 0], sizes = [8, 32], strides = [1, 1]} : vector<32x32xf32> to vector<8x32xf32>
    %cst_197 = arith.constant dense<0.000000e+00> : vector<8x32xf32>
    %520 = tpu.matmul %518, %519, %cst_197 {dimension_numbers = #tpu.dot_dimension_numbers<[1], [0], [0], [1], [0, 0, 1, 1], [], []>} : vector<8x8xf32>, vector<8x32xf32>, vector<8x32xf32> -> vector<8x32xf32>
    %521 = arith.addf %498, %520 : vector<8x32xf32>
    %cst_198 = arith.constant 0.000000e+00 : f32
    %522 = vector.broadcast %cst_198 : f32 to vector<8x32xf32>
    %523 = arith.maximumf %422, %522 : vector<8x32xf32>
    %cst_199 = arith.constant dense<0.000000e+00> : vector<8x96xf32>
    %524 = tpu.matmul %523, %4, %cst_199 {dimension_numbers = #tpu.dot_dimension_numbers<[1], [0], [0], [1], [0, 0, 1, 1], [], []>} : vector<8x32xf32>, vector<32x96xf32>, vector<8x96xf32> -> vector<8x96xf32>
    %525 = vector.broadcast %5 : vector<1x96xf32> to vector<8x96xf32>
    %526 = arith.addf %524, %525 : vector<8x96xf32>
    %527 = vector.broadcast %31 : vector<8x1xf32> to vector<8x96xf32>
    %528 = arith.mulf %526, %527 : vector<8x96xf32>
    %cst_200 = arith.constant 0.000000e+00 : f32
    %529 = vector.broadcast %cst_200 : f32 to vector<8x32xf32>
    %530 = arith.maximumf %521, %529 : vector<8x32xf32>
    %cst_201 = arith.constant dense<0.000000e+00> : vector<8x96xf32>
    %531 = tpu.matmul %530, %6, %cst_201 {dimension_numbers = #tpu.dot_dimension_numbers<[1], [0], [0], [1], [0, 0, 1, 1], [], []>} : vector<8x32xf32>, vector<32x96xf32>, vector<8x96xf32> -> vector<8x96xf32>
    %532 = vector.broadcast %7 : vector<1x96xf32> to vector<8x96xf32>
    %533 = arith.addf %531, %532 : vector<8x96xf32>
    %534 = vector.broadcast %33 : vector<8x1xf32> to vector<8x96xf32>
    %535 = arith.mulf %533, %534 : vector<8x96xf32>
    %536 = vector.extract_strided_slice %528 {offsets = [0, 0], sizes = [8, 32], strides = [1, 1]} : vector<8x96xf32> to vector<8x32xf32>
    %537 = vector.extract_strided_slice %528 {offsets = [0, 32], sizes = [8, 32], strides = [1, 1]} : vector<8x96xf32> to vector<8x32xf32>
    %538 = vector.extract_strided_slice %528 {offsets = [0, 64], sizes = [8, 32], strides = [1, 1]} : vector<8x96xf32> to vector<8x32xf32>
    %539 = vector.extract_strided_slice %535 {offsets = [0, 0], sizes = [8, 32], strides = [1, 1]} : vector<8x96xf32> to vector<8x32xf32>
    %540 = vector.extract_strided_slice %535 {offsets = [0, 32], sizes = [8, 32], strides = [1, 1]} : vector<8x96xf32> to vector<8x32xf32>
    %541 = vector.extract_strided_slice %535 {offsets = [0, 64], sizes = [8, 32], strides = [1, 1]} : vector<8x96xf32> to vector<8x32xf32>
    %cst_202 = arith.constant dense<0.000000e+00> : vector<8x32xf32>
    %542 = tpu.matmul %422, %8, %cst_202 {dimension_numbers = #tpu.dot_dimension_numbers<[1], [0], [0], [1], [0, 0, 1, 1], [], []>} : vector<8x32xf32>, vector<32x32xf32>, vector<8x32xf32> -> vector<8x32xf32>
    %543 = vector.broadcast %10 : vector<1x32xf32> to vector<8x32xf32>
    %544 = arith.addf %542, %543 : vector<8x32xf32>
    %545 = vector.extract_strided_slice %537 {offsets = [0, 0], sizes = [8, 8], strides = [1, 1]} : vector<8x32xf32> to vector<8x8xf32>
    %546 = vector.extract_strided_slice %539 {offsets = [0, 0], sizes = [8, 8], strides = [1, 1]} : vector<8x32xf32> to vector<8x8xf32>
    %547 = tpu.transpose %546, [1, 0] : vector<8x8xf32> -> vector<8x8xf32>
    %cst_203 = arith.constant dense<0.000000e+00> : vector<8x8xf32>
    %548 = tpu.matmul %545, %547, %cst_203 {dimension_numbers = #tpu.dot_dimension_numbers<[1], [0], [0], [1], [0, 0, 1, 1], [], []>} : vector<8x8xf32>, vector<8x8xf32>, vector<8x8xf32> -> vector<8x8xf32>
    %549 = vector.broadcast %45 : vector<1x8xf32> to vector<8x8xf32>
    %550 = arith.addf %548, %549 : vector<8x8xf32>
    %cst_204 = arith.constant 0.353553385 : f32
    %551 = vector.broadcast %cst_204 : f32 to vector<8x8xf32>
    %552 = arith.mulf %550, %551 : vector<8x8xf32>
    %cst_205 = arith.constant dense<0xFF800000> : vector<8xf32>
    %553 = vector.multi_reduction <maximumf>, %552, %cst_205 [1] : vector<8x8xf32> to vector<8xf32>
    %554 = vector.shape_cast %553 : vector<8xf32> to vector<8x1xf32>
    %555 = vector.broadcast %554 : vector<8x1xf32> to vector<8x8xf32>
    %556 = arith.subf %552, %555 : vector<8x8xf32>
    %557 = math.exp %556 : vector<8x8xf32>
    %cst_206 = arith.constant dense<0.000000e+00> : vector<8xf32>
    %558 = vector.multi_reduction <add>, %557, %cst_206 [1] : vector<8x8xf32> to vector<8xf32>
    %559 = vector.shape_cast %558 : vector<8xf32> to vector<8x1xf32>
    %560 = tpu.reciprocal %559 {approx = true} : vector<8x1xf32> -> vector<8x1xf32>
    %561 = vector.broadcast %560 : vector<8x1xf32> to vector<8x8xf32>
    %562 = arith.mulf %557, %561 : vector<8x8xf32>
    %563 = vector.extract_strided_slice %541 {offsets = [0, 0], sizes = [8, 8], strides = [1, 1]} : vector<8x32xf32> to vector<8x8xf32>
    %cst_207 = arith.constant dense<0.000000e+00> : vector<8x8xf32>
    %564 = tpu.matmul %562, %563, %cst_207 {dimension_numbers = #tpu.dot_dimension_numbers<[1], [0], [0], [1], [0, 0, 1, 1], [], []>} : vector<8x8xf32>, vector<8x8xf32>, vector<8x8xf32> -> vector<8x8xf32>
    %565 = vector.extract_strided_slice %9 {offsets = [0, 0], sizes = [8, 32], strides = [1, 1]} : vector<32x32xf32> to vector<8x32xf32>
    %cst_208 = arith.constant dense<0.000000e+00> : vector<8x32xf32>
    %566 = tpu.matmul %564, %565, %cst_208 {dimension_numbers = #tpu.dot_dimension_numbers<[1], [0], [0], [1], [0, 0, 1, 1], [], []>} : vector<8x8xf32>, vector<8x32xf32>, vector<8x32xf32> -> vector<8x32xf32>
    %567 = arith.addf %544, %566 : vector<8x32xf32>
    %568 = vector.extract_strided_slice %537 {offsets = [0, 8], sizes = [8, 8], strides = [1, 1]} : vector<8x32xf32> to vector<8x8xf32>
    %569 = vector.extract_strided_slice %539 {offsets = [0, 8], sizes = [8, 8], strides = [1, 1]} : vector<8x32xf32> to vector<8x8xf32>
    %570 = tpu.transpose %569, [1, 0] : vector<8x8xf32> -> vector<8x8xf32>
    %cst_209 = arith.constant dense<0.000000e+00> : vector<8x8xf32>
    %571 = tpu.matmul %568, %570, %cst_209 {dimension_numbers = #tpu.dot_dimension_numbers<[1], [0], [0], [1], [0, 0, 1, 1], [], []>} : vector<8x8xf32>, vector<8x8xf32>, vector<8x8xf32> -> vector<8x8xf32>
    %572 = vector.broadcast %45 : vector<1x8xf32> to vector<8x8xf32>
    %573 = arith.addf %571, %572 : vector<8x8xf32>
    %cst_210 = arith.constant 0.353553385 : f32
    %574 = vector.broadcast %cst_210 : f32 to vector<8x8xf32>
    %575 = arith.mulf %573, %574 : vector<8x8xf32>
    %cst_211 = arith.constant dense<0xFF800000> : vector<8xf32>
    %576 = vector.multi_reduction <maximumf>, %575, %cst_211 [1] : vector<8x8xf32> to vector<8xf32>
    %577 = vector.shape_cast %576 : vector<8xf32> to vector<8x1xf32>
    %578 = vector.broadcast %577 : vector<8x1xf32> to vector<8x8xf32>
    %579 = arith.subf %575, %578 : vector<8x8xf32>
    %580 = math.exp %579 : vector<8x8xf32>
    %cst_212 = arith.constant dense<0.000000e+00> : vector<8xf32>
    %581 = vector.multi_reduction <add>, %580, %cst_212 [1] : vector<8x8xf32> to vector<8xf32>
    %582 = vector.shape_cast %581 : vector<8xf32> to vector<8x1xf32>
    %583 = tpu.reciprocal %582 {approx = true} : vector<8x1xf32> -> vector<8x1xf32>
    %584 = vector.broadcast %583 : vector<8x1xf32> to vector<8x8xf32>
    %585 = arith.mulf %580, %584 : vector<8x8xf32>
    %586 = vector.extract_strided_slice %541 {offsets = [0, 8], sizes = [8, 8], strides = [1, 1]} : vector<8x32xf32> to vector<8x8xf32>
    %cst_213 = arith.constant dense<0.000000e+00> : vector<8x8xf32>
    %587 = tpu.matmul %585, %586, %cst_213 {dimension_numbers = #tpu.dot_dimension_numbers<[1], [0], [0], [1], [0, 0, 1, 1], [], []>} : vector<8x8xf32>, vector<8x8xf32>, vector<8x8xf32> -> vector<8x8xf32>
    %588 = vector.extract_strided_slice %9 {offsets = [8, 0], sizes = [8, 32], strides = [1, 1]} : vector<32x32xf32> to vector<8x32xf32>
    %cst_214 = arith.constant dense<0.000000e+00> : vector<8x32xf32>
    %589 = tpu.matmul %587, %588, %cst_214 {dimension_numbers = #tpu.dot_dimension_numbers<[1], [0], [0], [1], [0, 0, 1, 1], [], []>} : vector<8x8xf32>, vector<8x32xf32>, vector<8x32xf32> -> vector<8x32xf32>
    %590 = arith.addf %567, %589 : vector<8x32xf32>
    %591 = vector.extract_strided_slice %537 {offsets = [0, 16], sizes = [8, 8], strides = [1, 1]} : vector<8x32xf32> to vector<8x8xf32>
    %592 = vector.extract_strided_slice %539 {offsets = [0, 16], sizes = [8, 8], strides = [1, 1]} : vector<8x32xf32> to vector<8x8xf32>
    %593 = tpu.transpose %592, [1, 0] : vector<8x8xf32> -> vector<8x8xf32>
    %cst_215 = arith.constant dense<0.000000e+00> : vector<8x8xf32>
    %594 = tpu.matmul %591, %593, %cst_215 {dimension_numbers = #tpu.dot_dimension_numbers<[1], [0], [0], [1], [0, 0, 1, 1], [], []>} : vector<8x8xf32>, vector<8x8xf32>, vector<8x8xf32> -> vector<8x8xf32>
    %595 = vector.broadcast %45 : vector<1x8xf32> to vector<8x8xf32>
    %596 = arith.addf %594, %595 : vector<8x8xf32>
    %cst_216 = arith.constant 0.353553385 : f32
    %597 = vector.broadcast %cst_216 : f32 to vector<8x8xf32>
    %598 = arith.mulf %596, %597 : vector<8x8xf32>
    %cst_217 = arith.constant dense<0xFF800000> : vector<8xf32>
    %599 = vector.multi_reduction <maximumf>, %598, %cst_217 [1] : vector<8x8xf32> to vector<8xf32>
    %600 = vector.shape_cast %599 : vector<8xf32> to vector<8x1xf32>
    %601 = vector.broadcast %600 : vector<8x1xf32> to vector<8x8xf32>
    %602 = arith.subf %598, %601 : vector<8x8xf32>
    %603 = math.exp %602 : vector<8x8xf32>
    %cst_218 = arith.constant dense<0.000000e+00> : vector<8xf32>
    %604 = vector.multi_reduction <add>, %603, %cst_218 [1] : vector<8x8xf32> to vector<8xf32>
    %605 = vector.shape_cast %604 : vector<8xf32> to vector<8x1xf32>
    %606 = tpu.reciprocal %605 {approx = true} : vector<8x1xf32> -> vector<8x1xf32>
    %607 = vector.broadcast %606 : vector<8x1xf32> to vector<8x8xf32>
    %608 = arith.mulf %603, %607 : vector<8x8xf32>
    %609 = vector.extract_strided_slice %541 {offsets = [0, 16], sizes = [8, 8], strides = [1, 1]} : vector<8x32xf32> to vector<8x8xf32>
    %cst_219 = arith.constant dense<0.000000e+00> : vector<8x8xf32>
    %610 = tpu.matmul %608, %609, %cst_219 {dimension_numbers = #tpu.dot_dimension_numbers<[1], [0], [0], [1], [0, 0, 1, 1], [], []>} : vector<8x8xf32>, vector<8x8xf32>, vector<8x8xf32> -> vector<8x8xf32>
    %611 = vector.extract_strided_slice %9 {offsets = [16, 0], sizes = [8, 32], strides = [1, 1]} : vector<32x32xf32> to vector<8x32xf32>
    %cst_220 = arith.constant dense<0.000000e+00> : vector<8x32xf32>
    %612 = tpu.matmul %610, %611, %cst_220 {dimension_numbers = #tpu.dot_dimension_numbers<[1], [0], [0], [1], [0, 0, 1, 1], [], []>} : vector<8x8xf32>, vector<8x32xf32>, vector<8x32xf32> -> vector<8x32xf32>
    %613 = arith.addf %590, %612 : vector<8x32xf32>
    %614 = vector.extract_strided_slice %537 {offsets = [0, 24], sizes = [8, 8], strides = [1, 1]} : vector<8x32xf32> to vector<8x8xf32>
    %615 = vector.extract_strided_slice %539 {offsets = [0, 24], sizes = [8, 8], strides = [1, 1]} : vector<8x32xf32> to vector<8x8xf32>
    %616 = tpu.transpose %615, [1, 0] : vector<8x8xf32> -> vector<8x8xf32>
    %cst_221 = arith.constant dense<0.000000e+00> : vector<8x8xf32>
    %617 = tpu.matmul %614, %616, %cst_221 {dimension_numbers = #tpu.dot_dimension_numbers<[1], [0], [0], [1], [0, 0, 1, 1], [], []>} : vector<8x8xf32>, vector<8x8xf32>, vector<8x8xf32> -> vector<8x8xf32>
    %618 = vector.broadcast %45 : vector<1x8xf32> to vector<8x8xf32>
    %619 = arith.addf %617, %618 : vector<8x8xf32>
    %cst_222 = arith.constant 0.353553385 : f32
    %620 = vector.broadcast %cst_222 : f32 to vector<8x8xf32>
    %621 = arith.mulf %619, %620 : vector<8x8xf32>
    %cst_223 = arith.constant dense<0xFF800000> : vector<8xf32>
    %622 = vector.multi_reduction <maximumf>, %621, %cst_223 [1] : vector<8x8xf32> to vector<8xf32>
    %623 = vector.shape_cast %622 : vector<8xf32> to vector<8x1xf32>
    %624 = vector.broadcast %623 : vector<8x1xf32> to vector<8x8xf32>
    %625 = arith.subf %621, %624 : vector<8x8xf32>
    %626 = math.exp %625 : vector<8x8xf32>
    %cst_224 = arith.constant dense<0.000000e+00> : vector<8xf32>
    %627 = vector.multi_reduction <add>, %626, %cst_224 [1] : vector<8x8xf32> to vector<8xf32>
    %628 = vector.shape_cast %627 : vector<8xf32> to vector<8x1xf32>
    %629 = tpu.reciprocal %628 {approx = true} : vector<8x1xf32> -> vector<8x1xf32>
    %630 = vector.broadcast %629 : vector<8x1xf32> to vector<8x8xf32>
    %631 = arith.mulf %626, %630 : vector<8x8xf32>
    %632 = vector.extract_strided_slice %541 {offsets = [0, 24], sizes = [8, 8], strides = [1, 1]} : vector<8x32xf32> to vector<8x8xf32>
    %cst_225 = arith.constant dense<0.000000e+00> : vector<8x8xf32>
    %633 = tpu.matmul %631, %632, %cst_225 {dimension_numbers = #tpu.dot_dimension_numbers<[1], [0], [0], [1], [0, 0, 1, 1], [], []>} : vector<8x8xf32>, vector<8x8xf32>, vector<8x8xf32> -> vector<8x8xf32>
    %634 = vector.extract_strided_slice %9 {offsets = [24, 0], sizes = [8, 32], strides = [1, 1]} : vector<32x32xf32> to vector<8x32xf32>
    %cst_226 = arith.constant dense<0.000000e+00> : vector<8x32xf32>
    %635 = tpu.matmul %633, %634, %cst_226 {dimension_numbers = #tpu.dot_dimension_numbers<[1], [0], [0], [1], [0, 0, 1, 1], [], []>} : vector<8x8xf32>, vector<8x32xf32>, vector<8x32xf32> -> vector<8x32xf32>
    %636 = arith.addf %613, %635 : vector<8x32xf32>
    %cst_227 = arith.constant dense<0.000000e+00> : vector<8x32xf32>
    %637 = tpu.matmul %521, %11, %cst_227 {dimension_numbers = #tpu.dot_dimension_numbers<[1], [0], [0], [1], [0, 0, 1, 1], [], []>} : vector<8x32xf32>, vector<32x32xf32>, vector<8x32xf32> -> vector<8x32xf32>
    %638 = vector.broadcast %13 : vector<1x32xf32> to vector<8x32xf32>
    %639 = arith.addf %637, %638 : vector<8x32xf32>
    %640 = vector.extract_strided_slice %540 {offsets = [0, 0], sizes = [8, 8], strides = [1, 1]} : vector<8x32xf32> to vector<8x8xf32>
    %641 = vector.extract_strided_slice %536 {offsets = [0, 0], sizes = [8, 8], strides = [1, 1]} : vector<8x32xf32> to vector<8x8xf32>
    %642 = tpu.transpose %641, [1, 0] : vector<8x8xf32> -> vector<8x8xf32>
    %cst_228 = arith.constant dense<0.000000e+00> : vector<8x8xf32>
    %643 = tpu.matmul %640, %642, %cst_228 {dimension_numbers = #tpu.dot_dimension_numbers<[1], [0], [0], [1], [0, 0, 1, 1], [], []>} : vector<8x8xf32>, vector<8x8xf32>, vector<8x8xf32> -> vector<8x8xf32>
    %644 = vector.broadcast %39 : vector<1x8xf32> to vector<8x8xf32>
    %645 = arith.addf %643, %644 : vector<8x8xf32>
    %cst_229 = arith.constant 0.353553385 : f32
    %646 = vector.broadcast %cst_229 : f32 to vector<8x8xf32>
    %647 = arith.mulf %645, %646 : vector<8x8xf32>
    %cst_230 = arith.constant dense<0xFF800000> : vector<8xf32>
    %648 = vector.multi_reduction <maximumf>, %647, %cst_230 [1] : vector<8x8xf32> to vector<8xf32>
    %649 = vector.shape_cast %648 : vector<8xf32> to vector<8x1xf32>
    %650 = vector.broadcast %649 : vector<8x1xf32> to vector<8x8xf32>
    %651 = arith.subf %647, %650 : vector<8x8xf32>
    %652 = math.exp %651 : vector<8x8xf32>
    %cst_231 = arith.constant dense<0.000000e+00> : vector<8xf32>
    %653 = vector.multi_reduction <add>, %652, %cst_231 [1] : vector<8x8xf32> to vector<8xf32>
    %654 = vector.shape_cast %653 : vector<8xf32> to vector<8x1xf32>
    %655 = tpu.reciprocal %654 {approx = true} : vector<8x1xf32> -> vector<8x1xf32>
    %656 = vector.broadcast %655 : vector<8x1xf32> to vector<8x8xf32>
    %657 = arith.mulf %652, %656 : vector<8x8xf32>
    %658 = vector.extract_strided_slice %538 {offsets = [0, 0], sizes = [8, 8], strides = [1, 1]} : vector<8x32xf32> to vector<8x8xf32>
    %cst_232 = arith.constant dense<0.000000e+00> : vector<8x8xf32>
    %659 = tpu.matmul %657, %658, %cst_232 {dimension_numbers = #tpu.dot_dimension_numbers<[1], [0], [0], [1], [0, 0, 1, 1], [], []>} : vector<8x8xf32>, vector<8x8xf32>, vector<8x8xf32> -> vector<8x8xf32>
    %660 = vector.extract_strided_slice %12 {offsets = [0, 0], sizes = [8, 32], strides = [1, 1]} : vector<32x32xf32> to vector<8x32xf32>
    %cst_233 = arith.constant dense<0.000000e+00> : vector<8x32xf32>
    %661 = tpu.matmul %659, %660, %cst_233 {dimension_numbers = #tpu.dot_dimension_numbers<[1], [0], [0], [1], [0, 0, 1, 1], [], []>} : vector<8x8xf32>, vector<8x32xf32>, vector<8x32xf32> -> vector<8x32xf32>
    %662 = arith.addf %639, %661 : vector<8x32xf32>
    %663 = vector.extract_strided_slice %540 {offsets = [0, 8], sizes = [8, 8], strides = [1, 1]} : vector<8x32xf32> to vector<8x8xf32>
    %664 = vector.extract_strided_slice %536 {offsets = [0, 8], sizes = [8, 8], strides = [1, 1]} : vector<8x32xf32> to vector<8x8xf32>
    %665 = tpu.transpose %664, [1, 0] : vector<8x8xf32> -> vector<8x8xf32>
    %cst_234 = arith.constant dense<0.000000e+00> : vector<8x8xf32>
    %666 = tpu.matmul %663, %665, %cst_234 {dimension_numbers = #tpu.dot_dimension_numbers<[1], [0], [0], [1], [0, 0, 1, 1], [], []>} : vector<8x8xf32>, vector<8x8xf32>, vector<8x8xf32> -> vector<8x8xf32>
    %667 = vector.broadcast %39 : vector<1x8xf32> to vector<8x8xf32>
    %668 = arith.addf %666, %667 : vector<8x8xf32>
    %cst_235 = arith.constant 0.353553385 : f32
    %669 = vector.broadcast %cst_235 : f32 to vector<8x8xf32>
    %670 = arith.mulf %668, %669 : vector<8x8xf32>
    %cst_236 = arith.constant dense<0xFF800000> : vector<8xf32>
    %671 = vector.multi_reduction <maximumf>, %670, %cst_236 [1] : vector<8x8xf32> to vector<8xf32>
    %672 = vector.shape_cast %671 : vector<8xf32> to vector<8x1xf32>
    %673 = vector.broadcast %672 : vector<8x1xf32> to vector<8x8xf32>
    %674 = arith.subf %670, %673 : vector<8x8xf32>
    %675 = math.exp %674 : vector<8x8xf32>
    %cst_237 = arith.constant dense<0.000000e+00> : vector<8xf32>
    %676 = vector.multi_reduction <add>, %675, %cst_237 [1] : vector<8x8xf32> to vector<8xf32>
    %677 = vector.shape_cast %676 : vector<8xf32> to vector<8x1xf32>
    %678 = tpu.reciprocal %677 {approx = true} : vector<8x1xf32> -> vector<8x1xf32>
    %679 = vector.broadcast %678 : vector<8x1xf32> to vector<8x8xf32>
    %680 = arith.mulf %675, %679 : vector<8x8xf32>
    %681 = vector.extract_strided_slice %538 {offsets = [0, 8], sizes = [8, 8], strides = [1, 1]} : vector<8x32xf32> to vector<8x8xf32>
    %cst_238 = arith.constant dense<0.000000e+00> : vector<8x8xf32>
    %682 = tpu.matmul %680, %681, %cst_238 {dimension_numbers = #tpu.dot_dimension_numbers<[1], [0], [0], [1], [0, 0, 1, 1], [], []>} : vector<8x8xf32>, vector<8x8xf32>, vector<8x8xf32> -> vector<8x8xf32>
    %683 = vector.extract_strided_slice %12 {offsets = [8, 0], sizes = [8, 32], strides = [1, 1]} : vector<32x32xf32> to vector<8x32xf32>
    %cst_239 = arith.constant dense<0.000000e+00> : vector<8x32xf32>
    %684 = tpu.matmul %682, %683, %cst_239 {dimension_numbers = #tpu.dot_dimension_numbers<[1], [0], [0], [1], [0, 0, 1, 1], [], []>} : vector<8x8xf32>, vector<8x32xf32>, vector<8x32xf32> -> vector<8x32xf32>
    %685 = arith.addf %662, %684 : vector<8x32xf32>
    %686 = vector.extract_strided_slice %540 {offsets = [0, 16], sizes = [8, 8], strides = [1, 1]} : vector<8x32xf32> to vector<8x8xf32>
    %687 = vector.extract_strided_slice %536 {offsets = [0, 16], sizes = [8, 8], strides = [1, 1]} : vector<8x32xf32> to vector<8x8xf32>
    %688 = tpu.transpose %687, [1, 0] : vector<8x8xf32> -> vector<8x8xf32>
    %cst_240 = arith.constant dense<0.000000e+00> : vector<8x8xf32>
    %689 = tpu.matmul %686, %688, %cst_240 {dimension_numbers = #tpu.dot_dimension_numbers<[1], [0], [0], [1], [0, 0, 1, 1], [], []>} : vector<8x8xf32>, vector<8x8xf32>, vector<8x8xf32> -> vector<8x8xf32>
    %690 = vector.broadcast %39 : vector<1x8xf32> to vector<8x8xf32>
    %691 = arith.addf %689, %690 : vector<8x8xf32>
    %cst_241 = arith.constant 0.353553385 : f32
    %692 = vector.broadcast %cst_241 : f32 to vector<8x8xf32>
    %693 = arith.mulf %691, %692 : vector<8x8xf32>
    %cst_242 = arith.constant dense<0xFF800000> : vector<8xf32>
    %694 = vector.multi_reduction <maximumf>, %693, %cst_242 [1] : vector<8x8xf32> to vector<8xf32>
    %695 = vector.shape_cast %694 : vector<8xf32> to vector<8x1xf32>
    %696 = vector.broadcast %695 : vector<8x1xf32> to vector<8x8xf32>
    %697 = arith.subf %693, %696 : vector<8x8xf32>
    %698 = math.exp %697 : vector<8x8xf32>
    %cst_243 = arith.constant dense<0.000000e+00> : vector<8xf32>
    %699 = vector.multi_reduction <add>, %698, %cst_243 [1] : vector<8x8xf32> to vector<8xf32>
    %700 = vector.shape_cast %699 : vector<8xf32> to vector<8x1xf32>
    %701 = tpu.reciprocal %700 {approx = true} : vector<8x1xf32> -> vector<8x1xf32>
    %702 = vector.broadcast %701 : vector<8x1xf32> to vector<8x8xf32>
    %703 = arith.mulf %698, %702 : vector<8x8xf32>
    %704 = vector.extract_strided_slice %538 {offsets = [0, 16], sizes = [8, 8], strides = [1, 1]} : vector<8x32xf32> to vector<8x8xf32>
    %cst_244 = arith.constant dense<0.000000e+00> : vector<8x8xf32>
    %705 = tpu.matmul %703, %704, %cst_244 {dimension_numbers = #tpu.dot_dimension_numbers<[1], [0], [0], [1], [0, 0, 1, 1], [], []>} : vector<8x8xf32>, vector<8x8xf32>, vector<8x8xf32> -> vector<8x8xf32>
    %706 = vector.extract_strided_slice %12 {offsets = [16, 0], sizes = [8, 32], strides = [1, 1]} : vector<32x32xf32> to vector<8x32xf32>
    %cst_245 = arith.constant dense<0.000000e+00> : vector<8x32xf32>
    %707 = tpu.matmul %705, %706, %cst_245 {dimension_numbers = #tpu.dot_dimension_numbers<[1], [0], [0], [1], [0, 0, 1, 1], [], []>} : vector<8x8xf32>, vector<8x32xf32>, vector<8x32xf32> -> vector<8x32xf32>
    %708 = arith.addf %685, %707 : vector<8x32xf32>
    %709 = vector.extract_strided_slice %540 {offsets = [0, 24], sizes = [8, 8], strides = [1, 1]} : vector<8x32xf32> to vector<8x8xf32>
    %710 = vector.extract_strided_slice %536 {offsets = [0, 24], sizes = [8, 8], strides = [1, 1]} : vector<8x32xf32> to vector<8x8xf32>
    %711 = tpu.transpose %710, [1, 0] : vector<8x8xf32> -> vector<8x8xf32>
    %cst_246 = arith.constant dense<0.000000e+00> : vector<8x8xf32>
    %712 = tpu.matmul %709, %711, %cst_246 {dimension_numbers = #tpu.dot_dimension_numbers<[1], [0], [0], [1], [0, 0, 1, 1], [], []>} : vector<8x8xf32>, vector<8x8xf32>, vector<8x8xf32> -> vector<8x8xf32>
    %713 = vector.broadcast %39 : vector<1x8xf32> to vector<8x8xf32>
    %714 = arith.addf %712, %713 : vector<8x8xf32>
    %cst_247 = arith.constant 0.353553385 : f32
    %715 = vector.broadcast %cst_247 : f32 to vector<8x8xf32>
    %716 = arith.mulf %714, %715 : vector<8x8xf32>
    %cst_248 = arith.constant dense<0xFF800000> : vector<8xf32>
    %717 = vector.multi_reduction <maximumf>, %716, %cst_248 [1] : vector<8x8xf32> to vector<8xf32>
    %718 = vector.shape_cast %717 : vector<8xf32> to vector<8x1xf32>
    %719 = vector.broadcast %718 : vector<8x1xf32> to vector<8x8xf32>
    %720 = arith.subf %716, %719 : vector<8x8xf32>
    %721 = math.exp %720 : vector<8x8xf32>
    %cst_249 = arith.constant dense<0.000000e+00> : vector<8xf32>
    %722 = vector.multi_reduction <add>, %721, %cst_249 [1] : vector<8x8xf32> to vector<8xf32>
    %723 = vector.shape_cast %722 : vector<8xf32> to vector<8x1xf32>
    %724 = tpu.reciprocal %723 {approx = true} : vector<8x1xf32> -> vector<8x1xf32>
    %725 = vector.broadcast %724 : vector<8x1xf32> to vector<8x8xf32>
    %726 = arith.mulf %721, %725 : vector<8x8xf32>
    %727 = vector.extract_strided_slice %538 {offsets = [0, 24], sizes = [8, 8], strides = [1, 1]} : vector<8x32xf32> to vector<8x8xf32>
    %cst_250 = arith.constant dense<0.000000e+00> : vector<8x8xf32>
    %728 = tpu.matmul %726, %727, %cst_250 {dimension_numbers = #tpu.dot_dimension_numbers<[1], [0], [0], [1], [0, 0, 1, 1], [], []>} : vector<8x8xf32>, vector<8x8xf32>, vector<8x8xf32> -> vector<8x8xf32>
    %729 = vector.extract_strided_slice %12 {offsets = [24, 0], sizes = [8, 32], strides = [1, 1]} : vector<32x32xf32> to vector<8x32xf32>
    %cst_251 = arith.constant dense<0.000000e+00> : vector<8x32xf32>
    %730 = tpu.matmul %728, %729, %cst_251 {dimension_numbers = #tpu.dot_dimension_numbers<[1], [0], [0], [1], [0, 0, 1, 1], [], []>} : vector<8x8xf32>, vector<8x32xf32>, vector<8x32xf32> -> vector<8x32xf32>
    %731 = arith.addf %708, %730 : vector<8x32xf32>
    %cst_252 = arith.constant dense<0.000000e+00> : vector<1xf32>
    %732 = vector.multi_reduction <add>, %31, %cst_252 [0] : vector<8x1xf32> to vector<1xf32>
    %733 = vector.shape_cast %732 : vector<1xf32> to vector<1x1xf32>
    %cst_253 = arith.constant dense<0.000000e+00> : vector<1xf32>
    %734 = vector.multi_reduction <add>, %33, %cst_253 [0] : vector<8x1xf32> to vector<1xf32>
    %735 = vector.shape_cast %734 : vector<1xf32> to vector<1x1xf32>
    %736 = vector.broadcast %31 : vector<8x1xf32> to vector<8x32xf32>
    %737 = arith.mulf %636, %736 : vector<8x32xf32>
    %cst_254 = arith.constant dense<0.000000e+00> : vector<32xf32>
    %738 = vector.multi_reduction <add>, %737, %cst_254 [0] : vector<8x32xf32> to vector<32xf32>
    %739 = vector.shape_cast %738 : vector<32xf32> to vector<1x32xf32>
    %740 = vector.broadcast %733 : vector<1x1xf32> to vector<1x32xf32>
    %741 = arith.divf %739, %740 : vector<1x32xf32>
    %742 = vector.broadcast %33 : vector<8x1xf32> to vector<8x32xf32>
    %743 = arith.mulf %731, %742 : vector<8x32xf32>
    %cst_255 = arith.constant dense<0.000000e+00> : vector<32xf32>
    %744 = vector.multi_reduction <add>, %743, %cst_255 [0] : vector<8x32xf32> to vector<32xf32>
    %745 = vector.shape_cast %744 : vector<32xf32> to vector<1x32xf32>
    %746 = vector.broadcast %735 : vector<1x1xf32> to vector<1x32xf32>
    %747 = arith.divf %745, %746 : vector<1x32xf32>
    %cst_256 = arith.constant 0.000000e+00 : f32
    %748 = vector.broadcast %cst_256 : f32 to vector<1x32xf32>
    %749 = arith.maximumf %741, %748 : vector<1x32xf32>
    %cst_257 = arith.constant dense<0.000000e+00> : vector<1x32xf32>
    %750 = tpu.matmul %749, %14, %cst_257 {dimension_numbers = #tpu.dot_dimension_numbers<[1], [0], [0], [1], [0, 0, 1, 1], [], []>} : vector<1x32xf32>, vector<32x32xf32>, vector<1x32xf32> -> vector<1x32xf32>
    %751 = arith.addf %750, %15 : vector<1x32xf32>
    %cst_258 = arith.constant 0.000000e+00 : f32
    %752 = vector.broadcast %cst_258 : f32 to vector<1x32xf32>
    %753 = arith.subf %752, %751 : vector<1x32xf32>
    %754 = math.exp %753 : vector<1x32xf32>
    %cst_259 = arith.constant 1.000000e+00 : f32
    %755 = vector.broadcast %cst_259 : f32 to vector<1x32xf32>
    %756 = arith.addf %755, %754 : vector<1x32xf32>
    %cst_260 = arith.constant 1.000000e+00 : f32
    %757 = vector.broadcast %cst_260 : f32 to vector<1x32xf32>
    %758 = arith.divf %757, %756 : vector<1x32xf32>
    %cst_261 = arith.constant 0.000000e+00 : f32
    %759 = vector.broadcast %cst_261 : f32 to vector<1x32xf32>
    %760 = arith.maximumf %747, %759 : vector<1x32xf32>
    %cst_262 = arith.constant dense<0.000000e+00> : vector<1x32xf32>
    %761 = tpu.matmul %760, %16, %cst_262 {dimension_numbers = #tpu.dot_dimension_numbers<[1], [0], [0], [1], [0, 0, 1, 1], [], []>} : vector<1x32xf32>, vector<32x32xf32>, vector<1x32xf32> -> vector<1x32xf32>
    %762 = arith.addf %761, %17 : vector<1x32xf32>
    %cst_263 = arith.constant 0.000000e+00 : f32
    %763 = vector.broadcast %cst_263 : f32 to vector<1x32xf32>
    %764 = arith.subf %763, %762 : vector<1x32xf32>
    %765 = math.exp %764 : vector<1x32xf32>
    %cst_264 = arith.constant 1.000000e+00 : f32
    %766 = vector.broadcast %cst_264 : f32 to vector<1x32xf32>
    %767 = arith.addf %766, %765 : vector<1x32xf32>
    %cst_265 = arith.constant 1.000000e+00 : f32
    %768 = vector.broadcast %cst_265 : f32 to vector<1x32xf32>
    %769 = arith.divf %768, %767 : vector<1x32xf32>
    %cst_266 = arith.constant 0.000000e+00 : f32
    %770 = vector.broadcast %cst_266 : f32 to vector<8x32xf32>
    %771 = arith.maximumf %636, %770 : vector<8x32xf32>
    %cst_267 = arith.constant dense<0.000000e+00> : vector<8x96xf32>
    %772 = tpu.matmul %771, %18, %cst_267 {dimension_numbers = #tpu.dot_dimension_numbers<[1], [0], [0], [1], [0, 0, 1, 1], [], []>} : vector<8x32xf32>, vector<32x96xf32>, vector<8x96xf32> -> vector<8x96xf32>
    %773 = vector.broadcast %19 : vector<1x96xf32> to vector<8x96xf32>
    %774 = arith.addf %772, %773 : vector<8x96xf32>
    %775 = vector.broadcast %31 : vector<8x1xf32> to vector<8x96xf32>
    %776 = arith.mulf %774, %775 : vector<8x96xf32>
    %cst_268 = arith.constant 0.000000e+00 : f32
    %777 = vector.broadcast %cst_268 : f32 to vector<8x32xf32>
    %778 = arith.maximumf %731, %777 : vector<8x32xf32>
    %cst_269 = arith.constant dense<0.000000e+00> : vector<8x96xf32>
    %779 = tpu.matmul %778, %20, %cst_269 {dimension_numbers = #tpu.dot_dimension_numbers<[1], [0], [0], [1], [0, 0, 1, 1], [], []>} : vector<8x32xf32>, vector<32x96xf32>, vector<8x96xf32> -> vector<8x96xf32>
    %780 = vector.broadcast %21 : vector<1x96xf32> to vector<8x96xf32>
    %781 = arith.addf %779, %780 : vector<8x96xf32>
    %782 = vector.broadcast %33 : vector<8x1xf32> to vector<8x96xf32>
    %783 = arith.mulf %781, %782 : vector<8x96xf32>
    %784 = vector.extract_strided_slice %776 {offsets = [0, 0], sizes = [8, 32], strides = [1, 1]} : vector<8x96xf32> to vector<8x32xf32>
    %785 = vector.extract_strided_slice %776 {offsets = [0, 32], sizes = [8, 32], strides = [1, 1]} : vector<8x96xf32> to vector<8x32xf32>
    %786 = vector.extract_strided_slice %776 {offsets = [0, 64], sizes = [8, 32], strides = [1, 1]} : vector<8x96xf32> to vector<8x32xf32>
    %787 = vector.extract_strided_slice %783 {offsets = [0, 0], sizes = [8, 32], strides = [1, 1]} : vector<8x96xf32> to vector<8x32xf32>
    %788 = vector.extract_strided_slice %783 {offsets = [0, 32], sizes = [8, 32], strides = [1, 1]} : vector<8x96xf32> to vector<8x32xf32>
    %789 = vector.extract_strided_slice %783 {offsets = [0, 64], sizes = [8, 32], strides = [1, 1]} : vector<8x96xf32> to vector<8x32xf32>
    %cst_270 = arith.constant 1.000000e+00 : f32
    %790 = vector.broadcast %cst_270 : f32 to vector<1x32xf32>
    %791 = arith.addf %790, %769 : vector<1x32xf32>
    %cst_271 = arith.constant 1.000000e+00 : f32
    %792 = vector.broadcast %cst_271 : f32 to vector<1x32xf32>
    %793 = arith.addf %792, %758 : vector<1x32xf32>
    %cst_272 = arith.constant dense<0.000000e+00> : vector<8x32xf32>
    %794 = tpu.matmul %636, %22, %cst_272 {dimension_numbers = #tpu.dot_dimension_numbers<[1], [0], [0], [1], [0, 0, 1, 1], [], []>} : vector<8x32xf32>, vector<32x32xf32>, vector<8x32xf32> -> vector<8x32xf32>
    %795 = vector.broadcast %23 : vector<1x32xf32> to vector<8x32xf32>
    %796 = arith.addf %794, %795 : vector<8x32xf32>
    %797 = vector.broadcast %791 : vector<1x32xf32> to vector<8x32xf32>
    %798 = arith.mulf %797, %785 : vector<8x32xf32>
    %799 = vector.broadcast %791 : vector<1x32xf32> to vector<8x32xf32>
    %800 = arith.mulf %799, %784 : vector<8x32xf32>
    %801 = vector.extract_strided_slice %798 {offsets = [0, 0], sizes = [8, 8], strides = [1, 1]} : vector<8x32xf32> to vector<8x8xf32>
    %802 = vector.extract_strided_slice %800 {offsets = [0, 0], sizes = [8, 8], strides = [1, 1]} : vector<8x32xf32> to vector<8x8xf32>
    %803 = tpu.transpose %802, [1, 0] : vector<8x8xf32> -> vector<8x8xf32>
    %cst_273 = arith.constant dense<0.000000e+00> : vector<8x8xf32>
    %804 = tpu.matmul %801, %803, %cst_273 {dimension_numbers = #tpu.dot_dimension_numbers<[1], [0], [0], [1], [0, 0, 1, 1], [], []>} : vector<8x8xf32>, vector<8x8xf32>, vector<8x8xf32> -> vector<8x8xf32>
    %805 = vector.broadcast %39 : vector<1x8xf32> to vector<8x8xf32>
    %806 = arith.addf %804, %805 : vector<8x8xf32>
    %cst_274 = arith.constant 0.353553385 : f32
    %807 = vector.broadcast %cst_274 : f32 to vector<8x8xf32>
    %808 = arith.mulf %806, %807 : vector<8x8xf32>
    %cst_275 = arith.constant dense<0xFF800000> : vector<8xf32>
    %809 = vector.multi_reduction <maximumf>, %808, %cst_275 [1] : vector<8x8xf32> to vector<8xf32>
    %810 = vector.shape_cast %809 : vector<8xf32> to vector<8x1xf32>
    %811 = vector.broadcast %810 : vector<8x1xf32> to vector<8x8xf32>
    %812 = arith.subf %808, %811 : vector<8x8xf32>
    %813 = math.exp %812 : vector<8x8xf32>
    %cst_276 = arith.constant dense<0.000000e+00> : vector<8xf32>
    %814 = vector.multi_reduction <add>, %813, %cst_276 [1] : vector<8x8xf32> to vector<8xf32>
    %815 = vector.shape_cast %814 : vector<8xf32> to vector<8x1xf32>
    %816 = tpu.reciprocal %815 {approx = true} : vector<8x1xf32> -> vector<8x1xf32>
    %817 = vector.broadcast %816 : vector<8x1xf32> to vector<8x8xf32>
    %818 = arith.mulf %813, %817 : vector<8x8xf32>
    %819 = vector.extract_strided_slice %786 {offsets = [0, 0], sizes = [8, 8], strides = [1, 1]} : vector<8x32xf32> to vector<8x8xf32>
    %cst_277 = arith.constant dense<0.000000e+00> : vector<8x8xf32>
    %820 = tpu.matmul %818, %819, %cst_277 {dimension_numbers = #tpu.dot_dimension_numbers<[1], [0], [0], [1], [0, 0, 1, 1], [], []>} : vector<8x8xf32>, vector<8x8xf32>, vector<8x8xf32> -> vector<8x8xf32>
    %821 = vector.extract_strided_slice %22 {offsets = [0, 0], sizes = [8, 32], strides = [1, 1]} : vector<32x32xf32> to vector<8x32xf32>
    %cst_278 = arith.constant dense<0.000000e+00> : vector<8x32xf32>
    %822 = tpu.matmul %820, %821, %cst_278 {dimension_numbers = #tpu.dot_dimension_numbers<[1], [0], [0], [1], [0, 0, 1, 1], [], []>} : vector<8x8xf32>, vector<8x32xf32>, vector<8x32xf32> -> vector<8x32xf32>
    %823 = arith.addf %796, %822 : vector<8x32xf32>
    %824 = vector.extract_strided_slice %798 {offsets = [0, 8], sizes = [8, 8], strides = [1, 1]} : vector<8x32xf32> to vector<8x8xf32>
    %825 = vector.extract_strided_slice %800 {offsets = [0, 8], sizes = [8, 8], strides = [1, 1]} : vector<8x32xf32> to vector<8x8xf32>
    %826 = tpu.transpose %825, [1, 0] : vector<8x8xf32> -> vector<8x8xf32>
    %cst_279 = arith.constant dense<0.000000e+00> : vector<8x8xf32>
    %827 = tpu.matmul %824, %826, %cst_279 {dimension_numbers = #tpu.dot_dimension_numbers<[1], [0], [0], [1], [0, 0, 1, 1], [], []>} : vector<8x8xf32>, vector<8x8xf32>, vector<8x8xf32> -> vector<8x8xf32>
    %828 = vector.broadcast %39 : vector<1x8xf32> to vector<8x8xf32>
    %829 = arith.addf %827, %828 : vector<8x8xf32>
    %cst_280 = arith.constant 0.353553385 : f32
    %830 = vector.broadcast %cst_280 : f32 to vector<8x8xf32>
    %831 = arith.mulf %829, %830 : vector<8x8xf32>
    %cst_281 = arith.constant dense<0xFF800000> : vector<8xf32>
    %832 = vector.multi_reduction <maximumf>, %831, %cst_281 [1] : vector<8x8xf32> to vector<8xf32>
    %833 = vector.shape_cast %832 : vector<8xf32> to vector<8x1xf32>
    %834 = vector.broadcast %833 : vector<8x1xf32> to vector<8x8xf32>
    %835 = arith.subf %831, %834 : vector<8x8xf32>
    %836 = math.exp %835 : vector<8x8xf32>
    %cst_282 = arith.constant dense<0.000000e+00> : vector<8xf32>
    %837 = vector.multi_reduction <add>, %836, %cst_282 [1] : vector<8x8xf32> to vector<8xf32>
    %838 = vector.shape_cast %837 : vector<8xf32> to vector<8x1xf32>
    %839 = tpu.reciprocal %838 {approx = true} : vector<8x1xf32> -> vector<8x1xf32>
    %840 = vector.broadcast %839 : vector<8x1xf32> to vector<8x8xf32>
    %841 = arith.mulf %836, %840 : vector<8x8xf32>
    %842 = vector.extract_strided_slice %786 {offsets = [0, 8], sizes = [8, 8], strides = [1, 1]} : vector<8x32xf32> to vector<8x8xf32>
    %cst_283 = arith.constant dense<0.000000e+00> : vector<8x8xf32>
    %843 = tpu.matmul %841, %842, %cst_283 {dimension_numbers = #tpu.dot_dimension_numbers<[1], [0], [0], [1], [0, 0, 1, 1], [], []>} : vector<8x8xf32>, vector<8x8xf32>, vector<8x8xf32> -> vector<8x8xf32>
    %844 = vector.extract_strided_slice %22 {offsets = [8, 0], sizes = [8, 32], strides = [1, 1]} : vector<32x32xf32> to vector<8x32xf32>
    %cst_284 = arith.constant dense<0.000000e+00> : vector<8x32xf32>
    %845 = tpu.matmul %843, %844, %cst_284 {dimension_numbers = #tpu.dot_dimension_numbers<[1], [0], [0], [1], [0, 0, 1, 1], [], []>} : vector<8x8xf32>, vector<8x32xf32>, vector<8x32xf32> -> vector<8x32xf32>
    %846 = arith.addf %823, %845 : vector<8x32xf32>
    %847 = vector.extract_strided_slice %798 {offsets = [0, 16], sizes = [8, 8], strides = [1, 1]} : vector<8x32xf32> to vector<8x8xf32>
    %848 = vector.extract_strided_slice %800 {offsets = [0, 16], sizes = [8, 8], strides = [1, 1]} : vector<8x32xf32> to vector<8x8xf32>
    %849 = tpu.transpose %848, [1, 0] : vector<8x8xf32> -> vector<8x8xf32>
    %cst_285 = arith.constant dense<0.000000e+00> : vector<8x8xf32>
    %850 = tpu.matmul %847, %849, %cst_285 {dimension_numbers = #tpu.dot_dimension_numbers<[1], [0], [0], [1], [0, 0, 1, 1], [], []>} : vector<8x8xf32>, vector<8x8xf32>, vector<8x8xf32> -> vector<8x8xf32>
    %851 = vector.broadcast %39 : vector<1x8xf32> to vector<8x8xf32>
    %852 = arith.addf %850, %851 : vector<8x8xf32>
    %cst_286 = arith.constant 0.353553385 : f32
    %853 = vector.broadcast %cst_286 : f32 to vector<8x8xf32>
    %854 = arith.mulf %852, %853 : vector<8x8xf32>
    %cst_287 = arith.constant dense<0xFF800000> : vector<8xf32>
    %855 = vector.multi_reduction <maximumf>, %854, %cst_287 [1] : vector<8x8xf32> to vector<8xf32>
    %856 = vector.shape_cast %855 : vector<8xf32> to vector<8x1xf32>
    %857 = vector.broadcast %856 : vector<8x1xf32> to vector<8x8xf32>
    %858 = arith.subf %854, %857 : vector<8x8xf32>
    %859 = math.exp %858 : vector<8x8xf32>
    %cst_288 = arith.constant dense<0.000000e+00> : vector<8xf32>
    %860 = vector.multi_reduction <add>, %859, %cst_288 [1] : vector<8x8xf32> to vector<8xf32>
    %861 = vector.shape_cast %860 : vector<8xf32> to vector<8x1xf32>
    %862 = tpu.reciprocal %861 {approx = true} : vector<8x1xf32> -> vector<8x1xf32>
    %863 = vector.broadcast %862 : vector<8x1xf32> to vector<8x8xf32>
    %864 = arith.mulf %859, %863 : vector<8x8xf32>
    %865 = vector.extract_strided_slice %786 {offsets = [0, 16], sizes = [8, 8], strides = [1, 1]} : vector<8x32xf32> to vector<8x8xf32>
    %cst_289 = arith.constant dense<0.000000e+00> : vector<8x8xf32>
    %866 = tpu.matmul %864, %865, %cst_289 {dimension_numbers = #tpu.dot_dimension_numbers<[1], [0], [0], [1], [0, 0, 1, 1], [], []>} : vector<8x8xf32>, vector<8x8xf32>, vector<8x8xf32> -> vector<8x8xf32>
    %867 = vector.extract_strided_slice %22 {offsets = [16, 0], sizes = [8, 32], strides = [1, 1]} : vector<32x32xf32> to vector<8x32xf32>
    %cst_290 = arith.constant dense<0.000000e+00> : vector<8x32xf32>
    %868 = tpu.matmul %866, %867, %cst_290 {dimension_numbers = #tpu.dot_dimension_numbers<[1], [0], [0], [1], [0, 0, 1, 1], [], []>} : vector<8x8xf32>, vector<8x32xf32>, vector<8x32xf32> -> vector<8x32xf32>
    %869 = arith.addf %846, %868 : vector<8x32xf32>
    %870 = vector.extract_strided_slice %798 {offsets = [0, 24], sizes = [8, 8], strides = [1, 1]} : vector<8x32xf32> to vector<8x8xf32>
    %871 = vector.extract_strided_slice %800 {offsets = [0, 24], sizes = [8, 8], strides = [1, 1]} : vector<8x32xf32> to vector<8x8xf32>
    %872 = tpu.transpose %871, [1, 0] : vector<8x8xf32> -> vector<8x8xf32>
    %cst_291 = arith.constant dense<0.000000e+00> : vector<8x8xf32>
    %873 = tpu.matmul %870, %872, %cst_291 {dimension_numbers = #tpu.dot_dimension_numbers<[1], [0], [0], [1], [0, 0, 1, 1], [], []>} : vector<8x8xf32>, vector<8x8xf32>, vector<8x8xf32> -> vector<8x8xf32>
    %874 = vector.broadcast %39 : vector<1x8xf32> to vector<8x8xf32>
    %875 = arith.addf %873, %874 : vector<8x8xf32>
    %cst_292 = arith.constant 0.353553385 : f32
    %876 = vector.broadcast %cst_292 : f32 to vector<8x8xf32>
    %877 = arith.mulf %875, %876 : vector<8x8xf32>
    %cst_293 = arith.constant dense<0xFF800000> : vector<8xf32>
    %878 = vector.multi_reduction <maximumf>, %877, %cst_293 [1] : vector<8x8xf32> to vector<8xf32>
    %879 = vector.shape_cast %878 : vector<8xf32> to vector<8x1xf32>
    %880 = vector.broadcast %879 : vector<8x1xf32> to vector<8x8xf32>
    %881 = arith.subf %877, %880 : vector<8x8xf32>
    %882 = math.exp %881 : vector<8x8xf32>
    %cst_294 = arith.constant dense<0.000000e+00> : vector<8xf32>
    %883 = vector.multi_reduction <add>, %882, %cst_294 [1] : vector<8x8xf32> to vector<8xf32>
    %884 = vector.shape_cast %883 : vector<8xf32> to vector<8x1xf32>
    %885 = tpu.reciprocal %884 {approx = true} : vector<8x1xf32> -> vector<8x1xf32>
    %886 = vector.broadcast %885 : vector<8x1xf32> to vector<8x8xf32>
    %887 = arith.mulf %882, %886 : vector<8x8xf32>
    %888 = vector.extract_strided_slice %786 {offsets = [0, 24], sizes = [8, 8], strides = [1, 1]} : vector<8x32xf32> to vector<8x8xf32>
    %cst_295 = arith.constant dense<0.000000e+00> : vector<8x8xf32>
    %889 = tpu.matmul %887, %888, %cst_295 {dimension_numbers = #tpu.dot_dimension_numbers<[1], [0], [0], [1], [0, 0, 1, 1], [], []>} : vector<8x8xf32>, vector<8x8xf32>, vector<8x8xf32> -> vector<8x8xf32>
    %890 = vector.extract_strided_slice %22 {offsets = [24, 0], sizes = [8, 32], strides = [1, 1]} : vector<32x32xf32> to vector<8x32xf32>
    %cst_296 = arith.constant dense<0.000000e+00> : vector<8x32xf32>
    %891 = tpu.matmul %889, %890, %cst_296 {dimension_numbers = #tpu.dot_dimension_numbers<[1], [0], [0], [1], [0, 0, 1, 1], [], []>} : vector<8x8xf32>, vector<8x32xf32>, vector<8x32xf32> -> vector<8x32xf32>
    %892 = arith.addf %869, %891 : vector<8x32xf32>
    %cst_297 = arith.constant dense<0.000000e+00> : vector<8x32xf32>
    %893 = tpu.matmul %731, %24, %cst_297 {dimension_numbers = #tpu.dot_dimension_numbers<[1], [0], [0], [1], [0, 0, 1, 1], [], []>} : vector<8x32xf32>, vector<32x32xf32>, vector<8x32xf32> -> vector<8x32xf32>
    %894 = vector.broadcast %25 : vector<1x32xf32> to vector<8x32xf32>
    %895 = arith.addf %893, %894 : vector<8x32xf32>
    %896 = vector.broadcast %793 : vector<1x32xf32> to vector<8x32xf32>
    %897 = arith.mulf %896, %788 : vector<8x32xf32>
    %898 = vector.broadcast %793 : vector<1x32xf32> to vector<8x32xf32>
    %899 = arith.mulf %898, %787 : vector<8x32xf32>
    %900 = vector.extract_strided_slice %897 {offsets = [0, 0], sizes = [8, 8], strides = [1, 1]} : vector<8x32xf32> to vector<8x8xf32>
    %901 = vector.extract_strided_slice %899 {offsets = [0, 0], sizes = [8, 8], strides = [1, 1]} : vector<8x32xf32> to vector<8x8xf32>
    %902 = tpu.transpose %901, [1, 0] : vector<8x8xf32> -> vector<8x8xf32>
    %cst_298 = arith.constant dense<0.000000e+00> : vector<8x8xf32>
    %903 = tpu.matmul %900, %902, %cst_298 {dimension_numbers = #tpu.dot_dimension_numbers<[1], [0], [0], [1], [0, 0, 1, 1], [], []>} : vector<8x8xf32>, vector<8x8xf32>, vector<8x8xf32> -> vector<8x8xf32>
    %904 = vector.broadcast %45 : vector<1x8xf32> to vector<8x8xf32>
    %905 = arith.addf %903, %904 : vector<8x8xf32>
    %cst_299 = arith.constant 0.353553385 : f32
    %906 = vector.broadcast %cst_299 : f32 to vector<8x8xf32>
    %907 = arith.mulf %905, %906 : vector<8x8xf32>
    %cst_300 = arith.constant dense<0xFF800000> : vector<8xf32>
    %908 = vector.multi_reduction <maximumf>, %907, %cst_300 [1] : vector<8x8xf32> to vector<8xf32>
    %909 = vector.shape_cast %908 : vector<8xf32> to vector<8x1xf32>
    %910 = vector.broadcast %909 : vector<8x1xf32> to vector<8x8xf32>
    %911 = arith.subf %907, %910 : vector<8x8xf32>
    %912 = math.exp %911 : vector<8x8xf32>
    %cst_301 = arith.constant dense<0.000000e+00> : vector<8xf32>
    %913 = vector.multi_reduction <add>, %912, %cst_301 [1] : vector<8x8xf32> to vector<8xf32>
    %914 = vector.shape_cast %913 : vector<8xf32> to vector<8x1xf32>
    %915 = tpu.reciprocal %914 {approx = true} : vector<8x1xf32> -> vector<8x1xf32>
    %916 = vector.broadcast %915 : vector<8x1xf32> to vector<8x8xf32>
    %917 = arith.mulf %912, %916 : vector<8x8xf32>
    %918 = vector.extract_strided_slice %789 {offsets = [0, 0], sizes = [8, 8], strides = [1, 1]} : vector<8x32xf32> to vector<8x8xf32>
    %cst_302 = arith.constant dense<0.000000e+00> : vector<8x8xf32>
    %919 = tpu.matmul %917, %918, %cst_302 {dimension_numbers = #tpu.dot_dimension_numbers<[1], [0], [0], [1], [0, 0, 1, 1], [], []>} : vector<8x8xf32>, vector<8x8xf32>, vector<8x8xf32> -> vector<8x8xf32>
    %920 = vector.extract_strided_slice %24 {offsets = [0, 0], sizes = [8, 32], strides = [1, 1]} : vector<32x32xf32> to vector<8x32xf32>
    %cst_303 = arith.constant dense<0.000000e+00> : vector<8x32xf32>
    %921 = tpu.matmul %919, %920, %cst_303 {dimension_numbers = #tpu.dot_dimension_numbers<[1], [0], [0], [1], [0, 0, 1, 1], [], []>} : vector<8x8xf32>, vector<8x32xf32>, vector<8x32xf32> -> vector<8x32xf32>
    %922 = arith.addf %895, %921 : vector<8x32xf32>
    %923 = vector.extract_strided_slice %897 {offsets = [0, 8], sizes = [8, 8], strides = [1, 1]} : vector<8x32xf32> to vector<8x8xf32>
    %924 = vector.extract_strided_slice %899 {offsets = [0, 8], sizes = [8, 8], strides = [1, 1]} : vector<8x32xf32> to vector<8x8xf32>
    %925 = tpu.transpose %924, [1, 0] : vector<8x8xf32> -> vector<8x8xf32>
    %cst_304 = arith.constant dense<0.000000e+00> : vector<8x8xf32>
    %926 = tpu.matmul %923, %925, %cst_304 {dimension_numbers = #tpu.dot_dimension_numbers<[1], [0], [0], [1], [0, 0, 1, 1], [], []>} : vector<8x8xf32>, vector<8x8xf32>, vector<8x8xf32> -> vector<8x8xf32>
    %927 = vector.broadcast %45 : vector<1x8xf32> to vector<8x8xf32>
    %928 = arith.addf %926, %927 : vector<8x8xf32>
    %cst_305 = arith.constant 0.353553385 : f32
    %929 = vector.broadcast %cst_305 : f32 to vector<8x8xf32>
    %930 = arith.mulf %928, %929 : vector<8x8xf32>
    %cst_306 = arith.constant dense<0xFF800000> : vector<8xf32>
    %931 = vector.multi_reduction <maximumf>, %930, %cst_306 [1] : vector<8x8xf32> to vector<8xf32>
    %932 = vector.shape_cast %931 : vector<8xf32> to vector<8x1xf32>
    %933 = vector.broadcast %932 : vector<8x1xf32> to vector<8x8xf32>
    %934 = arith.subf %930, %933 : vector<8x8xf32>
    %935 = math.exp %934 : vector<8x8xf32>
    %cst_307 = arith.constant dense<0.000000e+00> : vector<8xf32>
    %936 = vector.multi_reduction <add>, %935, %cst_307 [1] : vector<8x8xf32> to vector<8xf32>
    %937 = vector.shape_cast %936 : vector<8xf32> to vector<8x1xf32>
    %938 = tpu.reciprocal %937 {approx = true} : vector<8x1xf32> -> vector<8x1xf32>
    %939 = vector.broadcast %938 : vector<8x1xf32> to vector<8x8xf32>
    %940 = arith.mulf %935, %939 : vector<8x8xf32>
    %941 = vector.extract_strided_slice %789 {offsets = [0, 8], sizes = [8, 8], strides = [1, 1]} : vector<8x32xf32> to vector<8x8xf32>
    %cst_308 = arith.constant dense<0.000000e+00> : vector<8x8xf32>
    %942 = tpu.matmul %940, %941, %cst_308 {dimension_numbers = #tpu.dot_dimension_numbers<[1], [0], [0], [1], [0, 0, 1, 1], [], []>} : vector<8x8xf32>, vector<8x8xf32>, vector<8x8xf32> -> vector<8x8xf32>
    %943 = vector.extract_strided_slice %24 {offsets = [8, 0], sizes = [8, 32], strides = [1, 1]} : vector<32x32xf32> to vector<8x32xf32>
    %cst_309 = arith.constant dense<0.000000e+00> : vector<8x32xf32>
    %944 = tpu.matmul %942, %943, %cst_309 {dimension_numbers = #tpu.dot_dimension_numbers<[1], [0], [0], [1], [0, 0, 1, 1], [], []>} : vector<8x8xf32>, vector<8x32xf32>, vector<8x32xf32> -> vector<8x32xf32>
    %945 = arith.addf %922, %944 : vector<8x32xf32>
    %946 = vector.extract_strided_slice %897 {offsets = [0, 16], sizes = [8, 8], strides = [1, 1]} : vector<8x32xf32> to vector<8x8xf32>
    %947 = vector.extract_strided_slice %899 {offsets = [0, 16], sizes = [8, 8], strides = [1, 1]} : vector<8x32xf32> to vector<8x8xf32>
    %948 = tpu.transpose %947, [1, 0] : vector<8x8xf32> -> vector<8x8xf32>
    %cst_310 = arith.constant dense<0.000000e+00> : vector<8x8xf32>
    %949 = tpu.matmul %946, %948, %cst_310 {dimension_numbers = #tpu.dot_dimension_numbers<[1], [0], [0], [1], [0, 0, 1, 1], [], []>} : vector<8x8xf32>, vector<8x8xf32>, vector<8x8xf32> -> vector<8x8xf32>
    %950 = vector.broadcast %45 : vector<1x8xf32> to vector<8x8xf32>
    %951 = arith.addf %949, %950 : vector<8x8xf32>
    %cst_311 = arith.constant 0.353553385 : f32
    %952 = vector.broadcast %cst_311 : f32 to vector<8x8xf32>
    %953 = arith.mulf %951, %952 : vector<8x8xf32>
    %cst_312 = arith.constant dense<0xFF800000> : vector<8xf32>
    %954 = vector.multi_reduction <maximumf>, %953, %cst_312 [1] : vector<8x8xf32> to vector<8xf32>
    %955 = vector.shape_cast %954 : vector<8xf32> to vector<8x1xf32>
    %956 = vector.broadcast %955 : vector<8x1xf32> to vector<8x8xf32>
    %957 = arith.subf %953, %956 : vector<8x8xf32>
    %958 = math.exp %957 : vector<8x8xf32>
    %cst_313 = arith.constant dense<0.000000e+00> : vector<8xf32>
    %959 = vector.multi_reduction <add>, %958, %cst_313 [1] : vector<8x8xf32> to vector<8xf32>
    %960 = vector.shape_cast %959 : vector<8xf32> to vector<8x1xf32>
    %961 = tpu.reciprocal %960 {approx = true} : vector<8x1xf32> -> vector<8x1xf32>
    %962 = vector.broadcast %961 : vector<8x1xf32> to vector<8x8xf32>
    %963 = arith.mulf %958, %962 : vector<8x8xf32>
    %964 = vector.extract_strided_slice %789 {offsets = [0, 16], sizes = [8, 8], strides = [1, 1]} : vector<8x32xf32> to vector<8x8xf32>
    %cst_314 = arith.constant dense<0.000000e+00> : vector<8x8xf32>
    %965 = tpu.matmul %963, %964, %cst_314 {dimension_numbers = #tpu.dot_dimension_numbers<[1], [0], [0], [1], [0, 0, 1, 1], [], []>} : vector<8x8xf32>, vector<8x8xf32>, vector<8x8xf32> -> vector<8x8xf32>
    %966 = vector.extract_strided_slice %24 {offsets = [16, 0], sizes = [8, 32], strides = [1, 1]} : vector<32x32xf32> to vector<8x32xf32>
    %cst_315 = arith.constant dense<0.000000e+00> : vector<8x32xf32>
    %967 = tpu.matmul %965, %966, %cst_315 {dimension_numbers = #tpu.dot_dimension_numbers<[1], [0], [0], [1], [0, 0, 1, 1], [], []>} : vector<8x8xf32>, vector<8x32xf32>, vector<8x32xf32> -> vector<8x32xf32>
    %968 = arith.addf %945, %967 : vector<8x32xf32>
    %969 = vector.extract_strided_slice %897 {offsets = [0, 24], sizes = [8, 8], strides = [1, 1]} : vector<8x32xf32> to vector<8x8xf32>
    %970 = vector.extract_strided_slice %899 {offsets = [0, 24], sizes = [8, 8], strides = [1, 1]} : vector<8x32xf32> to vector<8x8xf32>
    %971 = tpu.transpose %970, [1, 0] : vector<8x8xf32> -> vector<8x8xf32>
    %cst_316 = arith.constant dense<0.000000e+00> : vector<8x8xf32>
    %972 = tpu.matmul %969, %971, %cst_316 {dimension_numbers = #tpu.dot_dimension_numbers<[1], [0], [0], [1], [0, 0, 1, 1], [], []>} : vector<8x8xf32>, vector<8x8xf32>, vector<8x8xf32> -> vector<8x8xf32>
    %973 = vector.broadcast %45 : vector<1x8xf32> to vector<8x8xf32>
    %974 = arith.addf %972, %973 : vector<8x8xf32>
    %cst_317 = arith.constant 0.353553385 : f32
    %975 = vector.broadcast %cst_317 : f32 to vector<8x8xf32>
    %976 = arith.mulf %974, %975 : vector<8x8xf32>
    %cst_318 = arith.constant dense<0xFF800000> : vector<8xf32>
    %977 = vector.multi_reduction <maximumf>, %976, %cst_318 [1] : vector<8x8xf32> to vector<8xf32>
    %978 = vector.shape_cast %977 : vector<8xf32> to vector<8x1xf32>
    %979 = vector.broadcast %978 : vector<8x1xf32> to vector<8x8xf32>
    %980 = arith.subf %976, %979 : vector<8x8xf32>
    %981 = math.exp %980 : vector<8x8xf32>
    %cst_319 = arith.constant dense<0.000000e+00> : vector<8xf32>
    %982 = vector.multi_reduction <add>, %981, %cst_319 [1] : vector<8x8xf32> to vector<8xf32>
    %983 = vector.shape_cast %982 : vector<8xf32> to vector<8x1xf32>
    %984 = tpu.reciprocal %983 {approx = true} : vector<8x1xf32> -> vector<8x1xf32>
    %985 = vector.broadcast %984 : vector<8x1xf32> to vector<8x8xf32>
    %986 = arith.mulf %981, %985 : vector<8x8xf32>
    %987 = vector.extract_strided_slice %789 {offsets = [0, 24], sizes = [8, 8], strides = [1, 1]} : vector<8x32xf32> to vector<8x8xf32>
    %cst_320 = arith.constant dense<0.000000e+00> : vector<8x8xf32>
    %988 = tpu.matmul %986, %987, %cst_320 {dimension_numbers = #tpu.dot_dimension_numbers<[1], [0], [0], [1], [0, 0, 1, 1], [], []>} : vector<8x8xf32>, vector<8x8xf32>, vector<8x8xf32> -> vector<8x8xf32>
    %989 = vector.extract_strided_slice %24 {offsets = [24, 0], sizes = [8, 32], strides = [1, 1]} : vector<32x32xf32> to vector<8x32xf32>
    %cst_321 = arith.constant dense<0.000000e+00> : vector<8x32xf32>
    %990 = tpu.matmul %988, %989, %cst_321 {dimension_numbers = #tpu.dot_dimension_numbers<[1], [0], [0], [1], [0, 0, 1, 1], [], []>} : vector<8x8xf32>, vector<8x32xf32>, vector<8x32xf32> -> vector<8x32xf32>
    %991 = arith.addf %968, %990 : vector<8x32xf32>
    %c0_322 = arith.constant 0 : index
    %c0_323 = arith.constant 0 : index
    %c0_324 = arith.constant 0 : index
    %992 = vector.load %arg33[%c0_322, %c0_323, %c0_324] : memref<1x8x32xf32, #tpu.memory_space<vmem>>, vector<1x8x32xf32>
    %993 = vector.shape_cast %992 : vector<1x8x32xf32> to vector<8x32xf32>
    %994 = vector.shape_cast %892 : vector<8x32xf32> to vector<1x8x32xf32>
    tpu.vector_store %arg33[%c0_322, %c0_323, %c0_324], %994 {strides = array<i32>} : memref<1x8x32xf32, #tpu.memory_space<vmem>>, vector<1x8x32xf32>,
    %c0_325 = arith.constant 0 : index
    %c0_326 = arith.constant 0 : index
    %c0_327 = arith.constant 0 : index
    %995 = vector.load %arg34[%c0_325, %c0_326, %c0_327] : memref<1x8x32xf32, #tpu.memory_space<vmem>>, vector<1x8x32xf32>
    %996 = vector.shape_cast %995 : vector<1x8x32xf32> to vector<8x32xf32>
    %997 = vector.shape_cast %991 : vector<8x32xf32> to vector<1x8x32xf32>
    tpu.vector_store %arg34[%c0_325, %c0_326, %c0_327], %997 {strides = array<i32>} : memref<1x8x32xf32, #tpu.memory_space<vmem>>, vector<1x8x32xf32>,
    return
  }
  func.func @transform_0(%arg0: i32) -> (i32, i32, i32) {
    %c0_i32 = arith.constant 0 : i32
    %c0_i32_0 = arith.constant 0 : i32
    %c0_i32_1 = arith.constant 0 : i32
    return %arg0, %c0_i32, %c0_i32_0 : i32, i32, i32
  }
  func.func @transform_1(%arg0: i32) -> (i32, i32, i32) {
    %c0_i32 = arith.constant 0 : i32
    %c0_i32_0 = arith.constant 0 : i32
    %c0_i32_1 = arith.constant 0 : i32
    return %arg0, %c0_i32, %c0_i32_0 : i32, i32, i32
  }
  func.func @transform_2(%arg0: i32) -> (i32, i32, i32) {
    %c0_i32 = arith.constant 0 : i32
    %c0_i32_0 = arith.constant 0 : i32
    %c0_i32_1 = arith.constant 0 : i32
    return %arg0, %c0_i32, %c0_i32_0 : i32, i32, i32
  }
  func.func @transform_3(%arg0: i32) -> (i32, i32, i32) {
    %c0_i32 = arith.constant 0 : i32
    %c0_i32_0 = arith.constant 0 : i32
    %c0_i32_1 = arith.constant 0 : i32
    return %arg0, %c0_i32, %c0_i32_0 : i32, i32, i32
  }
  func.func @transform_4(%arg0: i32) -> (i32, i32, i32) {
    %c0_i32 = arith.constant 0 : i32
    %c0_i32_0 = arith.constant 0 : i32
    %c0_i32_1 = arith.constant 0 : i32
    return %arg0, %c0_i32, %c0_i32_0 : i32, i32, i32
  }
  func.func @transform_5(%arg0: i32) -> (i32, i32, i32) {
    %c0_i32 = arith.constant 0 : i32
    %c0_i32_0 = arith.constant 0 : i32
    %c0_i32_1 = arith.constant 0 : i32
    return %arg0, %c0_i32, %c0_i32_0 : i32, i32, i32
  }
  func.func @transform_6(%arg0: i32) -> (i32, i32) {
    %c0_i32 = arith.constant 0 : i32
    %c0_i32_0 = arith.constant 0 : i32
    %c0_i32_1 = arith.constant 0 : i32
    return %c0_i32, %c0_i32_0 : i32, i32
  }
  func.func @transform_7(%arg0: i32) -> (i32, i32) {
    %c0_i32 = arith.constant 0 : i32
    %c0_i32_0 = arith.constant 0 : i32
    %c0_i32_1 = arith.constant 0 : i32
    return %c0_i32, %c0_i32_0 : i32, i32
  }
  func.func @transform_8(%arg0: i32) -> (i32, i32) {
    %c0_i32 = arith.constant 0 : i32
    %c0_i32_0 = arith.constant 0 : i32
    %c0_i32_1 = arith.constant 0 : i32
    return %c0_i32, %c0_i32_0 : i32, i32
  }
  func.func @transform_9(%arg0: i32) -> (i32, i32) {
    %c0_i32 = arith.constant 0 : i32
    %c0_i32_0 = arith.constant 0 : i32
    %c0_i32_1 = arith.constant 0 : i32
    return %c0_i32, %c0_i32_0 : i32, i32
  }
  func.func @transform_10(%arg0: i32) -> (i32, i32) {
    %c0_i32 = arith.constant 0 : i32
    %c0_i32_0 = arith.constant 0 : i32
    %c0_i32_1 = arith.constant 0 : i32
    return %c0_i32, %c0_i32_0 : i32, i32
  }
  func.func @transform_11(%arg0: i32) -> (i32, i32) {
    %c0_i32 = arith.constant 0 : i32
    %c0_i32_0 = arith.constant 0 : i32
    %c0_i32_1 = arith.constant 0 : i32
    return %c0_i32, %c0_i32_0 : i32, i32
  }
  func.func @transform_12(%arg0: i32) -> (i32, i32) {
    %c0_i32 = arith.constant 0 : i32
    %c0_i32_0 = arith.constant 0 : i32
    %c0_i32_1 = arith.constant 0 : i32
    return %c0_i32, %c0_i32_0 : i32, i32
  }
  func.func @transform_13(%arg0: i32) -> (i32, i32) {
    %c0_i32 = arith.constant 0 : i32
    %c0_i32_0 = arith.constant 0 : i32
    %c0_i32_1 = arith.constant 0 : i32
    return %c0_i32, %c0_i32_0 : i32, i32
  }
  func.func @transform_14(%arg0: i32) -> (i32, i32) {
    %c0_i32 = arith.constant 0 : i32
    %c0_i32_0 = arith.constant 0 : i32
    %c0_i32_1 = arith.constant 0 : i32
    return %c0_i32, %c0_i32_0 : i32, i32
  }
  func.func @transform_15(%arg0: i32) -> (i32, i32) {
    %c0_i32 = arith.constant 0 : i32
    %c0_i32_0 = arith.constant 0 : i32
    %c0_i32_1 = arith.constant 0 : i32
    return %c0_i32, %c0_i32_0 : i32, i32
  }
  func.func @transform_16(%arg0: i32) -> (i32, i32) {
    %c0_i32 = arith.constant 0 : i32
    %c0_i32_0 = arith.constant 0 : i32
    %c0_i32_1 = arith.constant 0 : i32
    return %c0_i32, %c0_i32_0 : i32, i32
  }
  func.func @transform_17(%arg0: i32) -> (i32, i32) {
    %c0_i32 = arith.constant 0 : i32
    %c0_i32_0 = arith.constant 0 : i32
    %c0_i32_1 = arith.constant 0 : i32
    return %c0_i32, %c0_i32_0 : i32, i32
  }
  func.func @transform_18(%arg0: i32) -> (i32, i32) {
    %c0_i32 = arith.constant 0 : i32
    %c0_i32_0 = arith.constant 0 : i32
    %c0_i32_1 = arith.constant 0 : i32
    return %c0_i32, %c0_i32_0 : i32, i32
  }
  func.func @transform_19(%arg0: i32) -> (i32, i32) {
    %c0_i32 = arith.constant 0 : i32
    %c0_i32_0 = arith.constant 0 : i32
    %c0_i32_1 = arith.constant 0 : i32
    return %c0_i32, %c0_i32_0 : i32, i32
  }
  func.func @transform_20(%arg0: i32) -> (i32, i32) {
    %c0_i32 = arith.constant 0 : i32
    %c0_i32_0 = arith.constant 0 : i32
    %c0_i32_1 = arith.constant 0 : i32
    return %c0_i32, %c0_i32_0 : i32, i32
  }
  func.func @transform_21(%arg0: i32) -> (i32, i32) {
    %c0_i32 = arith.constant 0 : i32
    %c0_i32_0 = arith.constant 0 : i32
    %c0_i32_1 = arith.constant 0 : i32
    return %c0_i32, %c0_i32_0 : i32, i32
  }
  func.func @transform_22(%arg0: i32) -> (i32, i32) {
    %c0_i32 = arith.constant 0 : i32
    %c0_i32_0 = arith.constant 0 : i32
    %c0_i32_1 = arith.constant 0 : i32
    return %c0_i32, %c0_i32_0 : i32, i32
  }
  func.func @transform_23(%arg0: i32) -> (i32, i32) {
    %c0_i32 = arith.constant 0 : i32
    %c0_i32_0 = arith.constant 0 : i32
    %c0_i32_1 = arith.constant 0 : i32
    return %c0_i32, %c0_i32_0 : i32, i32
  }
  func.func @transform_24(%arg0: i32) -> (i32, i32) {
    %c0_i32 = arith.constant 0 : i32
    %c0_i32_0 = arith.constant 0 : i32
    %c0_i32_1 = arith.constant 0 : i32
    return %c0_i32, %c0_i32_0 : i32, i32
  }
  func.func @transform_25(%arg0: i32) -> (i32, i32) {
    %c0_i32 = arith.constant 0 : i32
    %c0_i32_0 = arith.constant 0 : i32
    %c0_i32_1 = arith.constant 0 : i32
    return %c0_i32, %c0_i32_0 : i32, i32
  }
  func.func @transform_26(%arg0: i32) -> (i32, i32) {
    %c0_i32 = arith.constant 0 : i32
    %c0_i32_0 = arith.constant 0 : i32
    %c0_i32_1 = arith.constant 0 : i32
    return %c0_i32, %c0_i32_0 : i32, i32
  }
  func.func @transform_27(%arg0: i32) -> (i32, i32) {
    %c0_i32 = arith.constant 0 : i32
    %c0_i32_0 = arith.constant 0 : i32
    %c0_i32_1 = arith.constant 0 : i32
    return %c0_i32, %c0_i32_0 : i32, i32
  }
  func.func @transform_28(%arg0: i32) -> (i32, i32) {
    %c0_i32 = arith.constant 0 : i32
    %c0_i32_0 = arith.constant 0 : i32
    %c0_i32_1 = arith.constant 0 : i32
    return %c0_i32, %c0_i32_0 : i32, i32
  }
  func.func @transform_29(%arg0: i32) -> (i32, i32) {
    %c0_i32 = arith.constant 0 : i32
    %c0_i32_0 = arith.constant 0 : i32
    %c0_i32_1 = arith.constant 0 : i32
    return %c0_i32, %c0_i32_0 : i32, i32
  }
  func.func @transform_30(%arg0: i32) -> (i32, i32) {
    %c0_i32 = arith.constant 0 : i32
    %c0_i32_0 = arith.constant 0 : i32
    %c0_i32_1 = arith.constant 0 : i32
    return %c0_i32, %c0_i32_0 : i32, i32
  }
  func.func @transform_31(%arg0: i32) -> (i32, i32) {
    %c0_i32 = arith.constant 0 : i32
    %c0_i32_0 = arith.constant 0 : i32
    %c0_i32_1 = arith.constant 0 : i32
    return %c0_i32, %c0_i32_0 : i32, i32
  }
  func.func @transform_32(%arg0: i32) -> (i32, i32, i32) {
    %c0_i32 = arith.constant 0 : i32
    %c0_i32_0 = arith.constant 0 : i32
    %c0_i32_1 = arith.constant 0 : i32
    return %arg0, %c0_i32, %c0_i32_0 : i32, i32, i32
  }
  func.func @transform_33(%arg0: i32) -> (i32, i32, i32) {
    %c0_i32 = arith.constant 0 : i32
    %c0_i32_0 = arith.constant 0 : i32
    %c0_i32_1 = arith.constant 0 : i32
    return %arg0, %c0_i32, %c0_i32_0 : i32, i32, i32
  }
}

</mosaic_0001>

<bundles_post_ra>
// kernel: single_block_forward.1
= control target key start
LH: loop header
LB: loop body
LE: loop exit
PB: predicated region body
PF: predicated region fallthrough
CT: control target
= control target key end

     0   :  { %s13659_s6 = smov 1   ;;  %s13660_s10 = smov 2   ;;  %s15330_s0 = inlined_call_operand.smem [shape: u32[34], index: -1, kind: input, shape index: {}] }
   0x1   :  { %s13736_s5 = sld [smem:[%s15330_s0]]   ;;  %s13661_s14 = smov 3  }
   0x2   :  { %s13741_s9 = sld [smem:[%s15330_s0 + %s13659_s6]]   ;;  %s13662_s18 = smov 4  }
   0x3   :  { %s13746_s13 = sld [smem:[%s15330_s0 + %s13660_s10]]   ;;  %s13663_s22 = smov 5  }
   0x4   :  { %s13751_s17 = sld [smem:[%s15330_s0 + %s13661_s14]]   ;;  %s13664_s26 = smov 6  }
   0x5   :  { %s13756_s21 = sld [smem:[%s15330_s0 + %s13662_s18]]   ;;  %s13665_s30 = smov 7  }
   0x6   :  { %s13761_s25 = sld [smem:[%s15330_s0 + %s13663_s22]]   ;;  %s13666_s4 = smov 8  }
   0x7   :  { %15373 = sst [smem:[#allocation46_spill]] %s13736_s5  ;;  %s13667_s10 = smov 9  }
   0x8   :  { %15374 = sst [smem:[#allocation47_spill]] %s13741_s9  ;;  %s13668_s15 = smov 10  }
   0x9   :  { %15375 = sst [smem:[#allocation48_spill]] %s13746_s13  ;;  %s13669_s20 = smov 11  }
   0xa   :  { %15376 = sst [smem:[#allocation49_spill]] %s13751_s17  ;;  %s13671_s1 = smov 13  }
   0xb   :  { %15377 = sst [smem:[#allocation50_spill]] %s13756_s21  ;;  %s13672_s7 = smov 14  }
   0xc   :  { %15378 = sst [smem:[#allocation51_spill]] %s13761_s25  ;;  %s13674_s22 = smov 16  }
   0xd   :  { %s13766_s29 = sld [smem:[%s15330_s0 + %s13664_s26]]   ;;  %s13670_s26 = smov 12  }
   0xe   :  { %s13771_s3 = sld [smem:[%s15330_s0 + %s13665_s30]]   ;;  %s13675_s28 = smov 17  }
   0xf   :  { %s13776_s8 = sld [smem:[%s15330_s0 + %s13666_s4]]  }
  0x10   :  { %s13781_s14 = sld [smem:[%s15330_s0 + %s13667_s10]]  }
  0x11   :  { %s13786_s19 = sld [smem:[%s15330_s0 + %s13668_s15]]   ;;  %s13673_s15 = smov 15  }
  0x12   :  { %s13791_s24 = sld [smem:[%s15330_s0 + %s13669_s20]]  }
  0x13   :  { %15379 = sst [smem:[#allocation52_spill]] %s13766_s29 }
  0x14   :  { %15380 = sst [smem:[#allocation53_spill]] %s13771_s3 }
  0x15   :  { %15381 = sst [smem:[#allocation54_spill]] %s13776_s8 }
  0x16   :  { %s13796_s30 = sld [smem:[%s15330_s0 + %s13670_s26]]  }
  0x17   :  { %15382 = sst [smem:[#allocation55_spill]] %s13786_s19 }
  0x18   :  { %15383 = sst [smem:[#allocation56_spill]] %s13791_s24 }
  0x19   :  { %s13801_s6 = sld [smem:[%s15330_s0 + %s13671_s1]]  }
  0x1a   :  { %s13806_s12 = sld [smem:[%s15330_s0 + %s13672_s7]]   ;;  %s13676_s7 = smov 18  }
  0x1b   :  { %s13811_s20 = sld [smem:[%s15330_s0 + %s13673_s15]]   ;;  %s13677_s15 = smov 19  }
  0x1c   :  { %15384 = sst [smem:[#allocation57_spill]] %s13796_s30 }
  0x1d   :  { %s13816_s27 = sld [smem:[%s15330_s0 + %s13674_s22]]   ;;  %s13678_s22 = smov 20  }
  0x1e   :  { %s13821_s4 = sld [smem:[%s15330_s0 + %s13675_s28]]   ;;  %s13679_s28 = smov 21  }
  0x1f   :  { %15385 = sst [smem:[#allocation58_spill]] %s13801_s6 }
  0x20   :  { %15386 = sst [smem:[#allocation59_spill]] %s13806_s12 }
  0x21   :  { %15387 = sst [smem:[#allocation60_spill]] %s13811_s20 }
  0x22   :  { %s13826_s17 = sld [smem:[%s15330_s0 + %s13676_s7]]   ;;  %s13680_s7 = smov 22  }
  0x23   :  { %s13831_s20 = sld [smem:[%s15330_s0 + %s13677_s15]]   ;;  %s13681_s15 = smov 23  }
  0x24   :  { %15388 = sst [smem:[#allocation61_spill]] %s13821_s4 }
  0x25   :  { %s13836_s25 = sld [smem:[%s15330_s0 + %s13678_s22]]   ;;  %s13682_s22 = smov 24  }
  0x26   :  { %s13841_s4 = sld [smem:[%s15330_s0 + %s13679_s28]]   ;;  %s13683_s28 = smov 25  }
  0x27   :  { %s13846_s12 = sld [smem:[%s15330_s0 + %s13680_s7]]   ;;  %s13684_s7 = smov 26  }
  0x28   :  { %s13851_s3 = sld [smem:[%s15330_s0 + %s13681_s15]]   ;;  %s13685_s15 = smov 27  }
  0x29   :  { %s13856_s21 = sld [smem:[%s15330_s0 + %s13682_s22]]   ;;  %s13686_s22 = smov 28  }
  0x2a   :  { %s13861_s13 = sld [smem:[%s15330_s0 + %s13683_s28]]   ;;  %s13687_s28 = smov 29  }
  0x2b   :  { %s13866_s30 = sld [smem:[%s15330_s0 + %s13684_s7]]   ;;  %s13688_s7 = smov 30  }
  0x2c   :  { %15389 = sst [smem:[#allocation62_spill]] %s13841_s4 }
  0x2d   :  { %s13871_s19 = sld [smem:[%s15330_s0 + %s13685_s15]]   ;;  %s13689_s15 = smov 31  }
  0x2e   :  { %15390 = sst [smem:[#allocation63_spill]] %s13851_s3 }
  0x2f   :  { %s13876_s5 = sld [smem:[%s15330_s0 + %s13686_s22]]   ;;  %s13690_s22 = smov 32  }
  0x30   :  { %s13881_s9 = sld [smem:[%s15330_s0 + %s13687_s28]]   ;;  %s13691_s28 = smov 33  }
  0x31   :  { %15391 = sst [smem:[#allocation64_spill]] %s13866_s30 }
  0x32   :  { %s13886_s8 = sld [smem:[%s15330_s0 + %s13688_s7]]  }
  0x33   :  { %s13891_s29 = sld [smem:[%s15330_s0 + %s13689_s15]]  }
  0x34   :  { %s13901_s30 = sld [smem:[%s15330_s0 + %s13691_s28]]  }
  0x35   :  { %15392 = sst [smem:[#allocation65_spill]] %s13876_s5 }
  0x36   :  { %15393 = sst [smem:[#allocation66_spill]] %s13881_s9 }
  0x37   :  { %s13896_s5 = sld [smem:[%s15330_s0 + %s13690_s22]]  }
  0x38   :  { %15394 = sst [smem:[#allocation67_spill]] %s13886_s8 }
  0x39   :  { %73 = vsyncpa [#allocation3], 0 }
  0x3a   :  { %74 = vsyncpa [#allocation6], 0 }
  0x3b   :  { %75 = vsyncpa [#allocation9], 0 }
  0x3c   :  { %76 = vsyncpa [#allocation12], 0 }
  0x3d   :  { %77 = vsyncpa [#allocation15], 0 }
  0x3e   :  { %78 = vsyncpa [#allocation18], 0 }
  0x3f   :  { %79 = vsyncpa [#allocation21], 0 }
  0x40   :  { %80 = vsyncpa [#allocation24], 0 }
  0x41   :  { %81 = vsyncpa [#allocation27], 0 }
  0x42   :  { %82 = vsyncpa [#allocation30], 0 }
  0x43   :  { %83 = vsyncpa [#allocation4], 0 }
  0x44   :  { %85 = vsyncpa [#allocation4 + $0x1], 0 }
  0x45   :  { %86 = vsyncpa [#allocation33], 0 }
  0x46   :  { %88 = vsyncpa [#allocation33 + $0x1], 0  ;;  %s13903_s7 = smov 0   ;;  %s13905_s10 = smov 0  }
  0x47   :  { %s13907_s0 = smov 0   ;;  %s13909_s11 = smov 0  }
  0x48 LB: > { %15395 = sst [smem:[#allocation68_spill]] %s13645_s7  ;;  %s13924_s15 = sadd.s32 4294967295, %s13657_s11   ;;  %s13657_s11 = sphi %s13909_s11, %s15468_s11   ;;  %s13653_s0 = sphi %s13907_s0, %s15470_s0   ;;  %s13649_s10 = sphi %s13905_s10, %s15472_s10   ;;  %s13645_s7 = sphi %s13903_s7, %s15471_s7  }
  0x49   : > { %15396 = sst [smem:[#allocation69_spill]] %s13653_s0  ;;  %s11321_s16 = sadd.s32 4294967294, %s13657_s11  }
  0x4a   : > { %15397 = sst [smem:[#allocation70_spill]] %s13657_s11  ;;  %s13928_s18 = sadd.s32 1, %s13657_s11  }
  0x4b   : > { %15398 = sst [smem:[#allocation71_spill]] %s13928_s18  ;;  %s803_s22 = sadd.s32 1, %s13653_s0 }
  0x4c   : > { %s800_s23 = ssub.s32 %s13657_s11, %s13928_s18  ;;  %p813_p0 = scmp.ne.s32.totalorder %s13653_s0, %s13649_s10 }
  0x4d   : > { %p801_p1 = scmp.eq.s32.totalorder %s800_s23, 0  ;;  %p814_p2 = scmp.eq.s32.totalorder %s13924_s15, 1 }
  0x4e   : > { %p819_p3 = scmp.ne.s32.totalorder %s13649_s10, %s13645_s7  ;;  %p820_p4 = scmp.eq.s32.totalorder %s11321_s16, 1 }
  0x4f   : > { %s13939_s26 = scalar_select %p801_p1, %s13653_s0, %s803_s22  }
  0x50   : > { %p13941_p5 = por %p814_p2, %p813_p0  ;;  %p13945_p6 = por %p820_p4, %p819_p3 }
  0x51   : > { %15399 = sst [smem:[#allocation72_spill]] %s13939_s26  ;;  %p11322_p7 = scmp.ge.s32.totalorder %s13657_s11, 1 }
  0x52   : > { %s15400_s28 = scalar_select %p13941_p5, 1, 0 }
  0x53   : > { %s15401_s1 = scalar_select %p13945_p6, 1, 0 }
  0x54   : > { %p853_p8 = scmp.lt.s32.totalorder %s13657_s11, 3  ;;  %p15343_p9 = scmp.eq.s32.totalorder %s13924_s15, 0 }
  0x55   : > { %15402 = sst [smem:[#allocation73_spill]] %s15401_s1  ;;  %s13692_s23 = smov [#allocation5]  }
  0x56   : > { %p13952_p10 = pnand %p11322_p7, %p853_p8  ;;  %s889_s16 = sshll.u32 %s13692_s23, 4  ;;  %s890_s16 = int_to_ptr.vmem [resolvable:$true] %s889_s16 }
  0x57   : > { %s13693_s22 = smov [#allocation8]   ;;  %s13694_s18 = smov [#allocation11]  }
  0x58   : > { %s15403_s2 = scalar_select %p13952_p10, 1, 0 }
  0x59   : > { %p12653_p11 = pneg %p13952_p10  ;;  %s920_s26 = sshll.u32 %s13693_s22, 4  ;;  %s921_s26 = int_to_ptr.vmem [resolvable:$true] %s920_s26 }
  0x5a   : > { %s947_s1 = sshll.u32 %s13694_s18, 4  ;;  %s13070_s23 = scalar_lea.vmem %s890_s16, 16  ;;  %s13964_s1 = int_to_ptr.vmem [resolvable:$true] %s947_s1 }
  0x5b   : > { %p13960_p12 = pnand %p15343_p9, %p12653_p11  ;;  %p13071_p0 = scmp.ne.s32.totalorder %s890_s16, %s13070_s23 }
  0x5c   : > { %s13077_s22 = scalar_lea.vmem %s890_s16, 32  ;;  %p13078_p3 = scmp.lt.s32.totalorder %s890_s16, %s890_s16 }
  0x5d   : > { %p13968_p13 = pneg %p13960_p12  ;;  %p13079_p4 = scmp.lt.s32.totalorder %s13077_s22, %s13070_s23 }
  0x5f   : > { %p13073_p1 = pnand %p13071_p0, %p13968_p13  ;;  %p13080_p7 = por %p13079_p4, %p13078_p3 }
  0x61   : > { %p13074_p2 = pneg %p13073_p1 }
  0x63   : > { %p13081_p8 = pnand %p13080_p7, %p13074_p2 }
  0x65   : > { %13084 = shalt.err (!%p13081_p8)
}
  0x66   : > { %s15406_s24 = sld [smem:[#allocation56_spill]]  ;;  %s13096_s18 = scalar_lea.vmem %s921_s26, 16 }
  0x67   : > { %p13097_p11 = scmp.ne.s32.totalorder %s921_s26, %s13096_s18  ;;  %s13103_s11 = scalar_lea.vmem %s921_s26, 32 }
  0x68   : > { %p13104_p5 = scmp.lt.s32.totalorder %s921_s26, %s921_s26  ;;  %p13105_p0 = scmp.lt.s32.totalorder %s13103_s11, %s13096_s18 }
  0x69   : > { %p13099_p9 = pnand %p13097_p11, %p13968_p13 }
  0x6a   : > { %p13106_p1 = por %p13105_p0, %p13104_p5 }
  0x6b   : > { %p13100_p6 = pneg %p13099_p9 }
  0x6c   : > { %12659 = dma.hbm_to_vmem [thread:$0]  (!%p13960_p12), %s15406_s24, 16, %s890_s16, [#allocation6]  }
  0x6d   : > { %p13107_p10 = pnand %p13106_p1, %p13100_p6 }
  0x6f   : > { %13110 = shalt.err (!%p13107_p10)
}
  0x70   : > { %12665 = dma.hbm_to_vmem [thread:$0]  (!%p13960_p12), %s13816_s27, 16, %s921_s26, [#allocation9]  }
  0x71   : > { %s13122_s16 = scalar_lea.vmem %s13964_s1, 16  ;;  %s13129_s23 = scalar_lea.vmem %s13964_s1, 32 }
  0x72   : > { %p13123_p2 = scmp.ne.s32.totalorder %s13964_s1, %s13122_s16  ;;  %p13130_p4 = scmp.lt.s32.totalorder %s13964_s1, %s13964_s1 }
  0x73   : > { %p13131_p5 = scmp.lt.s32.totalorder %s13129_s23, %s13122_s16 }
  0x74   : > { %p13125_p3 = pnand %p13123_p2, %p13968_p13 }
  0x75   : > { %p13132_p6 = por %p13131_p5, %p13130_p4 }
  0x76   : > { %p13126_p9 = pneg %p13125_p3 }
  0x78   : > { %p13133_p10 = pnand %p13132_p6, %p13126_p9 }
  0x7a   : > { %13136 = shalt.err (!%p13133_p10)
}
  0x7b   : > { %12671 = dma.hbm_to_vmem [thread:$0]  (!%p13960_p12), %s13831_s20, 16, %s13964_s1, [#allocation12]  }
  0x7c   : > { %s13695_s11 = smov [#allocation14]   ;;  %s13696_s22 = smov [#allocation17]  }
  0x7d   : > { %s971_s26 = sshll.u32 %s13695_s11, 4  ;;  %s995_s18 = sshll.u32 %s13696_s22, 4  ;;  %s972_s26 = int_to_ptr.vmem [resolvable:$true] %s971_s26  ;;  %s996_s18 = int_to_ptr.vmem [resolvable:$true] %s995_s18 }
  0x7e   : > { %s13148_s24 = scalar_lea.vmem %s972_s26, 16  ;;  %s13155_s16 = scalar_lea.vmem %s972_s26, 32 }
  0x7f   : > { %p13149_p7 = scmp.ne.s32.totalorder %s972_s26, %s13148_s24  ;;  %p13156_p0 = scmp.lt.s32.totalorder %s972_s26, %s972_s26 }
  0x80   : > { %p13157_p1 = scmp.lt.s32.totalorder %s13155_s16, %s13148_s24 }
  0x81   : > { %p13151_p8 = pnand %p13149_p7, %p13968_p13 }
  0x82   : > { %p13158_p2 = por %p13157_p1, %p13156_p0 }
  0x83   : > { %p13152_p11 = pneg %p13151_p8 }
  0x85   : > { %p13159_p3 = pnand %p13158_p2, %p13152_p11 }
  0x87   : > { %13162 = shalt.err (!%p13159_p3)
}
  0x88   : > { %s15407_s4 = sld [smem:[#allocation62_spill]]  ;;  %s13174_s1 = scalar_lea.vmem %s996_s18, 16 }
  0x89   : > { %p13175_p9 = scmp.ne.s32.totalorder %s996_s18, %s13174_s1  ;;  %s13181_s23 = scalar_lea.vmem %s996_s18, 32 }
  0x8a   : > { %p13182_p6 = scmp.lt.s32.totalorder %s996_s18, %s996_s18  ;;  %p13183_p10 = scmp.lt.s32.totalorder %s13181_s23, %s13174_s1 }
  0x8b   : > { %p13177_p4 = pnand %p13175_p9, %p13968_p13 }
  0x8c   : > { %p13184_p7 = por %p13183_p10, %p13182_p6 }
  0x8d   : > { %p13178_p5 = pneg %p13177_p4 }
  0x8e   : > { %12677 = dma.hbm_to_vmem [thread:$0]  (!%p13960_p12), %s15407_s4, 16, %s972_s26, [#allocation15]  }
  0x8f   : > { %p13185_p8 = pnand %p13184_p7, %p13178_p5 }
  0x91   : > { %13188 = shalt.err (!%p13185_p8)
}
  0x92   : > { %s15408_s3 = sld [smem:[#allocation63_spill]]  ;;  %s13697_s24 = smov [#allocation20]  }
  0x93   : > { %s1019_s11 = sshll.u32 %s13697_s24, 4  ;;  %s13698_s26 = smov [#allocation23]   ;;  %s1020_s11 = int_to_ptr.vmem [resolvable:$true] %s1019_s11 }
  0x94   : > { %s1043_s22 = sshll.u32 %s13698_s26, 4  ;;  %s13200_s16 = scalar_lea.vmem %s1020_s11, 16  ;;  %s1044_s22 = int_to_ptr.vmem [resolvable:$true] %s1043_s22 }
  0x95   : > { %p13201_p11 = scmp.ne.s32.totalorder %s1020_s11, %s13200_s16  ;;  %s13207_s4 = scalar_lea.vmem %s1020_s11, 32 }
  0x96   : > { %p13208_p2 = scmp.lt.s32.totalorder %s1020_s11, %s1020_s11  ;;  %p13209_p3 = scmp.lt.s32.totalorder %s13207_s4, %s13200_s16 }
  0x97   : > { %p13203_p0 = pnand %p13201_p11, %p13968_p13 }
  0x98   : > { %12683 = dma.hbm_to_vmem [thread:$0]  (!%p13960_p12), %s15408_s3, 16, %s996_s18, [#allocation18]  }
  0x99   : > { %p13204_p1 = pneg %p13203_p0  ;;  %p13210_p9 = por %p13209_p3, %p13208_p2 }
  0x9b   : > { %p13211_p4 = pnand %p13210_p9, %p13204_p1 }
  0x9d   : > { %13214 = shalt.err (!%p13211_p4)
}
  0x9e   : > { %12689 = dma.hbm_to_vmem [thread:$0]  (!%p13960_p12), %s13861_s13, 16, %s1020_s11, [#allocation21]  }
  0x9f   : > { %s13226_s18 = scalar_lea.vmem %s1044_s22, 16  ;;  %s13233_s1 = scalar_lea.vmem %s1044_s22, 32 }
  0xa0   : > { %p13227_p5 = scmp.ne.s32.totalorder %s1044_s22, %s13226_s18  ;;  %p13234_p7 = scmp.lt.s32.totalorder %s1044_s22, %s1044_s22 }
  0xa1   : > { %p13235_p8 = scmp.lt.s32.totalorder %s13233_s1, %s13226_s18 }
  0xa2   : > { %p13229_p6 = pnand %p13227_p5, %p13968_p13 }
  0xa3   : > { %p13236_p11 = por %p13235_p8, %p13234_p7 }
  0xa4   : > { %p13230_p10 = pneg %p13229_p6 }
  0xa6   : > { %p13237_p0 = pnand %p13236_p11, %p13230_p10 }
  0xa8   : > { %13240 = shalt.err (!%p13237_p0)
}
  0xa9   : > { %12695 = dma.hbm_to_vmem [thread:$0]  (!%p13960_p12), %s13871_s19, 16, %s1044_s22, [#allocation24]  }
  0xaa   : > { %s13699_s4 = smov [#allocation26]   ;;  %s13700_s24 = smov [#allocation2]  }
  0xab   : > { %s1067_s23 = sshll.u32 %s13699_s4, 4  ;;  %s875_s11 = sshll.u32 %s13700_s24, 4  ;;  %s1068_s23 = int_to_ptr.vmem [resolvable:$true] %s1067_s23  ;;  %s876_s11 = int_to_ptr.vmem [resolvable:$true] %s875_s11 }
  0xac   : > { %s13252_s26 = scalar_lea.vmem %s1068_s23, 16  ;;  %s13259_s16 = scalar_lea.vmem %s1068_s23, 32 }
  0xad   : > { %p13253_p1 = scmp.ne.s32.totalorder %s1068_s23, %s13252_s26  ;;  %p13260_p9 = scmp.lt.s32.totalorder %s1068_s23, %s1068_s23 }
  0xae   : > { %p13261_p4 = scmp.lt.s32.totalorder %s13259_s16, %s13252_s26 }
  0xaf   : > { %p13255_p2 = pnand %p13253_p1, %p13968_p13 }
  0xb0   : > { %p13262_p5 = por %p13261_p4, %p13260_p9 }
  0xb1   : > { %p13256_p3 = pneg %p13255_p2 }
  0xb3   : > { %p13263_p6 = pnand %p13262_p5, %p13256_p3 }
  0xb5   : > { %13266 = shalt.err (!%p13263_p6)
}
  0xb6   : > { %s15409_s9 = sld [smem:[#allocation66_spill]]  ;;  %s13278_s22 = scalar_lea.vmem %s876_s11, 16 }
  0xb7   : > { %p13279_p10 = scmp.ne.s32.totalorder %s876_s11, %s13278_s22  ;;  %s13285_s18 = scalar_lea.vmem %s876_s11, 32 }
  0xb8   : > { %p13286_p11 = scmp.lt.s32.totalorder %s876_s11, %s876_s11  ;;  %p13287_p0 = scmp.lt.s32.totalorder %s13285_s18, %s13278_s22 }
  0xb9   : > { %p13281_p7 = pnand %p13279_p10, %p13968_p13 }
  0xba   : > { %p13288_p1 = por %p13287_p0, %p13286_p11 }
  0xbb   : > { %p13282_p8 = pneg %p13281_p7 }
  0xbc   : > { %12701 = dma.hbm_to_vmem [thread:$0]  (!%p13960_p12), %s15409_s9, 16, %s1068_s23, [#allocation27]  }
  0xbd   : > { %p13289_p2 = pnand %p13288_p1, %p13282_p8 }
  0xbf   : > { %13292 = shalt.err (!%p13289_p2)
}
  0xc0   : > { %12656 = dma.hbm_to_vmem [thread:$0]  (!%p13960_p12), %s13781_s14, 16, %s876_s11, [#allocation3]  }
  0xc1   : > { %s13701_s1 = smov [#allocation7]   ;;  %s13702_s23 = smov [#allocation10]  }
  0xc2   : > { %s903_s4 = sshll.u32 %s13701_s1, 4  ;;  %s933_s24 = sshll.u32 %s13702_s23, 4  ;;  %s904_s4 = int_to_ptr.vmem [resolvable:$true] %s903_s4  ;;  %s934_s24 = int_to_ptr.vmem [resolvable:$true] %s933_s24 }
  0xc3   : > { %s13304_s26 = scalar_lea.vmem %s904_s4, 16  ;;  %s13311_s16 = scalar_lea.vmem %s904_s4, 32 }
  0xc4   : > { %p13305_p3 = scmp.ne.s32.totalorder %s904_s4, %s13304_s26  ;;  %p13312_p5 = scmp.lt.s32.totalorder %s904_s4, %s904_s4 }
  0xc5   : > { %p13313_p6 = scmp.lt.s32.totalorder %s13311_s16, %s13304_s26 }
  0xc6   : > { %p13307_p9 = pnand %p13305_p3, %p13968_p13 }
  0xc7   : > { %p13314_p10 = por %p13313_p6, %p13312_p5 }
  0xc8   : > { %p13308_p4 = pneg %p13307_p9 }
  0xca   : > { %p13315_p7 = pnand %p13314_p10, %p13308_p4 }
  0xcc   : > { %13318 = shalt.err (!%p13315_p7)
}
  0xcd   : > { %s15410_s6 = sld [smem:[#allocation58_spill]]  ;;  %s13330_s11 = scalar_lea.vmem %s934_s24, 512 }
  0xce   : > { %p13331_p8 = scmp.ne.s32.totalorder %s934_s24, %s13330_s11  ;;  %p13338_p1 = scmp.lt.s32.totalorder %s934_s24, %s934_s24 }
  0xcf   : > { %p13339_p2 = scmp.lt.s32.totalorder %s13330_s11, %s13330_s11 }
  0xd0   : > { %p13333_p11 = pnand %p13331_p8, %p13968_p13 }
  0xd1   : > { %p13340_p3 = por %p13339_p2, %p13338_p1 }
  0xd2   : > { %p13334_p0 = pneg %p13333_p11 }
  0xd3   : > { %12662 = dma.hbm_to_vmem [thread:$0]  (!%p13960_p12), %s15410_s6, 16, %s904_s4, [#allocation6]  }
  0xd4   : > { %p13341_p9 = pnand %p13340_p3, %p13334_p0 }
  0xd6   : > { %13344 = shalt.err (!%p13341_p9)
}
  0xd7   : > { %s13703_s22 = smov 128   ;;  %s13704_s18 = smov 8  }
  0xd8   : > { %12668 = dma.hbm_to_vmem [thread:$0]  (!%p13960_p12), %s13826_s17, 512, %s934_s24, [#allocation9], %s13703_s22, %s13703_s22, %s13704_s18  }
  0xd9   : > { %s13705_s1 = smov [#allocation13]   ;;  %s13706_s23 = smov [#allocation16]  }
  0xda   : > { %s957_s4 = sshll.u32 %s13705_s1, 4  ;;  %s981_s26 = sshll.u32 %s13706_s23, 4  ;;  %s958_s4 = int_to_ptr.vmem [resolvable:$true] %s957_s4  ;;  %s982_s26 = int_to_ptr.vmem [resolvable:$true] %s981_s26 }
  0xdb   : > { %s13356_s16 = scalar_lea.vmem %s958_s4, 512  ;;  %p13364_p10 = scmp.lt.s32.totalorder %s958_s4, %s958_s4 }
  0xdc   : > { %p13357_p4 = scmp.ne.s32.totalorder %s958_s4, %s13356_s16  ;;  %p13365_p7 = scmp.lt.s32.totalorder %s13356_s16, %s13356_s16 }
  0xde   : > { %p13359_p5 = pnand %p13357_p4, %p13968_p13  ;;  %p13366_p8 = por %p13365_p7, %p13364_p10 }
  0xe0   : > { %p13360_p6 = pneg %p13359_p5 }
  0xe2   : > { %p13367_p11 = pnand %p13366_p8, %p13360_p6 }
  0xe4   : > { %13370 = shalt.err (!%p13367_p11)
}
  0xe5   : > { %12674 = dma.hbm_to_vmem [thread:$0]  (!%p13960_p12), %s13836_s25, 512, %s958_s4, [#allocation12], %s13703_s22, %s13703_s22, %s13704_s18  }
  0xe6   : > { %s13382_s24 = scalar_lea.vmem %s982_s26, 512  ;;  %p13390_p3 = scmp.lt.s32.totalorder %s982_s26, %s982_s26 }
  0xe7   : > { %p13383_p0 = scmp.ne.s32.totalorder %s982_s26, %s13382_s24  ;;  %p13391_p9 = scmp.lt.s32.totalorder %s13382_s24, %s13382_s24 }
  0xe9   : > { %p13385_p1 = pnand %p13383_p0, %p13968_p13  ;;  %p13392_p4 = por %p13391_p9, %p13390_p3 }
  0xeb   : > { %p13386_p2 = pneg %p13385_p1 }
  0xed   : > { %p13393_p5 = pnand %p13392_p4, %p13386_p2 }
  0xef   : > { %13396 = shalt.err (!%p13393_p5)
}
  0xf0   : > { %12680 = dma.hbm_to_vmem [thread:$0]  (!%p13960_p12), %s13846_s12, 512, %s982_s26, [#allocation15], %s13703_s22, %s13703_s22, %s13704_s18  }
  0xf1   : > { %s13707_s11 = smov [#allocation19]   ;;  %s13708_s4 = smov [#allocation22]  }
  0xf2   : > { %s1005_s1 = sshll.u32 %s13707_s11, 4  ;;  %s1029_s23 = sshll.u32 %s13708_s4, 4  ;;  %s1006_s1 = int_to_ptr.vmem [resolvable:$true] %s1005_s1  ;;  %s1030_s23 = int_to_ptr.vmem [resolvable:$true] %s1029_s23 }
  0xf3   : > { %s13408_s16 = scalar_lea.vmem %s1006_s1, 512  ;;  %p13416_p8 = scmp.lt.s32.totalorder %s1006_s1, %s1006_s1 }
  0xf4   : > { %p13409_p6 = scmp.ne.s32.totalorder %s1006_s1, %s13408_s16  ;;  %p13417_p11 = scmp.lt.s32.totalorder %s13408_s16, %s13408_s16 }
  0xf6   : > { %p13411_p10 = pnand %p13409_p6, %p13968_p13  ;;  %p13418_p0 = por %p13417_p11, %p13416_p8 }
  0xf8   : > { %p13412_p7 = pneg %p13411_p10 }
  0xfa   : > { %p13419_p1 = pnand %p13418_p0, %p13412_p7 }
  0xfc   : > { %13422 = shalt.err (!%p13419_p1)
}
  0xfd   : > { %12686 = dma.hbm_to_vmem [thread:$0]  (!%p13960_p12), %s13856_s21, 512, %s1006_s1, [#allocation18], %s13703_s22, %s13703_s22, %s13704_s18  }
  0xfe   : > { %s13434_s26 = scalar_lea.vmem %s1030_s23, 512  ;;  %p13442_p4 = scmp.lt.s32.totalorder %s1030_s23, %s1030_s23 }
  0xff   : > { %p13435_p2 = scmp.ne.s32.totalorder %s1030_s23, %s13434_s26  ;;  %p13443_p5 = scmp.lt.s32.totalorder %s13434_s26, %s13434_s26 }
 0x101   : > { %p13437_p3 = pnand %p13435_p2, %p13968_p13  ;;  %p13444_p6 = por %p13443_p5, %p13442_p4 }
 0x103   : > { %p13438_p9 = pneg %p13437_p3 }
 0x105   : > { %p13445_p10 = pnand %p13444_p6, %p13438_p9 }
 0x107   : > { %13448 = shalt.err (!%p13445_p10)
}
 0x108   : > { %s15411_s24 = sld [smem:[#allocation64_spill]]  ;;  %s13709_s11 = smov [#allocation25]  }
 0x109   : > { %s1053_s1 = sshll.u32 %s13709_s11, 4  ;;  %s13710_s4 = smov [#allocation28]   ;;  %s1054_s1 = int_to_ptr.vmem [resolvable:$true] %s1053_s1 }
 0x10a   : > { %s1077_s16 = sshll.u32 %s13710_s4, 4  ;;  %s13460_s3 = scalar_lea.vmem %s1054_s1, 512  ;;  %s1078_s16 = int_to_ptr.vmem [resolvable:$true] %s1077_s16 }
 0x10b   : > { %p13461_p7 = scmp.ne.s32.totalorder %s1054_s1, %s13460_s3  ;;  %p13468_p0 = scmp.lt.s32.totalorder %s1054_s1, %s1054_s1 }
 0x10c   : > { %p13469_p1 = scmp.lt.s32.totalorder %s13460_s3, %s13460_s3 }
 0x10d   : > { %p13463_p8 = pnand %p13461_p7, %p13968_p13 }
 0x10e   : > { %12692 = dma.hbm_to_vmem [thread:$0]  (!%p13960_p12), %s15411_s24, 512, %s1030_s23, [#allocation21], %s13703_s22, %s13703_s22, %s13704_s18  }
 0x10f   : > { %p13464_p11 = pneg %p13463_p8  ;;  %p13470_p2 = por %p13469_p1, %p13468_p0 }
 0x111   : > { %p13471_p3 = pnand %p13470_p2, %p13464_p11 }
 0x113   : > { %13474 = shalt.err (!%p13471_p3)
}
 0x114   : > { %s15412_s23 = sld [smem:[#allocation65_spill]]  ;;  %s13486_s26 = scalar_lea.vmem %s1078_s16, 512 }
 0x115   : > { %p13487_p9 = scmp.ne.s32.totalorder %s1078_s16, %s13486_s26  ;;  %p13494_p6 = scmp.lt.s32.totalorder %s1078_s16, %s1078_s16 }
 0x116   : > { %p13495_p10 = scmp.lt.s32.totalorder %s13486_s26, %s13486_s26 }
 0x117   : > { %p13489_p4 = pnand %p13487_p9, %p13968_p13 }
 0x118   : > { %p13496_p7 = por %p13495_p10, %p13494_p6 }
 0x119   : > { %p13490_p5 = pneg %p13489_p4 }
 0x11a   : > { %12698 = dma.hbm_to_vmem [thread:$0]  (!%p13960_p12), %s15412_s23, 512, %s1054_s1, [#allocation24], %s13703_s22, %s13703_s22, %s13704_s18  }
 0x11b   : > { %p13497_p8 = pnand %p13496_p7, %p13490_p5 }
 0x11d   : > { %13500 = shalt.err (!%p13497_p8)
}
 0x11e   : > { %s15413_s8 = sld [smem:[#allocation67_spill]]  ;;  %s13711_s3 = smov [#allocation29]  }
 0x11f   : > { %s1091_s24 = sshll.u32 %s13711_s3, 4  ;;  %s1092_s24 = int_to_ptr.vmem [resolvable:$true] %s1091_s24 }
 0x120   : > { %s13512_s11 = scalar_lea.vmem %s1092_s24, 16  ;;  %s13519_s1 = scalar_lea.vmem %s1092_s24, 32 }
 0x121   : > { %p13513_p11 = scmp.ne.s32.totalorder %s1092_s24, %s13512_s11  ;;  %p13520_p2 = scmp.lt.s32.totalorder %s1092_s24, %s1092_s24 }
 0x122   : > { %p13521_p3 = scmp.lt.s32.totalorder %s13519_s1, %s13512_s11 }
 0x123   : > { %p13515_p0 = pnand %p13513_p11, %p13968_p13 }
 0x124   : > { %12704 = dma.hbm_to_vmem [thread:$0]  (!%p13960_p12), %s15413_s8, 512, %s1078_s16, [#allocation27], %s13703_s22, %s13703_s22, %s13704_s18  }
 0x125   : > { %p13516_p1 = pneg %p13515_p0  ;;  %p13522_p9 = por %p13521_p3, %p13520_p2 }
 0x127   : > { %p13523_p4 = pnand %p13522_p9, %p13516_p1 }
 0x129   : > { %13526 = shalt.err (!%p13523_p4)
}
 0x12a   : > { %12707 = dma.hbm_to_vmem [thread:$0]  (!%p13960_p12), %s13891_s29, 16, %s1092_s24, [#allocation30]  }
 0x12b   : > { %p15414_p5 = scmp.ne.s32.totalorder %s15403_s2, 0 }
 0x12c   : > { %p15415_p6 = scmp.eq.s32.totalorder (!%p15414_p5), %s13924_s15, 0 }
 0x12d   : > { %1144 = sbr.rel (%p15414_p5) target bundleno = 20319 (0x4f5f), region = 148 }
 0x132   : > { %13596 = dma.done.wait (%p15415_p6), [#allocation3], 16   ;;  %p15416_p10 = pmov %p15415_p6 }
 0x133   : > { %p15417_p13 = pmov %p15415_p6 }
 0x134   : > { %13598 = vsyncadd (%p15416_p10), [#allocation3], 4294967280 }
 0x135   : > { %13600 = dma.done.wait (%p15417_p13), [#allocation6], 32   ;;  %p15418_p7 = pmov %p15415_p6 }
 0x136   : > { %p15419_p8 = pmov %p15415_p6 }
 0x137   : > { %13602 = vsyncadd (%p15418_p7), [#allocation6], 4294967264 }
 0x138   : > { %13604 = dma.done.wait (%p15419_p8), [#allocation9], 528   ;;  %p15420_p12 = pmov %p15415_p6 }
 0x139   : > { %p15421_p11 = pmov %p15415_p6 }
 0x13a   : > { %13606 = vsyncadd (%p15420_p12), [#allocation9], 4294966768 }
 0x13b   : > { %13608 = dma.done.wait (%p15421_p11), [#allocation12], 528   ;;  %p15422_p0 = pmov %p15415_p6 }
 0x13d   : > { %13610 = vsyncadd (%p15422_p0), [#allocation12], 4294966768  ;;  %p15423_p1 = pmov %p15422_p0 }
 0x13e   : > { %p15424_p2 = pmov %p15422_p0 }
 0x13f   : > { %13612 = dma.done.wait (%p15423_p1), [#allocation15], 528  }
 0x140   : > { %13614 = vsyncadd (%p15424_p2), [#allocation15], 4294966768  ;;  %p15425_p3 = pmov %p15422_p0 }
 0x141   : > { %p15426_p9 = pmov %p15422_p0 }
 0x142   : > { %13616 = dma.done.wait (%p15425_p3), [#allocation18], 528  }
 0x143   : > { %13618 = vsyncadd (%p15426_p9), [#allocation18], 4294966768  ;;  %p15427_p4 = pmov %p15422_p0 }
 0x144   : > { %p15428_p5 = pmov %p15422_p0 }
 0x145   : > { %13620 = dma.done.wait (%p15427_p4), [#allocation21], 528  }
 0x146   : > { %13622 = vsyncadd (%p15428_p5), [#allocation21], 4294966768  ;;  %p15429_p6 = pmov %p15422_p0 }
 0x147   : > { %p15430_p10 = pmov %p15422_p0 }
 0x148   : > { %13624 = dma.done.wait (%p15429_p6), [#allocation24], 528  }
 0x149   : > { %13626 = vsyncadd (%p15430_p10), [#allocation24], 4294966768  ;;  %p15431_p13 = pmov %p15422_p0 }
 0x14a   : > { %p15432_p7 = pmov %p15422_p0 }
 0x14b   : > { %13628 = dma.done.wait (%p15431_p13), [#allocation27], 528  }
 0x14c   : > { %13630 = vsyncadd (%p15432_p7), [#allocation27], 4294966768  ;;  %p15433_p8 = pmov %p15422_p0 }
 0x14d   : > { %p15434_p12 = pmov %p15422_p0 }
 0x14e   : > { %13632 = dma.done.wait (%p15433_p8), [#allocation30], 16  }
 0x14f   : > { %13634 = vsyncadd (%p15434_p12), [#allocation30], 4294967280  ;;  %s15435_s7 = sld [smem:[#allocation52_spill]]  ;;  %v13712_v0 = vmov 0.0   ;;  %vm13713_vm0 = vmmov 0   ;;  %p1318_p11 = scmp.lt.s32.totalorder %s13924_s15, 1  ;;  %v1837_v58 = vlaneseq }
 0x150   : > { %s15437_s0 = sld [smem:[#allocation54_spill]]  ;;  %11843 = vmatprep.subr.mxu0 %v13712_v0  ;;  %11862 = vmatprep.subr.mxu1 %v13712_v0  ;;  %vm1510_vm1 = vcmask 392192   ;;  %vm1430_vm2 = vcmask 523264   ;;  %v13714_v25 = vmov 0   ;;  %vm3846_vm3 = vcmask 7168   ;;  %s15458_s6 = smov 96  }
 0x151   : > { %11859 = vmatprep.mubr.msk.f32.mxu0 %vm13713_vm0, %v13712_v0  ;;  %11874 = vmatprep.mubr.msk.f32.mxu1 %vm13713_vm0, %v13712_v0  ;;  %s14141_s18 = scalar_select %p1318_p11, %s13924_s15, 1  ;;  %v11371_v29 = vld [vmem:[#allocation2] ss:$0 sm:$0xff]  ;;  %vm1591_vm4 = vcmask 261120   ;;  %v11375_v44 = vld [vmem:[#allocation7] ss:$0 sm:$0xff] }
 0x152   : > { %s15439_s4 = sld [smem:[#allocation47_spill]]  ;;  %12851 = vset.pattern.permute.xlu0 %v13714_v25  ;;  %12852 = vset.pattern.permute.xlu1 %v13714_v25  ;;  %v11373_v47 = vld [vmem:[#allocation5] ss:$0 sm:$0xff]  ;;  %vm1845_vm5 = vcmask 64512   ;;  %v1838_v61 = vshrl.u32 %v1837_v58, 7  ;;  %s15459_s8 = smov 64  }
 0x153   : > { %s14152_s16 = sshll.u32 %s14141_s18, 3  ;;  %s15440_s23 = sld [smem:[#allocation46_spill]] }
 0x154   : > { %s15441_s3 = sld [smem:[#allocation55_spill]]  ;;  %v14249_v63 = vsub.s32 0, %v1838_v61  ;;  %s15460_s9 = smov 48  }
 0x155   : > { %s15436_s2 = smov %s15435_s7  ;;  %v1347_v1 = vld [vmem:[%s15435_s7 + $0x38] sm:$0xff]  ;;  %s15442_s24 = sld [smem:[#allocation57_spill]] }
 0x156   : > { %s15438_s22 = smov %s15437_s0  ;;  %v1346_v2 = vld [vmem:[%s15436_s2 + $0x30] sm:$0xff]  ;;  %11844 = vmatpush3.msra.mxu0 %v1347_v1  ;;  %v1354_v3 = vld [vmem:[%s15437_s0 + $0x28] sm:$0xff]  ;;  %v1344_v7 = vld [vmem:[%s15436_s2 + $0x20] sm:$0xff]  ;;  %s15443_s1 = sld [smem:[#allocation48_spill]] }
 0x157   : > { %v1353_v4 = vld [vmem:[%s15438_s22 + $0x20] sm:$0xff]  ;;  %11845 = vmatprep.subr.mxu0 %v13712_v0  ;;  %v1345_v5 = vld [vmem:[%s15436_s2 + $0x28] sm:$0xff]  ;;  %11863 = vmatpush3.msra.mxu1 %v1354_v3  ;;  %v1352_v6 = vld [vmem:[%s15438_s22 + $0x18] sm:$0xff]  ;;  %s15444_s7 = sld [smem:[#allocation50_spill]]  ;;  %p15462_p1 = scmp.ne.s32.totalorder %s15400_s28, 0 }
 0x158   : > { %11846 = vmatpush3.msra.mxu0 %v1346_v2  ;;  %11864 = vmatprep.subr.mxu1 %v13712_v0  ;;  %v1351_v8 = vld [vmem:[%s15438_s22 + $0x10] sm:$0xff]  ;;  %v1343_v9 = vld [vmem:[%s15436_s2 + $0x18] sm:$0xff]  ;;  %v1350_v10 = vld [vmem:[%s15438_s22 + $0x8] sm:$0xff]  ;;  %s1325_s26 = scalar_lea.vmem %s15439_s4, %s14152_s16  ;;  %s15445_s0 = sld [smem:[#allocation53_spill]] }
 0x159   : > { %11847 = vmatprep.subr.mxu0 %v13712_v0  ;;  %11865 = vmatpush3.msra.mxu1 %v1353_v4  ;;  %v1342_v11 = vld [vmem:[%s15436_s2 + $0x10] sm:$0xff]  ;;  %v1349_v12 = vld [vmem:[%s15438_s22] sm:$0xff]  ;;  %v1341_v13 = vld [vmem:[%s15436_s2 + $0x8] sm:$0xff]  ;;  %s1321_s11 = scalar_lea.vmem %s15440_s23, %s14152_s16 }
 0x15a   : > { %11848 = vmatpush3.msra.mxu0 %v1345_v5  ;;  %11866 = vmatprep.subr.mxu1 %v13712_v0  ;;  %v1415_v14 = vld [vmem:[%s1325_s26] sm:$0xff]  ;;  %v1359_v16 = vld [vmem:[%s15441_s3 + $0x18] sm:$0xff]  ;;  %v1358_v19 = vld [vmem:[%s15441_s3 + $0x10] sm:$0xff]  ;;  %s15446_s26 = sld [smem:[#allocation59_spill]] }
 0x15b   : > { %11849 = vmatprep.subr.mxu0 %v13712_v0  ;;  %11867 = vmatpush3.msra.mxu1 %v1352_v6  ;;  %v1340_v15 = vld [vmem:[%s15436_s2] sm:$0xff]  ;;  %v1364_v18 = vld [vmem:[%s15442_s24 + $0x18] sm:$0xff]  ;;  %v1363_v20 = vld [vmem:[%s15442_s24 + $0x10] sm:$0xff]  ;;  %s15456_s2 = smov 104  }
 0x15c   : > { %11850 = vmatpush3.msra.mxu0 %v1344_v7  ;;  %11868 = vmatprep.subr.mxu1 %v13712_v0  ;;  %v1414_v17 = vld [vmem:[%s1321_s11] sm:$0xff]  ;;  %v1357_v21 = vld [vmem:[%s15441_s3 + $0x8] sm:$0xff]  ;;  %s1329_s4 = scalar_lea.vmem %s15443_s1, %s14152_s16  ;;  %s15359_s11 = smov 96  }
 0x15d   : > { %11851 = vmatprep.subr.mxu0 %v13712_v0  ;;  %11869 = vmatpush3.msra.mxu1 %v1351_v8  ;;  %v1362_v22 = vld [vmem:[%s15442_s24 + $0x8] sm:$0xff]  ;;  %v1356_v23 = vld [vmem:[%s15441_s3] sm:$0xff]  ;;  %s1336_s23 = scalar_lea.vmem %s15444_s7, %s14152_s16  ;;  %s15447_s16 = sld [smem:[#allocation51_spill]] }
 0x15e   : > { %11852 = vmatpush3.msra.mxu0 %v1343_v9  ;;  %11870 = vmatprep.subr.mxu1 %v13712_v0  ;;  %v1361_v24 = vld [vmem:[%s15442_s24] sm:$0xff]  ;;  %s15347_s7 = smov 120  }
 0x15f   : > { %11853 = vmatprep.subr.mxu0 %v13712_v0  ;;  %11871 = vmatpush3.msra.mxu1 %v1350_v10  ;;  %v14200_v26 = vld [vmem:[%s1329_s4] sm:$0xff]  ;;  %s15365_s4 = smov 64  }
 0x160   : > { %11854 = vmatpush3.msra.mxu0 %v1342_v11  ;;  %11872 = vmatprep.subr.mxu1 %v13712_v0  ;;  %v1417_v27 = vld [vmem:[%s1336_s23] sm:$0xff]  ;;  %v1369_v39 = vld [vmem:[%s15446_s26 + $0x18] sm:$0xff]  ;;  %v1368_v40 = vld [vmem:[%s15446_s26 + $0x10] sm:$0xff]  ;;  %s15448_s23 = sld [smem:[#allocation60_spill]] }
 0x161   : > { %11855 = vmatprep.subr.mxu0 %v13712_v0  ;;  %11873 = vmatpush3.msra.mxu1 %v1349_v12  ;;  %v14204_v28 = vsel %vm3846_vm3, %v1417_v27, 0.0  ;;  %v11369_v31 = vld [vmem:[%s15445_s0] ss:$0 sm:$0xff]  ;;  %v1367_v41 = vld [vmem:[%s15446_s26 + $0x8] sm:$0xff]  ;;  %s15363_s0 = smov 88  }
 0x162   : > { %11856 = vmatpush3.msra.mxu0 %v1341_v13  ;;  %11875 = vmatmul.mubr.msk.f32.vlgmr.msra.gmra.mxu1 %vm1510_vm1, %v1415_v14  ;;  %v1366_v42 = vld [vmem:[%s15446_s26] sm:$0xff] }
 0x163   : > { %11857 = vmatprep.subr.mxu0 %v13712_v0  ;;  %11877 = vmatprep.subr.mxu1 %v13712_v0  ;;  %s1339_s1 = scalar_lea.vmem %s15447_s16, %s14141_s18  ;;  %s15349_s16 = smov 56  }
 0x164   : > { %11858 = vmatpush3.msra.mxu0 %v1340_v15  ;;  %11878 = vmatpush3.msra.mxu1 %v1359_v16  ;;  %v1421_v59 = vld [vmem:[%s1339_s1] sm:$0x1]  ;;  %s15351_s1 = smov 80  }
 0x165   : > { %11860 = vmatmul.mubr.msk.f32.vlgmr.msra.gmra.mxu0 %vm1430_vm2, %v1414_v17  ;;  %11888 = vmatprep.subr.mxu0 %v13712_v0  ;;  %v11368_v60 = vadd.f32 -1.0, %v1421_v59 }
 0x166   : > { %11879 = vmatprep.subr.mxu1 %v13712_v0  ;;  %11889 = vmatpush3.msra.mxu0 %v1364_v18  ;;  %v1370_v18 = vld [vmem:[%s15448_s23] sm:$0xff] }
 0x167   : > { %11880 = vmatpush3.msra.mxu1 %v1358_v19  ;;  %11890 = vmatprep.subr.mxu0 %v13712_v0  ;;  %v1423_v62 = vmul.f32 1e+09, %v11368_v60 }
 0x168   : > { %11881 = vmatprep.subr.mxu1 %v13712_v0  ;;  %11885 = vmatprep.mubr.msk.f32.mxu1 %vm13713_vm0, %v13712_v0 }
 0x169   : > { %11896 = vmatprep.mubr.msk.f32.mxu0 %vm13713_vm0, %v13712_v0  ;;  %11891 = vmatpush3.msra.mxu0 %v1363_v20  ;;  %v14252_v1 = vrot.slane %v1423_v62, %v14249_v63 }
 0x16a   : > { %11882 = vmatpush3.msra.mxu1 %v1357_v21  ;;  %11892 = vmatprep.subr.mxu0 %v13712_v0 }
 0x16b   : > { %11883 = vmatprep.subr.mxu1 %v13712_v0  ;;  %11893 = vmatpush3.msra.mxu0 %v1362_v22 }
 0x16c   : > { %11884 = vmatpush3.msra.mxu1 %v1356_v23  ;;  %11894 = vmatprep.subr.mxu0 %v13712_v0 }
 0x16d   : > { %11895 = vmatpush3.msra.mxu0 %v1361_v24  ;;  %11899 = vmatprep.subr.mxu1 %v13712_v0 }
 0x16e   : > { %11910 = vmatprep.subr.mxu0 %v13712_v0  ;;  %1667 = vperm.xlu0 %12851, %v14200_v26  }
 0x172   : > { %1753 = vperm.xlu0 %12851, %v1417_v27  }
 0x1e9   : > { %v14227_v43 = vpop.permute.xlu0 %1667 }
 0x1ed   : > { %v14229_v46 = vpop.permute.xlu0 %1753 }
 0x222   : > { %v1580_v30 = vpop.f32.mrf.mxu1 }
 0x223   : > { %v14207_v32 = vadd.f32 %v11371_v29, %v1580_v30 }
 0x224   : > { %v11876_v33 = vpop.f32.mrf.mxu1 }
 0x225   : > { %v1500_v34 = vpop.f32.mrf.mxu0  ;;  %v1671_v35 = vmax.f32 %v14207_v32, 0.0 }
 0x226   : > { %v1501_v36 = vadd.f32 %v11369_v31, %v1500_v34 }
 0x227   : > { %v11861_v37 = vpop.f32.mrf.mxu0  ;;  %11897 = vmatmul.mubr.msk.f32.vlgmr.msra.gmra.mxu0 %vm1591_vm4, %v1671_v35  ;;  %v11377_v35 = vld [vmem:[#allocation8] ss:$0 sm:$0xff] }
 0x228   : > { %v1584_v38 = vmax.f32 %v1501_v36, 0.0  ;;  %11912 = vmatprep.mubr.msk.f32.mxu0 %vm13713_vm0, %v13712_v0 }
 0x22a   : > { %11886 = vmatmul.mubr.msk.f32.vlgmr.msra.gmra.mxu1 %vm1591_vm4, %v1584_v38 }
 0x22b   : > { %11900 = vmatpush3.msra.mxu1 %v1369_v39  ;;  %11907 = vmatprep.mubr.msk.f32.mxu1 %vm13713_vm0, %v13712_v0 }
 0x22c   : > { %11901 = vmatprep.subr.mxu1 %v13712_v0 }
 0x22d   : > { %11902 = vmatpush3.msra.mxu1 %v1368_v40 }
 0x22e   : > { %11903 = vmatprep.subr.mxu1 %v13712_v0 }
 0x22f   : > { %11904 = vmatpush3.msra.mxu1 %v1367_v41 }
 0x230   : > { %11905 = vmatprep.subr.mxu1 %v13712_v0 }
 0x231   : > { %11906 = vmatpush3.msra.mxu1 %v1366_v42 }
 0x232   : > { %11908 = vmatmul.mubr.msk.f32.vlgmr.msra.gmra.mxu1 %vm1591_vm4, %v1501_v36  ;;  %11920 = vmatprep.subr.mxu1 %v13712_v0 }
 0x233   : > { %11922 = vmatprep.mubr.msk.f32.mxu1 %vm13713_vm0, %v13712_v0  ;;  %11921 = vmatpush3.msra.mxu1 %v1370_v18 }
 0x234   : > { %11930 = vmatprep.subr.mxu1 %v13712_v0 }
 0x2e7   : > { %v1747_v45 = vpop.f32.mrf.mxu0 }
 0x2e8   : > { %v1748_v48 = vadd.f32 %v11375_v44, %v1747_v45 }
 0x2e9   : > { %v11898_v49 = vpop.f32.mrf.mxu0 }
 0x2ea   : > { %v1661_v50 = vpop.f32.mrf.mxu1  ;;  %v14232_v51 = vmul.f32 %v14229_v46, %v1748_v48 }
 0x2eb   : > { %v1662_v52 = vadd.f32 %v11373_v47, %v1661_v50  ;;  %v1371_v47 = vld [vmem:[%s15448_s23 + $0x8] sm:$0xff] }
 0x2ec   : > { %v11887_v53 = vpop.f32.mrf.mxu1  ;;  %11911 = vmatpush3.xpose.msk.msra.mxu0 %vm1845_vm5, %v14232_v51 }
 0x2ed   : > { %v14237_v54 = vmul.f32 %v14227_v43, %v1662_v52  ;;  %11915 = vmatprep.subr.mxu0 %v13712_v0 }
 0x2ef   : > { %1843 = vrot.lane.b32.xlu1 %v14237_v54, %s15359_s11 }
 0x2f2   : > { %v14242_v55 = vpop.f32.mrf.mxu1 }
 0x2f3   : > { %v1833_v36 = vadd.f32 %v11377_v35, %v14242_v55 }
 0x2f4   : > { %v11909_v56 = vpop.f32.mrf.mxu1 }
 0x361   : > { %v1844_v57 = vpop.permute.xlu1 %1843 }
 0x362   : > { %11913 = vmatmul.mubr.msk.f32.vlgmr.msra.gmra.mxu0 %vm1845_vm5, %v1844_v57 }
 0x363   : > { %11917 = vmatprep.mubr.msk.f32.mxu0 %vm13713_vm0, %v13712_v0 }
 0x422   : > { %v1917_v2 = vpop.f32.mrf.mxu0 }
 0x423   : > { %v1918_v3 = vadd.f32 %v1917_v2, %v14252_v1 }
 0x424   : > { %v11914_v4 = vpop.f32.mrf.mxu0 }
 0x425   : > { %v1921_v5 = vmul.f32 0.35355338, %v1918_v3 }
 0x427   : > { %v1922_v6 = vsel %vm1845_vm5, %v1921_v5, -inf }
 0x428   : > { %1923 = vmax.xlane.f32.xlu1 %v1922_v6 }
 0x439   : > { %2085 = vrot.lane.b32.xlu1 %v14232_v51, %s15347_s7  ;;  %s15353_s7 = smov 112  }
 0x43d   : > { %2083 = vrot.lane.b32.xlu1 %v14237_v54, %s15363_s0 }
 0x4b1   : > { %v1924_v7 = vpop.xlane.xlu1 %1923 }
 0x4b2   : > { %v1925_v8 = vsub.f32 %v1921_v5, %v1924_v7 }
 0x4b4   : > { %v1926_v9 = vmul.f32 1.442695, %v1925_v8 }
 0x4b5   : > { %v2086_v15 = vpop.permute.xlu1 %2085 }
 0x4b6   : > { %12853 = vpow2.f32 %v1926_v9 }
 0x4b9   : > { %v2084_v17 = vpop.permute.xlu1 %2083 }
 0x4c3   : > { %v12854_v10 = vpop.eup %12853 }
 0x4c4   : > { %v1928_v11 = vsel %vm1845_vm5, %v12854_v10, 0.0 }
 0x4c5   : > { %1929 = vadd.xlane.f32.xlu0 %v1928_v11 }
 0x4db   : > { %1933 = vrot.lane.b32.xlu0 %v14232_v51, %s15365_s4 }
 0x54e   : > { %v1930_v12 = vpop.xlane.xlu0 %1929 }
 0x54f   : > { %12855 = vrcp.f32 %v1930_v12 }
 0x552   : > { %v1934_v13 = vpop.permute.xlu0 %1933 }
 0x553   : > { %11916 = vmatpush3.msra.mxu0 %v1934_v13 }
 0x554   : > { %11925 = vmatprep.subr.mxu0 %v13712_v0 }
 0x55c   : > { %v12856_v14 = vpop.eup %12855 }
 0x55d   : > { %v1932_v16 = vmul.f32 %v12856_v14, %v12854_v10  ;;  %v1372_v10 = vld [vmem:[%s15448_s23 + $0x10] sm:$0xff] }
 0x55f   : > { %11918 = vmatmul.mubr.msk.f32.vlgmr.msra.gmra.mxu0 %vm1845_vm5, %v1932_v16 }
 0x560   : > { %11926 = vmatpush3.xpose.msk.msra.mxu0 %vm1845_vm5, %v2086_v15  ;;  %11927 = vmatprep.mubr.msk.f32.mxu0 %vm13713_vm0, %v13712_v0 }
 0x561   : > { %11935 = vmatprep.subr.mxu0 %v13712_v0 }
 0x563   : > { %11928 = vmatmul.mubr.msk.f32.vlgmr.msra.gmra.mxu0 %vm1845_vm5, %v2084_v17 }
 0x564   : > { %11937 = vmatprep.mubr.msk.f32.mxu0 %vm13713_vm0, %v13712_v0  ;;  %11936 = vmatpush3.msra.mxu0 %v1371_v47 }
 0x565   : > { %11945 = vmatprep.subr.mxu0 %v13712_v0 }
 0x61f   : > { %v2005_v19 = vpop.f32.mrf.mxu0 }
 0x620   : > { %11923 = vmatmul.mubr.msk.f32.vlgmr.msra.gmra.mxu1 %vm1845_vm5, %v2005_v19 }
 0x621   : > { %v11919_v20 = vpop.f32.mrf.mxu0  ;;  %11932 = vmatprep.mubr.msk.f32.mxu1 %vm13713_vm0, %v13712_v0 }
 0x623   : > { %v2157_v21 = vpop.f32.mrf.mxu0 }
 0x624   : > { %v2158_v22 = vadd.f32 %v2157_v21, %v14252_v1 }
 0x625   : > { %v11929_v23 = vpop.f32.mrf.mxu0 }
 0x626   : > { %v2161_v24 = vmul.f32 0.35355338, %v2158_v22 }
 0x628   : > { %v2162_v25 = vsel %vm1845_vm5, %v2161_v24, -inf }
 0x629   : > { %2163 = vmax.xlane.f32.xlu0 %v2162_v25 }
 0x63f   : > { %2173 = vrot.lane.b32.xlu0 %v14232_v51, %s15349_s16  ;;  %s15355_s16 = smov 104  }
 0x643   : > { %2323 = vrot.lane.b32.xlu0 %v14237_v54, %s15351_s1  ;;  %s15357_s1 = smov 72  }
 0x6b2   : > { %v2164_v27 = vpop.xlane.xlu0 %2163 }
 0x6b3   : > { %v2165_v29 = vsub.f32 %v2161_v24, %v2164_v27 }
 0x6b5   : > { %v2166_v30 = vmul.f32 1.442695, %v2165_v29  ;;  %v1373_v29 = vld [vmem:[%s15448_s23 + $0x18] sm:$0xff] }
 0x6b6   : > { %v2174_v31 = vpop.permute.xlu0 %2173 }
 0x6b7   : > { %12857 = vpow2.f32 %v2166_v30  ;;  %11931 = vmatpush3.msra.mxu1 %v2174_v31 }
 0x6b8   : > { %11940 = vmatprep.subr.mxu1 %v13712_v0 }
 0x6ba   : > { %v2324_v45 = vpop.permute.xlu0 %2323 }
 0x6c4   : > { %v12858_v33 = vpop.eup %12857 }
 0x6c5   : > { %v2168_v34 = vsel %vm1845_vm5, %v12858_v33, 0.0 }
 0x6c6   : > { %2169 = vadd.xlane.f32.xlu1 %v2168_v34 }
 0x6d7   : > { %2325 = vrot.lane.b32.xlu1 %v14232_v51, %s15353_s7  ;;  %s15368_s7 = smov 48  }
 0x6e0   : > { %v2078_v37 = vpop.f32.mrf.mxu1 }
 0x6e1   : > { %v2082_v38 = vadd.f32 %v2078_v37, %v1833_v36 }
 0x6e2   : > { %v11924_v39 = vpop.f32.mrf.mxu1 }
 0x74f   : > { %v2170_v40 = vpop.xlane.xlu1 %2169 }
 0x750   : > { %12859 = vrcp.f32 %v2170_v40 }
 0x753   : > { %v2326_v44 = vpop.permute.xlu1 %2325 }
 0x75d   : > { %v12860_v41 = vpop.eup %12859 }
 0x75e   : > { %v2172_v42 = vmul.f32 %v12860_v41, %v12858_v33 }
 0x760   : > { %11933 = vmatmul.mubr.msk.f32.vlgmr.msra.gmra.mxu1 %vm1845_vm5, %v2172_v42 }
 0x761   : > { %11941 = vmatpush3.xpose.msk.msra.mxu1 %vm1845_vm5, %v2326_v44  ;;  %11942 = vmatprep.mubr.msk.f32.mxu1 %vm13713_vm0, %v13712_v0 }
 0x762   : > { %11950 = vmatprep.subr.mxu1 %v13712_v0 }
 0x764   : > { %11943 = vmatmul.mubr.msk.f32.vlgmr.msra.gmra.mxu1 %vm1845_vm5, %v2324_v45 }
 0x765   : > { %11952 = vmatprep.mubr.msk.f32.mxu1 %vm13713_vm0, %v13712_v0  ;;  %11951 = vmatpush3.msra.mxu1 %v1372_v10 }
 0x766   : > { %11960 = vmatprep.subr.mxu1 %v13712_v0 }
 0x820   : > { %v2245_v48 = vpop.f32.mrf.mxu1 }
 0x821   : > { %11938 = vmatmul.mubr.msk.f32.vlgmr.msra.gmra.mxu0 %vm1845_vm5, %v2245_v48 }
 0x822   : > { %v11934_v49 = vpop.f32.mrf.mxu1  ;;  %11947 = vmatprep.mubr.msk.f32.mxu0 %vm13713_vm0, %v13712_v0 }
 0x824   : > { %v2397_v50 = vpop.f32.mrf.mxu1 }
 0x825   : > { %v2398_v52 = vadd.f32 %v2397_v50, %v14252_v1 }
 0x826   : > { %v11944_v53 = vpop.f32.mrf.mxu1 }
 0x827   : > { %v2401_v55 = vmul.f32 0.35355338, %v2398_v52 }
 0x829   : > { %v2402_v56 = vsel %vm1845_vm5, %v2401_v55, -inf }
 0x82a   : > { %2403 = vmax.xlane.f32.xlu1 %v2402_v56 }
 0x83b   : > { %2565 = vrot.lane.b32.xlu1 %v14232_v51, %s15355_s16  ;;  %s15361_s16 = smov 40  }
 0x83f   : > { %2563 = vrot.lane.b32.xlu1 %v14237_v54, %s15357_s1  ;;  %s15449_s1 = sld [smem:[#allocation61_spill]] }
 0x845   : > { %v1378_v34 = vld [vmem:[%s15449_s1 + $0x18] sm:$0xff]  ;;  %v1377_v35 = vld [vmem:[%s15449_s1 + $0x10] sm:$0xff]  ;;  %v1376_v36 = vld [vmem:[%s15449_s1 + $0x8] sm:$0xff] }
 0x846   : > { %v1375_v37 = vld [vmem:[%s15449_s1] sm:$0xff] }
 0x8b3   : > { %v2404_v57 = vpop.xlane.xlu1 %2403 }
 0x8b4   : > { %v2405_v58 = vsub.f32 %v2401_v55, %v2404_v57 }
 0x8b6   : > { %v2406_v59 = vmul.f32 1.442695, %v2405_v58 }
 0x8b7   : > { %v2566_v7 = vpop.permute.xlu1 %2565 }
 0x8b8   : > { %12861 = vpow2.f32 %v2406_v59 }
 0x8bb   : > { %v2564_v9 = vpop.permute.xlu1 %2563 }
 0x8c5   : > { %v12862_v60 = vpop.eup %12861 }
 0x8c6   : > { %v2408_v61 = vsel %vm1845_vm5, %v12862_v60, 0.0 }
 0x8c7   : > { %2409 = vadd.xlane.f32.xlu0 %v2408_v61 }
 0x8dd   : > { %2413 = vrot.lane.b32.xlu0 %v14232_v51, %s15368_s7 }
 0x8e1   : > { %v2318_v62 = vpop.f32.mrf.mxu0 }
 0x8e2   : > { %v2322_v2 = vadd.f32 %v2318_v62, %v2082_v38 }
 0x8e3   : > { %v11939_v3 = vpop.f32.mrf.mxu0 }
 0x950   : > { %v2410_v4 = vpop.xlane.xlu0 %2409 }
 0x951   : > { %12863 = vrcp.f32 %v2410_v4 }
 0x954   : > { %v2414_v5 = vpop.permute.xlu0 %2413 }
 0x955   : > { %11946 = vmatpush3.msra.mxu0 %v2414_v5 }
 0x956   : > { %11955 = vmatprep.subr.mxu0 %v13712_v0 }
 0x95e   : > { %v12864_v6 = vpop.eup %12863 }
 0x95f   : > { %v2412_v8 = vmul.f32 %v12864_v6, %v12862_v60 }
 0x961   : > { %11948 = vmatmul.mubr.msk.f32.vlgmr.msra.gmra.mxu0 %vm1845_vm5, %v2412_v8  ;;  %v1379_v8 = vld [vmem:[#allocation10] sm:$0xff] }
 0x962   : > { %11956 = vmatpush3.xpose.msk.msra.mxu0 %vm1845_vm5, %v2566_v7  ;;  %11957 = vmatprep.mubr.msk.f32.mxu0 %vm13713_vm0, %v13712_v0 }
 0x963   : > { %11965 = vmatprep.subr.mxu0 %v13712_v0 }
 0x965   : > { %11958 = vmatmul.mubr.msk.f32.vlgmr.msra.gmra.mxu0 %vm1845_vm5, %v2564_v9 }
 0x966   : > { %11967 = vmatprep.mubr.msk.f32.mxu0 %vm13713_vm0, %v13712_v0  ;;  %11966 = vmatpush3.msra.mxu0 %v1373_v29 }
 0x967   : > { %11981 = vmatprep.subr.mxu0 %v13712_v0 }
 0xa21   : > { %v2485_v11 = vpop.f32.mrf.mxu0 }
 0xa22   : > { %11953 = vmatmul.mubr.msk.f32.vlgmr.msra.gmra.mxu1 %vm1845_vm5, %v2485_v11 }
 0xa23   : > { %v11949_v12 = vpop.f32.mrf.mxu0  ;;  %11962 = vmatprep.mubr.msk.f32.mxu1 %vm13713_vm0, %v13712_v0 }
 0xa25   : > { %v2637_v13 = vpop.f32.mrf.mxu0 }
 0xa26   : > { %v2638_v14 = vadd.f32 %v2637_v13, %v14252_v1 }
 0xa27   : > { %v11959_v15 = vpop.f32.mrf.mxu0 }
 0xa28   : > { %v2641_v16 = vmul.f32 0.35355338, %v2638_v14 }
 0xa2a   : > { %v2642_v17 = vsel %vm1845_vm5, %v2641_v16, -inf }
 0xa2b   : > { %2643 = vmax.xlane.f32.xlu0 %v2642_v17 }
 0xa41   : > { %2653 = vrot.lane.b32.xlu0 %v14232_v51, %s15361_s16 }
 0xab4   : > { %v2644_v18 = vpop.xlane.xlu0 %2643 }
 0xab5   : > { %v2645_v19 = vsub.f32 %v2641_v16, %v2644_v18 }
 0xab7   : > { %v2646_v20 = vmul.f32 1.442695, %v2645_v19 }
 0xab8   : > { %v2654_v21 = vpop.permute.xlu0 %2653 }
 0xab9   : > { %12865 = vpow2.f32 %v2646_v20  ;;  %11961 = vmatpush3.msra.mxu1 %v2654_v21  ;;  %v11395_v21 = vld [vmem:[#allocation11] ss:$0 sm:$0xff] }
 0xaba   : > { %11970 = vmatprep.subr.mxu1 %v13712_v0 }
 0xac6   : > { %v12866_v22 = vpop.eup %12865 }
 0xac7   : > { %v2648_v23 = vsel %vm1845_vm5, %v12866_v22, 0.0 }
 0xac8   : > { %2649 = vadd.xlane.f32.xlu1 %v2648_v23 }
 0xad9   : > { %2888 = vrot.lane.b32.xlu1 %v14232_v51, %s15359_s11  ;;  %s15450_s11 = sld [smem:[#allocation49_spill]] }
 0xadf   : > { %s1332_s16 = scalar_lea.vmem %s15450_s11, %s14141_s18  ;;  %s15451_s18 = smov 120  }
 0xae0   : > { %v1418_v42 = vld [vmem:[%s1332_s16] sm:$0x1]  ;;  %s15452_s11 = smov 112   ;;  %s15453_s16 = smov 80  }
 0xae1   : > { %v11367_v44 = vadd.f32 -1.0, %v1418_v42 }
 0xae2   : > { %v2558_v24 = vpop.f32.mrf.mxu1 }
 0xae3   : > { %v2562_v25 = vadd.f32 %v2558_v24, %v2322_v2  ;;  %v1420_v45 = vmul.f32 1e+09, %v11367_v44 }
 0xae4   : > { %v11954_v27 = vpop.f32.mrf.mxu1 }
 0xae5   : > { %v14363_v48 = vrot.slane %v1420_v45, %v14249_v63 }
 0xb51   : > { %v2650_v30 = vpop.xlane.xlu1 %2649 }
 0xb52   : > { %12867 = vrcp.f32 %v2650_v30 }
 0xb55   : > { %v2889_v40 = vpop.permute.xlu1 %2888 }
 0xb5f   : > { %v12868_v31 = vpop.eup %12867 }
 0xb60   : > { %v2652_v33 = vmul.f32 %v12868_v31, %v12866_v22 }
 0xb62   : > { %11963 = vmatmul.mubr.msk.f32.vlgmr.msra.gmra.mxu1 %vm1845_vm5, %v2652_v33 }
 0xb63   : > { %11971 = vmatpush3.msra.mxu1 %v1378_v34  ;;  %11978 = vmatprep.mubr.msk.f32.mxu1 %vm13713_vm0, %v13712_v0 }
 0xb64   : > { %11972 = vmatprep.subr.mxu1 %v13712_v0 }
 0xb65   : > { %11973 = vmatpush3.msra.mxu1 %v1377_v35  ;;  %v1380_v35 = vld [vmem:[#allocation10 + $0x8] sm:$0xff] }
 0xb66   : > { %11974 = vmatprep.subr.mxu1 %v13712_v0 }
 0xb67   : > { %11975 = vmatpush3.msra.mxu1 %v1376_v36 }
 0xb68   : > { %11976 = vmatprep.subr.mxu1 %v13712_v0 }
 0xb69   : > { %11977 = vmatpush3.msra.mxu1 %v1375_v37 }
 0xb6a   : > { %11979 = vmatmul.mubr.msk.f32.vlgmr.msra.gmra.mxu1 %vm1591_vm4, %v14207_v32  ;;  %11991 = vmatprep.subr.mxu1 %v13712_v0 }
 0xb6b   : > { %11993 = vmatprep.mubr.msk.f32.mxu1 %vm13713_vm0, %v13712_v0  ;;  %11992 = vmatpush3.msra.mxu1 %v1379_v8 }
 0xb6c   : > { %12001 = vmatprep.subr.mxu1 %v13712_v0 }
 0xc22   : > { %v2725_v38 = vpop.f32.mrf.mxu1 }
 0xc23   : > { %11968 = vmatmul.mubr.msk.f32.vlgmr.msra.gmra.mxu0 %vm1845_vm5, %v2725_v38 }
 0xc24   : > { %11982 = vmatpush3.xpose.msk.msra.mxu0 %vm1845_vm5, %v14237_v54  ;;  %v11964_v39 = vpop.f32.mrf.mxu1  ;;  %11983 = vmatprep.mubr.msk.f32.mxu0 %vm13713_vm0, %v13712_v0 }
 0xc25   : > { %11986 = vmatprep.subr.mxu0 %v13712_v0 }
 0xc27   : > { %11984 = vmatmul.mubr.msk.f32.vlgmr.msra.gmra.mxu0 %vm1845_vm5, %v2889_v40 }
 0xc28   : > { %11988 = vmatprep.mubr.msk.f32.mxu0 %vm13713_vm0, %v13712_v0 }
 0xc2a   : > { %v14358_v32 = vpop.f32.mrf.mxu1 }
 0xc2b   : > { %v2879_v22 = vadd.f32 %v11395_v21, %v14358_v32 }
 0xc2c   : > { %v11980_v41 = vpop.f32.mrf.mxu1 }
 0xce3   : > { %v2798_v47 = vpop.f32.mrf.mxu0 }
 0xce4   : > { %v14365_v49 = vadd.f32 %v2798_v47, %v2562_v25 }
 0xce5   : > { %v11969_v50 = vpop.f32.mrf.mxu0 }
 0xce7   : > { %v2960_v52 = vpop.f32.mrf.mxu0 }
 0xce8   : > { %v2961_v53 = vadd.f32 %v2960_v52, %v14363_v48 }
 0xce9   : > { %v11985_v55 = vpop.f32.mrf.mxu0 }
 0xcea   : > { %v2964_v56 = vmul.f32 0.35355338, %v2961_v53 }
 0xcec   : > { %v2965_v57 = vsel %vm1845_vm5, %v2964_v56, -inf }
 0xced   : > { %2966 = vmax.xlane.f32.xlu0 %v2965_v57 }
 0xd03   : > { %2976 = vrot.lane.b32.xlu0 %v14237_v54, %s15365_s4  ;;  %s15455_s4 = smov 72  }
 0xd07   : > { %3126 = vrot.lane.b32.xlu0 %v14232_v51, %s15363_s0  ;;  %s15454_s0 = smov 56  }
 0xd76   : > { %v2967_v58 = vpop.xlane.xlu0 %2966 }
 0xd77   : > { %v2968_v59 = vsub.f32 %v2964_v56, %v2967_v58 }
 0xd79   : > { %v2969_v60 = vmul.f32 1.442695, %v2968_v59 }
 0xd7a   : > { %v2977_v61 = vpop.permute.xlu0 %2976 }
 0xd7b   : > { %12869 = vpow2.f32 %v2969_v60  ;;  %11987 = vmatpush3.msra.mxu0 %v2977_v61  ;;  %v1381_v61 = vld [vmem:[#allocation10 + $0x10] sm:$0xff] }
 0xd7c   : > { %11996 = vmatprep.subr.mxu0 %v13712_v0 }
 0xd7e   : > { %v3127_v7 = vpop.permute.xlu0 %3126 }
 0xd88   : > { %v12870_v62 = vpop.eup %12869 }
 0xd89   : > { %v2971_v2 = vsel %vm1845_vm5, %v12870_v62, 0.0 }
 0xd8a   : > { %2972 = vadd.xlane.f32.xlu1 %v2971_v2 }
 0xd9b   : > { %3128 = vrot.lane.b32.xlu1 %v14237_v54, %s15451_s18 }
 0xe13   : > { %v2973_v3 = vpop.xlane.xlu1 %2972 }
 0xe14   : > { %12871 = vrcp.f32 %v2973_v3 }
 0xe17   : > { %v3129_v6 = vpop.permute.xlu1 %3128 }
 0xe21   : > { %v12872_v4 = vpop.eup %12871 }
 0xe22   : > { %v2975_v5 = vmul.f32 %v12872_v4, %v12870_v62  ;;  %v3847_v62 = vsel %vm3846_vm3, %v14200_v26, 0.0 }
 0xe23   : > { %v3848_v4 = vrot.slane %v3847_v62, 4 }
 0xe24   : > { %11989 = vmatmul.mubr.msk.f32.vlgmr.msra.gmra.mxu0 %vm1845_vm5, %v2975_v5 }
 0xe25   : > { %11997 = vmatpush3.xpose.msk.msra.mxu0 %vm1845_vm5, %v3129_v6  ;;  %11998 = vmatprep.mubr.msk.f32.mxu0 %vm13713_vm0, %v13712_v0  ;;  %v3849_v8 = vadd.f32 %v3848_v4, %v3847_v62  ;;  %v1404_v62 = vld [vmem:[#allocation25] sm:$0xff] }
 0xe26   : > { %12006 = vmatprep.subr.mxu0 %v13712_v0 }
 0xe28   : > { %11999 = vmatmul.mubr.msk.f32.vlgmr.msra.gmra.mxu0 %vm1845_vm5, %v3127_v7 }
 0xe29   : > { %12008 = vmatprep.mubr.msk.f32.mxu0 %vm13713_vm0, %v13712_v0  ;;  %12007 = vmatpush3.msra.mxu0 %v1380_v35 }
 0xe2a   : > { %12016 = vmatprep.subr.mxu0 %v13712_v0 }
 0xee4   : > { %v3048_v9 = vpop.f32.mrf.mxu0 }
 0xee5   : > { %11994 = vmatmul.mubr.msk.f32.vlgmr.msra.gmra.mxu1 %vm1845_vm5, %v3048_v9 }
 0xee6   : > { %v11990_v10 = vpop.f32.mrf.mxu0  ;;  %12003 = vmatprep.mubr.msk.f32.mxu1 %vm13713_vm0, %v13712_v0 }
 0xee8   : > { %v3200_v11 = vpop.f32.mrf.mxu0 }
 0xee9   : > { %v3201_v12 = vadd.f32 %v3200_v11, %v14363_v48  ;;  %v3850_v11 = vrot.slane %v3849_v8, 2 }
 0xeea   : > { %v12000_v13 = vpop.f32.mrf.mxu0 }
 0xeeb   : > { %v3204_v14 = vmul.f32 0.35355338, %v3201_v12  ;;  %v3851_v12 = vadd.f32 %v3850_v11, %v3849_v8 }
 0xeed   : > { %v3205_v15 = vsel %vm1845_vm5, %v3204_v14, -inf  ;;  %v3852_v26 = vrot.slane %v3851_v12, 1 }
 0xeee   : > { %3206 = vmax.xlane.f32.xlu1 %v3205_v15 }
 0xeef   : > { %v3853_v13 = vadd.f32 %v3852_v26, %v3851_v12  ;;  %v1392_v12 = vld [vmem:[#allocation16 + $0x18] sm:$0xff]  ;;  %v1391_v26 = vld [vmem:[#allocation16 + $0x10] sm:$0xff] }
 0xeff   : > { %3368 = vrot.lane.b32.xlu1 %v14237_v54, %s15452_s11 }
 0xf03   : > { %3366 = vrot.lane.b32.xlu1 %v14232_v51, %s15453_s16 }
 0xf77   : > { %v3207_v16 = vpop.xlane.xlu1 %3206 }
 0xf78   : > { %v3208_v17 = vsub.f32 %v3204_v14, %v3207_v16 }
 0xf7a   : > { %v3209_v18 = vmul.f32 1.442695, %v3208_v17 }
 0xf7b   : > { %v3369_v31 = vpop.permute.xlu1 %3368 }
 0xf7c   : > { %12873 = vpow2.f32 %v3209_v18 }
 0xf7f   : > { %v3367_v34 = vpop.permute.xlu1 %3366 }
 0xf89   : > { %v12874_v19 = vpop.eup %12873 }
 0xf8a   : > { %v3211_v20 = vsel %vm1845_vm5, %v12874_v19, 0.0 }
 0xf8b   : > { %3212 = vadd.xlane.f32.xlu0 %v3211_v20 }
 0xfa1   : > { %3216 = vrot.lane.b32.xlu0 %v14237_v54, %s15454_s0 }
 0xfa5   : > { %v3121_v23 = vpop.f32.mrf.mxu1 }
 0xfa6   : > { %v3125_v24 = vadd.f32 %v3121_v23, %v2879_v22  ;;  %v3855_v22 = vrot.slane %v14204_v28, 4 }
 0xfa7   : > { %v11995_v25 = vpop.f32.mrf.mxu1 }
 0xfa8   : > { %v3856_v23 = vadd.f32 %v3855_v22, %v14204_v28 }
0x1014   : > { %v3213_v27 = vpop.xlane.xlu0 %3212 }
0x1015   : > { %12875 = vrcp.f32 %v3213_v27 }
0x1018   : > { %v3217_v29 = vpop.permute.xlu0 %3216 }
0x1019   : > { %12002 = vmatpush3.msra.mxu1 %v3217_v29  ;;  %v1382_v29 = vld [vmem:[#allocation10 + $0x18] sm:$0xff] }
0x101a   : > { %12011 = vmatprep.subr.mxu1 %v13712_v0 }
0x1022   : > { %v12876_v30 = vpop.eup %12875 }
0x1023   : > { %v3215_v33 = vmul.f32 %v12876_v30, %v12874_v19 }
0x1025   : > { %12004 = vmatmul.mubr.msk.f32.vlgmr.msra.gmra.mxu1 %vm1845_vm5, %v3215_v33 }
0x1026   : > { %12012 = vmatpush3.xpose.msk.msra.mxu1 %vm1845_vm5, %v3369_v31  ;;  %12013 = vmatprep.mubr.msk.f32.mxu1 %vm13713_vm0, %v13712_v0 }
0x1027   : > { %12021 = vmatprep.subr.mxu1 %v13712_v0 }
0x1029   : > { %12014 = vmatmul.mubr.msk.f32.vlgmr.msra.gmra.mxu1 %vm1845_vm5, %v3367_v34 }
0x102a   : > { %12023 = vmatprep.mubr.msk.f32.mxu1 %vm13713_vm0, %v13712_v0  ;;  %12022 = vmatpush3.msra.mxu1 %v1381_v61  ;;  %v14477_v61 = vld [vmem:[#allocation25 + $0x8] sm:$0xff] }
0x102b   : > { %12031 = vmatprep.subr.mxu1 %v13712_v0 }
0x10e5   : > { %v3288_v36 = vpop.f32.mrf.mxu1 }
0x10e6   : > { %12009 = vmatmul.mubr.msk.f32.vlgmr.msra.gmra.mxu0 %vm1845_vm5, %v3288_v36 }
0x10e7   : > { %v12005_v37 = vpop.f32.mrf.mxu1  ;;  %12018 = vmatprep.mubr.msk.f32.mxu0 %vm13713_vm0, %v13712_v0 }
0x10e9   : > { %v3440_v38 = vpop.f32.mrf.mxu1 }
0x10ea   : > { %v3441_v39 = vadd.f32 %v3440_v38, %v14363_v48 }
0x10eb   : > { %v12015_v40 = vpop.f32.mrf.mxu1 }
0x10ec   : > { %v3444_v32 = vmul.f32 0.35355338, %v3441_v39 }
0x10ee   : > { %v3445_v41 = vsel %vm1845_vm5, %v3444_v32, -inf }
0x10ef   : > { %3446 = vmax.xlane.f32.xlu0 %v3445_v41  ;;  %v1387_v41 = vld [vmem:[#allocation13 + $0x18] sm:$0xff] }
0x1105   : > { %3456 = vrot.lane.b32.xlu0 %v14237_v54, %s15368_s7  ;;  %s15457_s7 = smov 40  }
0x1109   : > { %3606 = vrot.lane.b32.xlu0 %v14232_v51, %s15455_s4 }
0x1178   : > { %v3447_v42 = vpop.xlane.xlu0 %3446 }
0x1179   : > { %v3448_v44 = vsub.f32 %v3444_v32, %v3447_v42 }
0x117b   : > { %v3449_v45 = vmul.f32 1.442695, %v3448_v44 }
0x117c   : > { %v3457_v47 = vpop.permute.xlu0 %3456 }
0x117d   : > { %12877 = vpow2.f32 %v3449_v45  ;;  %12017 = vmatpush3.msra.mxu0 %v3457_v47  ;;  %v1386_v45 = vld [vmem:[#allocation13 + $0x10] sm:$0xff]  ;;  %v1385_v47 = vld [vmem:[#allocation13 + $0x8] sm:$0xff] }
0x117e   : > { %12026 = vmatprep.subr.mxu0 %v13712_v0 }
0x1180   : > { %v3607_v60 = vpop.permute.xlu0 %3606 }
0x118a   : > { %v12878_v50 = vpop.eup %12877 }
0x118b   : > { %v3451_v52 = vsel %vm1845_vm5, %v12878_v50, 0.0 }
0x118c   : > { %3452 = vadd.xlane.f32.xlu1 %v3451_v52  ;;  %v1384_v52 = vld [vmem:[#allocation13] sm:$0xff] }
0x119d   : > { %3608 = vrot.lane.b32.xlu1 %v14237_v54, %s15456_s2 }
0x11a6   : > { %v3361_v53 = vpop.f32.mrf.mxu0 }
0x11a7   : > { %v3365_v55 = vadd.f32 %v3361_v53, %v3125_v24  ;;  %v3857_v24 = vrot.slane %v3856_v23, 2 }
0x11a8   : > { %v12010_v56 = vpop.f32.mrf.mxu0 }
0x11a9   : > { %v3858_v25 = vadd.f32 %v3857_v24, %v3856_v23  ;;  %v1396_v56 = vld [vmem:[#allocation19 + $0x10] sm:$0xff] }
0x11ab   : > { %v3859_v27 = vrot.slane %v3858_v25, 1 }
0x11ad   : > { %v3860_v30 = vadd.f32 %v3859_v27, %v3858_v25 }
0x1215   : > { %v3453_v57 = vpop.xlane.xlu1 %3452 }
0x1216   : > { %12879 = vrcp.f32 %v3453_v57  ;;  %v1395_v57 = vld [vmem:[#allocation19 + $0x8] sm:$0xff] }
0x1219   : > { %v3609_v59 = vpop.permute.xlu1 %3608 }
0x1223   : > { %v12880_v51 = vpop.eup %12879 }
0x1224   : > { %v3455_v58 = vmul.f32 %v12880_v51, %v12878_v50  ;;  %v1394_v51 = vld [vmem:[#allocation19] sm:$0xff] }
0x1226   : > { %12019 = vmatmul.mubr.msk.f32.vlgmr.msra.gmra.mxu0 %vm1845_vm5, %v3455_v58  ;;  %v4051_v58 = vmax.f32 %v14365_v49, 0.0 }
0x1227   : > { %12027 = vmatpush3.xpose.msk.msra.mxu0 %vm1845_vm5, %v3609_v59  ;;  %12028 = vmatprep.mubr.msk.f32.mxu0 %vm13713_vm0, %v13712_v0  ;;  %v14467_v59 = vld [vmem:[#allocation25 + $0x18] sm:$0xff] }
0x1228   : > { %12036 = vmatprep.subr.mxu0 %v13712_v0 }
0x122a   : > { %12029 = vmatmul.mubr.msk.f32.vlgmr.msra.gmra.mxu0 %vm1845_vm5, %v3607_v60  ;;  %v14471_v60 = vld [vmem:[#allocation25 + $0x10] sm:$0xff] }
0x122b   : > { %12038 = vmatprep.mubr.msk.f32.mxu0 %vm13713_vm0, %v13712_v0  ;;  %12037 = vmatpush3.msra.mxu0 %v1382_v29 }
0x122c   : > { %12052 = vmatprep.subr.mxu0 %v13712_v0 }
0x12e6   : > { %v3528_v2 = vpop.f32.mrf.mxu0 }
0x12e7   : > { %12024 = vmatmul.mubr.msk.f32.vlgmr.msra.gmra.mxu1 %vm1845_vm5, %v3528_v2 }
0x12e8   : > { %v12020_v3 = vpop.f32.mrf.mxu0  ;;  %12033 = vmatprep.mubr.msk.f32.mxu1 %vm13713_vm0, %v13712_v0 }
0x12ea   : > { %v3680_v5 = vpop.f32.mrf.mxu0 }
0x12eb   : > { %v3681_v6 = vadd.f32 %v3680_v5, %v14363_v48 }
0x12ec   : > { %v12030_v7 = vpop.f32.mrf.mxu0 }
0x12ed   : > { %v3684_v9 = vmul.f32 0.35355338, %v3681_v6  ;;  %v11415_v6 = vld [vmem:[#allocation20] ss:$0 sm:$0xff] }
0x12ef   : > { %v3685_v10 = vsel %vm1845_vm5, %v3684_v9, -inf }
0x12f0   : > { %3686 = vmax.xlane.f32.xlu1 %v3685_v10 }
0x1301   : > { %3871 = vperm.xlu1 %12852, %v3853_v13   ;;  %v1390_v13 = vld [vmem:[#allocation16 + $0x8] sm:$0xff] }
0x1305   : > { %3886 = vperm.xlu1 %12852, %v3860_v30  }
0x1379   : > { %v3687_v14 = vpop.xlane.xlu1 %3686 }
0x137a   : > { %v3688_v15 = vsub.f32 %v3684_v9, %v3687_v14  ;;  %v1389_v14 = vld [vmem:[#allocation16] sm:$0xff] }
0x137c   : > { %v3689_v16 = vmul.f32 1.442695, %v3688_v15 }
0x137d   : > { %v3872_v34 = vpop.permute.xlu1 %3871 }
0x137e   : > { %12881 = vpow2.f32 %v3689_v16 }
0x1381   : > { %v3887_v16 = vpop.permute.xlu1 %3886 }
0x138b   : > { %v12882_v17 = vpop.eup %12881 }
0x138c   : > { %v3691_v18 = vsel %vm1845_vm5, %v12882_v17, 0.0 }
0x138d   : > { %3692 = vadd.xlane.f32.xlu0 %v3691_v18 }
0x13a3   : > { %3696 = vrot.lane.b32.xlu0 %v14237_v54, %s15457_s7  ;;  %v3861_v54 = vmul.f32 %v14365_v49, %v14227_v43 }
0x13a5   : > { %v3862_v31 = vsel %vm1591_vm4, %v3861_v54, 0.0 }
0x13a6   : > { %v3863_v33 = vrot.slane %v3862_v31, 4 }
0x13a7   : > { %v3601_v19 = vpop.f32.mrf.mxu1 }
0x13a8   : > { %v14441_v20 = vadd.f32 %v3601_v19, %v3365_v55  ;;  %v3864_v36 = vadd.f32 %v3863_v33, %v3862_v31  ;;  %v1397_v55 = vld [vmem:[#allocation19 + $0x18] sm:$0xff] }
0x13a9   : > { %v12025_v21 = vpop.f32.mrf.mxu1  ;;  %v1401_v33 = vld [vmem:[#allocation22 + $0x10] sm:$0xff] }
0x13aa   : > { %v3865_v37 = vrot.slane %v3864_v36, 2 }
0x13ac   : > { %v3866_v38 = vadd.f32 %v3865_v37, %v3864_v36 }
0x13ae   : > { %v3867_v39 = vrot.slane %v3866_v38, 1 }
0x13b0   : > { %v3868_v44 = vadd.f32 %v3867_v39, %v3866_v38 }
0x1416   : > { %v3693_v35 = vpop.xlane.xlu0 %3692 }
0x1417   : > { %12883 = vrcp.f32 %v3693_v35  ;;  %v1399_v35 = vld [vmem:[#allocation22] sm:$0xff] }
0x1418   : > { %12885 = vrcp.f32 %v3872_v34  ;;  %v1400_v34 = vld [vmem:[#allocation22 + $0x8] sm:$0xff] }
0x1419   : > { %12887 = vrcp.f32 %v3887_v16 }
0x141a   : > { %v3697_v28 = vpop.permute.xlu0 %3696 }
0x141b   : > { %12032 = vmatpush3.msra.mxu1 %v3697_v28  ;;  %v1393_v28 = vld [vmem:[#allocation17] sm:$0x1] }
0x141c   : > { %12041 = vmatprep.subr.mxu1 %v13712_v0 }
0x1424   : > { %v12884_v40 = vpop.eup %12883 }
0x1425   : > { %v3695_v32 = vmul.f32 %v12884_v40, %v12882_v17  ;;  %v14450_v42 = vpop.eup %12885 }
0x1426   : > { %v3875_v50 = vmul.f32 %v14450_v42, %v3868_v44  ;;  %v14511_v30 = vpop.eup %12887 }
0x1427   : > { %12034 = vmatmul.mubr.msk.f32.vlgmr.msra.gmra.mxu1 %vm1845_vm5, %v3695_v32 }
0x1428   : > { %12042 = vmatpush3.msra.mxu1 %v1387_v41  ;;  %12049 = vmatprep.mubr.msk.f32.mxu1 %vm13713_vm0, %v13712_v0  ;;  %v3891_v53 = vmax.f32 %v3875_v50, 0.0 }
0x1429   : > { %12043 = vmatprep.subr.mxu1 %v13712_v0 }
0x142a   : > { %12044 = vmatpush3.msra.mxu1 %v1386_v45 }
0x142b   : > { %12045 = vmatprep.subr.mxu1 %v13712_v0 }
0x142c   : > { %12046 = vmatpush3.msra.mxu1 %v1385_v47 }
0x142d   : > { %12047 = vmatprep.subr.mxu1 %v13712_v0 }
0x142e   : > { %12048 = vmatpush3.msra.mxu1 %v1384_v52 }
0x142f   : > { %12050 = vmatmul.mubr.msk.f32.vlgmr.msra.gmra.mxu1 %vm1591_vm4, %v3891_v53  ;;  %12063 = vmatprep.subr.mxu1 %v13712_v0 }
0x1430   : > { %12064 = vmatpush3.msra.mxu1 %v1397_v55  ;;  %12071 = vmatprep.mubr.msk.f32.mxu1 %vm13713_vm0, %v13712_v0 }
0x1431   : > { %12065 = vmatprep.subr.mxu1 %v13712_v0 }
0x1432   : > { %12066 = vmatpush3.msra.mxu1 %v1396_v56 }
0x1433   : > { %12067 = vmatprep.subr.mxu1 %v13712_v0 }
0x1434   : > { %12068 = vmatpush3.msra.mxu1 %v1395_v57 }
0x1435   : > { %12069 = vmatprep.subr.mxu1 %v13712_v0 }
0x1436   : > { %12070 = vmatpush3.msra.mxu1 %v1394_v51 }
0x1437   : > { %12072 = vmatmul.mubr.msk.f32.vlgmr.msra.gmra.mxu1 %vm1591_vm4, %v4051_v58  ;;  %12085 = vmatprep.subr.mxu1 %v13712_v0 }
0x1438   : > { %12086 = vmatpush3.msra.mxu1 %v14467_v59  ;;  %12093 = vmatprep.mubr.msk.f32.mxu1 %vm13713_vm0, %v13712_v0 }
0x1439   : > { %12087 = vmatprep.subr.mxu1 %v13712_v0 }
0x143a   : > { %12088 = vmatpush3.msra.mxu1 %v14471_v60 }
0x143b   : > { %12089 = vmatprep.subr.mxu1 %v13712_v0 }
0x143c   : > { %12090 = vmatpush3.msra.mxu1 %v14477_v61 }
0x143d   : > { %12091 = vmatprep.subr.mxu1 %v13712_v0 }
0x143e   : > { %12092 = vmatpush3.msra.mxu1 %v1404_v62 }
0x143f   : > { %12094 = vmatmul.mubr.msk.f32.vlgmr.msra.gmra.mxu1 %vm1591_vm4, %v14365_v49  ;;  %12106 = vmatprep.subr.mxu1 %v13712_v0 }
0x1440   : > { %12107 = vmatpush3.msra.mxu1 %v1404_v62  ;;  %12108 = vmatprep.mubr.msk.f32.mxu1 %vm13713_vm0, %v13712_v0 }
0x1441   : > { %12116 = vmatprep.subr.mxu1 %v13712_v0 }
0x14e7   : > { %v3768_v2 = vpop.f32.mrf.mxu1 }
0x14e8   : > { %12039 = vmatmul.mubr.msk.f32.vlgmr.msra.gmra.mxu0 %vm1845_vm5, %v3768_v2 }
0x14e9   : > { %v12035_v3 = vpop.f32.mrf.mxu1  ;;  %12060 = vmatprep.mubr.msk.f32.mxu0 %vm13713_vm0, %v13712_v0  ;;  %12053 = vmatpush3.msra.mxu0 %v1392_v12 }
0x14ea   : > { %12054 = vmatprep.subr.mxu0 %v13712_v0 }
0x14eb   : > { %12055 = vmatpush3.msra.mxu0 %v1391_v26 }
0x14ec   : > { %12056 = vmatprep.subr.mxu0 %v13712_v0 }
0x14ed   : > { %12057 = vmatpush3.msra.mxu0 %v1390_v13 }
0x14ee   : > { %12058 = vmatprep.subr.mxu0 %v13712_v0 }
0x14ef   : > { %v14492_v4 = vpop.f32.mrf.mxu1  ;;  %12059 = vmatpush3.msra.mxu0 %v1389_v14 }
0x14f0   : > { %12074 = vmatprep.subr.mxu0 %v13712_v0 }
0x14f1   : > { %v12051_v5 = vpop.f32.mrf.mxu1 }
0x14f7   : > { %v4127_v49 = vpop.f32.mrf.mxu1 }
0x14f8   : > { %v4128_v7 = vadd.f32 %v11415_v6, %v4127_v49 }
0x14f9   : > { %v12073_v8 = vpop.f32.mrf.mxu1 }
0x14fa   : > { %v14495_v9 = vmul.f32 %v4128_v7, %v14227_v43 }
0x14fc   : > { %4299 = vrot.lane.b32.xlu0 %v14495_v9, %s15458_s6 }
0x14ff   : > { %v14499_v10 = vpop.f32.mrf.mxu1 }
0x1501   : > { %v12095_v11 = vpop.f32.mrf.mxu1 }
0x156e   : > { %v4300_v56 = vpop.permute.xlu0 %4299 }
0x15a8   : > { %v3841_v15 = vpop.f32.mrf.mxu0 }
0x15a9   : > { %v14506_v17 = vadd.f32 %v3841_v15, %v14441_v20  ;;  %v1402_v20 = vld [vmem:[#allocation22 + $0x18] sm:$0xff] }
0x15aa   : > { %v12040_v18 = vpop.f32.mrf.mxu0 }
0x15ab   : > { %v3876_v19 = vmul.f32 %v14506_v17, %v14229_v46  ;;  %v4132_v36 = vmax.f32 %v14506_v17, 0.0 }
0x15ad   : > { %v3877_v21 = vsel %vm1591_vm4, %v3876_v19, 0.0 }
0x15ae   : > { %v3878_v22 = vrot.slane %v3877_v21, 4 }
0x15b0   : > { %v3879_v23 = vadd.f32 %v3878_v22, %v3877_v21 }
0x15b2   : > { %v3880_v24 = vrot.slane %v3879_v23, 2 }
0x15b4   : > { %v3881_v25 = vadd.f32 %v3880_v24, %v3879_v23 }
0x15b6   : > { %v3882_v27 = vrot.slane %v3881_v25, 1 }
0x15b8   : > { %v3883_v29 = vadd.f32 %v3882_v27, %v3881_v25 }
0x15ba   : > { %v3890_v54 = vmul.f32 %v14511_v30, %v3883_v29 }
0x15bc   : > { %v3971_v31 = vmax.f32 %v3890_v54, 0.0 }
0x15be   : > { %12061 = vmatmul.mubr.msk.f32.vlgmr.msra.gmra.mxu0 %vm1591_vm4, %v3971_v31 }
0x15bf   : > { %12075 = vmatpush3.msra.mxu0 %v1402_v20  ;;  %12082 = vmatprep.mubr.msk.f32.mxu0 %vm13713_vm0, %v13712_v0  ;;  %v11419_v20 = vld [vmem:[#allocation26] ss:$0 sm:$0xff] }
0x15c0   : > { %12076 = vmatprep.subr.mxu0 %v13712_v0 }
0x15c1   : > { %12077 = vmatpush3.msra.mxu0 %v1401_v33  ;;  %v4291_v33 = vadd.f32 %v11419_v20, %v14499_v10  ;;  %v14622_v20 = vld [vmem:[#allocation28 + $0x18] sm:$0xff] }
0x15c2   : > { %12078 = vmatprep.subr.mxu0 %v13712_v0 }
0x15c3   : > { %12079 = vmatpush3.msra.mxu0 %v1400_v34 }
0x15c4   : > { %12080 = vmatprep.subr.mxu0 %v13712_v0 }
0x15c5   : > { %12081 = vmatpush3.msra.mxu0 %v1399_v35 }
0x15c6   : > { %12083 = vmatmul.mubr.msk.f32.vlgmr.msra.gmra.mxu0 %vm1591_vm4, %v4132_v36  ;;  %12096 = vmatprep.subr.mxu0 %v13712_v0 }
0x15c7   : > { %12098 = vmatprep.mubr.msk.f32.mxu0 %vm13713_vm0, %v13712_v0 }
0x167e   : > { %v4041_v37 = vpop.f32.mrf.mxu0 }
0x167f   : > { %v4042_v38 = vadd.f32 %v4041_v37, %v1393_v28 }
0x1680   : > { %v12062_v39 = vpop.f32.mrf.mxu0 }
0x1681   : > { %v4045_v40 = vsub.f32 0.0, %v4042_v38 }
0x1683   : > { %v4046_v32 = vmul.f32 1.442695, %v4045_v40 }
0x1685   : > { %12889 = vpow2.f32 %v4046_v32 }
0x1686   : > { %v14525_v41 = vpop.f32.mrf.mxu0 }
0x1688   : > { %v12084_v44 = vpop.f32.mrf.mxu0 }
0x1692   : > { %v12890_v45 = vpop.eup %12889 }
0x1693   : > { %v4048_v47 = vadd.f32 1.0, %v12890_v45 }
0x1695   : > { %12891 = vrcp.f32 %v4048_v47 }
0x16a2   : > { %v12892_v50 = vpop.eup %12891 }
0x16a3   : > { %v4213_v52 = vadd.f32 1.0, %v12892_v50 }
0x16a5   : > { %v4297_v53 = vrot.slane %v4213_v52, %v14249_v63 }
0x16a7   : > { %v14529_v55 = vmul.f32 %v4297_v53, %v14495_v9  ;;  %v14533_v57 = vmul.f32 %v4300_v56, %v4297_v53 }
0x16a9   : > { %12097 = vmatpush3.xpose.msk.msra.mxu0 %vm1845_vm5, %v14529_v55 }
0x16aa   : > { %12101 = vmatprep.subr.mxu0 %v13712_v0 }
0x16ac   : > { %12099 = vmatmul.mubr.msk.f32.vlgmr.msra.gmra.mxu0 %vm1845_vm5, %v14533_v57 }
0x16ad   : > { %12103 = vmatprep.mubr.msk.f32.mxu0 %vm13713_vm0, %v13712_v0 }
0x176c   : > { %v4376_v51 = vpop.f32.mrf.mxu0 }
0x176d   : > { %v4377_v58 = vadd.f32 %v4376_v51, %v14363_v48 }
0x176e   : > { %v12100_v62 = vpop.f32.mrf.mxu0 }
0x176f   : > { %v4380_v2 = vmul.f32 0.35355338, %v4377_v58 }
0x1771   : > { %v4381_v3 = vsel %vm1845_vm5, %v4380_v2, -inf }
0x1772   : > { %4382 = vmax.xlane.f32.xlu1 %v4381_v3 }
0x1783   : > { %4544 = vrot.lane.b32.xlu1 %v14529_v55, %s15451_s18 }
0x1787   : > { %4542 = vrot.lane.b32.xlu1 %v14533_v57, %s15451_s18 }
0x17fb   : > { %v4383_v5 = vpop.xlane.xlu1 %4382 }
0x17fc   : > { %v4384_v6 = vsub.f32 %v4380_v2, %v4383_v5 }
0x17fe   : > { %v4385_v49 = vmul.f32 1.442695, %v4384_v6 }
0x17ff   : > { %v4545_v13 = vpop.permute.xlu1 %4544 }
0x1800   : > { %12893 = vpow2.f32 %v4385_v49 }
0x1803   : > { %v4543_v15 = vpop.permute.xlu1 %4542 }
0x180d   : > { %v12894_v7 = vpop.eup %12893 }
0x180e   : > { %v4387_v8 = vsel %vm1845_vm5, %v12894_v7, 0.0 }
0x180f   : > { %4388 = vadd.xlane.f32.xlu0 %v4387_v8 }
0x1825   : > { %4392 = vrot.lane.b32.xlu0 %v14495_v9, %s15459_s8 }
0x1898   : > { %v4389_v11 = vpop.xlane.xlu0 %4388 }
0x1899   : > { %12895 = vrcp.f32 %v4389_v11 }
0x189c   : > { %v4393_v12 = vpop.permute.xlu0 %4392 }
0x189d   : > { %12102 = vmatpush3.msra.mxu0 %v4393_v12 }
0x189e   : > { %12111 = vmatprep.subr.mxu0 %v13712_v0 }
0x18a6   : > { %v12896_v26 = vpop.eup %12895 }
0x18a7   : > { %v4391_v14 = vmul.f32 %v12896_v26, %v12894_v7 }
0x18a9   : > { %12104 = vmatmul.mubr.msk.f32.vlgmr.msra.gmra.mxu0 %vm1845_vm5, %v4391_v14 }
0x18aa   : > { %12112 = vmatpush3.xpose.msk.msra.mxu0 %vm1845_vm5, %v4545_v13  ;;  %12113 = vmatprep.mubr.msk.f32.mxu0 %vm13713_vm0, %v13712_v0 }
0x18ab   : > { %12121 = vmatprep.subr.mxu0 %v13712_v0 }
0x18ad   : > { %12114 = vmatmul.mubr.msk.f32.vlgmr.msra.gmra.mxu0 %vm1845_vm5, %v4543_v15 }
0x18ae   : > { %12122 = vmatpush3.msra.mxu0 %v14477_v61  ;;  %12123 = vmatprep.mubr.msk.f32.mxu0 %vm13713_vm0, %v13712_v0 }
0x18af   : > { %12131 = vmatprep.subr.mxu0 %v13712_v0 }
0x1969   : > { %v4464_v16 = vpop.f32.mrf.mxu0 }
0x196a   : > { %12109 = vmatmul.mubr.msk.f32.vlgmr.msra.gmra.mxu1 %vm1845_vm5, %v4464_v16 }
0x196b   : > { %v12105_v18 = vpop.f32.mrf.mxu0  ;;  %12118 = vmatprep.mubr.msk.f32.mxu1 %vm13713_vm0, %v13712_v0 }
0x196d   : > { %v4616_v19 = vpop.f32.mrf.mxu0 }
0x196e   : > { %v4617_v21 = vadd.f32 %v4616_v19, %v14363_v48 }
0x196f   : > { %v12115_v22 = vpop.f32.mrf.mxu0 }
0x1970   : > { %v4620_v23 = vmul.f32 0.35355338, %v4617_v21 }
0x1972   : > { %v4621_v24 = vsel %vm1845_vm5, %v4620_v23, -inf }
0x1973   : > { %4622 = vmax.xlane.f32.xlu0 %v4621_v24 }
0x1989   : > { %4632 = vrot.lane.b32.xlu0 %v14495_v9, %s15454_s0 }
0x198d   : > { %4782 = vrot.lane.b32.xlu0 %v14533_v57, %s15452_s11 }
0x19fc   : > { %v4623_v61 = vpop.xlane.xlu0 %4622 }
0x19fd   : > { %v4624_v25 = vsub.f32 %v4620_v23, %v4623_v61  ;;  %v11417_v23 = vld [vmem:[#allocation23] ss:$0 sm:$0xff] }
0x19fe   : > { %v4209_v24 = vadd.f32 %v11417_v23, %v14525_v41  ;;  %v14631_v41 = vld [vmem:[#allocation28 + $0x8] sm:$0xff] }
0x19ff   : > { %v4625_v27 = vmul.f32 1.442695, %v4624_v25 }
0x1a00   : > { %v4633_v29 = vpop.permute.xlu0 %4632  ;;  %v14618_v61 = vmul.f32 %v4209_v24, %v14229_v46 }
0x1a01   : > { %12897 = vpow2.f32 %v4625_v27  ;;  %12117 = vmatpush3.msra.mxu1 %v4633_v29 }
0x1a02   : > { %12126 = vmatprep.subr.mxu1 %v13712_v0 }
0x1a04   : > { %v4783_v40 = vpop.permute.xlu0 %4782 }
0x1a0e   : > { %v12898_v54 = vpop.eup %12897 }
0x1a0f   : > { %v4627_v31 = vsel %vm1845_vm5, %v12898_v54, 0.0 }
0x1a10   : > { %4628 = vadd.xlane.f32.xlu1 %v4627_v31 }
0x1a21   : > { %4784 = vrot.lane.b32.xlu1 %v14529_v55, %s15452_s11 }
0x1a2a   : > { %v4537_v34 = vpop.f32.mrf.mxu1 }
0x1a2b   : > { %v4541_v35 = vadd.f32 %v4537_v34, %v4291_v33  ;;  %v14625_v33 = vld [vmem:[#allocation28 + $0x10] sm:$0xff]  ;;  %v1409_v34 = vld [vmem:[#allocation28] sm:$0xff] }
0x1a2c   : > { %v12110_v36 = vpop.f32.mrf.mxu1 }
0x1a99   : > { %v4629_v28 = vpop.xlane.xlu1 %4628 }
0x1a9a   : > { %12899 = vrcp.f32 %v4629_v28 }
0x1a9d   : > { %v4785_v39 = vpop.permute.xlu1 %4784 }
0x1aa7   : > { %v12900_v37 = vpop.eup %12899 }
0x1aa8   : > { %v4631_v38 = vmul.f32 %v12900_v37, %v12898_v54 }
0x1aaa   : > { %12119 = vmatmul.mubr.msk.f32.vlgmr.msra.gmra.mxu1 %vm1845_vm5, %v4631_v38 }
0x1aab   : > { %12127 = vmatpush3.xpose.msk.msra.mxu1 %vm1845_vm5, %v4785_v39  ;;  %12128 = vmatprep.mubr.msk.f32.mxu1 %vm13713_vm0, %v13712_v0 }
0x1aac   : > { %12136 = vmatprep.subr.mxu1 %v13712_v0 }
0x1aae   : > { %12129 = vmatmul.mubr.msk.f32.vlgmr.msra.gmra.mxu1 %vm1845_vm5, %v4783_v40 }
0x1aaf   : > { %12137 = vmatpush3.msra.mxu1 %v14471_v60  ;;  %12138 = vmatprep.mubr.msk.f32.mxu1 %vm13713_vm0, %v13712_v0 }
0x1ab0   : > { %12146 = vmatprep.subr.mxu1 %v13712_v0 }
0x1b6a   : > { %v4704_v10 = vpop.f32.mrf.mxu1 }
0x1b6b   : > { %12124 = vmatmul.mubr.msk.f32.vlgmr.msra.gmra.mxu0 %vm1845_vm5, %v4704_v10 }
0x1b6c   : > { %v12120_v32 = vpop.f32.mrf.mxu1  ;;  %12133 = vmatprep.mubr.msk.f32.mxu0 %vm13713_vm0, %v13712_v0 }
0x1b6e   : > { %v4856_v44 = vpop.f32.mrf.mxu1 }
0x1b6f   : > { %v4857_v45 = vadd.f32 %v4856_v44, %v14363_v48 }
0x1b70   : > { %v12130_v47 = vpop.f32.mrf.mxu1 }
0x1b71   : > { %v4860_v50 = vmul.f32 0.35355338, %v4857_v45 }
0x1b73   : > { %v4861_v52 = vsel %vm1845_vm5, %v4860_v50, -inf }
0x1b74   : > { %4862 = vmax.xlane.f32.xlu1 %v4861_v52 }
0x1b85   : > { %5024 = vrot.lane.b32.xlu1 %v14529_v55, %s15456_s2 }
0x1b89   : > { %5022 = vrot.lane.b32.xlu1 %v14533_v57, %s15456_s2 }
0x1bfd   : > { %v4863_v60 = vpop.xlane.xlu1 %4862 }
0x1bfe   : > { %v4864_v53 = vsub.f32 %v4860_v50, %v4863_v60 }
0x1c00   : > { %v4865_v56 = vmul.f32 1.442695, %v4864_v53 }
0x1c01   : > { %v5025_v6 = vpop.permute.xlu1 %5024 }
0x1c02   : > { %12901 = vpow2.f32 %v4865_v56 }
0x1c05   : > { %v5023_v7 = vpop.permute.xlu1 %5022 }
0x1c0f   : > { %v12902_v51 = vpop.eup %12901 }
0x1c10   : > { %v4867_v58 = vsel %vm1845_vm5, %v12902_v51, 0.0 }
0x1c11   : > { %4868 = vadd.xlane.f32.xlu0 %v4867_v58 }
0x1c27   : > { %4872 = vrot.lane.b32.xlu0 %v14495_v9, %s15460_s9 }
0x1c2b   : > { %v4777_v62 = vpop.f32.mrf.mxu0 }
0x1c2c   : > { %v4781_v2 = vadd.f32 %v4777_v62, %v4541_v35  ;;  %v1388_v35 = vld [vmem:[#allocation14] sm:$0x1] }
0x1c2d   : > { %v12125_v3 = vpop.f32.mrf.mxu0  ;;  %v3962_v36 = vadd.f32 %v14492_v4, %v1388_v35 }
0x1c2f   : > { %v3965_v28 = vsub.f32 0.0, %v3962_v36 }
0x1c31   : > { %v3966_v37 = vmul.f32 1.442695, %v3965_v28 }
0x1c9a   : > { %v4869_v5 = vpop.xlane.xlu0 %4868 }
0x1c9b   : > { %12903 = vrcp.f32 %v4869_v5 }
0x1c9e   : > { %v4873_v55 = vpop.permute.xlu0 %4872 }
0x1c9f   : > { %12132 = vmatpush3.msra.mxu0 %v4873_v55 }
0x1ca0   : > { %12141 = vmatprep.subr.mxu0 %v13712_v0 }
0x1ca8   : > { %v12904_v57 = vpop.eup %12903 }
0x1ca9   : > { %v4871_v49 = vmul.f32 %v12904_v57, %v12902_v51 }
0x1cab   : > { %12134 = vmatmul.mubr.msk.f32.vlgmr.msra.gmra.mxu0 %vm1845_vm5, %v4871_v49 }
0x1cac   : > { %12142 = vmatpush3.xpose.msk.msra.mxu0 %vm1845_vm5, %v5025_v6  ;;  %12143 = vmatprep.mubr.msk.f32.mxu0 %vm13713_vm0, %v13712_v0 }
0x1cad   : > { %12151 = vmatprep.subr.mxu0 %v13712_v0 }
0x1caf   : > { %12144 = vmatmul.mubr.msk.f32.vlgmr.msra.gmra.mxu0 %vm1845_vm5, %v5023_v7 }
0x1cb0   : > { %12152 = vmatpush3.msra.mxu0 %v14467_v59  ;;  %12153 = vmatprep.mubr.msk.f32.mxu0 %vm13713_vm0, %v13712_v0 }
0x1cb1   : > { %12167 = vmatprep.subr.mxu0 %v13712_v0 }
0x1d6b   : > { %v4944_v8 = vpop.f32.mrf.mxu0 }
0x1d6c   : > { %12139 = vmatmul.mubr.msk.f32.vlgmr.msra.gmra.mxu1 %vm1845_vm5, %v4944_v8 }
0x1d6d   : > { %v12135_v11 = vpop.f32.mrf.mxu0  ;;  %12148 = vmatprep.mubr.msk.f32.mxu1 %vm13713_vm0, %v13712_v0 }
0x1d6f   : > { %v5096_v12 = vpop.f32.mrf.mxu0 }
0x1d70   : > { %v5097_v26 = vadd.f32 %v5096_v12, %v14363_v48 }
0x1d71   : > { %v12145_v13 = vpop.f32.mrf.mxu0 }
0x1d72   : > { %v5100_v14 = vmul.f32 0.35355338, %v5097_v26 }
0x1d74   : > { %v5101_v15 = vsel %vm1845_vm5, %v5100_v14, -inf }
0x1d75   : > { %5102 = vmax.xlane.f32.xlu0 %v5101_v15 }
0x1d8b   : > { %5112 = vrot.lane.b32.xlu0 %v14495_v9, %s15457_s7 }
0x1dfe   : > { %v5103_v59 = vpop.xlane.xlu0 %5102 }
0x1dff   : > { %v5104_v16 = vsub.f32 %v5100_v14, %v5103_v59 }
0x1e01   : > { %v5105_v18 = vmul.f32 1.442695, %v5104_v16 }
0x1e02   : > { %v5113_v19 = vpop.permute.xlu0 %5112 }
0x1e03   : > { %12905 = vpow2.f32 %v5105_v18  ;;  %12147 = vmatpush3.msra.mxu1 %v5113_v19 }
0x1e04   : > { %12156 = vmatprep.subr.mxu1 %v13712_v0 }
0x1e10   : > { %v12906_v21 = vpop.eup %12905 }
0x1e11   : > { %v5107_v22 = vsel %vm1845_vm5, %v12906_v21, 0.0 }
0x1e12   : > { %5108 = vadd.xlane.f32.xlu1 %v5107_v22 }
0x1e23   : > { %5346 = vrot.lane.b32.xlu1 %v14618_v61, %s15458_s6 }
0x1e2c   : > { %v5017_v9 = vpop.f32.mrf.mxu1 }
0x1e2d   : > { %v5021_v25 = vadd.f32 %v5017_v9, %v4781_v2 }
0x1e2e   : > { %v12140_v27 = vpop.f32.mrf.mxu1 }
0x1e2f   : > { %v11437_v27 = vld [vmem:[#allocation29] ss:$0 sm:$0xff] }
0x1e9b   : > { %v5109_v29 = vpop.xlane.xlu1 %5108 }
0x1e9c   : > { %12907 = vrcp.f32 %v5109_v29 }
0x1e9d   : > { %12909 = vpow2.f32 %v3966_v37 }
0x1e9f   : > { %v5347_v44 = vpop.permute.xlu1 %5346 }
0x1ea9   : > { %v12908_v54 = vpop.eup %12907 }
0x1eaa   : > { %v5111_v31 = vmul.f32 %v12908_v54, %v12906_v21  ;;  %v12910_v38 = vpop.eup %12909 }
0x1eab   : > { %v3968_v39 = vadd.f32 1.0, %v12910_v38 }
0x1eac   : > { %12149 = vmatmul.mubr.msk.f32.vlgmr.msra.gmra.mxu1 %vm1845_vm5, %v5111_v31 }
0x1ead   : > { %12157 = vmatpush3.msra.mxu1 %v14622_v20  ;;  %12164 = vmatprep.mubr.msk.f32.mxu1 %vm13713_vm0, %v13712_v0  ;;  %12911 = vrcp.f32 %v3968_v39 }
0x1eae   : > { %12158 = vmatprep.subr.mxu1 %v13712_v0 }
0x1eaf   : > { %12159 = vmatpush3.msra.mxu1 %v14625_v33 }
0x1eb0   : > { %12160 = vmatprep.subr.mxu1 %v13712_v0 }
0x1eb1   : > { %12161 = vmatpush3.msra.mxu1 %v14631_v41 }
0x1eb2   : > { %12162 = vmatprep.subr.mxu1 %v13712_v0 }
0x1eb3   : > { %12163 = vmatpush3.msra.mxu1 %v1409_v34 }
0x1eb4   : > { %12165 = vmatmul.mubr.msk.f32.vlgmr.msra.gmra.mxu1 %vm1591_vm4, %v14506_v17  ;;  %12177 = vmatprep.subr.mxu1 %v13712_v0 }
0x1eb5   : > { %12178 = vmatpush3.msra.mxu1 %v1409_v34  ;;  %12179 = vmatprep.mubr.msk.f32.mxu1 %vm13713_vm0, %v13712_v0 }
0x1eb6   : > { %12187 = vmatprep.subr.mxu1 %v13712_v0 }
0x1eba   : > { %v12912_v40 = vpop.eup %12911 }
0x1ebb   : > { %v4214_v10 = vadd.f32 1.0, %v12912_v40 }
0x1ebd   : > { %v5344_v17 = vrot.slane %v4214_v10, %v14249_v63 }
0x1ebf   : > { %v14646_v32 = vmul.f32 %v5344_v17, %v14618_v61  ;;  %v14653_v47 = vmul.f32 %v5347_v44, %v5344_v17 }
0x1f6c   : > { %v5184_v45 = vpop.f32.mrf.mxu1 }
0x1f6d   : > { %12154 = vmatmul.mubr.msk.f32.vlgmr.msra.gmra.mxu0 %vm1845_vm5, %v5184_v45 }
0x1f6e   : > { %12168 = vmatpush3.xpose.msk.msra.mxu0 %vm1845_vm5, %v14646_v32  ;;  %v12150_v4 = vpop.f32.mrf.mxu1  ;;  %12169 = vmatprep.mubr.msk.f32.mxu0 %vm13713_vm0, %v13712_v0 }
0x1f6f   : > { %12172 = vmatprep.subr.mxu0 %v13712_v0 }
0x1f71   : > { %12170 = vmatmul.mubr.msk.f32.vlgmr.msra.gmra.mxu0 %vm1845_vm5, %v14653_v47 }
0x1f72   : > { %12174 = vmatprep.mubr.msk.f32.mxu0 %vm13713_vm0, %v13712_v0 }
0x1f74   : > { %v5337_v50 = vpop.f32.mrf.mxu1 }
0x1f75   : > { %v5338_v29 = vadd.f32 %v11437_v27, %v5337_v50  ;;  %v13004_v27 = vld [vmem:[%s15441_s3] sm:$0xff] }
0x1f76   : > { %v12166_v52 = vpop.f32.mrf.mxu1 }
0x202d   : > { %v5257_v60 = vpop.f32.mrf.mxu0 }
0x202e   : > { %v14660_v53 = vadd.f32 %v5257_v60, %v5021_v25 }
0x202f   : > { %v12155_v56 = vpop.f32.mrf.mxu0 }
0x2031   : > { %v5423_v51 = vpop.f32.mrf.mxu0 }
0x2032   : > { %v5424_v58 = vadd.f32 %v5423_v51, %v14252_v1 }
0x2033   : > { %v12171_v62 = vpop.f32.mrf.mxu0 }
0x2034   : > { %v5427_v2 = vmul.f32 0.35355338, %v5424_v58 }
0x2036   : > { %v5428_v3 = vsel %vm1845_vm5, %v5427_v2, -inf }
0x2037   : > { %5429 = vmax.xlane.f32.xlu0 %v5428_v3 }
0x204d   : > { %5439 = vrot.lane.b32.xlu0 %v14618_v61, %s15459_s8 }
0x2051   : > { %5589 = vrot.lane.b32.xlu0 %v14653_v47, %s15451_s18 }
0x20c0   : > { %v5430_v5 = vpop.xlane.xlu0 %5429 }
0x20c1   : > { %v5431_v55 = vsub.f32 %v5427_v2, %v5430_v5 }
0x20c3   : > { %v5432_v57 = vmul.f32 1.442695, %v5431_v55 }
0x20c4   : > { %v5440_v6 = vpop.permute.xlu0 %5439 }
0x20c5   : > { %12913 = vpow2.f32 %v5432_v57  ;;  %12173 = vmatpush3.msra.mxu0 %v5440_v6 }
0x20c6   : > { %12182 = vmatprep.subr.mxu0 %v13712_v0 }
0x20c8   : > { %v5590_v13 = vpop.permute.xlu0 %5589 }
0x20d2   : > { %v12914_v49 = vpop.eup %12913 }
0x20d3   : > { %v5434_v7 = vsel %vm1845_vm5, %v12914_v49, 0.0 }
0x20d4   : > { %5435 = vadd.xlane.f32.xlu1 %v5434_v7 }
0x20e5   : > { %5591 = vrot.lane.b32.xlu1 %v14646_v32, %s15451_s18 }
0x215d   : > { %v5436_v8 = vpop.xlane.xlu1 %5435 }
0x215e   : > { %12915 = vrcp.f32 %v5436_v8 }
0x2161   : > { %v5592_v26 = vpop.permute.xlu1 %5591 }
0x216b   : > { %v12916_v11 = vpop.eup %12915 }
0x216c   : > { %v5438_v12 = vmul.f32 %v12916_v11, %v12914_v49 }
0x216e   : > { %12175 = vmatmul.mubr.msk.f32.vlgmr.msra.gmra.mxu0 %vm1845_vm5, %v5438_v12 }
0x216f   : > { %12183 = vmatpush3.xpose.msk.msra.mxu0 %vm1845_vm5, %v5592_v26  ;;  %12184 = vmatprep.mubr.msk.f32.mxu0 %vm13713_vm0, %v13712_v0 }
0x2170   : > { %12192 = vmatprep.subr.mxu0 %v13712_v0 }
0x2172   : > { %12185 = vmatmul.mubr.msk.f32.vlgmr.msra.gmra.mxu0 %vm1845_vm5, %v5590_v13 }
0x2173   : > { %12193 = vmatpush3.msra.mxu0 %v14631_v41  ;;  %12194 = vmatprep.mubr.msk.f32.mxu0 %vm13713_vm0, %v13712_v0 }
0x2174   : > { %12202 = vmatprep.subr.mxu0 %v13712_v0 }
0x222e   : > { %v5511_v14 = vpop.f32.mrf.mxu0 }
0x222f   : > { %12180 = vmatmul.mubr.msk.f32.vlgmr.msra.gmra.mxu1 %vm1845_vm5, %v5511_v14 }
0x2230   : > { %v12176_v15 = vpop.f32.mrf.mxu0  ;;  %12189 = vmatprep.mubr.msk.f32.mxu1 %vm13713_vm0, %v13712_v0 }
0x2232   : > { %v5663_v59 = vpop.f32.mrf.mxu0 }
0x2233   : > { %v5664_v16 = vadd.f32 %v5663_v59, %v14252_v1 }
0x2234   : > { %v12186_v18 = vpop.f32.mrf.mxu0 }
0x2235   : > { %v5667_v19 = vmul.f32 0.35355338, %v5664_v16 }
0x2237   : > { %v5668_v21 = vsel %vm1845_vm5, %v5667_v19, -inf }
0x2238   : > { %5669 = vmax.xlane.f32.xlu1 %v5668_v21 }
0x2249   : > { %5831 = vrot.lane.b32.xlu1 %v14646_v32, %s15452_s11 }
0x224d   : > { %5829 = vrot.lane.b32.xlu1 %v14653_v47, %s15452_s11 }
0x22c1   : > { %v5670_v22 = vpop.xlane.xlu1 %5669 }
0x22c2   : > { %v5671_v23 = vsub.f32 %v5667_v19, %v5670_v22 }
0x22c4   : > { %v5672_v24 = vmul.f32 1.442695, %v5671_v23 }
0x22c5   : > { %v5832_v28 = vpop.permute.xlu1 %5831 }
0x22c6   : > { %12917 = vpow2.f32 %v5672_v24  ;;  %v13001_v24 = vld [vmem:[%s15441_s3 + $0x18] sm:$0xff] }
0x22c9   : > { %v5830_v38 = vpop.permute.xlu1 %5829 }
0x22d3   : > { %v12918_v9 = vpop.eup %12917 }
0x22d4   : > { %v5674_v25 = vsel %vm1845_vm5, %v12918_v9, 0.0 }
0x22d5   : > { %5675 = vadd.xlane.f32.xlu0 %v5674_v25  ;;  %v6309_v25 = vmax.f32 %v14660_v53, 0.0 }
0x22eb   : > { %5679 = vrot.lane.b32.xlu0 %v14618_v61, %s15454_s0 }
0x22ef   : > { %v5584_v54 = vpop.f32.mrf.mxu1 }
0x22f0   : > { %v5588_v31 = vadd.f32 %v5584_v54, %v5338_v29  ;;  %v13005_v29 = vld [vmem:[%s15446_s26 + $0x18] sm:$0xff]  ;;  %v13006_v54 = vld [vmem:[%s15446_s26 + $0x10] sm:$0xff] }
0x22f1   : > { %v12181_v41 = vpop.f32.mrf.mxu1 }
0x22f2   : > { %v13008_v41 = vld [vmem:[%s15446_s26] sm:$0xff] }
0x235e   : > { %v5676_v34 = vpop.xlane.xlu0 %5675 }
0x235f   : > { %12919 = vrcp.f32 %v5676_v34  ;;  %v13009_v34 = vld [vmem:[%s15448_s23] sm:$0xff] }
0x2362   : > { %v5680_v35 = vpop.permute.xlu0 %5679 }
0x2363   : > { %12188 = vmatpush3.msra.mxu1 %v5680_v35 }
0x2364   : > { %12197 = vmatprep.subr.mxu1 %v13712_v0 }
0x236c   : > { %v12920_v36 = vpop.eup %12919 }
0x236d   : > { %v5678_v37 = vmul.f32 %v12920_v36, %v12918_v9  ;;  %v13003_v9 = vld [vmem:[%s15441_s3 + $0x8] sm:$0xff] }
0x236f   : > { %12190 = vmatmul.mubr.msk.f32.vlgmr.msra.gmra.mxu1 %vm1845_vm5, %v5678_v37  ;;  %v13012_v37 = vld [vmem:[%s15442_s24 + $0x8] sm:$0xff] }
0x2370   : > { %12198 = vmatpush3.xpose.msk.msra.mxu1 %vm1845_vm5, %v5832_v28  ;;  %12199 = vmatprep.mubr.msk.f32.mxu1 %vm13713_vm0, %v13712_v0  ;;  %v13010_v28 = vld [vmem:[%s15442_s24 + $0x18] sm:$0xff] }
0x2371   : > { %12207 = vmatprep.subr.mxu1 %v13712_v0 }
0x2373   : > { %12200 = vmatmul.mubr.msk.f32.vlgmr.msra.gmra.mxu1 %vm1845_vm5, %v5830_v38 }
0x2374   : > { %12208 = vmatpush3.msra.mxu1 %v14625_v33  ;;  %12209 = vmatprep.mubr.msk.f32.mxu1 %vm13713_vm0, %v13712_v0 }
0x2375   : > { %12217 = vmatprep.subr.mxu1 %v13712_v0 }
0x242f   : > { %v5751_v39 = vpop.f32.mrf.mxu1 }
0x2430   : > { %12195 = vmatmul.mubr.msk.f32.vlgmr.msra.gmra.mxu0 %vm1845_vm5, %v5751_v39  ;;  %v13013_v39 = vld [vmem:[%s15442_s24] sm:$0xff] }
0x2431   : > { %v12191_v40 = vpop.f32.mrf.mxu1  ;;  %12204 = vmatprep.mubr.msk.f32.mxu0 %vm13713_vm0, %v13712_v0 }
0x2432   : > { %v13014_v40 = vld [vmem:[#allocation5] ss:$0 sm:$0xff] }
0x2433   : > { %v5903_v10 = vpop.f32.mrf.mxu1 }
0x2434   : > { %v5904_v17 = vadd.f32 %v5903_v10, %v14252_v1 }
0x2435   : > { %v12201_v44 = vpop.f32.mrf.mxu1 }
0x2436   : > { %v5907_v45 = vmul.f32 0.35355338, %v5904_v17 }
0x2438   : > { %v5908_v4 = vsel %vm1845_vm5, %v5907_v45, -inf }
0x2439   : > { %5909 = vmax.xlane.f32.xlu0 %v5908_v4 }
0x244f   : > { %5919 = vrot.lane.b32.xlu0 %v14618_v61, %s15460_s9 }
0x2453   : > { %6069 = vrot.lane.b32.xlu0 %v14653_v47, %s15456_s2 }
0x24c2   : > { %v5910_v33 = vpop.xlane.xlu0 %5909 }
0x24c3   : > { %v5911_v50 = vsub.f32 %v5907_v45, %v5910_v33 }
0x24c5   : > { %v5912_v52 = vmul.f32 1.442695, %v5911_v50 }
0x24c6   : > { %v5920_v60 = vpop.permute.xlu0 %5919 }
0x24c7   : > { %12921 = vpow2.f32 %v5912_v52  ;;  %12203 = vmatpush3.msra.mxu0 %v5920_v60 }
0x24c8   : > { %12212 = vmatprep.subr.mxu0 %v13712_v0 }
0x24ca   : > { %v6070_v57 = vpop.permute.xlu0 %6069 }
0x24d4   : > { %v12922_v56 = vpop.eup %12921 }
0x24d5   : > { %v5914_v51 = vsel %vm1845_vm5, %v12922_v56, 0.0 }
0x24d6   : > { %5915 = vadd.xlane.f32.xlu1 %v5914_v51  ;;  %v13015_v51 = vld [vmem:[#allocation7] ss:$0 sm:$0xff] }
0x24e7   : > { %6071 = vrot.lane.b32.xlu1 %v14646_v32, %s15456_s2 }
0x24f0   : > { %v5824_v58 = vpop.f32.mrf.mxu0 }
0x24f1   : > { %v5828_v62 = vadd.f32 %v5824_v58, %v5588_v31  ;;  %v13007_v31 = vld [vmem:[%s15446_s26 + $0x8] sm:$0xff] }
0x24f2   : > { %v12196_v2 = vpop.f32.mrf.mxu0 }
0x255f   : > { %v5916_v3 = vpop.xlane.xlu1 %5915 }
0x2560   : > { %12923 = vrcp.f32 %v5916_v3 }
0x2563   : > { %v6072_v55 = vpop.permute.xlu1 %6071 }
0x256d   : > { %v12924_v47 = vpop.eup %12923 }
0x256e   : > { %v5918_v5 = vmul.f32 %v12924_v47, %v12922_v56 }
0x2570   : > { %12205 = vmatmul.mubr.msk.f32.vlgmr.msra.gmra.mxu0 %vm1845_vm5, %v5918_v5 }
0x2571   : > { %12213 = vmatpush3.xpose.msk.msra.mxu0 %vm1845_vm5, %v6072_v55  ;;  %12214 = vmatprep.mubr.msk.f32.mxu0 %vm13713_vm0, %v13712_v0 }
0x2572   : > { %12222 = vmatprep.subr.mxu0 %v13712_v0 }
0x2574   : > { %12215 = vmatmul.mubr.msk.f32.vlgmr.msra.gmra.mxu0 %vm1845_vm5, %v6070_v57 }
0x2575   : > { %12223 = vmatpush3.msra.mxu0 %v14622_v20  ;;  %12224 = vmatprep.mubr.msk.f32.mxu0 %vm13713_vm0, %v13712_v0 }
0x2576   : > { %12238 = vmatprep.subr.mxu0 %v13712_v0 }
0x2630   : > { %v5991_v32 = vpop.f32.mrf.mxu0 }
0x2631   : > { %12210 = vmatmul.mubr.msk.f32.vlgmr.msra.gmra.mxu1 %vm1845_vm5, %v5991_v32 }
0x2632   : > { %v12206_v6 = vpop.f32.mrf.mxu0  ;;  %12219 = vmatprep.mubr.msk.f32.mxu1 %vm13713_vm0, %v13712_v0 }
0x2634   : > { %v6143_v49 = vpop.f32.mrf.mxu0 }
0x2635   : > { %v6144_v7 = vadd.f32 %v6143_v49, %v14252_v1 }
0x2636   : > { %v12216_v8 = vpop.f32.mrf.mxu0 }
0x2637   : > { %v6147_v11 = vmul.f32 0.35355338, %v6144_v7 }
0x2639   : > { %v6148_v12 = vsel %vm1845_vm5, %v6147_v11, -inf }
0x263a   : > { %6149 = vmax.xlane.f32.xlu1 %v6148_v12 }
0x26c3   : > { %v6150_v20 = vpop.xlane.xlu1 %6149 }
0x26c4   : > { %v6151_v26 = vsub.f32 %v6147_v11, %v6150_v20 }
0x26c6   : > { %v6152_v13 = vmul.f32 1.442695, %v6151_v26 }
0x26c8   : > { %12925 = vpow2.f32 %v6152_v13 }
0x26d5   : > { %v12926_v14 = vpop.eup %12925 }
0x26d6   : > { %v6154_v15 = vsel %vm1845_vm5, %v12926_v14, 0.0 }
0x26d7   : > { %6155 = vadd.xlane.f32.xlu0 %v6154_v15 }
0x26ed   : > { %6159 = vrot.lane.b32.xlu0 %v14618_v61, %s15457_s7  ;;  %v13002_v61 = vld [vmem:[%s15441_s3 + $0x10] sm:$0xff]  ;;  %s15461_s3 = smov 88  }
0x26f1   : > { %v6064_v59 = vpop.f32.mrf.mxu1 }
0x26f2   : > { %v14736_v16 = vadd.f32 %v6064_v59, %v5828_v62  ;;  %v13016_v59 = vld [vmem:[%s15448_s23 + $0x8] sm:$0xff] }
0x26f3   : > { %v12211_v18 = vpop.f32.mrf.mxu1 }
0x2760   : > { %v6156_v19 = vpop.xlane.xlu0 %6155 }
0x2761   : > { %12927 = vrcp.f32 %v6156_v19 }
0x2764   : > { %v6160_v21 = vpop.permute.xlu0 %6159 }
0x2765   : > { %12218 = vmatpush3.msra.mxu1 %v6160_v21 }
0x2766   : > { %12227 = vmatprep.subr.mxu1 %v13712_v0 }
0x276e   : > { %v12928_v22 = vpop.eup %12927 }
0x276f   : > { %v6158_v23 = vmul.f32 %v12928_v22, %v12926_v14 }
0x2771   : > { %12220 = vmatmul.mubr.msk.f32.vlgmr.msra.gmra.mxu1 %vm1845_vm5, %v6158_v23 }
0x2772   : > { %12228 = vmatpush3.msra.mxu1 %v13001_v24  ;;  %12235 = vmatprep.mubr.msk.f32.mxu1 %vm13713_vm0, %v13712_v0 }
0x2773   : > { %12229 = vmatprep.subr.mxu1 %v13712_v0 }
0x2774   : > { %12230 = vmatpush3.msra.mxu1 %v13002_v61 }
0x2775   : > { %12231 = vmatprep.subr.mxu1 %v13712_v0 }
0x2776   : > { %12232 = vmatpush3.msra.mxu1 %v13003_v9 }
0x2777   : > { %12233 = vmatprep.subr.mxu1 %v13712_v0 }
0x2778   : > { %12234 = vmatpush3.msra.mxu1 %v13004_v27 }
0x2779   : > { %12236 = vmatmul.mubr.msk.f32.vlgmr.msra.gmra.mxu1 %vm1591_vm4, %v6309_v25  ;;  %12249 = vmatprep.subr.mxu1 %v13712_v0 }
0x277a   : > { %12250 = vmatpush3.msra.mxu1 %v13005_v29  ;;  %12257 = vmatprep.mubr.msk.f32.mxu1 %vm13713_vm0, %v13712_v0 }
0x277b   : > { %12251 = vmatprep.subr.mxu1 %v13712_v0 }
0x277c   : > { %12252 = vmatpush3.msra.mxu1 %v13006_v54 }
0x277d   : > { %12253 = vmatprep.subr.mxu1 %v13712_v0 }
0x277e   : > { %12254 = vmatpush3.msra.mxu1 %v13007_v31  ;;  %v13017_v31 = vld [vmem:[#allocation8] ss:$0 sm:$0xff] }
0x277f   : > { %12255 = vmatprep.subr.mxu1 %v13712_v0 }
0x2780   : > { %12256 = vmatpush3.msra.mxu1 %v13008_v41 }
0x2781   : > { %12258 = vmatmul.mubr.msk.f32.vlgmr.msra.gmra.mxu1 %vm1591_vm4, %v14660_v53  ;;  %12270 = vmatprep.subr.mxu1 %v13712_v0  ;;  %v13011_v53 = vld [vmem:[%s15442_s24 + $0x10] sm:$0xff] }
0x2782   : > { %12271 = vmatpush3.msra.mxu1 %v13009_v34  ;;  %12272 = vmatprep.mubr.msk.f32.mxu1 %vm13713_vm0, %v13712_v0 }
0x2783   : > { %12280 = vmatprep.subr.mxu1 %v13712_v0 }
0x2831   : > { %v6231_v35 = vpop.f32.mrf.mxu1 }
0x2832   : > { %12225 = vmatmul.mubr.msk.f32.vlgmr.msra.gmra.mxu0 %vm1845_vm5, %v6231_v35 }
0x2833   : > { %v12221_v36 = vpop.f32.mrf.mxu1  ;;  %12239 = vmatpush3.msra.mxu0 %v13010_v28  ;;  %12246 = vmatprep.mubr.msk.f32.mxu0 %vm13713_vm0, %v13712_v0 }
0x2834   : > { %12240 = vmatprep.subr.mxu0 %v13712_v0 }
0x2835   : > { %12241 = vmatpush3.msra.mxu0 %v13011_v53 }
0x2836   : > { %12242 = vmatprep.subr.mxu0 %v13712_v0 }
0x2837   : > { %12243 = vmatpush3.msra.mxu0 %v13012_v37 }
0x2838   : > { %12244 = vmatprep.subr.mxu0 %v13712_v0 }
0x2839   : > { %v6379_v38 = vpop.f32.mrf.mxu1  ;;  %12245 = vmatpush3.msra.mxu0 %v13013_v39 }
0x283a   : > { %v6380_v10 = vadd.f32 %v13014_v40, %v6379_v38  ;;  %12260 = vmatprep.subr.mxu0 %v13712_v0  ;;  %v13018_v40 = vld [vmem:[%s15448_s23 + $0x10] sm:$0xff] }
0x283b   : > { %v12237_v17 = vpop.f32.mrf.mxu1 }
0x283c   : > { %v14780_v44 = vmul.f32 %v6380_v10, %v14227_v43 }
0x283e   : > { %6533 = vrot.lane.b32.xlu1 %v14780_v44, %s15458_s6 }
0x2841   : > { %v14784_v45 = vpop.f32.mrf.mxu1 }
0x2842   : > { %v6529_v41 = vadd.f32 %v13017_v31, %v14784_v45  ;;  %v13021_v31 = vld [vmem:[%s15449_s1 + $0x10] sm:$0xff] }
0x2843   : > { %v12259_v4 = vpop.f32.mrf.mxu1 }
0x28b0   : > { %v6534_v3 = vpop.permute.xlu1 %6533 }
0x28f2   : > { %v6304_v33 = vpop.f32.mrf.mxu0 }
0x28f3   : > { %v14787_v50 = vadd.f32 %v6304_v33, %v14736_v16 }
0x28f4   : > { %v12226_v52 = vpop.f32.mrf.mxu0 }
0x28f5   : > { %v6384_v60 = vmax.f32 %v14787_v50, 0.0 }
0x28f7   : > { %12247 = vmatmul.mubr.msk.f32.vlgmr.msra.gmra.mxu0 %vm1591_vm4, %v6384_v60 }
0x28f8   : > { %12262 = vmatprep.mubr.msk.f32.mxu0 %vm13713_vm0, %v13712_v0 }
0x29b7   : > { %v6454_v56 = vpop.f32.mrf.mxu0 }
0x29b8   : > { %v6455_v58 = vadd.f32 %v13015_v51, %v6454_v56 }
0x29b9   : > { %v12248_v62 = vpop.f32.mrf.mxu0 }
0x29ba   : > { %v14794_v2 = vmul.f32 %v6455_v58, %v14229_v46 }
0x29bc   : > { %12261 = vmatpush3.xpose.msk.msra.mxu0 %vm1845_vm5, %v14794_v2 }
0x29bd   : > { %12265 = vmatprep.subr.mxu0 %v13712_v0 }
0x29bf   : > { %12263 = vmatmul.mubr.msk.f32.vlgmr.msra.gmra.mxu0 %vm1845_vm5, %v6534_v3 }
0x29c0   : > { %12267 = vmatprep.mubr.msk.f32.mxu0 %vm13713_vm0, %v13712_v0 }
0x2a7f   : > { %v6606_v47 = vpop.f32.mrf.mxu0 }
0x2a80   : > { %v6607_v5 = vadd.f32 %v6606_v47, %v14252_v1 }
0x2a81   : > { %v12264_v55 = vpop.f32.mrf.mxu0 }
0x2a82   : > { %v6610_v57 = vmul.f32 0.35355338, %v6607_v5 }
0x2a84   : > { %v6611_v32 = vsel %vm1845_vm5, %v6610_v57, -inf }
0x2a85   : > { %6612 = vmax.xlane.f32.xlu1 %v6611_v32 }
0x2a96   : > { %6774 = vrot.lane.b32.xlu1 %v14794_v2, %s15451_s18 }
0x2a9a   : > { %6772 = vrot.lane.b32.xlu1 %v14780_v44, %s15461_s3 }
0x2b0e   : > { %v6613_v6 = vpop.xlane.xlu1 %6612 }
0x2b0f   : > { %v6614_v49 = vsub.f32 %v6610_v57, %v6613_v6 }
0x2b11   : > { %v6615_v7 = vmul.f32 1.442695, %v6614_v49 }
0x2b12   : > { %v6775_v13 = vpop.permute.xlu1 %6774 }
0x2b13   : > { %12929 = vpow2.f32 %v6615_v7 }
0x2b16   : > { %v6773_v15 = vpop.permute.xlu1 %6772 }
0x2b20   : > { %v12930_v8 = vpop.eup %12929 }
0x2b21   : > { %v6617_v11 = vsel %vm1845_vm5, %v12930_v8, 0.0 }
0x2b22   : > { %6618 = vadd.xlane.f32.xlu0 %v6617_v11  ;;  %v13019_v11 = vld [vmem:[%s15448_s23 + $0x18] sm:$0xff] }
0x2b38   : > { %6622 = vrot.lane.b32.xlu0 %v14794_v2, %s15459_s8 }
0x2bab   : > { %v6619_v12 = vpop.xlane.xlu0 %6618 }
0x2bac   : > { %12931 = vrcp.f32 %v6619_v12 }
0x2baf   : > { %v6623_v20 = vpop.permute.xlu0 %6622 }
0x2bb0   : > { %12266 = vmatpush3.msra.mxu0 %v6623_v20 }
0x2bb1   : > { %12275 = vmatprep.subr.mxu0 %v13712_v0 }
0x2bb9   : > { %v12932_v26 = vpop.eup %12931 }
0x2bba   : > { %v6621_v14 = vmul.f32 %v12932_v26, %v12930_v8 }
0x2bbc   : > { %12268 = vmatmul.mubr.msk.f32.vlgmr.msra.gmra.mxu0 %vm1845_vm5, %v6621_v14 }
0x2bbd   : > { %12276 = vmatpush3.xpose.msk.msra.mxu0 %vm1845_vm5, %v6775_v13  ;;  %12277 = vmatprep.mubr.msk.f32.mxu0 %vm13713_vm0, %v13712_v0 }
0x2bbe   : > { %12285 = vmatprep.subr.mxu0 %v13712_v0 }
0x2bc0   : > { %12278 = vmatmul.mubr.msk.f32.vlgmr.msra.gmra.mxu0 %vm1845_vm5, %v6773_v15 }
0x2bc1   : > { %12286 = vmatpush3.msra.mxu0 %v13016_v59  ;;  %12287 = vmatprep.mubr.msk.f32.mxu0 %vm13713_vm0, %v13712_v0 }
0x2bc2   : > { %12295 = vmatprep.subr.mxu0 %v13712_v0 }
0x2c7c   : > { %v6694_v16 = vpop.f32.mrf.mxu0 }
0x2c7d   : > { %12273 = vmatmul.mubr.msk.f32.vlgmr.msra.gmra.mxu1 %vm1845_vm5, %v6694_v16 }
0x2c7e   : > { %v12269_v18 = vpop.f32.mrf.mxu0  ;;  %12282 = vmatprep.mubr.msk.f32.mxu1 %vm13713_vm0, %v13712_v0 }
0x2c80   : > { %v6846_v19 = vpop.f32.mrf.mxu0 }
0x2c81   : > { %v6847_v21 = vadd.f32 %v6846_v19, %v14252_v1 }
0x2c82   : > { %v12279_v22 = vpop.f32.mrf.mxu0 }
0x2c83   : > { %v6850_v23 = vmul.f32 0.35355338, %v6847_v21 }
0x2c85   : > { %v6851_v24 = vsel %vm1845_vm5, %v6850_v23, -inf }
0x2c86   : > { %6852 = vmax.xlane.f32.xlu0 %v6851_v24 }
0x2c9c   : > { %6862 = vrot.lane.b32.xlu0 %v14794_v2, %s15454_s0 }
0x2ca0   : > { %7012 = vrot.lane.b32.xlu0 %v14780_v44, %s15453_s16 }
0x2d0f   : > { %v6853_v61 = vpop.xlane.xlu0 %6852 }
0x2d10   : > { %v6854_v9 = vsub.f32 %v6850_v23, %v6853_v61 }
0x2d12   : > { %v6855_v25 = vmul.f32 1.442695, %v6854_v9 }
0x2d13   : > { %v6863_v27 = vpop.permute.xlu0 %6862 }
0x2d14   : > { %12933 = vpow2.f32 %v6855_v25  ;;  %12281 = vmatpush3.msra.mxu1 %v6863_v27 }
0x2d15   : > { %12290 = vmatprep.subr.mxu1 %v13712_v0 }
0x2d17   : > { %v7013_v39 = vpop.permute.xlu0 %7012 }
0x2d21   : > { %v12934_v29 = vpop.eup %12933 }
0x2d22   : > { %v6857_v54 = vsel %vm1845_vm5, %v12934_v29, 0.0 }
0x2d23   : > { %6858 = vadd.xlane.f32.xlu1 %v6857_v54  ;;  %v13020_v54 = vld [vmem:[%s15449_s1 + $0x18] sm:$0xff] }
0x2d34   : > { %7014 = vrot.lane.b32.xlu1 %v14794_v2, %s15452_s11 }
0x2d3d   : > { %v6767_v34 = vpop.f32.mrf.mxu1 }
0x2d3e   : > { %v6771_v35 = vadd.f32 %v6767_v34, %v6529_v41  ;;  %v13022_v41 = vld [vmem:[%s15449_s1 + $0x8] sm:$0xff]  ;;  %v13023_v34 = vld [vmem:[%s15449_s1] sm:$0xff] }
0x2d3f   : > { %v12274_v36 = vpop.f32.mrf.mxu1 }
0x2dac   : > { %v6859_v28 = vpop.xlane.xlu1 %6858 }
0x2dad   : > { %12935 = vrcp.f32 %v6859_v28 }
0x2db0   : > { %v7015_v38 = vpop.permute.xlu1 %7014 }
0x2dba   : > { %v12936_v53 = vpop.eup %12935 }
0x2dbb   : > { %v6861_v37 = vmul.f32 %v12936_v53, %v12934_v29 }
0x2dbd   : > { %12283 = vmatmul.mubr.msk.f32.vlgmr.msra.gmra.mxu1 %vm1845_vm5, %v6861_v37 }
0x2dbe   : > { %12291 = vmatpush3.xpose.msk.msra.mxu1 %vm1845_vm5, %v7015_v38  ;;  %12292 = vmatprep.mubr.msk.f32.mxu1 %vm13713_vm0, %v13712_v0 }
0x2dbf   : > { %12300 = vmatprep.subr.mxu1 %v13712_v0 }
0x2dc1   : > { %12293 = vmatmul.mubr.msk.f32.vlgmr.msra.gmra.mxu1 %vm1845_vm5, %v7013_v39 }
0x2dc2   : > { %12301 = vmatpush3.msra.mxu1 %v13018_v40  ;;  %12302 = vmatprep.mubr.msk.f32.mxu1 %vm13713_vm0, %v13712_v0 }
0x2dc3   : > { %12310 = vmatprep.subr.mxu1 %v13712_v0 }
0x2e7d   : > { %v6934_v10 = vpop.f32.mrf.mxu1 }
0x2e7e   : > { %12288 = vmatmul.mubr.msk.f32.vlgmr.msra.gmra.mxu0 %vm1845_vm5, %v6934_v10 }
0x2e7f   : > { %v12284_v17 = vpop.f32.mrf.mxu1  ;;  %12297 = vmatprep.mubr.msk.f32.mxu0 %vm13713_vm0, %v13712_v0 }
0x2e81   : > { %v7086_v45 = vpop.f32.mrf.mxu1 }
0x2e82   : > { %v7087_v4 = vadd.f32 %v7086_v45, %v14252_v1 }
0x2e83   : > { %v12294_v33 = vpop.f32.mrf.mxu1 }
0x2e84   : > { %v7090_v52 = vmul.f32 0.35355338, %v7087_v4 }
0x2e86   : > { %v7091_v60 = vsel %vm1845_vm5, %v7090_v52, -inf }
0x2e87   : > { %7092 = vmax.xlane.f32.xlu1 %v7091_v60 }
0x2e98   : > { %7254 = vrot.lane.b32.xlu1 %v14794_v2, %s15456_s2 }
0x2e9c   : > { %7252 = vrot.lane.b32.xlu1 %v14780_v44, %s15455_s4 }
0x2f10   : > { %v7093_v56 = vpop.xlane.xlu1 %7092 }
0x2f11   : > { %v7094_v51 = vsub.f32 %v7090_v52, %v7093_v56 }
0x2f13   : > { %v7095_v58 = vmul.f32 1.442695, %v7094_v51 }
0x2f14   : > { %v7255_v49 = vpop.permute.xlu1 %7254 }
0x2f15   : > { %12937 = vpow2.f32 %v7095_v58 }
0x2f18   : > { %v7253_v8 = vpop.permute.xlu1 %7252 }
0x2f22   : > { %v12938_v62 = vpop.eup %12937 }
0x2f23   : > { %v7097_v3 = vsel %vm1845_vm5, %v12938_v62, 0.0 }
0x2f24   : > { %7098 = vadd.xlane.f32.xlu0 %v7097_v3 }
0x2f3a   : > { %7102 = vrot.lane.b32.xlu0 %v14794_v2, %s15460_s9 }
0x2f3e   : > { %v7007_v47 = vpop.f32.mrf.mxu0 }
0x2f3f   : > { %v7011_v5 = vadd.f32 %v7007_v47, %v6771_v35  ;;  %v13024_v35 = vld [vmem:[#allocation10] sm:$0xff] }
0x2f40   : > { %v12289_v55 = vpop.f32.mrf.mxu0 }
0x2fad   : > { %v7099_v57 = vpop.xlane.xlu0 %7098 }
0x2fae   : > { %12939 = vrcp.f32 %v7099_v57 }
0x2fb1   : > { %v7103_v32 = vpop.permute.xlu0 %7102 }
0x2fb2   : > { %12296 = vmatpush3.msra.mxu0 %v7103_v32  ;;  %v13025_v32 = vld [vmem:[#allocation10 + $0x8] sm:$0xff] }
0x2fb3   : > { %12305 = vmatprep.subr.mxu0 %v13712_v0 }
0x2fbb   : > { %v12940_v6 = vpop.eup %12939 }
0x2fbc   : > { %v7101_v7 = vmul.f32 %v12940_v6, %v12938_v62 }
0x2fbe   : > { %12298 = vmatmul.mubr.msk.f32.vlgmr.msra.gmra.mxu0 %vm1845_vm5, %v7101_v7 }
0x2fbf   : > { %12306 = vmatpush3.xpose.msk.msra.mxu0 %vm1845_vm5, %v7255_v49  ;;  %12307 = vmatprep.mubr.msk.f32.mxu0 %vm13713_vm0, %v13712_v0 }
0x2fc0   : > { %12315 = vmatprep.subr.mxu0 %v13712_v0 }
0x2fc2   : > { %12308 = vmatmul.mubr.msk.f32.vlgmr.msra.gmra.mxu0 %vm1845_vm5, %v7253_v8 }
0x2fc3   : > { %12316 = vmatpush3.msra.mxu0 %v13019_v11  ;;  %12317 = vmatprep.mubr.msk.f32.mxu0 %vm13713_vm0, %v13712_v0 }
0x2fc4   : > { %12331 = vmatprep.subr.mxu0 %v13712_v0 }
0x307e   : > { %v7174_v12 = vpop.f32.mrf.mxu0 }
0x307f   : > { %12303 = vmatmul.mubr.msk.f32.vlgmr.msra.gmra.mxu1 %vm1845_vm5, %v7174_v12 }
0x3080   : > { %v12299_v20 = vpop.f32.mrf.mxu0  ;;  %12312 = vmatprep.mubr.msk.f32.mxu1 %vm13713_vm0, %v13712_v0 }
0x3082   : > { %v7326_v26 = vpop.f32.mrf.mxu0 }
0x3083   : > { %v7327_v13 = vadd.f32 %v7326_v26, %v14252_v1 }
0x3084   : > { %v12309_v14 = vpop.f32.mrf.mxu0 }
0x3085   : > { %v7330_v15 = vmul.f32 0.35355338, %v7327_v13 }
0x3087   : > { %v7331_v59 = vsel %vm1845_vm5, %v7330_v15, -inf }
0x3088   : > { %7332 = vmax.xlane.f32.xlu0 %v7331_v59 }
0x309e   : > { %7342 = vrot.lane.b32.xlu0 %v14794_v2, %s15457_s7 }
0x3111   : > { %v7333_v16 = vpop.xlane.xlu0 %7332 }
0x3112   : > { %v7334_v18 = vsub.f32 %v7330_v15, %v7333_v16  ;;  %v13026_v16 = vld [vmem:[#allocation11] ss:$0 sm:$0xff] }
0x3114   : > { %v7335_v19 = vmul.f32 1.442695, %v7334_v18 }
0x3115   : > { %v7343_v21 = vpop.permute.xlu0 %7342 }
0x3116   : > { %12941 = vpow2.f32 %v7335_v19  ;;  %12311 = vmatpush3.msra.mxu1 %v7343_v21 }
0x3117   : > { %12320 = vmatprep.subr.mxu1 %v13712_v0 }
0x3123   : > { %v12942_v22 = vpop.eup %12941 }
0x3124   : > { %v7337_v23 = vsel %vm1845_vm5, %v12942_v22, 0.0 }
0x3125   : > { %7338 = vadd.xlane.f32.xlu1 %v7337_v23 }
0x3136   : > { %7565 = vrot.lane.b32.xlu1 %v14794_v2, %s15458_s6 }
0x313f   : > { %v7247_v24 = vpop.f32.mrf.mxu1 }
0x3140   : > { %v7251_v61 = vadd.f32 %v7247_v24, %v7011_v5 }
0x3141   : > { %v12304_v9 = vpop.f32.mrf.mxu1 }
0x31ae   : > { %v7339_v25 = vpop.xlane.xlu1 %7338 }
0x31af   : > { %12943 = vrcp.f32 %v7339_v25 }
0x31bc   : > { %v12944_v27 = vpop.eup %12943 }
0x31bd   : > { %v7341_v29 = vmul.f32 %v12944_v27, %v12942_v22 }
0x31bf   : > { %12313 = vmatmul.mubr.msk.f32.vlgmr.msra.gmra.mxu1 %vm1845_vm5, %v7341_v29  ;;  %v13027_v29 = vld [vmem:[#allocation10 + $0x10] sm:$0xff] }
0x31c0   : > { %12321 = vmatpush3.msra.mxu1 %v13020_v54  ;;  %12328 = vmatprep.mubr.msk.f32.mxu1 %vm13713_vm0, %v13712_v0 }
0x31c1   : > { %12322 = vmatprep.subr.mxu1 %v13712_v0 }
0x31c2   : > { %12323 = vmatpush3.msra.mxu1 %v13021_v31 }
0x31c3   : > { %12324 = vmatprep.subr.mxu1 %v13712_v0 }
0x31c4   : > { %12325 = vmatpush3.msra.mxu1 %v13022_v41 }
0x31c5   : > { %12326 = vmatprep.subr.mxu1 %v13712_v0 }
0x31c6   : > { %12327 = vmatpush3.msra.mxu1 %v13023_v34 }
0x31c7   : > { %12329 = vmatmul.mubr.msk.f32.vlgmr.msra.gmra.mxu1 %vm1591_vm4, %v14787_v50  ;;  %12341 = vmatprep.subr.mxu1 %v13712_v0  ;;  %v7566_v50 = vpop.permute.xlu1 %7565 }
0x31c8   : > { %12342 = vmatpush3.msra.mxu1 %v13024_v35  ;;  %12343 = vmatprep.mubr.msk.f32.mxu1 %vm13713_vm0, %v13712_v0 }
0x31c9   : > { %12351 = vmatprep.subr.mxu1 %v13712_v0 }
0x327f   : > { %v7414_v36 = vpop.f32.mrf.mxu1 }
0x3280   : > { %12318 = vmatmul.mubr.msk.f32.vlgmr.msra.gmra.mxu0 %vm1845_vm5, %v7414_v36 }
0x3281   : > { %12332 = vmatpush3.xpose.msk.msra.mxu0 %vm1845_vm5, %v14780_v44  ;;  %v12314_v28 = vpop.f32.mrf.mxu1  ;;  %12333 = vmatprep.mubr.msk.f32.mxu0 %vm13713_vm0, %v13712_v0 }
0x3282   : > { %12336 = vmatprep.subr.mxu0 %v13712_v0 }
0x3284   : > { %12334 = vmatmul.mubr.msk.f32.vlgmr.msra.gmra.mxu0 %vm1845_vm5, %v7566_v50 }
0x3285   : > { %12338 = vmatprep.mubr.msk.f32.mxu0 %vm13713_vm0, %v13712_v0 }
0x3287   : > { %v7561_v53 = vpop.f32.mrf.mxu1 }
0x3288   : > { %v7562_v18 = vadd.f32 %v13026_v16, %v7561_v53 }
0x3289   : > { %v12330_v37 = vpop.f32.mrf.mxu1 }
0x3340   : > { %v7487_v38 = vpop.f32.mrf.mxu0 }
0x3341   : > { %v14905_v39 = vadd.f32 %v7487_v38, %v7251_v61 }
0x3342   : > { %v12319_v40 = vpop.f32.mrf.mxu0 }
0x3344   : > { %v7637_v10 = vpop.f32.mrf.mxu0 }
0x3345   : > { %v7638_v17 = vadd.f32 %v7637_v10, %v14363_v48 }
0x3346   : > { %v12335_v45 = vpop.f32.mrf.mxu0 }
0x3347   : > { %v7641_v4 = vmul.f32 0.35355338, %v7638_v17 }
0x3349   : > { %v7642_v33 = vsel %vm1845_vm5, %v7641_v4, -inf }
0x334a   : > { %7643 = vmax.xlane.f32.xlu0 %v7642_v33 }
0x3360   : > { %7653 = vrot.lane.b32.xlu0 %v14780_v44, %s15459_s8 }
0x3364   : > { %7803 = vrot.lane.b32.xlu0 %v14794_v2, %s15461_s3 }
0x33d3   : > { %v7644_v52 = vpop.xlane.xlu0 %7643 }
0x33d4   : > { %v7645_v60 = vsub.f32 %v7641_v4, %v7644_v52 }
0x33d6   : > { %v7646_v56 = vmul.f32 1.442695, %v7645_v60 }
0x33d7   : > { %v7654_v51 = vpop.permute.xlu0 %7653 }
0x33d8   : > { %12945 = vpow2.f32 %v7646_v56  ;;  %12337 = vmatpush3.msra.mxu0 %v7654_v51  ;;  %v13028_v51 = vld [vmem:[#allocation10 + $0x18] sm:$0xff] }
0x33d9   : > { %12346 = vmatprep.subr.mxu0 %v13712_v0 }
0x33db   : > { %v7804_v57 = vpop.permute.xlu0 %7803 }
0x33e5   : > { %v12946_v58 = vpop.eup %12945 }
0x33e6   : > { %v7648_v62 = vsel %vm1845_vm5, %v12946_v58, 0.0 }
0x33e7   : > { %7649 = vadd.xlane.f32.xlu1 %v7648_v62 }
0x33f8   : > { %7805 = vrot.lane.b32.xlu1 %v14780_v44, %s15451_s18 }
0x3470   : > { %v7650_v3 = vpop.xlane.xlu1 %7649 }
0x3471   : > { %12947 = vrcp.f32 %v7650_v3 }
0x3474   : > { %v7806_v55 = vpop.permute.xlu1 %7805 }
0x347e   : > { %v12948_v47 = vpop.eup %12947 }
0x347f   : > { %v7652_v5 = vmul.f32 %v12948_v47, %v12946_v58 }
0x3481   : > { %12339 = vmatmul.mubr.msk.f32.vlgmr.msra.gmra.mxu0 %vm1845_vm5, %v7652_v5 }
0x3482   : > { %12347 = vmatpush3.xpose.msk.msra.mxu0 %vm1845_vm5, %v7806_v55  ;;  %12348 = vmatprep.mubr.msk.f32.mxu0 %vm13713_vm0, %v13712_v0 }
0x3483   : > { %12356 = vmatprep.subr.mxu0 %v13712_v0 }
0x3485   : > { %12349 = vmatmul.mubr.msk.f32.vlgmr.msra.gmra.mxu0 %vm1845_vm5, %v7804_v57 }
0x3486   : > { %12357 = vmatpush3.msra.mxu0 %v13025_v32  ;;  %12358 = vmatprep.mubr.msk.f32.mxu0 %vm13713_vm0, %v13712_v0 }
0x3487   : > { %12366 = vmatprep.subr.mxu0 %v13712_v0 }
0x3541   : > { %v7725_v6 = vpop.f32.mrf.mxu0 }
0x3542   : > { %12344 = vmatmul.mubr.msk.f32.vlgmr.msra.gmra.mxu1 %vm1845_vm5, %v7725_v6 }
0x3543   : > { %v12340_v49 = vpop.f32.mrf.mxu0  ;;  %12353 = vmatprep.mubr.msk.f32.mxu1 %vm13713_vm0, %v13712_v0 }
0x3545   : > { %v7877_v7 = vpop.f32.mrf.mxu0 }
0x3546   : > { %v7878_v8 = vadd.f32 %v7877_v7, %v14363_v48 }
0x3547   : > { %v12350_v11 = vpop.f32.mrf.mxu0 }
0x3548   : > { %v7881_v12 = vmul.f32 0.35355338, %v7878_v8 }
0x354a   : > { %v7882_v20 = vsel %vm1845_vm5, %v7881_v12, -inf }
0x354b   : > { %7883 = vmax.xlane.f32.xlu1 %v7882_v20 }
0x355c   : > { %8045 = vrot.lane.b32.xlu1 %v14780_v44, %s15452_s11 }
0x3560   : > { %8043 = vrot.lane.b32.xlu1 %v14794_v2, %s15453_s16 }
0x35d4   : > { %v7884_v26 = vpop.xlane.xlu1 %7883 }
0x35d5   : > { %v7885_v13 = vsub.f32 %v7881_v12, %v7884_v26  ;;  %v8523_v26 = vmul.f32 %v14905_v39, %v14227_v43 }
0x35d7   : > { %v7886_v14 = vmul.f32 1.442695, %v7885_v13  ;;  %v8524_v13 = vsel %vm1591_vm4, %v8523_v26, 0.0 }
0x35d8   : > { %v8046_v9 = vpop.permute.xlu1 %8045 }
0x35d9   : > { %12949 = vpow2.f32 %v7886_v14  ;;  %v8525_v14 = vrot.slane %v8524_v13, 4 }
0x35dc   : > { %v8044_v27 = vpop.permute.xlu1 %8043 }
0x35e6   : > { %v12950_v15 = vpop.eup %12949 }
0x35e7   : > { %v7888_v59 = vsel %vm1845_vm5, %v12950_v15, 0.0 }
0x35e8   : > { %7889 = vadd.xlane.f32.xlu0 %v7888_v59 }
0x35fe   : > { %7893 = vrot.lane.b32.xlu0 %v14780_v44, %s15454_s0 }
0x3602   : > { %v7798_v19 = vpop.f32.mrf.mxu1 }
0x3603   : > { %v7802_v21 = vadd.f32 %v7798_v19, %v7562_v18 }
0x3604   : > { %v12345_v22 = vpop.f32.mrf.mxu1 }
0x3671   : > { %v7890_v23 = vpop.xlane.xlu0 %7889 }
0x3672   : > { %12951 = vrcp.f32 %v7890_v23 }
0x3675   : > { %v7894_v24 = vpop.permute.xlu0 %7893 }
0x3676   : > { %12352 = vmatpush3.msra.mxu1 %v7894_v24  ;;  %v13029_v24 = vld [vmem:[#allocation13 + $0x18] sm:$0xff] }
0x3677   : > { %12361 = vmatprep.subr.mxu1 %v13712_v0 }
0x367f   : > { %v12952_v61 = vpop.eup %12951 }
0x3680   : > { %v7892_v25 = vmul.f32 %v12952_v61, %v12950_v15  ;;  %v8526_v15 = vadd.f32 %v8525_v14, %v8524_v13  ;;  %v13050_v14 = vld [vmem:[#allocation17] sm:$0x1] }
0x3682   : > { %12354 = vmatmul.mubr.msk.f32.vlgmr.msra.gmra.mxu1 %vm1845_vm5, %v7892_v25  ;;  %v8527_v16 = vrot.slane %v8526_v15, 2  ;;  %v13031_v25 = vld [vmem:[#allocation13 + $0x8] sm:$0xff] }
0x3683   : > { %12362 = vmatpush3.xpose.msk.msra.mxu1 %vm1845_vm5, %v8046_v9  ;;  %12363 = vmatprep.mubr.msk.f32.mxu1 %vm13713_vm0, %v13712_v0  ;;  %v13030_v9 = vld [vmem:[#allocation13 + $0x10] sm:$0xff] }
0x3684   : > { %12371 = vmatprep.subr.mxu1 %v13712_v0  ;;  %v8528_v19 = vadd.f32 %v8527_v16, %v8526_v15 }
0x3686   : > { %12364 = vmatmul.mubr.msk.f32.vlgmr.msra.gmra.mxu1 %vm1845_vm5, %v8044_v27 }
0x3687   : > { %12372 = vmatpush3.msra.mxu1 %v13027_v29  ;;  %12373 = vmatprep.mubr.msk.f32.mxu1 %vm13713_vm0, %v13712_v0  ;;  %v13032_v29 = vld [vmem:[#allocation13] sm:$0xff] }
0x3688   : > { %12381 = vmatprep.subr.mxu1 %v13712_v0 }
0x3742   : > { %v7965_v54 = vpop.f32.mrf.mxu1 }
0x3743   : > { %12359 = vmatmul.mubr.msk.f32.vlgmr.msra.gmra.mxu0 %vm1845_vm5, %v7965_v54  ;;  %v13033_v54 = vld [vmem:[#allocation19 + $0x18] sm:$0xff] }
0x3744   : > { %v12355_v31 = vpop.f32.mrf.mxu1  ;;  %12368 = vmatprep.mubr.msk.f32.mxu0 %vm13713_vm0, %v13712_v0 }
0x3745   : > { %v13035_v31 = vld [vmem:[#allocation19 + $0x8] sm:$0xff] }
0x3746   : > { %v8117_v41 = vpop.f32.mrf.mxu1 }
0x3747   : > { %v8118_v34 = vadd.f32 %v8117_v41, %v14363_v48  ;;  %v8701_v41 = vmax.f32 %v14905_v39, 0.0 }
0x3748   : > { %v12365_v35 = vpop.f32.mrf.mxu1 }
0x3749   : > { %v8121_v36 = vmul.f32 0.35355338, %v8118_v34  ;;  %v13036_v34 = vld [vmem:[#allocation19] sm:$0xff] }
0x374a   : > { %v15001_v35 = vld [vmem:[#allocation25 + $0x18] sm:$0xff] }
0x374b   : > { %v8122_v28 = vsel %vm1845_vm5, %v8121_v36, -inf }
0x374c   : > { %8123 = vmax.xlane.f32.xlu0 %v8122_v28  ;;  %v15011_v28 = vld [vmem:[#allocation25 + $0x8] sm:$0xff] }
0x3762   : > { %8133 = vrot.lane.b32.xlu0 %v14780_v44, %s15460_s9 }
0x3766   : > { %8283 = vrot.lane.b32.xlu0 %v14794_v2, %s15455_s4 }
0x37d5   : > { %v8124_v50 = vpop.xlane.xlu0 %8123 }
0x37d6   : > { %v8125_v53 = vsub.f32 %v8121_v36, %v8124_v50  ;;  %v15007_v36 = vld [vmem:[#allocation25 + $0x10] sm:$0xff]  ;;  %v13040_v50 = vld [vmem:[#allocation25] sm:$0xff] }
0x37d8   : > { %v8126_v37 = vmul.f32 1.442695, %v8125_v53 }
0x37d9   : > { %v8134_v38 = vpop.permute.xlu0 %8133 }
0x37da   : > { %12953 = vpow2.f32 %v8126_v37  ;;  %12367 = vmatpush3.msra.mxu0 %v8134_v38  ;;  %v13041_v38 = vld [vmem:[#allocation16 + $0x18] sm:$0xff] }
0x37db   : > { %12376 = vmatprep.subr.mxu0 %v13712_v0 }
0x37dd   : > { %v8284_v56 = vpop.permute.xlu0 %8283 }
0x37e7   : > { %v12954_v40 = vpop.eup %12953 }
0x37e8   : > { %v8128_v10 = vsel %vm1845_vm5, %v12954_v40, 0.0 }
0x37e9   : > { %8129 = vadd.xlane.f32.xlu1 %v8128_v10 }
0x37fa   : > { %8285 = vrot.lane.b32.xlu1 %v14780_v44, %s15456_s2 }
0x3803   : > { %v8038_v17 = vpop.f32.mrf.mxu0 }
0x3804   : > { %v8042_v45 = vadd.f32 %v8038_v17, %v7802_v21  ;;  %v13044_v17 = vld [vmem:[#allocation16] sm:$0xff] }
0x3805   : > { %v12360_v4 = vpop.f32.mrf.mxu0 }
0x3872   : > { %v8130_v33 = vpop.xlane.xlu1 %8129 }
0x3873   : > { %12955 = vrcp.f32 %v8130_v33  ;;  %v13045_v33 = vld [vmem:[#allocation20] ss:$0 sm:$0xff] }
0x3876   : > { %v8286_v60 = vpop.permute.xlu1 %8285 }
0x3880   : > { %v12956_v2 = vpop.eup %12955 }
0x3881   : > { %v8132_v52 = vmul.f32 %v12956_v2, %v12954_v40  ;;  %v13043_v40 = vld [vmem:[#allocation16 + $0x8] sm:$0xff] }
0x3883   : > { %12369 = vmatmul.mubr.msk.f32.vlgmr.msra.gmra.mxu0 %vm1845_vm5, %v8132_v52 }
0x3884   : > { %12377 = vmatpush3.xpose.msk.msra.mxu0 %vm1845_vm5, %v8286_v60  ;;  %12378 = vmatprep.mubr.msk.f32.mxu0 %vm13713_vm0, %v13712_v0 }
0x3885   : > { %12386 = vmatprep.subr.mxu0 %v13712_v0 }
0x3887   : > { %12379 = vmatmul.mubr.msk.f32.vlgmr.msra.gmra.mxu0 %vm1845_vm5, %v8284_v56 }
0x3888   : > { %12387 = vmatpush3.msra.mxu0 %v13028_v51  ;;  %12388 = vmatprep.mubr.msk.f32.mxu0 %vm13713_vm0, %v13712_v0 }
0x3889   : > { %12402 = vmatprep.subr.mxu0 %v13712_v0 }
0x3943   : > { %v8205_v58 = vpop.f32.mrf.mxu0 }
0x3944   : > { %12374 = vmatmul.mubr.msk.f32.vlgmr.msra.gmra.mxu1 %vm1845_vm5, %v8205_v58 }
0x3945   : > { %v12370_v62 = vpop.f32.mrf.mxu0  ;;  %12383 = vmatprep.mubr.msk.f32.mxu1 %vm13713_vm0, %v13712_v0 }
0x3947   : > { %v8357_v3 = vpop.f32.mrf.mxu0 }
0x3948   : > { %v8358_v47 = vadd.f32 %v8357_v3, %v14363_v48 }
0x3949   : > { %v12380_v5 = vpop.f32.mrf.mxu0 }
0x394a   : > { %v8361_v55 = vmul.f32 0.35355338, %v8358_v47 }
0x394c   : > { %v8362_v57 = vsel %vm1845_vm5, %v8361_v55, -inf }
0x394d   : > { %8363 = vmax.xlane.f32.xlu1 %v8362_v57 }
0x39d6   : > { %v8364_v32 = vpop.xlane.xlu1 %8363 }
0x39d7   : > { %v8365_v6 = vsub.f32 %v8361_v55, %v8364_v32 }
0x39d9   : > { %v8366_v49 = vmul.f32 1.442695, %v8365_v6 }
0x39db   : > { %12957 = vpow2.f32 %v8366_v49 }
0x39e8   : > { %v12958_v7 = vpop.eup %12957 }
0x39e9   : > { %v8368_v8 = vsel %vm1845_vm5, %v12958_v7, 0.0 }
0x39ea   : > { %8369 = vadd.xlane.f32.xlu0 %v8368_v8 }
0x3a00   : > { %8373 = vrot.lane.b32.xlu0 %v14780_v44, %s15457_s7  ;;  %v8529_v44 = vrot.slane %v8528_v19, 1 }
0x3a02   : > { %v8530_v22 = vadd.f32 %v8529_v44, %v8528_v19 }
0x3a04   : > { %v8278_v11 = vpop.f32.mrf.mxu1  ;;  %v8531_v61 = vmul.f32 %v14450_v42, %v8530_v22  ;;  %v13034_v42 = vld [vmem:[#allocation19 + $0x10] sm:$0xff] }
0x3a05   : > { %v14978_v12 = vadd.f32 %v8278_v11, %v8042_v45  ;;  %v13046_v11 = vld [vmem:[#allocation22 + $0x18] sm:$0xff] }
0x3a06   : > { %v12375_v20 = vpop.f32.mrf.mxu1  ;;  %v8541_v27 = vmax.f32 %v8531_v61, 0.0 }
0x3a07   : > { %v13048_v20 = vld [vmem:[#allocation22 + $0x8] sm:$0xff] }
0x3a73   : > { %v8370_v59 = vpop.xlane.xlu0 %8369 }
0x3a74   : > { %12959 = vrcp.f32 %v8370_v59 }
0x3a77   : > { %v8374_v18 = vpop.permute.xlu0 %8373 }
0x3a78   : > { %12382 = vmatpush3.msra.mxu1 %v8374_v18 }
0x3a79   : > { %12391 = vmatprep.subr.mxu1 %v13712_v0 }
0x3a81   : > { %v12960_v21 = vpop.eup %12959 }
0x3a82   : > { %v8372_v23 = vmul.f32 %v12960_v21, %v12958_v7 }
0x3a84   : > { %12384 = vmatmul.mubr.msk.f32.vlgmr.msra.gmra.mxu1 %vm1845_vm5, %v8372_v23 }
0x3a85   : > { %12392 = vmatpush3.msra.mxu1 %v13029_v24  ;;  %12399 = vmatprep.mubr.msk.f32.mxu1 %vm13713_vm0, %v13712_v0 }
0x3a86   : > { %12393 = vmatprep.subr.mxu1 %v13712_v0 }
0x3a87   : > { %12394 = vmatpush3.msra.mxu1 %v13030_v9 }
0x3a88   : > { %12395 = vmatprep.subr.mxu1 %v13712_v0 }
0x3a89   : > { %12396 = vmatpush3.msra.mxu1 %v13031_v25 }
0x3a8a   : > { %12397 = vmatprep.subr.mxu1 %v13712_v0 }
0x3a8b   : > { %12398 = vmatpush3.msra.mxu1 %v13032_v29 }
0x3a8c   : > { %12400 = vmatmul.mubr.msk.f32.vlgmr.msra.gmra.mxu1 %vm1591_vm4, %v8541_v27  ;;  %12413 = vmatprep.subr.mxu1 %v13712_v0 }
0x3a8d   : > { %12414 = vmatpush3.msra.mxu1 %v13033_v54  ;;  %12421 = vmatprep.mubr.msk.f32.mxu1 %vm13713_vm0, %v13712_v0 }
0x3a8e   : > { %12415 = vmatprep.subr.mxu1 %v13712_v0 }
0x3a8f   : > { %12416 = vmatpush3.msra.mxu1 %v13034_v42 }
0x3a90   : > { %12417 = vmatprep.subr.mxu1 %v13712_v0 }
0x3a91   : > { %12418 = vmatpush3.msra.mxu1 %v13035_v31 }
0x3a92   : > { %12419 = vmatprep.subr.mxu1 %v13712_v0 }
0x3a93   : > { %12420 = vmatpush3.msra.mxu1 %v13036_v34 }
0x3a94   : > { %12422 = vmatmul.mubr.msk.f32.vlgmr.msra.gmra.mxu1 %vm1591_vm4, %v8701_v41  ;;  %12435 = vmatprep.subr.mxu1 %v13712_v0 }
0x3a95   : > { %12436 = vmatpush3.msra.mxu1 %v15001_v35  ;;  %12443 = vmatprep.mubr.msk.f32.mxu1 %vm13713_vm0, %v13712_v0 }
0x3a96   : > { %12437 = vmatprep.subr.mxu1 %v13712_v0 }
0x3a97   : > { %12438 = vmatpush3.msra.mxu1 %v15007_v36 }
0x3a98   : > { %12439 = vmatprep.subr.mxu1 %v13712_v0 }
0x3a99   : > { %12440 = vmatpush3.msra.mxu1 %v15011_v28 }
0x3a9a   : > { %12441 = vmatprep.subr.mxu1 %v13712_v0 }
0x3a9b   : > { %12442 = vmatpush3.msra.mxu1 %v13040_v50 }
0x3a9c   : > { %12444 = vmatmul.mubr.msk.f32.vlgmr.msra.gmra.mxu1 %vm1591_vm4, %v14905_v39  ;;  %12456 = vmatprep.subr.mxu1 %v13712_v0  ;;  %v13042_v39 = vld [vmem:[#allocation16 + $0x10] sm:$0xff] }
0x3a9d   : > { %12457 = vmatpush3.msra.mxu1 %v13040_v50  ;;  %12458 = vmatprep.mubr.msk.f32.mxu1 %vm13713_vm0, %v13712_v0 }
0x3a9e   : > { %12466 = vmatprep.subr.mxu1 %v13712_v0 }
0x3b44   : > { %v8445_v53 = vpop.f32.mrf.mxu1 }
0x3b45   : > { %12389 = vmatmul.mubr.msk.f32.vlgmr.msra.gmra.mxu0 %vm1845_vm5, %v8445_v53 }
0x3b46   : > { %v12385_v37 = vpop.f32.mrf.mxu1  ;;  %12403 = vmatpush3.msra.mxu0 %v13041_v38  ;;  %12410 = vmatprep.mubr.msk.f32.mxu0 %vm13713_vm0, %v13712_v0 }
0x3b47   : > { %12404 = vmatprep.subr.mxu0 %v13712_v0 }
0x3b48   : > { %12405 = vmatpush3.msra.mxu0 %v13042_v39 }
0x3b49   : > { %12406 = vmatprep.subr.mxu0 %v13712_v0 }
0x3b4a   : > { %12407 = vmatpush3.msra.mxu0 %v13043_v40 }
0x3b4b   : > { %12408 = vmatprep.subr.mxu0 %v13712_v0 }
0x3b4c   : > { %v15027_v10 = vpop.f32.mrf.mxu1  ;;  %12409 = vmatpush3.msra.mxu0 %v13044_v17 }
0x3b4d   : > { %12424 = vmatprep.subr.mxu0 %v13712_v0 }
0x3b4e   : > { %v12401_v45 = vpop.f32.mrf.mxu1 }
0x3b54   : > { %v8771_v4 = vpop.f32.mrf.mxu1 }
0x3b55   : > { %v8772_v2 = vadd.f32 %v13045_v33, %v8771_v4 }
0x3b56   : > { %v12423_v52 = vpop.f32.mrf.mxu1 }
0x3b57   : > { %v15031_v60 = vmul.f32 %v8772_v2, %v14227_v43 }
0x3b59   : > { %8931 = vrot.lane.b32.xlu1 %v15031_v60, %s15458_s6 }
0x3b5c   : > { %v15035_v56 = vpop.f32.mrf.mxu1 }
0x3b5e   : > { %v12445_v51 = vpop.f32.mrf.mxu1 }
0x3bcb   : > { %v8932_v25 = vpop.permute.xlu1 %8931 }
0x3c05   : > { %v8518_v58 = vpop.f32.mrf.mxu0 }
0x3c06   : > { %v15038_v62 = vadd.f32 %v8518_v58, %v14978_v12  ;;  %v13047_v12 = vld [vmem:[#allocation22 + $0x10] sm:$0xff] }
0x3c07   : > { %v12390_v3 = vpop.f32.mrf.mxu0 }
0x3c08   : > { %v8532_v47 = vmul.f32 %v15038_v62, %v14229_v46  ;;  %v8776_v26 = vmax.f32 %v15038_v62, 0.0 }
0x3c0a   : > { %v8533_v5 = vsel %vm1591_vm4, %v8532_v47, 0.0 }
0x3c0b   : > { %v8534_v55 = vrot.slane %v8533_v5, 4 }
0x3c0d   : > { %v8535_v57 = vadd.f32 %v8534_v55, %v8533_v5 }
0x3c0f   : > { %v8536_v43 = vrot.slane %v8535_v57, 2 }
0x3c11   : > { %v8537_v32 = vadd.f32 %v8536_v43, %v8535_v57 }
0x3c13   : > { %v8538_v6 = vrot.slane %v8537_v32, 1 }
0x3c15   : > { %v8539_v49 = vadd.f32 %v8538_v6, %v8537_v32 }
0x3c17   : > { %v8540_v7 = vmul.f32 %v14511_v30, %v8539_v49  ;;  %v13049_v30 = vld [vmem:[#allocation22] sm:$0xff] }
0x3c18   : > { %v13051_v49 = vld [vmem:[#allocation26] ss:$0 sm:$0xff] }
0x3c19   : > { %v8621_v8 = vmax.f32 %v8540_v7, 0.0  ;;  %v8923_v7 = vadd.f32 %v13051_v49, %v15035_v56 }
0x3c1b   : > { %12411 = vmatmul.mubr.msk.f32.vlgmr.msra.gmra.mxu0 %vm1591_vm4, %v8621_v8 }
0x3c1c   : > { %12425 = vmatpush3.msra.mxu0 %v13046_v11  ;;  %12432 = vmatprep.mubr.msk.f32.mxu0 %vm13713_vm0, %v13712_v0 }
0x3c1d   : > { %12426 = vmatprep.subr.mxu0 %v13712_v0 }
0x3c1e   : > { %12427 = vmatpush3.msra.mxu0 %v13047_v12 }
0x3c1f   : > { %12428 = vmatprep.subr.mxu0 %v13712_v0 }
0x3c20   : > { %12429 = vmatpush3.msra.mxu0 %v13048_v20 }
0x3c21   : > { %12430 = vmatprep.subr.mxu0 %v13712_v0 }
0x3c22   : > { %12431 = vmatpush3.msra.mxu0 %v13049_v30 }
0x3c23   : > { %12433 = vmatmul.mubr.msk.f32.vlgmr.msra.gmra.mxu0 %vm1591_vm4, %v8776_v26  ;;  %12446 = vmatprep.subr.mxu0 %v13712_v0 }
0x3c24   : > { %12448 = vmatprep.mubr.msk.f32.mxu0 %vm13713_vm0, %v13712_v0 }
0x3cdb   : > { %v8691_v13 = vpop.f32.mrf.mxu0 }
0x3cdc   : > { %v8692_v15 = vadd.f32 %v13050_v14, %v8691_v13 }
0x3cdd   : > { %v12412_v59 = vpop.f32.mrf.mxu0 }
0x3cde   : > { %v8695_v16 = vsub.f32 0.0, %v8692_v15 }
0x3ce0   : > { %v8696_v18 = vmul.f32 1.442695, %v8695_v16 }
0x3ce2   : > { %12961 = vpow2.f32 %v8696_v18 }
0x3ce3   : > { %v15055_v19 = vpop.f32.mrf.mxu0 }
0x3ce5   : > { %v12434_v44 = vpop.f32.mrf.mxu0 }
0x3cef   : > { %v12962_v21 = vpop.eup %12961 }
0x3cf0   : > { %v8698_v22 = vadd.f32 1.0, %v12962_v21 }
0x3cf2   : > { %12963 = vrcp.f32 %v8698_v22 }
0x3cff   : > { %v12964_v23 = vpop.eup %12963 }
0x3d00   : > { %v8851_v24 = vadd.f32 1.0, %v12964_v23 }
0x3d02   : > { %v8929_v61 = vrot.slane %v8851_v24, %v14249_v63 }
0x3d04   : > { %v15059_v9 = vmul.f32 %v8929_v61, %v15031_v60  ;;  %v15063_v27 = vmul.f32 %v8932_v25, %v8929_v61 }
0x3d06   : > { %12447 = vmatpush3.xpose.msk.msra.mxu0 %vm1845_vm5, %v15059_v9 }
0x3d07   : > { %12451 = vmatprep.subr.mxu0 %v13712_v0 }
0x3d09   : > { %12449 = vmatmul.mubr.msk.f32.vlgmr.msra.gmra.mxu0 %vm1845_vm5, %v15063_v27 }
0x3d0a   : > { %12453 = vmatprep.mubr.msk.f32.mxu0 %vm13713_vm0, %v13712_v0 }
0x3dc9   : > { %v9008_v29 = vpop.f32.mrf.mxu0 }
0x3dca   : > { %v9009_v54 = vadd.f32 %v9008_v29, %v14363_v48 }
0x3dcb   : > { %v12450_v42 = vpop.f32.mrf.mxu0 }
0x3dcc   : > { %v9012_v31 = vmul.f32 0.35355338, %v9009_v54 }
0x3dce   : > { %v9013_v41 = vsel %vm1845_vm5, %v9012_v31, -inf }
0x3dcf   : > { %9014 = vmax.xlane.f32.xlu1 %v9013_v41 }
0x3de0   : > { %9176 = vrot.lane.b32.xlu1 %v15059_v9, %s15451_s18 }
0x3de4   : > { %9174 = vrot.lane.b32.xlu1 %v15063_v27, %s15451_s18 }
0x3e58   : > { %v9015_v34 = vpop.xlane.xlu1 %9014 }
0x3e59   : > { %v9016_v50 = vsub.f32 %v9012_v31, %v9015_v34 }
0x3e5b   : > { %v9017_v53 = vmul.f32 1.442695, %v9016_v50 }
0x3e5c   : > { %v9177_v45 = vpop.permute.xlu1 %9176 }
0x3e5d   : > { %12965 = vpow2.f32 %v9017_v53 }
0x3e60   : > { %v9175_v33 = vpop.permute.xlu1 %9174 }
0x3e6a   : > { %v12966_v37 = vpop.eup %12965 }
0x3e6b   : > { %v9019_v38 = vsel %vm1845_vm5, %v12966_v37, 0.0 }
0x3e6c   : > { %9020 = vadd.xlane.f32.xlu0 %v9019_v38 }
0x3e82   : > { %9024 = vrot.lane.b32.xlu0 %v15031_v60, %s15459_s8 }
0x3ef5   : > { %v9021_v39 = vpop.xlane.xlu0 %9020 }
0x3ef6   : > { %12967 = vrcp.f32 %v9021_v39 }
0x3ef9   : > { %v9025_v40 = vpop.permute.xlu0 %9024 }
0x3efa   : > { %12452 = vmatpush3.msra.mxu0 %v9025_v40 }
0x3efb   : > { %12461 = vmatprep.subr.mxu0 %v13712_v0 }
0x3f03   : > { %v12968_v17 = vpop.eup %12967 }
0x3f04   : > { %v9023_v4 = vmul.f32 %v12968_v17, %v12966_v37 }
0x3f06   : > { %12454 = vmatmul.mubr.msk.f32.vlgmr.msra.gmra.mxu0 %vm1845_vm5, %v9023_v4 }
0x3f07   : > { %12462 = vmatpush3.xpose.msk.msra.mxu0 %vm1845_vm5, %v9177_v45  ;;  %12463 = vmatprep.mubr.msk.f32.mxu0 %vm13713_vm0, %v13712_v0 }
0x3f08   : > { %12471 = vmatprep.subr.mxu0 %v13712_v0 }
0x3f0a   : > { %12464 = vmatmul.mubr.msk.f32.vlgmr.msra.gmra.mxu0 %vm1845_vm5, %v9175_v33 }
0x3f0b   : > { %12472 = vmatpush3.msra.mxu0 %v15011_v28  ;;  %12473 = vmatprep.mubr.msk.f32.mxu0 %vm13713_vm0, %v13712_v0 }
0x3f0c   : > { %12481 = vmatprep.subr.mxu0 %v13712_v0 }
0x3fc6   : > { %v9096_v2 = vpop.f32.mrf.mxu0 }
0x3fc7   : > { %12459 = vmatmul.mubr.msk.f32.vlgmr.msra.gmra.mxu1 %vm1845_vm5, %v9096_v2 }
0x3fc8   : > { %v12455_v52 = vpop.f32.mrf.mxu0  ;;  %12468 = vmatprep.mubr.msk.f32.mxu1 %vm13713_vm0, %v13712_v0 }
0x3fca   : > { %v9248_v51 = vpop.f32.mrf.mxu0 }
0x3fcb   : > { %v9249_v58 = vadd.f32 %v9248_v51, %v14363_v48 }
0x3fcc   : > { %v12465_v3 = vpop.f32.mrf.mxu0 }
0x3fcd   : > { %v9252_v47 = vmul.f32 0.35355338, %v9249_v58 }
0x3fcf   : > { %v9253_v5 = vsel %vm1845_vm5, %v9252_v47, -inf }
0x3fd0   : > { %9254 = vmax.xlane.f32.xlu0 %v9253_v5 }
0x3fe6   : > { %9264 = vrot.lane.b32.xlu0 %v15031_v60, %s15454_s0 }
0x3fea   : > { %9414 = vrot.lane.b32.xlu0 %v15063_v27, %s15452_s11 }
0x4059   : > { %v9255_v28 = vpop.xlane.xlu0 %9254 }
0x405a   : > { %v9256_v55 = vsub.f32 %v9252_v47, %v9255_v28 }
0x405c   : > { %v9257_v57 = vmul.f32 1.442695, %v9256_v55 }
0x405d   : > { %v9265_v43 = vpop.permute.xlu0 %9264 }
0x405e   : > { %12969 = vpow2.f32 %v9257_v57  ;;  %12467 = vmatpush3.msra.mxu1 %v9265_v43  ;;  %v15153_v57 = vld [vmem:[#allocation28 + $0x18] sm:$0xff]  ;;  %v13056_v43 = vld [vmem:[#allocation28] sm:$0xff] }
0x405f   : > { %12476 = vmatprep.subr.mxu1 %v13712_v0 }
0x4061   : > { %v9415_v14 = vpop.permute.xlu0 %9414 }
0x406b   : > { %v12970_v32 = vpop.eup %12969 }
0x406c   : > { %v9259_v6 = vsel %vm1845_vm5, %v12970_v32, 0.0 }
0x406d   : > { %9260 = vadd.xlane.f32.xlu1 %v9259_v6 }
0x407e   : > { %9416 = vrot.lane.b32.xlu1 %v15059_v9, %s15452_s11 }
0x4087   : > { %v9169_v8 = vpop.f32.mrf.mxu1 }
0x4088   : > { %v9173_v11 = vadd.f32 %v9169_v8, %v8923_v7 }
0x4089   : > { %v12460_v12 = vpop.f32.mrf.mxu1 }
0x40f6   : > { %v9261_v20 = vpop.xlane.xlu1 %9260 }
0x40f7   : > { %12971 = vrcp.f32 %v9261_v20 }
0x40fa   : > { %v9417_v13 = vpop.permute.xlu1 %9416 }
0x4104   : > { %v12972_v26 = vpop.eup %12971 }
0x4105   : > { %v9263_v30 = vmul.f32 %v12972_v26, %v12970_v32  ;;  %v13057_v32 = vld [vmem:[#allocation14] sm:$0x1] }
0x4106   : > { %v8612_v6 = vadd.f32 %v13057_v32, %v15027_v10 }
0x4107   : > { %12469 = vmatmul.mubr.msk.f32.vlgmr.msra.gmra.mxu1 %vm1845_vm5, %v9263_v30 }
0x4108   : > { %12477 = vmatpush3.xpose.msk.msra.mxu1 %vm1845_vm5, %v9417_v13  ;;  %12478 = vmatprep.mubr.msk.f32.mxu1 %vm13713_vm0, %v13712_v0  ;;  %v8615_v49 = vsub.f32 0.0, %v8612_v6 }
0x4109   : > { %12486 = vmatprep.subr.mxu1 %v13712_v0 }
0x410a   : > { %v8616_v7 = vmul.f32 1.442695, %v8615_v49 }
0x410b   : > { %12479 = vmatmul.mubr.msk.f32.vlgmr.msra.gmra.mxu1 %vm1845_vm5, %v9415_v14 }
0x410c   : > { %12487 = vmatpush3.msra.mxu1 %v15007_v36  ;;  %12488 = vmatprep.mubr.msk.f32.mxu1 %vm13713_vm0, %v13712_v0 }
0x410d   : > { %12496 = vmatprep.subr.mxu1 %v13712_v0 }
0x41c7   : > { %v9336_v56 = vpop.f32.mrf.mxu1 }
0x41c8   : > { %12474 = vmatmul.mubr.msk.f32.vlgmr.msra.gmra.mxu0 %vm1845_vm5, %v9336_v56 }
0x41c9   : > { %v12470_v15 = vpop.f32.mrf.mxu1  ;;  %12483 = vmatprep.mubr.msk.f32.mxu0 %vm13713_vm0, %v13712_v0 }
0x41cb   : > { %v9488_v59 = vpop.f32.mrf.mxu1 }
0x41cc   : > { %v9489_v16 = vadd.f32 %v9488_v59, %v14363_v48 }
0x41cd   : > { %v12480_v18 = vpop.f32.mrf.mxu1 }
0x41ce   : > { %v9492_v44 = vmul.f32 0.35355338, %v9489_v16 }
0x41d0   : > { %v9493_v21 = vsel %vm1845_vm5, %v9492_v44, -inf }
0x41d1   : > { %9494 = vmax.xlane.f32.xlu1 %v9493_v21 }
0x41e2   : > { %9656 = vrot.lane.b32.xlu1 %v15059_v9, %s15456_s2 }
0x41e6   : > { %9654 = vrot.lane.b32.xlu1 %v15063_v27, %s15456_s2 }
0x425a   : > { %v9495_v36 = vpop.xlane.xlu1 %9494 }
0x425b   : > { %v9496_v22 = vsub.f32 %v9492_v44, %v9495_v36 }
0x425d   : > { %v9497_v23 = vmul.f32 1.442695, %v9496_v22 }
0x425e   : > { %v9657_v31 = vpop.permute.xlu1 %9656 }
0x425f   : > { %12973 = vpow2.f32 %v9497_v23 }
0x4262   : > { %v9655_v34 = vpop.permute.xlu1 %9654 }
0x426c   : > { %v12974_v24 = vpop.eup %12973 }
0x426d   : > { %v9499_v61 = vsel %vm1845_vm5, %v12974_v24, 0.0 }
0x426e   : > { %9500 = vadd.xlane.f32.xlu0 %v9499_v61 }
0x4284   : > { %9504 = vrot.lane.b32.xlu0 %v15031_v60, %s15460_s9 }
0x4288   : > { %v9409_v25 = vpop.f32.mrf.mxu0 }
0x4289   : > { %v9413_v29 = vadd.f32 %v9409_v25, %v9173_v11 }
0x428a   : > { %v12475_v54 = vpop.f32.mrf.mxu0 }
0x42f7   : > { %v9501_v42 = vpop.xlane.xlu0 %9500 }
0x42f8   : > { %12975 = vrcp.f32 %v9501_v42 }
0x42fb   : > { %v9505_v9 = vpop.permute.xlu0 %9504 }
0x42fc   : > { %12482 = vmatpush3.msra.mxu0 %v9505_v9 }
0x42fd   : > { %12491 = vmatprep.subr.mxu0 %v13712_v0 }
0x4305   : > { %v12976_v27 = vpop.eup %12975 }
0x4306   : > { %v9503_v41 = vmul.f32 %v12976_v27, %v12974_v24 }
0x4308   : > { %12484 = vmatmul.mubr.msk.f32.vlgmr.msra.gmra.mxu0 %vm1845_vm5, %v9503_v41 }
0x4309   : > { %12492 = vmatpush3.xpose.msk.msra.mxu0 %vm1845_vm5, %v9657_v31  ;;  %12493 = vmatprep.mubr.msk.f32.mxu0 %vm13713_vm0, %v13712_v0 }
0x430a   : > { %12501 = vmatprep.subr.mxu0 %v13712_v0 }
0x430c   : > { %12494 = vmatmul.mubr.msk.f32.vlgmr.msra.gmra.mxu0 %vm1845_vm5, %v9655_v34 }
0x430d   : > { %12502 = vmatpush3.msra.mxu0 %v15001_v35  ;;  %12503 = vmatprep.mubr.msk.f32.mxu0 %vm13713_vm0, %v13712_v0 }
0x430e   : > { %12517 = vmatprep.subr.mxu0 %v13712_v0 }
0x43c8   : > { %v9576_v50 = vpop.f32.mrf.mxu0 }
0x43c9   : > { %12489 = vmatmul.mubr.msk.f32.vlgmr.msra.gmra.mxu1 %vm1845_vm5, %v9576_v50 }
0x43ca   : > { %v12485_v53 = vpop.f32.mrf.mxu0  ;;  %12498 = vmatprep.mubr.msk.f32.mxu1 %vm13713_vm0, %v13712_v0 }
0x43cc   : > { %v9728_v37 = vpop.f32.mrf.mxu0 }
0x43cd   : > { %v9729_v38 = vadd.f32 %v9728_v37, %v14363_v48  ;;  %v13052_v48 = vld [vmem:[#allocation23] ss:$0 sm:$0xff] }
0x43ce   : > { %v12495_v39 = vpop.f32.mrf.mxu0  ;;  %v8847_v51 = vadd.f32 %v13052_v48, %v15055_v19  ;;  %v15163_v19 = vld [vmem:[#allocation28 + $0x8] sm:$0xff] }
0x43cf   : > { %v9732_v40 = vmul.f32 0.35355338, %v9729_v38 }
0x43d0   : > { %v15148_v58 = vmul.f32 %v8847_v51, %v14229_v46  ;;  %v15159_v46 = vld [vmem:[#allocation28 + $0x10] sm:$0xff] }
0x43d1   : > { %v9733_v17 = vsel %vm1845_vm5, %v9732_v40, -inf }
0x43d2   : > { %9734 = vmax.xlane.f32.xlu0 %v9733_v17 }
0x43e8   : > { %9744 = vrot.lane.b32.xlu0 %v15031_v60, %s15457_s7 }
0x445b   : > { %v9735_v35 = vpop.xlane.xlu0 %9734 }
0x445c   : > { %v9736_v45 = vsub.f32 %v9732_v40, %v9735_v35 }
0x445e   : > { %v9737_v4 = vmul.f32 1.442695, %v9736_v45 }
0x445f   : > { %v9745_v33 = vpop.permute.xlu0 %9744 }
0x4460   : > { %12977 = vpow2.f32 %v9737_v4  ;;  %12497 = vmatpush3.msra.mxu1 %v9745_v33 }
0x4461   : > { %12506 = vmatprep.subr.mxu1 %v13712_v0 }
0x446d   : > { %v12978_v2 = vpop.eup %12977 }
0x446e   : > { %v9739_v52 = vsel %vm1845_vm5, %v12978_v2, 0.0 }
0x446f   : > { %9740 = vadd.xlane.f32.xlu1 %v9739_v52 }
0x4480   : > { %9972 = vrot.lane.b32.xlu1 %v15148_v58, %s15458_s6  ;;  %s15193_s6 = sand.u32 1, %s13649_s10  }
0x4481   : > { %s15371_s3 = sshll.u32 %s15193_s6, 3 }
0x4482   : > { %s15198_s4 = scalar_lea.vmem [#allocation31], %s15371_s3 }
0x4489   : > { %v9649_v60 = vpop.f32.mrf.mxu1 }
0x448a   : > { %v9653_v3 = vadd.f32 %v9649_v60, %v9413_v29 }
0x448b   : > { %v12490_v47 = vpop.f32.mrf.mxu1 }
0x44f8   : > { %v9741_v5 = vpop.xlane.xlu1 %9740 }
0x44f9   : > { %12979 = vrcp.f32 %v9741_v5 }
0x44fa   : > { %12981 = vpow2.f32 %v8616_v7 }
0x44fc   : > { %v9973_v30 = vpop.permute.xlu1 %9972 }
0x4506   : > { %v12980_v28 = vpop.eup %12979 }
0x4507   : > { %v9743_v55 = vmul.f32 %v12980_v28, %v12978_v2  ;;  %v12982_v8 = vpop.eup %12981  ;;  %v13058_v2 = vld [vmem:[#allocation29] ss:$0 sm:$0xff] }
0x4508   : > { %v8618_v11 = vadd.f32 1.0, %v12982_v8 }
0x4509   : > { %12499 = vmatmul.mubr.msk.f32.vlgmr.msra.gmra.mxu1 %vm1845_vm5, %v9743_v55 }
0x450a   : > { %12507 = vmatpush3.msra.mxu1 %v15153_v57  ;;  %12514 = vmatprep.mubr.msk.f32.mxu1 %vm13713_vm0, %v13712_v0  ;;  %12983 = vrcp.f32 %v8618_v11 }
0x450b   : > { %12508 = vmatprep.subr.mxu1 %v13712_v0 }
0x450c   : > { %12509 = vmatpush3.msra.mxu1 %v15159_v46 }
0x450d   : > { %12510 = vmatprep.subr.mxu1 %v13712_v0 }
0x450e   : > { %12511 = vmatpush3.msra.mxu1 %v15163_v19 }
0x450f   : > { %12512 = vmatprep.subr.mxu1 %v13712_v0 }
0x4510   : > { %12513 = vmatpush3.msra.mxu1 %v13056_v43 }
0x4511   : > { %12515 = vmatmul.mubr.msk.f32.vlgmr.msra.gmra.mxu1 %vm1591_vm4, %v15038_v62  ;;  %12527 = vmatprep.subr.mxu1 %v13712_v0 }
0x4512   : > { %12528 = vmatpush3.msra.mxu1 %v13056_v43  ;;  %12529 = vmatprep.mubr.msk.f32.mxu1 %vm13713_vm0, %v13712_v0 }
0x4513   : > { %12537 = vmatprep.subr.mxu1 %v13712_v0 }
0x4517   : > { %v12984_v12 = vpop.eup %12983 }
0x4518   : > { %v8852_v62 = vadd.f32 1.0, %v12984_v12 }
0x451a   : > { %v9970_v20 = vrot.slane %v8852_v62, %v14249_v63 }
0x451c   : > { %v15176_v26 = vmul.f32 %v9970_v20, %v15148_v58  ;;  %v15183_v14 = vmul.f32 %v9973_v30, %v9970_v20 }
0x45c9   : > { %v9816_v13 = vpop.f32.mrf.mxu1 }
0x45ca   : > { %12504 = vmatmul.mubr.msk.f32.vlgmr.msra.gmra.mxu0 %vm1845_vm5, %v9816_v13 }
0x45cb   : > { %12518 = vmatpush3.xpose.msk.msra.mxu0 %vm1845_vm5, %v15176_v26  ;;  %v12500_v10 = vpop.f32.mrf.mxu1  ;;  %12519 = vmatprep.mubr.msk.f32.mxu0 %vm13713_vm0, %v13712_v0 }
0x45cc   : > { %12522 = vmatprep.subr.mxu0 %v13712_v0 }
0x45ce   : > { %12520 = vmatmul.mubr.msk.f32.vlgmr.msra.gmra.mxu0 %vm1845_vm5, %v15183_v14 }
0x45cf   : > { %12524 = vmatprep.mubr.msk.f32.mxu0 %vm13713_vm0, %v13712_v0 }
0x45d1   : > { %v15190_v63 = vpop.f32.mrf.mxu1 }
0x45d2   : > { %v9964_v52 = vadd.f32 %v13058_v2, %v15190_v63 }
0x45d3   : > { %v12516_v56 = vpop.f32.mrf.mxu1 }
0x468a   : > { %v9889_v15 = vpop.f32.mrf.mxu0 }
0x468b   : > { %v9893_v59 = vadd.f32 %v9889_v15, %v9653_v3 }
0x468c   : > { %v12505_v16 = vpop.f32.mrf.mxu0 }
0x468d   : > { %10935 = vst.msk [vmem:[%s15198_s4] sm:$0xff] %vm1591_vm4, %v9893_v59 }
0x468e   : > { %v10049_v18 = vpop.f32.mrf.mxu0 }
0x468f   : > { %v10050_v44 = vadd.f32 %v10049_v18, %v14252_v1 }
0x4690   : > { %v12521_v21 = vpop.f32.mrf.mxu0 }
0x4691   : > { %v10053_v36 = vmul.f32 0.35355338, %v10050_v44 }
0x4693   : > { %v10054_v22 = vsel %vm1845_vm5, %v10053_v36, -inf }
0x4694   : > { %10055 = vmax.xlane.f32.xlu0 %v10054_v22 }
0x46aa   : > { %10065 = vrot.lane.b32.xlu0 %v15148_v58, %s15459_s8 }
0x46ae   : > { %10215 = vrot.lane.b32.xlu0 %v15183_v14, %s15451_s18 }
0x471d   : > { %v10056_v23 = vpop.xlane.xlu0 %10055 }
0x471e   : > { %v10057_v24 = vsub.f32 %v10053_v36, %v10056_v23 }
0x4720   : > { %v10058_v61 = vmul.f32 1.442695, %v10057_v24 }
0x4721   : > { %v10066_v25 = vpop.permute.xlu0 %10065 }
0x4722   : > { %12985 = vpow2.f32 %v10058_v61  ;;  %12523 = vmatpush3.msra.mxu0 %v10066_v25 }
0x4723   : > { %12532 = vmatprep.subr.mxu0 %v13712_v0 }
0x4725   : > { %v10216_v41 = vpop.permute.xlu0 %10215 }
0x472f   : > { %v12986_v29 = vpop.eup %12985 }
0x4730   : > { %v10060_v54 = vsel %vm1845_vm5, %v12986_v29, 0.0 }
0x4731   : > { %10061 = vadd.xlane.f32.xlu1 %v10060_v54 }
0x4742   : > { %10217 = vrot.lane.b32.xlu1 %v15176_v26, %s15451_s18  ;;  %s13726_s18 = smov [#allocation31]  }
0x47ba   : > { %v10062_v42 = vpop.xlane.xlu1 %10061 }
0x47bb   : > { %12987 = vrcp.f32 %v10062_v42 }
0x47be   : > { %v10218_v31 = vpop.permute.xlu1 %10217 }
0x47c8   : > { %v12988_v9 = vpop.eup %12987 }
0x47c9   : > { %v10064_v27 = vmul.f32 %v12988_v9, %v12986_v29 }
0x47cb   : > { %12525 = vmatmul.mubr.msk.f32.vlgmr.msra.gmra.mxu0 %vm1845_vm5, %v10064_v27 }
0x47cc   : > { %12533 = vmatpush3.xpose.msk.msra.mxu0 %vm1845_vm5, %v10218_v31  ;;  %12534 = vmatprep.mubr.msk.f32.mxu0 %vm13713_vm0, %v13712_v0 }
0x47cd   : > { %12542 = vmatprep.subr.mxu0 %v13712_v0 }
0x47cf   : > { %12535 = vmatmul.mubr.msk.f32.vlgmr.msra.gmra.mxu0 %vm1845_vm5, %v10216_v41 }
0x47d0   : > { %12543 = vmatpush3.msra.mxu0 %v15163_v19  ;;  %12544 = vmatprep.mubr.msk.f32.mxu0 %vm13713_vm0, %v13712_v0 }
0x47d1   : > { %12552 = vmatprep.subr.mxu0 %v13712_v0 }
0x488b   : > { %v10137_v34 = vpop.f32.mrf.mxu0 }
0x488c   : > { %12530 = vmatmul.mubr.msk.f32.vlgmr.msra.gmra.mxu1 %vm1845_vm5, %v10137_v34 }
0x488d   : > { %v12526_v50 = vpop.f32.mrf.mxu0  ;;  %12539 = vmatprep.mubr.msk.f32.mxu1 %vm13713_vm0, %v13712_v0 }
0x488f   : > { %v10289_v53 = vpop.f32.mrf.mxu0 }
0x4890   : > { %v10290_v37 = vadd.f32 %v10289_v53, %v14252_v1 }
0x4891   : > { %v12536_v38 = vpop.f32.mrf.mxu0 }
0x4892   : > { %v10293_v39 = vmul.f32 0.35355338, %v10290_v37 }
0x4894   : > { %v10294_v40 = vsel %vm1845_vm5, %v10293_v39, -inf }
0x4895   : > { %10295 = vmax.xlane.f32.xlu1 %v10294_v40 }
0x48a6   : > { %10457 = vrot.lane.b32.xlu1 %v15176_v26, %s15452_s11 }
0x48aa   : > { %10455 = vrot.lane.b32.xlu1 %v15183_v14, %s15452_s11  ;;  %s13531_s11 = sshll.u32 %s13726_s18, 4  ;;  %s13532_s11 = int_to_ptr.vmem [resolvable:$false] %s13531_s11 }
0x48ab   : > { %s13533_s16 = scalar_lea.vmem %s13532_s11, 256 }
0x491e   : > { %v10296_v17 = vpop.xlane.xlu1 %10295 }
0x491f   : > { %v10297_v35 = vsub.f32 %v10293_v39, %v10296_v17 }
0x4921   : > { %v10298_v45 = vmul.f32 1.442695, %v10297_v35 }
0x4922   : > { %v10458_v28 = vpop.permute.xlu1 %10457 }
0x4923   : > { %12989 = vpow2.f32 %v10298_v45 }
0x4926   : > { %v10456_v19 = vpop.permute.xlu1 %10455 }
0x4930   : > { %v12990_v4 = vpop.eup %12989 }
0x4931   : > { %v10300_v33 = vsel %vm1845_vm5, %v12990_v4, 0.0 }
0x4932   : > { %10301 = vadd.xlane.f32.xlu0 %v10300_v33 }
0x4948   : > { %10305 = vrot.lane.b32.xlu0 %v15148_v58, %s15454_s0 }
0x494c   : > { %v10210_v48 = vpop.f32.mrf.mxu1 }
0x494d   : > { %v10214_v51 = vadd.f32 %v10210_v48, %v9964_v52 }
0x494e   : > { %v12531_v60 = vpop.f32.mrf.mxu1 }
0x49bb   : > { %v10302_v3 = vpop.xlane.xlu0 %10301 }
0x49bc   : > { %12991 = vrcp.f32 %v10302_v3 }
0x49bf   : > { %v10306_v47 = vpop.permute.xlu0 %10305 }
0x49c0   : > { %12538 = vmatpush3.msra.mxu1 %v10306_v47 }
0x49c1   : > { %12547 = vmatprep.subr.mxu1 %v13712_v0 }
0x49c9   : > { %v12992_v5 = vpop.eup %12991 }
0x49ca   : > { %v10304_v55 = vmul.f32 %v12992_v5, %v12990_v4 }
0x49cc   : > { %12540 = vmatmul.mubr.msk.f32.vlgmr.msra.gmra.mxu1 %vm1845_vm5, %v10304_v55 }
0x49cd   : > { %12548 = vmatpush3.xpose.msk.msra.mxu1 %vm1845_vm5, %v10458_v28  ;;  %12549 = vmatprep.mubr.msk.f32.mxu1 %vm13713_vm0, %v13712_v0 }
0x49ce   : > { %12557 = vmatprep.subr.mxu1 %v13712_v0 }
0x49d0   : > { %12550 = vmatmul.mubr.msk.f32.vlgmr.msra.gmra.mxu1 %vm1845_vm5, %v10456_v19 }
0x49d1   : > { %12558 = vmatpush3.msra.mxu1 %v15159_v46  ;;  %12559 = vmatprep.mubr.msk.f32.mxu1 %vm13713_vm0, %v13712_v0 }
0x49d2   : > { %12567 = vmatprep.subr.mxu1 %v13712_v0 }
0x4a8c   : > { %v10377_v43 = vpop.f32.mrf.mxu1 }
0x4a8d   : > { %12545 = vmatmul.mubr.msk.f32.vlgmr.msra.gmra.mxu0 %vm1845_vm5, %v10377_v43 }
0x4a8e   : > { %v12541_v32 = vpop.f32.mrf.mxu1  ;;  %12554 = vmatprep.mubr.msk.f32.mxu0 %vm13713_vm0, %v13712_v0 }
0x4a90   : > { %v10529_v6 = vpop.f32.mrf.mxu1 }
0x4a91   : > { %v10530_v49 = vadd.f32 %v10529_v6, %v14252_v1 }
0x4a92   : > { %v12551_v7 = vpop.f32.mrf.mxu1 }
0x4a93   : > { %v10533_v8 = vmul.f32 0.35355338, %v10530_v49 }
0x4a95   : > { %v10534_v11 = vsel %vm1845_vm5, %v10533_v8, -inf }
0x4a96   : > { %10535 = vmax.xlane.f32.xlu0 %v10534_v11 }
0x4aac   : > { %10545 = vrot.lane.b32.xlu0 %v15148_v58, %s15460_s9  ;;  %s11531_s9 = sshll.u32 %s13924_s15, 7 }
0x4aad   : > { %s10954_s8 = scalar_lea.hbm %s13896_s5, %s11531_s9 }
0x4ab0   : > { %10695 = vrot.lane.b32.xlu0 %v15183_v14, %s15456_s2 }
0x4b1f   : > { %v10536_v46 = vpop.xlane.xlu0 %10535 }
0x4b20   : > { %v10537_v12 = vsub.f32 %v10533_v8, %v10536_v46 }
0x4b22   : > { %v10538_v62 = vmul.f32 1.442695, %v10537_v12 }
0x4b23   : > { %v10546_v20 = vpop.permute.xlu0 %10545 }
0x4b24   : > { %12993 = vpow2.f32 %v10538_v62  ;;  %12553 = vmatpush3.msra.mxu0 %v10546_v20 }
0x4b25   : > { %12562 = vmatprep.subr.mxu0 %v13712_v0 }
0x4b27   : > { %v10696_v18 = vpop.permute.xlu0 %10695 }
0x4b31   : > { %v12994_v30 = vpop.eup %12993 }
0x4b32   : > { %v10540_v13 = vsel %vm1845_vm5, %v12994_v30, 0.0 }
0x4b33   : > { %10541 = vadd.xlane.f32.xlu1 %v10540_v13 }
0x4b44   : > { %10697 = vrot.lane.b32.xlu1 %v15176_v26, %s15456_s2  ;;  %s10956_s2 = sshll.u32 %s15198_s4, 4  ;;  %s10957_s2 = int_to_ptr.vmem [resolvable:$true] %s10956_s2 }
0x4b45   : > { %s13527_s0 = scalar_lea.vmem %s10957_s2, 128  ;;  %p13534_p9 = scmp.lt.s32.totalorder %s10957_s2, %s13532_s11 }
0x4b46   : > { %p13528_p0 = scmp.ne.s32.totalorder %s10957_s2, %s13527_s0  ;;  %p13535_p4 = scmp.lt.s32.totalorder %s13533_s16, %s13527_s0 }
0x4b48   : > { %p13529_p2 = pnand %p13528_p0, %p15462_p1  ;;  %p13536_p5 = por %p13535_p4, %p13534_p9 }
0x4b4a   : > { %p13530_p3 = pneg %p13529_p2 }
0x4b4c   : > { %p13537_p6 = pnand %p13536_p5, %p13530_p3 }
0x4b4d   : > { %v10450_v10 = vpop.f32.mrf.mxu0 }
0x4b4e   : > { %v10454_v63 = vadd.f32 %v10450_v10, %v10214_v51 }
0x4b4f   : > { %v12546_v56 = vpop.f32.mrf.mxu0 }
0x4bbc   : > { %v10542_v15 = vpop.xlane.xlu1 %10541 }
0x4bbd   : > { %12995 = vrcp.f32 %v10542_v15 }
0x4bc0   : > { %v10698_v16 = vpop.permute.xlu1 %10697 }
0x4bca   : > { %v12996_v14 = vpop.eup %12995 }
0x4bcb   : > { %v10544_v59 = vmul.f32 %v12996_v14, %v12994_v30 }
0x4bcd   : > { %12555 = vmatmul.mubr.msk.f32.vlgmr.msra.gmra.mxu0 %vm1845_vm5, %v10544_v59 }
0x4bce   : > { %12563 = vmatpush3.xpose.msk.msra.mxu0 %vm1845_vm5, %v10698_v16  ;;  %12564 = vmatprep.mubr.msk.f32.mxu0 %vm13713_vm0, %v13712_v0 }
0x4bcf   : > { %12572 = vmatprep.subr.mxu0 %v13712_v0 }
0x4bd1   : > { %12565 = vmatmul.mubr.msk.f32.vlgmr.msra.gmra.mxu0 %vm1845_vm5, %v10696_v18 }
0x4bd2   : > { %12573 = vmatpush3.msra.mxu0 %v15153_v57  ;;  %12574 = vmatprep.mubr.msk.f32.mxu0 %vm13713_vm0, %v13712_v0 }
0x4c8d   : > { %v10617_v26 = vpop.f32.mrf.mxu0 }
0x4c8e   : > { %12560 = vmatmul.mubr.msk.f32.vlgmr.msra.gmra.mxu1 %vm1845_vm5, %v10617_v26 }
0x4c8f   : > { %v12556_v44 = vpop.f32.mrf.mxu0  ;;  %12569 = vmatprep.mubr.msk.f32.mxu1 %vm13713_vm0, %v13712_v0 }
0x4c91   : > { %v10769_v21 = vpop.f32.mrf.mxu0 }
0x4c92   : > { %v10770_v36 = vadd.f32 %v10769_v21, %v14252_v1 }
0x4c93   : > { %v12566_v22 = vpop.f32.mrf.mxu0 }
0x4c94   : > { %v10773_v23 = vmul.f32 0.35355338, %v10770_v36 }
0x4c96   : > { %v10774_v24 = vsel %vm1845_vm5, %v10773_v23, -inf }
0x4c97   : > { %10775 = vmax.xlane.f32.xlu1 %v10774_v24 }
0x4d20   : > { %v10776_v61 = vpop.xlane.xlu1 %10775 }
0x4d21   : > { %v10777_v57 = vsub.f32 %v10773_v23, %v10776_v61 }
0x4d23   : > { %v10778_v25 = vmul.f32 1.442695, %v10777_v57 }
0x4d25   : > { %12997 = vpow2.f32 %v10778_v25 }
0x4d32   : > { %v12998_v29 = vpop.eup %12997 }
0x4d33   : > { %v10780_v54 = vsel %vm1845_vm5, %v12998_v29, 0.0 }
0x4d34   : > { %10781 = vadd.xlane.f32.xlu0 %v10780_v54 }
0x4d4a   : > { %10785 = vrot.lane.b32.xlu0 %v15148_v58, %s15457_s7  ;;  %s10938_s7 = scalar_lea.sflag [#allocation4], %s15193_s6 }
0x4d4e   : > { %v10690_v0 = vpop.f32.mrf.mxu1 }
0x4d4f   : > { %v10694_v1 = vadd.f32 %v10690_v0, %v10454_v63 }
0x4d50   : > { %v12561_v42 = vpop.f32.mrf.mxu1 }
0x4dbd   : > { %v10782_v9 = vpop.xlane.xlu0 %10781 }
0x4dbe   : > { %12999 = vrcp.f32 %v10782_v9 }
0x4dc1   : > { %v10786_v27 = vpop.permute.xlu0 %10785 }
0x4dc2   : > { %12568 = vmatpush3.msra.mxu1 %v10786_v27 }
0x4dcb   : > { %v13000_v31 = vpop.eup %12999 }
0x4dcc   : > { %v10784_v41 = vmul.f32 %v13000_v31, %v12998_v29 }
0x4dce   : > { %12570 = vmatmul.mubr.msk.f32.vlgmr.msra.gmra.mxu1 %vm1845_vm5, %v10784_v41 }
0x4e8e   : > { %v10857_v34 = vpop.f32.mrf.mxu1 }
0x4e8f   : > { %12575 = vmatmul.mubr.msk.f32.vlgmr.msra.gmra.mxu0 %vm1845_vm5, %v10857_v34 }
0x4e90   : > { %v12571_v50 = vpop.f32.mrf.mxu1 }
0x4e91   : > { %13540 = shalt.err (!%p13537_p6)
}
0x4e92   : > { %s13541_s3 = scalar_lea.hbm %s10954_s8, 128  ;;  %s13545_s4 = scalar_lea.hbm %s13896_s5, 256 }
0x4e93   : > { %p13542_p10 = scmp.ne.s32.totalorder %s10954_s8, %s13541_s3  ;;  %p13546_p8 = scmp.lt.s32.totalorder %s10954_s8, %s13896_s5 }
0x4e94   : > { %p13547_p12 = scmp.lt.s32.totalorder %s13545_s4, %s13541_s3 }
0x4e95   : > { %p13543_p13 = pnand %p13542_p10, %p15462_p1 }
0x4e96   : > { %p13548_p11 = por %p13547_p12, %p13546_p8 }
0x4e97   : > { %p13544_p7 = pneg %p13543_p13 }
0x4e99   : > { %p13549_p0 = pnand %p13548_p11, %p13544_p7 }
0x4e9b   : > { %13552 = shalt.err (!%p13549_p0)
}
0x4e9c   : > { %12649 = dma.vmem_to_hbm [thread:$0]  (%p15462_p1), %s10957_s2, 128, %s10954_s8, %s10938_s7  }
0x4e9d   : > { %s15463_s0 = sshll.u32 %s15193_s6, 3  ;;  %s15297_s16 = scalar_lea.hbm %s13901_s30, %s11531_s9 }
0x4e9e   : > { %s1317_s18 = scalar_lea.vmem [#allocation32], %s15463_s0  ;;  %s10943_s3 = scalar_lea.sflag [#allocation33], %s15193_s6 }
0x4e9f   : > { %s10969_s11 = sshll.u32 %s1317_s18, 4  ;;  %s13727_s1 = smov [#allocation32]   ;;  %s10970_s11 = int_to_ptr.vmem [resolvable:$true] %s10969_s11 }
0x4ea0   : > { %s13553_s4 = scalar_lea.vmem %s10970_s11, 128  ;;  %s13557_s8 = sshll.u32 %s13727_s1, 4  ;;  %s13558_s8 = int_to_ptr.vmem [resolvable:$false] %s13557_s8 }
0x4ea1   : > { %p13554_p2 = scmp.ne.s32.totalorder %s10970_s11, %s13553_s4  ;;  %s13559_s2 = scalar_lea.vmem %s13558_s8, 256 }
0x4ea2   : > { %p13560_p4 = scmp.lt.s32.totalorder %s10970_s11, %s13558_s8  ;;  %p13561_p5 = scmp.lt.s32.totalorder %s13559_s2, %s13553_s4 }
0x4ea3   : > { %p13555_p3 = pnand %p13554_p2, %p15462_p1 }
0x4ea4   : > { %p13562_p6 = por %p13561_p5, %p13560_p4 }
0x4ea5   : > { %p13556_p9 = pneg %p13555_p3 }
0x4ea7   : > { %p13563_p10 = pnand %p13562_p6, %p13556_p9 }
0x4f4f   : > { %v10930_v58 = vpop.f32.mrf.mxu0 }
0x4f50   : > { %v10934_v53 = vadd.f32 %v10930_v58, %v10694_v1 }
0x4f51   : > { %v12576_v37 = vpop.f32.mrf.mxu0 }
0x4f52   : > { %10936 = vst.msk [vmem:[%s1317_s18] sm:$0xff] %vm1591_vm4, %v10934_v53 }
0x4f53   : > { %13566 = shalt.err (!%p13563_p10)
}
0x4f54   : > { %s13567_s15 = scalar_lea.hbm %s15297_s16, 128  ;;  %s13571_s6 = scalar_lea.hbm %s13901_s30, 256 }
0x4f55   : > { %p13568_p13 = scmp.ne.s32.totalorder %s15297_s16, %s13567_s15  ;;  %p13572_p12 = scmp.lt.s32.totalorder %s15297_s16, %s13901_s30 }
0x4f56   : > { %p13573_p11 = scmp.lt.s32.totalorder %s13571_s6, %s13567_s15 }
0x4f57   : > { %p13569_p7 = pnand %p13568_p13, %p15462_p1 }
0x4f58   : > { %p13574_p0 = por %p13573_p11, %p13572_p12 }
0x4f59   : > { %p13570_p8 = pneg %p13569_p7 }
0x4f5b   : > { %p13575_p2 = pnand %p13574_p0, %p13570_p8 }
0x4f5d   : > { %13578 = shalt.err (!%p13575_p2)
}
0x4f5e   : > { %12650 = dma.vmem_to_hbm [thread:$0]  (%p15462_p1), %s10970_s11, 128, %s15297_s16, %s10943_s3  }
0x4f5f PF: > { %s15464_s1 = sld [smem:[#allocation70_spill]] }
0x4f60   : > { %s15465_s9 = sld [smem:[#allocation68_spill]] }
0x4f61   : > { %s15466_s7 = sld [smem:[#allocation73_spill]] }
0x4f65   : > { %p12751_p3 = scmp.ge.s32.totalorder %s15464_s1, 2 }
0x4f66   : > { %s10981_s0 = sand.u32 1, %s15465_s9  }
0x4f67   : > { %p15467_p9 = scmp.ne.s32.totalorder %s15466_s7, 0  ;;  %s10982_s18 = scalar_lea.sflag [#allocation4], %s10981_s0 }
0x4f69   : > { %p12709_p4 = pnand %p12751_p3, %p15467_p9 }
0x4f6b   : > { %p12710_p5 = pneg %p12709_p4 }
0x4f6d   : > { %13636 = dma.done.wait (%p12710_p5), %s10982_s18, 128  }
0x4f6e   : > { %13638 = vsyncadd (%p12710_p5), %s10982_s18, 4294967168  ;;  %s10991_s4 = scalar_lea.sflag [#allocation33], %s10981_s0 }
0x4f6f   : > { %13640 = dma.done.wait (%p12710_p5), %s10991_s4, 128  }
0x4f70   : > { %13642 = vsyncadd (%p12710_p5), %s10991_s4, 4294967168  ;;  %s15468_s11 = sld [smem:[#allocation71_spill]]  ;;  %s15471_s7 = smov %s13649_s10 }
0x4f71   : > { %s15469_s28 = sld [smem:[#allocation69_spill]] }
0x4f72   : > { %s15470_s0 = sld [smem:[#allocation72_spill]] }
0x4f76   : > { %p91_p1 = scmp.ge.s32.totalorder %s15468_s11, 4  }
0x4f77   : > { %s15472_s10 = smov %s15469_s28 }
0x4f78   :  { %93 = sbr.rel (!%p91_p1) target bundleno = 72 (0x48), region = 321 }
0x4f7d   :  { %10996 = vsyncpa [#allocation3], 1 }
0x4f7e   :  { %10998 = vsyncpa [#allocation3 + $0x1], 1 }
0x4f7f   :  { %10999 = vsyncpa [#allocation6], 1 }
0x4f80   :  { %11000 = vsyncpa [#allocation9], 1 }
0x4f81   :  { %11001 = vsyncpa [#allocation12], 1 }
0x4f82   :  { %11002 = vsyncpa [#allocation15], 1 }
0x4f83   :  { %11003 = vsyncpa [#allocation18], 1 }
0x4f84   :  { %11004 = vsyncpa [#allocation21], 1 }
0x4f85   :  { %11005 = vsyncpa [#allocation24], 1 }
0x4f86   :  { %11006 = vsyncpa [#allocation27], 1 }
0x4f87   :  { %11007 = vsyncpa [#allocation30], 1 }
0x4f88   :  { %11008 = vsyncpa [#allocation4], 1 }
0x4f89   :  { %11010 = vsyncpa [#allocation4 + $0x1], 1 }
0x4f8a   :  { %11011 = vsyncpa [#allocation33], 1 }
0x4f8b   :  { %11013 = vsyncpa [#allocation33 + $0x1], 1 }

</bundles_post_ra>
